<compile_context>
chip_gen: v5e
topology: v5e:2x2
jax: 0.10.0
libtpu: 0.0.40
codegen_flags: <defaults>
</compile_context>

<pallas_src>
import jax
import jax.numpy as jnp
from jax.experimental import pallas as pl
from jax.experimental.pallas import tpu as pltpu


# ----------------------------------------------------------------------------
# Pallas kernel: 5x5 stride-2 pad-2 conv on a space-to-depth (phase) input.
#   xs[n, i, j, (p*2+q)*Cin + c] == x_pad[n, 2i+p, 2j+q, c]
#   out(oh,ow) = sum_{kh,kw,c} x_pad[2oh+kh, 2ow+kw, c] * w[kh,kw,c,:]
#             = sum over 25 taps read as contiguous slices of xs.
# ----------------------------------------------------------------------------
def make_s2_conv_kernel(Ho, Wo, Cin, Cout):
    def kernel(x_ref, w_ref, b_ref, o_ref):
        x = x_ref[0].astype(jnp.bfloat16)              # (Ho+2, Wo+2, 4*Cin)
        cols = []
        for kh in range(5):
            a, p = kh // 2, kh % 2
            for kw in range(5):
                bb, q = kw // 2, kw % 2
                blk = (p * 2 + q) * Cin
                cols.append(x[a:a + Ho, bb:bb + Wo, blk:blk + Cin])
        patches = jnp.concatenate(cols, axis=-1).reshape(Ho * Wo, 25 * Cin)
        acc = jnp.dot(patches, w_ref[...],
                      preferred_element_type=jnp.float32)   # one big-K matmul
        acc = acc + b_ref[...]                               # f32 bias
        o_ref[0] = acc.reshape(Ho, Wo, Cout).astype(o_ref.dtype)
    return kernel


def conv5x5_s2_pallas(x, w, b):
    """Conv2d(Cin, Cout, k=5, s=2, p=2).  x: (N,H,W,Cin) f32 NHWC."""
    N, H, W, Cin = x.shape
    KH, KW, _, Cout = w.shape
    assert KH == 5 and KW == 5
    # TODO(synk): odd H/W (PyTorch would give ceil(H/2)); test shapes are even.
    assert H % 2 == 0 and W % 2 == 0
    Ho, Wo = H // 2, W // 2
    Hs, Ws = Ho + 2, Wo + 2

    # pad + space-to-depth (layout plumbing only; all MACs stay in the kernel)
    xp = jnp.pad(x, ((0, 0), (2, 2), (2, 2), (0, 0)))
    xs = xp.reshape(N, Hs, 2, Ws, 2, Cin).transpose(0, 1, 3, 2, 4, 5)
    xs = xs.reshape(N, Hs, Ws, 4 * Cin)

    wmat = w.reshape(25 * Cin, Cout).astype(jnp.bfloat16)   # tap-major, c-minor
    b2 = b.reshape(1, Cout).astype(jnp.float32)

    kernel = make_s2_conv_kernel(Ho, Wo, Cin, Cout)
    return pl.pallas_call(
        kernel,
        out_shape=jax.ShapeDtypeStruct((N, Ho, Wo, Cout), jnp.float32),
        grid=(N,),
        in_specs=[
            pl.BlockSpec((1, Hs, Ws, 4 * Cin), lambda n: (n, 0, 0, 0)),
            pl.BlockSpec((25 * Cin, Cout), lambda n: (0, 0)),
            pl.BlockSpec((1, Cout), lambda n: (0, 0)),
        ],
        out_specs=pl.BlockSpec((1, Ho, Wo, Cout), lambda n: (n, 0, 0, 0)),
        compiler_params=pltpu.CompilerParams(dimension_semantics=("parallel",)),
    )(xs, wmat, b2)


# ----------------------------------------------------------------------------
# Pallas kernel: the entire residual trunk (6 BasicBlocks + conv_alone) fused.
# All weights resident in VMEM, intermediates never touch HBM.
# ----------------------------------------------------------------------------
def make_trunk_kernel(H, W, C, n_blocks):
    K = 9 * C

    def kernel(x_ref, w1_ref, b1_ref, wc_ref, bc_ref, o_ref):
        # zero borders hoisted out of the layer loop (no re-broadcast per conv)
        zc = jnp.zeros((H, 1, C), jnp.float32)
        zr = jnp.zeros((1, W + 2, C), jnp.float32)

        def conv3x3(x, wmat, bias, leaky):
            # in-kernel "same" padding via concat with zeros
            xp = jnp.concatenate([zc, x, zc], axis=1)          # (H, W+2, C)
            xp = jnp.concatenate([zr, xp, zr], axis=0)         # (H+2, W+2, C)
            xp = xp.astype(jnp.bfloat16)
            cols = [xp[kh:kh + H, kw:kw + W, :]
                    for kh in range(3) for kw in range(3)]
            patches = jnp.concatenate(cols, axis=-1).reshape(H * W, K)
            acc = jnp.dot(patches, wmat,
                          preferred_element_type=jnp.float32)  # (H*W, C), f32
            acc = acc + bias
            if leaky:
                acc = jnp.where(acc >= 0.0, acc, 0.2 * acc)    # LeakyReLU(0.2)
            return acc.reshape(H, W, C)

        x = x_ref[0]                                           # (H, W, C) f32
        for i in range(n_blocks):
            # BasicBlock.forward: out = x + LeakyReLU(convbn1(x))
            # (conv2 exists in the module but forward() never uses it)
            x = x + conv3x3(x, w1_ref[i], b1_ref[i], leaky=True)
        out = conv3x3(x, wc_ref[...], bc_ref[...], leaky=False)   # conv_alone
        o_ref[0] = out.astype(o_ref.dtype)

    return kernel


def trunk_pallas(x, w1s, b1s, wc_mat, bc):
    """x: (N,H,W,32) f32; w1s: (6,288,32) bf16; b1s: (6,1,32) f32;
       wc_mat: (288,32) bf16; bc: (1,32) f32."""
    N, H, W, C = x.shape
    nb = w1s.shape[0]
    kernel = make_trunk_kernel(H, W, C, nb)
    return pl.pallas_call(
        kernel,
        out_shape=jax.ShapeDtypeStruct((N, H, W, C), jnp.float32),
        grid=(N,),
        in_specs=[
            pl.BlockSpec((1, H, W, C), lambda n: (n, 0, 0, 0)),
            pl.BlockSpec((nb, 9 * C, C), lambda n: (0, 0, 0)),
            pl.BlockSpec((nb, 1, C), lambda n: (0, 0, 0)),
            pl.BlockSpec((9 * C, C), lambda n: (0, 0)),
            pl.BlockSpec((1, C), lambda n: (0, 0)),
        ],
        out_specs=pl.BlockSpec((1, H, W, C), lambda n: (n, 0, 0, 0)),
        compiler_params=pltpu.CompilerParams(dimension_semantics=("parallel",)),
    )(x, w1s, b1s, wc_mat, bc)


# ----------------------------------------------------------------------------
# Deterministic parameter construction + BN folding (glue)
# ----------------------------------------------------------------------------
def _init_conv(key, kh, kw, cin, cout):
    k1, k2 = jax.random.split(key)
    fan = float(kh * kw * cin)
    w = jax.random.normal(k1, (kh, kw, cin, cout), jnp.float32) * (fan ** -0.5)
    b = jax.random.normal(k2, (cout,), jnp.float32) * 0.01
    return w, b


def _init_bn(key, c):
    k1, k2, k3, k4 = jax.random.split(key, 4)
    gamma = 1.0 + 0.1 * jax.random.normal(k1, (c,), jnp.float32)
    beta = 0.1 * jax.random.normal(k2, (c,), jnp.float32)
    mean = 0.1 * jax.random.normal(k3, (c,), jnp.float32)
    var = 0.5 + jax.random.uniform(k4, (c,), jnp.float32)
    return gamma, beta, mean, var


def _fold_bn(w, b, gamma, beta, mean, var, eps=1e-5):
    s = gamma / jnp.sqrt(var + eps)
    return w * s[None, None, None, :], b * s + (beta - mean * s)


def init_feature_extraction(k, key):
    params = {"downsample": []}
    cin = 3
    for _ in range(k):
        key, sub = jax.random.split(key)
        params["downsample"].append(_init_conv(sub, 5, 5, cin, 32))  # f32
        cin = 32
    w1_list, b1_list = [], []
    for _ in range(6):
        key, k1, k2 = jax.random.split(key, 3)
        w1, b1 = _init_conv(k1, 3, 3, 32, 32)
        w1, b1 = _fold_bn(w1, b1, *_init_bn(k2, 32))      # eval-mode BN folded
        w1_list.append(w1.reshape(9 * 32, 32).astype(jnp.bfloat16))
        b1_list.append(b1.reshape(1, 32).astype(jnp.float32))
        # (BasicBlock.conv2 / BN2 are defined in the module but unused by
        #  forward(), so no parameters are needed for them here.)
    params["w1s"] = jnp.stack(w1_list)                    # (6, 288, 32) bf16
    params["b1s"] = jnp.stack(b1_list)                    # (6, 1, 32)  f32
    key, sub = jax.random.split(key)
    wc, bc = _init_conv(sub, 3, 3, 32, 32)                # conv_alone (no BN)
    params["wc_mat"] = wc.reshape(9 * 32, 32).astype(jnp.bfloat16)
    params["bc"] = bc.reshape(1, 32).astype(jnp.float32)
    return params


# ----------------------------------------------------------------------------
# Forward pass (matches FeatureExtraction.forward)
# ----------------------------------------------------------------------------
def feature_extraction_forward(params, rgb_img_nchw):
    x = jnp.transpose(rgb_img_nchw, (0, 2, 3, 1)).astype(jnp.float32)  # ->NHWC
    # k downsample convs: Conv2d(*, 32, k=5, s=2, p=2)
    for (w, b) in params["downsample"]:
        x = conv5x5_s2_pallas(x, w, b)
    # 6 BasicBlocks + conv_alone fused into one Pallas kernel
    x = trunk_pallas(x, params["w1s"], params["b1s"],
                     params["wc_mat"], params["bc"])
    return jnp.transpose(x, (0, 3, 1, 2))                 # back to NCHW


if __name__ == "__main__":
    key = jax.random.PRNGKey(0)
    k_img, k_par = jax.random.split(key)

    K = 2                                                  # downsample stages
    rgb_img = jax.random.normal(k_img, (2, 3, 32, 32), jnp.float32)   # NCHW

    params = init_feature_extraction(K, k_par)
    fwd = jax.jit(feature_extraction_forward)
    out = jax.block_until_ready(fwd(params, rgb_img))

    expected = (2, 32, 32 // (2 ** K), 32 // (2 ** K))
    assert out.shape == expected, (out.shape, expected)
    assert bool(jnp.all(jnp.isfinite(out)))
    print("KERNEL_OK")
</pallas_src>

<mosaic_0001>
module attributes {stable_mosaic.version = 11 : i64} {
  func.func @kernel(%arg0: i32, %arg1: memref<1x18x18x12xf32, #tpu.memory_space<vmem>>, %arg2: memref<75x32xbf16, #tpu.memory_space<vmem>>, %arg3: memref<1x32xf32, #tpu.memory_space<vmem>>, %arg4: memref<1x16x16x32xf32, #tpu.memory_space<vmem>>) attributes {dimension_semantics = [#tpu.dimension_semantics<parallel>], iteration_bounds = array<i64: 2>, scalar_prefetch = 0 : i64, scratch_operands = 0 : i64, tpu.core_type = #tpu.core_type<tc>, window_params = [{transform_indices = @transform_0, window_bounds = array<i64: 1, 18, 18, 12>}, {pipeline_mode = #tpu.pipeline_mode<synchronous>, transform_indices = @transform_1, window_bounds = array<i64: 75, 32>}, {pipeline_mode = #tpu.pipeline_mode<synchronous>, transform_indices = @transform_2, window_bounds = array<i64: 1, 32>}, {transform_indices = @transform_3, window_bounds = array<i64: 1, 16, 16, 32>}]} {
    %c0 = arith.constant 0 : index
    %c0_0 = arith.constant 0 : index
    %c0_1 = arith.constant 0 : index
    %c0_2 = arith.constant 0 : index
    %0 = vector.load %arg1[%c0, %c0_0, %c0_1, %c0_2] : memref<1x18x18x12xf32, #tpu.memory_space<vmem>>, vector<1x18x18x12xf32>
    %1 = vector.shape_cast %0 : vector<1x18x18x12xf32> to vector<18x18x12xf32>
    %2 = arith.truncf %1 : vector<18x18x12xf32> to vector<18x18x12xbf16>
    %3 = vector.extract_strided_slice %2 {offsets = [0, 0, 0], sizes = [16, 16, 3], strides = [1, 1, 1]} : vector<18x18x12xbf16> to vector<16x16x3xbf16>
    %4 = vector.extract_strided_slice %2 {offsets = [0, 0, 3], sizes = [16, 16, 3], strides = [1, 1, 1]} : vector<18x18x12xbf16> to vector<16x16x3xbf16>
    %5 = vector.extract_strided_slice %2 {offsets = [0, 1, 0], sizes = [16, 16, 3], strides = [1, 1, 1]} : vector<18x18x12xbf16> to vector<16x16x3xbf16>
    %6 = vector.extract_strided_slice %2 {offsets = [0, 1, 3], sizes = [16, 16, 3], strides = [1, 1, 1]} : vector<18x18x12xbf16> to vector<16x16x3xbf16>
    %7 = vector.extract_strided_slice %2 {offsets = [0, 2, 0], sizes = [16, 16, 3], strides = [1, 1, 1]} : vector<18x18x12xbf16> to vector<16x16x3xbf16>
    %8 = vector.extract_strided_slice %2 {offsets = [0, 0, 6], sizes = [16, 16, 3], strides = [1, 1, 1]} : vector<18x18x12xbf16> to vector<16x16x3xbf16>
    %9 = vector.extract_strided_slice %2 {offsets = [0, 0, 9], sizes = [16, 16, 3], strides = [1, 1, 1]} : vector<18x18x12xbf16> to vector<16x16x3xbf16>
    %10 = vector.extract_strided_slice %2 {offsets = [0, 1, 6], sizes = [16, 16, 3], strides = [1, 1, 1]} : vector<18x18x12xbf16> to vector<16x16x3xbf16>
    %11 = vector.extract_strided_slice %2 {offsets = [0, 1, 9], sizes = [16, 16, 3], strides = [1, 1, 1]} : vector<18x18x12xbf16> to vector<16x16x3xbf16>
    %12 = vector.extract_strided_slice %2 {offsets = [0, 2, 6], sizes = [16, 16, 3], strides = [1, 1, 1]} : vector<18x18x12xbf16> to vector<16x16x3xbf16>
    %13 = vector.extract_strided_slice %2 {offsets = [1, 0, 0], sizes = [16, 16, 3], strides = [1, 1, 1]} : vector<18x18x12xbf16> to vector<16x16x3xbf16>
    %14 = vector.extract_strided_slice %2 {offsets = [1, 0, 3], sizes = [16, 16, 3], strides = [1, 1, 1]} : vector<18x18x12xbf16> to vector<16x16x3xbf16>
    %15 = vector.extract_strided_slice %2 {offsets = [1, 1, 0], sizes = [16, 16, 3], strides = [1, 1, 1]} : vector<18x18x12xbf16> to vector<16x16x3xbf16>
    %16 = vector.extract_strided_slice %2 {offsets = [1, 1, 3], sizes = [16, 16, 3], strides = [1, 1, 1]} : vector<18x18x12xbf16> to vector<16x16x3xbf16>
    %17 = vector.extract_strided_slice %2 {offsets = [1, 2, 0], sizes = [16, 16, 3], strides = [1, 1, 1]} : vector<18x18x12xbf16> to vector<16x16x3xbf16>
    %18 = vector.extract_strided_slice %2 {offsets = [1, 0, 6], sizes = [16, 16, 3], strides = [1, 1, 1]} : vector<18x18x12xbf16> to vector<16x16x3xbf16>
    %19 = vector.extract_strided_slice %2 {offsets = [1, 0, 9], sizes = [16, 16, 3], strides = [1, 1, 1]} : vector<18x18x12xbf16> to vector<16x16x3xbf16>
    %20 = vector.extract_strided_slice %2 {offsets = [1, 1, 6], sizes = [16, 16, 3], strides = [1, 1, 1]} : vector<18x18x12xbf16> to vector<16x16x3xbf16>
    %21 = vector.extract_strided_slice %2 {offsets = [1, 1, 9], sizes = [16, 16, 3], strides = [1, 1, 1]} : vector<18x18x12xbf16> to vector<16x16x3xbf16>
    %22 = vector.extract_strided_slice %2 {offsets = [1, 2, 6], sizes = [16, 16, 3], strides = [1, 1, 1]} : vector<18x18x12xbf16> to vector<16x16x3xbf16>
    %23 = vector.extract_strided_slice %2 {offsets = [2, 0, 0], sizes = [16, 16, 3], strides = [1, 1, 1]} : vector<18x18x12xbf16> to vector<16x16x3xbf16>
    %24 = vector.extract_strided_slice %2 {offsets = [2, 0, 3], sizes = [16, 16, 3], strides = [1, 1, 1]} : vector<18x18x12xbf16> to vector<16x16x3xbf16>
    %25 = vector.extract_strided_slice %2 {offsets = [2, 1, 0], sizes = [16, 16, 3], strides = [1, 1, 1]} : vector<18x18x12xbf16> to vector<16x16x3xbf16>
    %26 = vector.extract_strided_slice %2 {offsets = [2, 1, 3], sizes = [16, 16, 3], strides = [1, 1, 1]} : vector<18x18x12xbf16> to vector<16x16x3xbf16>
    %27 = vector.extract_strided_slice %2 {offsets = [2, 2, 0], sizes = [16, 16, 3], strides = [1, 1, 1]} : vector<18x18x12xbf16> to vector<16x16x3xbf16>
    %28 = tpu.concatenate %3, %4, %5, %6, %7, %8, %9, %10, %11, %12, %13, %14, %15, %16, %17, %18 in 2 : vector<16x16x3xbf16>, vector<16x16x3xbf16>, vector<16x16x3xbf16>, vector<16x16x3xbf16>, vector<16x16x3xbf16>, vector<16x16x3xbf16>, vector<16x16x3xbf16>, vector<16x16x3xbf16>, vector<16x16x3xbf16>, vector<16x16x3xbf16>, vector<16x16x3xbf16>, vector<16x16x3xbf16>, vector<16x16x3xbf16>, vector<16x16x3xbf16>, vector<16x16x3xbf16>, vector<16x16x3xbf16> -> vector<16x16x48xbf16>
    %29 = tpu.concatenate %19, %20, %21, %22, %23, %24, %25, %26, %27 in 2 : vector<16x16x3xbf16>, vector<16x16x3xbf16>, vector<16x16x3xbf16>, vector<16x16x3xbf16>, vector<16x16x3xbf16>, vector<16x16x3xbf16>, vector<16x16x3xbf16>, vector<16x16x3xbf16>, vector<16x16x3xbf16> -> vector<16x16x27xbf16>
    %30 = tpu.concatenate %28, %29 in 2 : vector<16x16x48xbf16>, vector<16x16x27xbf16> -> vector<16x16x75xbf16>
    %31 = vector.shape_cast %30 : vector<16x16x75xbf16> to vector<256x75xbf16>
    %c0_3 = arith.constant 0 : index
    %c0_4 = arith.constant 0 : index
    %32 = vector.load %arg2[%c0_3, %c0_4] : memref<75x32xbf16, #tpu.memory_space<vmem>>, vector<75x32xbf16>
    %cst = arith.constant dense<0.000000e+00> : vector<256x32xf32>
    %33 = tpu.matmul %31, %32, %cst {dimension_numbers = #tpu.dot_dimension_numbers<[1], [0], [0], [1], [0, 0, 1, 1], [], []>} : vector<256x75xbf16>, vector<75x32xbf16>, vector<256x32xf32> -> vector<256x32xf32>
    %c0_5 = arith.constant 0 : index
    %c0_6 = arith.constant 0 : index
    %34 = vector.load %arg3[%c0_5, %c0_6] : memref<1x32xf32, #tpu.memory_space<vmem>>, vector<1x32xf32>
    %35 = vector.broadcast %34 : vector<1x32xf32> to vector<256x32xf32>
    %36 = arith.addf %33, %35 : vector<256x32xf32>
    %37 = vector.shape_cast %36 : vector<256x32xf32> to vector<16x16x32xf32>
    %c0_7 = arith.constant 0 : index
    %c0_8 = arith.constant 0 : index
    %c0_9 = arith.constant 0 : index
    %c0_10 = arith.constant 0 : index
    %38 = vector.load %arg4[%c0_7, %c0_8, %c0_9, %c0_10] : memref<1x16x16x32xf32, #tpu.memory_space<vmem>>, vector<1x16x16x32xf32>
    %39 = vector.shape_cast %38 : vector<1x16x16x32xf32> to vector<16x16x32xf32>
    %40 = vector.shape_cast %37 : vector<16x16x32xf32> to vector<1x16x16x32xf32>
    tpu.vector_store %arg4[%c0_7, %c0_8, %c0_9, %c0_10], %40 {strides = array<i32>} : memref<1x16x16x32xf32, #tpu.memory_space<vmem>>, vector<1x16x16x32xf32>,
    return
  }
  func.func @transform_0(%arg0: i32) -> (i32, i32, i32, i32) {
    %c0_i32 = arith.constant 0 : i32
    %c0_i32_0 = arith.constant 0 : i32
    %c0_i32_1 = arith.constant 0 : i32
    %c0_i32_2 = arith.constant 0 : i32
    return %arg0, %c0_i32, %c0_i32_0, %c0_i32_1 : i32, i32, i32, i32
  }
  func.func @transform_1(%arg0: i32) -> (i32, i32) {
    %c0_i32 = arith.constant 0 : i32
    %c0_i32_0 = arith.constant 0 : i32
    %c0_i32_1 = arith.constant 0 : i32
    return %c0_i32, %c0_i32_0 : i32, i32
  }
  func.func @transform_2(%arg0: i32) -> (i32, i32) {
    %c0_i32 = arith.constant 0 : i32
    %c0_i32_0 = arith.constant 0 : i32
    %c0_i32_1 = arith.constant 0 : i32
    return %c0_i32, %c0_i32_0 : i32, i32
  }
  func.func @transform_3(%arg0: i32) -> (i32, i32, i32, i32) {
    %c0_i32 = arith.constant 0 : i32
    %c0_i32_0 = arith.constant 0 : i32
    %c0_i32_1 = arith.constant 0 : i32
    %c0_i32_2 = arith.constant 0 : i32
    return %arg0, %c0_i32, %c0_i32_0, %c0_i32_1 : i32, i32, i32, i32
  }
}

module attributes {stable_mosaic.version = 11 : i64} {
  func.func @kernel(%arg0: i32, %arg1: memref<1x10x10x128xf32, #tpu.memory_space<vmem>>, %arg2: memref<800x32xbf16, #tpu.memory_space<vmem>>, %arg3: memref<1x32xf32, #tpu.memory_space<vmem>>, %arg4: memref<1x8x8x32xf32, #tpu.memory_space<vmem>>) attributes {dimension_semantics = [#tpu.dimension_semantics<parallel>], iteration_bounds = array<i64: 2>, scalar_prefetch = 0 : i64, scratch_operands = 0 : i64, tpu.core_type = #tpu.core_type<tc>, window_params = [{transform_indices = @transform_0, window_bounds = array<i64: 1, 10, 10, 128>}, {pipeline_mode = #tpu.pipeline_mode<synchronous>, transform_indices = @transform_1, window_bounds = array<i64: 800, 32>}, {pipeline_mode = #tpu.pipeline_mode<synchronous>, transform_indices = @transform_2, window_bounds = array<i64: 1, 32>}, {transform_indices = @transform_3, window_bounds = array<i64: 1, 8, 8, 32>}]} {
    %c0 = arith.constant 0 : index
    %c0_0 = arith.constant 0 : index
    %c0_1 = arith.constant 0 : index
    %c0_2 = arith.constant 0 : index
    %0 = vector.load %arg1[%c0, %c0_0, %c0_1, %c0_2] : memref<1x10x10x128xf32, #tpu.memory_space<vmem>>, vector<1x10x10x128xf32>
    %1 = vector.shape_cast %0 : vector<1x10x10x128xf32> to vector<10x10x128xf32>
    %2 = arith.truncf %1 : vector<10x10x128xf32> to vector<10x10x128xbf16>
    %3 = vector.extract_strided_slice %2 {offsets = [0, 0, 0], sizes = [8, 8, 32], strides = [1, 1, 1]} : vector<10x10x128xbf16> to vector<8x8x32xbf16>
    %4 = vector.extract_strided_slice %2 {offsets = [0, 0, 32], sizes = [8, 8, 32], strides = [1, 1, 1]} : vector<10x10x128xbf16> to vector<8x8x32xbf16>
    %5 = vector.extract_strided_slice %2 {offsets = [0, 1, 0], sizes = [8, 8, 32], strides = [1, 1, 1]} : vector<10x10x128xbf16> to vector<8x8x32xbf16>
    %6 = vector.extract_strided_slice %2 {offsets = [0, 1, 32], sizes = [8, 8, 32], strides = [1, 1, 1]} : vector<10x10x128xbf16> to vector<8x8x32xbf16>
    %7 = vector.extract_strided_slice %2 {offsets = [0, 2, 0], sizes = [8, 8, 32], strides = [1, 1, 1]} : vector<10x10x128xbf16> to vector<8x8x32xbf16>
    %8 = vector.extract_strided_slice %2 {offsets = [0, 0, 64], sizes = [8, 8, 32], strides = [1, 1, 1]} : vector<10x10x128xbf16> to vector<8x8x32xbf16>
    %9 = vector.extract_strided_slice %2 {offsets = [0, 0, 96], sizes = [8, 8, 32], strides = [1, 1, 1]} : vector<10x10x128xbf16> to vector<8x8x32xbf16>
    %10 = vector.extract_strided_slice %2 {offsets = [0, 1, 64], sizes = [8, 8, 32], strides = [1, 1, 1]} : vector<10x10x128xbf16> to vector<8x8x32xbf16>
    %11 = vector.extract_strided_slice %2 {offsets = [0, 1, 96], sizes = [8, 8, 32], strides = [1, 1, 1]} : vector<10x10x128xbf16> to vector<8x8x32xbf16>
    %12 = vector.extract_strided_slice %2 {offsets = [0, 2, 64], sizes = [8, 8, 32], strides = [1, 1, 1]} : vector<10x10x128xbf16> to vector<8x8x32xbf16>
    %13 = vector.extract_strided_slice %2 {offsets = [1, 0, 0], sizes = [8, 8, 32], strides = [1, 1, 1]} : vector<10x10x128xbf16> to vector<8x8x32xbf16>
    %14 = vector.extract_strided_slice %2 {offsets = [1, 0, 32], sizes = [8, 8, 32], strides = [1, 1, 1]} : vector<10x10x128xbf16> to vector<8x8x32xbf16>
    %15 = vector.extract_strided_slice %2 {offsets = [1, 1, 0], sizes = [8, 8, 32], strides = [1, 1, 1]} : vector<10x10x128xbf16> to vector<8x8x32xbf16>
    %16 = vector.extract_strided_slice %2 {offsets = [1, 1, 32], sizes = [8, 8, 32], strides = [1, 1, 1]} : vector<10x10x128xbf16> to vector<8x8x32xbf16>
    %17 = vector.extract_strided_slice %2 {offsets = [1, 2, 0], sizes = [8, 8, 32], strides = [1, 1, 1]} : vector<10x10x128xbf16> to vector<8x8x32xbf16>
    %18 = vector.extract_strided_slice %2 {offsets = [1, 0, 64], sizes = [8, 8, 32], strides = [1, 1, 1]} : vector<10x10x128xbf16> to vector<8x8x32xbf16>
    %19 = vector.extract_strided_slice %2 {offsets = [1, 0, 96], sizes = [8, 8, 32], strides = [1, 1, 1]} : vector<10x10x128xbf16> to vector<8x8x32xbf16>
    %20 = vector.extract_strided_slice %2 {offsets = [1, 1, 64], sizes = [8, 8, 32], strides = [1, 1, 1]} : vector<10x10x128xbf16> to vector<8x8x32xbf16>
    %21 = vector.extract_strided_slice %2 {offsets = [1, 1, 96], sizes = [8, 8, 32], strides = [1, 1, 1]} : vector<10x10x128xbf16> to vector<8x8x32xbf16>
    %22 = vector.extract_strided_slice %2 {offsets = [1, 2, 64], sizes = [8, 8, 32], strides = [1, 1, 1]} : vector<10x10x128xbf16> to vector<8x8x32xbf16>
    %23 = vector.extract_strided_slice %2 {offsets = [2, 0, 0], sizes = [8, 8, 32], strides = [1, 1, 1]} : vector<10x10x128xbf16> to vector<8x8x32xbf16>
    %24 = vector.extract_strided_slice %2 {offsets = [2, 0, 32], sizes = [8, 8, 32], strides = [1, 1, 1]} : vector<10x10x128xbf16> to vector<8x8x32xbf16>
    %25 = vector.extract_strided_slice %2 {offsets = [2, 1, 0], sizes = [8, 8, 32], strides = [1, 1, 1]} : vector<10x10x128xbf16> to vector<8x8x32xbf16>
    %26 = vector.extract_strided_slice %2 {offsets = [2, 1, 32], sizes = [8, 8, 32], strides = [1, 1, 1]} : vector<10x10x128xbf16> to vector<8x8x32xbf16>
    %27 = vector.extract_strided_slice %2 {offsets = [2, 2, 0], sizes = [8, 8, 32], strides = [1, 1, 1]} : vector<10x10x128xbf16> to vector<8x8x32xbf16>
    %28 = tpu.concatenate %3, %4, %5, %6, %7, %8, %9, %10, %11, %12, %13, %14, %15, %16, %17, %18 in 2 : vector<8x8x32xbf16>, vector<8x8x32xbf16>, vector<8x8x32xbf16>, vector<8x8x32xbf16>, vector<8x8x32xbf16>, vector<8x8x32xbf16>, vector<8x8x32xbf16>, vector<8x8x32xbf16>, vector<8x8x32xbf16>, vector<8x8x32xbf16>, vector<8x8x32xbf16>, vector<8x8x32xbf16>, vector<8x8x32xbf16>, vector<8x8x32xbf16>, vector<8x8x32xbf16>, vector<8x8x32xbf16> -> vector<8x8x512xbf16>
    %29 = tpu.concatenate %19, %20, %21, %22, %23, %24, %25, %26, %27 in 2 : vector<8x8x32xbf16>, vector<8x8x32xbf16>, vector<8x8x32xbf16>, vector<8x8x32xbf16>, vector<8x8x32xbf16>, vector<8x8x32xbf16>, vector<8x8x32xbf16>, vector<8x8x32xbf16>, vector<8x8x32xbf16> -> vector<8x8x288xbf16>
    %30 = tpu.concatenate %28, %29 in 2 : vector<8x8x512xbf16>, vector<8x8x288xbf16> -> vector<8x8x800xbf16>
    %31 = vector.shape_cast %30 : vector<8x8x800xbf16> to vector<64x800xbf16>
    %c0_3 = arith.constant 0 : index
    %c0_4 = arith.constant 0 : index
    %32 = vector.load %arg2[%c0_3, %c0_4] : memref<800x32xbf16, #tpu.memory_space<vmem>>, vector<800x32xbf16>
    %cst = arith.constant dense<0.000000e+00> : vector<64x32xf32>
    %33 = tpu.matmul %31, %32, %cst {dimension_numbers = #tpu.dot_dimension_numbers<[1], [0], [0], [1], [0, 0, 1, 1], [], []>} : vector<64x800xbf16>, vector<800x32xbf16>, vector<64x32xf32> -> vector<64x32xf32>
    %c0_5 = arith.constant 0 : index
    %c0_6 = arith.constant 0 : index
    %34 = vector.load %arg3[%c0_5, %c0_6] : memref<1x32xf32, #tpu.memory_space<vmem>>, vector<1x32xf32>
    %35 = vector.broadcast %34 : vector<1x32xf32> to vector<64x32xf32>
    %36 = arith.addf %33, %35 : vector<64x32xf32>
    %37 = vector.shape_cast %36 : vector<64x32xf32> to vector<8x8x32xf32>
    %c0_7 = arith.constant 0 : index
    %c0_8 = arith.constant 0 : index
    %c0_9 = arith.constant 0 : index
    %c0_10 = arith.constant 0 : index
    %38 = vector.load %arg4[%c0_7, %c0_8, %c0_9, %c0_10] : memref<1x8x8x32xf32, #tpu.memory_space<vmem>>, vector<1x8x8x32xf32>
    %39 = vector.shape_cast %38 : vector<1x8x8x32xf32> to vector<8x8x32xf32>
    %40 = vector.shape_cast %37 : vector<8x8x32xf32> to vector<1x8x8x32xf32>
    tpu.vector_store %arg4[%c0_7, %c0_8, %c0_9, %c0_10], %40 {strides = array<i32>} : memref<1x8x8x32xf32, #tpu.memory_space<vmem>>, vector<1x8x8x32xf32>,
    return
  }
  func.func @transform_0(%arg0: i32) -> (i32, i32, i32, i32) {
    %c0_i32 = arith.constant 0 : i32
    %c0_i32_0 = arith.constant 0 : i32
    %c0_i32_1 = arith.constant 0 : i32
    %c0_i32_2 = arith.constant 0 : i32
    return %arg0, %c0_i32, %c0_i32_0, %c0_i32_1 : i32, i32, i32, i32
  }
  func.func @transform_1(%arg0: i32) -> (i32, i32) {
    %c0_i32 = arith.constant 0 : i32
    %c0_i32_0 = arith.constant 0 : i32
    %c0_i32_1 = arith.constant 0 : i32
    return %c0_i32, %c0_i32_0 : i32, i32
  }
  func.func @transform_2(%arg0: i32) -> (i32, i32) {
    %c0_i32 = arith.constant 0 : i32
    %c0_i32_0 = arith.constant 0 : i32
    %c0_i32_1 = arith.constant 0 : i32
    return %c0_i32, %c0_i32_0 : i32, i32
  }
  func.func @transform_3(%arg0: i32) -> (i32, i32, i32, i32) {
    %c0_i32 = arith.constant 0 : i32
    %c0_i32_0 = arith.constant 0 : i32
    %c0_i32_1 = arith.constant 0 : i32
    %c0_i32_2 = arith.constant 0 : i32
    return %arg0, %c0_i32, %c0_i32_0, %c0_i32_1 : i32, i32, i32, i32
  }
}

module attributes {stable_mosaic.version = 11 : i64} {
  func.func @kernel(%arg0: i32, %arg1: memref<1x8x8x32xf32, #tpu.memory_space<vmem>>, %arg2: memref<6x288x32xbf16, #tpu.memory_space<vmem>>, %arg3: memref<6x1x32xf32, #tpu.memory_space<vmem>>, %arg4: memref<288x32xbf16, #tpu.memory_space<vmem>>, %arg5: memref<1x32xf32, #tpu.memory_space<vmem>>, %arg6: memref<1x8x8x32xf32, #tpu.memory_space<vmem>>) attributes {dimension_semantics = [#tpu.dimension_semantics<parallel>], iteration_bounds = array<i64: 2>, scalar_prefetch = 0 : i64, scratch_operands = 0 : i64, tpu.core_type = #tpu.core_type<tc>, window_params = [{transform_indices = @transform_0, window_bounds = array<i64: 1, 8, 8, 32>}, {pipeline_mode = #tpu.pipeline_mode<synchronous>, transform_indices = @transform_1, window_bounds = array<i64: 6, 288, 32>}, {pipeline_mode = #tpu.pipeline_mode<synchronous>, transform_indices = @transform_2, window_bounds = array<i64: 6, 1, 32>}, {pipeline_mode = #tpu.pipeline_mode<synchronous>, transform_indices = @transform_3, window_bounds = array<i64: 288, 32>}, {pipeline_mode = #tpu.pipeline_mode<synchronous>, transform_indices = @transform_4, window_bounds = array<i64: 1, 32>}, {transform_indices = @transform_5, window_bounds = array<i64: 1, 8, 8, 32>}]} {
    %cst = arith.constant 0.000000e+00 : f32
    %0 = vector.broadcast %cst : f32 to vector<8x1x32xf32>
    %cst_0 = arith.constant 0.000000e+00 : f32
    %1 = vector.broadcast %cst_0 : f32 to vector<1x10x32xf32>
    %c0 = arith.constant 0 : index
    %c0_1 = arith.constant 0 : index
    %c0_2 = arith.constant 0 : index
    %c0_3 = arith.constant 0 : index
    %2 = vector.load %arg1[%c0, %c0_1, %c0_2, %c0_3] : memref<1x8x8x32xf32, #tpu.memory_space<vmem>>, vector<1x8x8x32xf32>
    %3 = vector.shape_cast %2 : vector<1x8x8x32xf32> to vector<8x8x32xf32>
    %c0_4 = arith.constant 0 : index
    %c0_5 = arith.constant 0 : index
    %c0_6 = arith.constant 0 : index
    %4 = vector.load %arg2[%c0_4, %c0_5, %c0_6] : memref<6x288x32xbf16, #tpu.memory_space<vmem>>, vector<1x288x32xbf16>
    %5 = vector.shape_cast %4 : vector<1x288x32xbf16> to vector<288x32xbf16>
    %c0_7 = arith.constant 0 : index
    %c0_8 = arith.constant 0 : index
    %c0_9 = arith.constant 0 : index
    %6 = vector.load %arg3[%c0_7, %c0_8, %c0_9] : memref<6x1x32xf32, #tpu.memory_space<vmem>>, vector<1x1x32xf32>
    %7 = vector.shape_cast %6 : vector<1x1x32xf32> to vector<1x32xf32>
    %8 = tpu.concatenate %0, %3, %0 in 1 : vector<8x1x32xf32>, vector<8x8x32xf32>, vector<8x1x32xf32> -> vector<8x10x32xf32>
    %9 = tpu.concatenate %1, %8, %1 in 0 : vector<1x10x32xf32>, vector<8x10x32xf32>, vector<1x10x32xf32> -> vector<10x10x32xf32>
    %10 = arith.truncf %9 : vector<10x10x32xf32> to vector<10x10x32xbf16>
    %11 = vector.extract_strided_slice %10 {offsets = [0, 0, 0], sizes = [8, 8, 32], strides = [1, 1, 1]} : vector<10x10x32xbf16> to vector<8x8x32xbf16>
    %12 = vector.extract_strided_slice %10 {offsets = [0, 1, 0], sizes = [8, 8, 32], strides = [1, 1, 1]} : vector<10x10x32xbf16> to vector<8x8x32xbf16>
    %13 = vector.extract_strided_slice %10 {offsets = [0, 2, 0], sizes = [8, 8, 32], strides = [1, 1, 1]} : vector<10x10x32xbf16> to vector<8x8x32xbf16>
    %14 = vector.extract_strided_slice %10 {offsets = [1, 0, 0], sizes = [8, 8, 32], strides = [1, 1, 1]} : vector<10x10x32xbf16> to vector<8x8x32xbf16>
    %15 = vector.extract_strided_slice %10 {offsets = [1, 1, 0], sizes = [8, 8, 32], strides = [1, 1, 1]} : vector<10x10x32xbf16> to vector<8x8x32xbf16>
    %16 = vector.extract_strided_slice %10 {offsets = [1, 2, 0], sizes = [8, 8, 32], strides = [1, 1, 1]} : vector<10x10x32xbf16> to vector<8x8x32xbf16>
    %17 = vector.extract_strided_slice %10 {offsets = [2, 0, 0], sizes = [8, 8, 32], strides = [1, 1, 1]} : vector<10x10x32xbf16> to vector<8x8x32xbf16>
    %18 = vector.extract_strided_slice %10 {offsets = [2, 1, 0], sizes = [8, 8, 32], strides = [1, 1, 1]} : vector<10x10x32xbf16> to vector<8x8x32xbf16>
    %19 = vector.extract_strided_slice %10 {offsets = [2, 2, 0], sizes = [8, 8, 32], strides = [1, 1, 1]} : vector<10x10x32xbf16> to vector<8x8x32xbf16>
    %20 = tpu.concatenate %11, %12, %13, %14, %15, %16, %17, %18, %19 in 2 : vector<8x8x32xbf16>, vector<8x8x32xbf16>, vector<8x8x32xbf16>, vector<8x8x32xbf16>, vector<8x8x32xbf16>, vector<8x8x32xbf16>, vector<8x8x32xbf16>, vector<8x8x32xbf16>, vector<8x8x32xbf16> -> vector<8x8x288xbf16>
    %21 = vector.shape_cast %20 : vector<8x8x288xbf16> to vector<64x288xbf16>
    %cst_10 = arith.constant dense<0.000000e+00> : vector<64x32xf32>
    %22 = tpu.matmul %21, %5, %cst_10 {dimension_numbers = #tpu.dot_dimension_numbers<[1], [0], [0], [1], [0, 0, 1, 1], [], []>} : vector<64x288xbf16>, vector<288x32xbf16>, vector<64x32xf32> -> vector<64x32xf32>
    %23 = vector.broadcast %7 : vector<1x32xf32> to vector<64x32xf32>
    %24 = arith.addf %22, %23 : vector<64x32xf32>
    %cst_11 = arith.constant 0.000000e+00 : f32
    %25 = vector.broadcast %cst_11 : f32 to vector<64x32xf32>
    %26 = arith.cmpf oge, %24, %25 : vector<64x32xf32>
    %cst_12 = arith.constant 2.000000e-01 : f32
    %27 = vector.broadcast %cst_12 : f32 to vector<64x32xf32>
    %28 = arith.mulf %27, %24 : vector<64x32xf32>
    %29 = arith.select %26, %24, %28 : vector<64x32xi1>, vector<64x32xf32>
    %30 = vector.shape_cast %29 : vector<64x32xf32> to vector<8x8x32xf32>
    %31 = arith.addf %3, %30 : vector<8x8x32xf32>
    %c1 = arith.constant 1 : index
    %c0_13 = arith.constant 0 : index
    %c0_14 = arith.constant 0 : index
    %32 = vector.load %arg2[%c1, %c0_13, %c0_14] : memref<6x288x32xbf16, #tpu.memory_space<vmem>>, vector<1x288x32xbf16>
    %33 = vector.shape_cast %32 : vector<1x288x32xbf16> to vector<288x32xbf16>
    %c1_15 = arith.constant 1 : index
    %c0_16 = arith.constant 0 : index
    %c0_17 = arith.constant 0 : index
    %34 = vector.load %arg3[%c1_15, %c0_16, %c0_17] : memref<6x1x32xf32, #tpu.memory_space<vmem>>, vector<1x1x32xf32>
    %35 = vector.shape_cast %34 : vector<1x1x32xf32> to vector<1x32xf32>
    %36 = tpu.concatenate %0, %31, %0 in 1 : vector<8x1x32xf32>, vector<8x8x32xf32>, vector<8x1x32xf32> -> vector<8x10x32xf32>
    %37 = tpu.concatenate %1, %36, %1 in 0 : vector<1x10x32xf32>, vector<8x10x32xf32>, vector<1x10x32xf32> -> vector<10x10x32xf32>
    %38 = arith.truncf %37 : vector<10x10x32xf32> to vector<10x10x32xbf16>
    %39 = vector.extract_strided_slice %38 {offsets = [0, 0, 0], sizes = [8, 8, 32], strides = [1, 1, 1]} : vector<10x10x32xbf16> to vector<8x8x32xbf16>
    %40 = vector.extract_strided_slice %38 {offsets = [0, 1, 0], sizes = [8, 8, 32], strides = [1, 1, 1]} : vector<10x10x32xbf16> to vector<8x8x32xbf16>
    %41 = vector.extract_strided_slice %38 {offsets = [0, 2, 0], sizes = [8, 8, 32], strides = [1, 1, 1]} : vector<10x10x32xbf16> to vector<8x8x32xbf16>
    %42 = vector.extract_strided_slice %38 {offsets = [1, 0, 0], sizes = [8, 8, 32], strides = [1, 1, 1]} : vector<10x10x32xbf16> to vector<8x8x32xbf16>
    %43 = vector.extract_strided_slice %38 {offsets = [1, 1, 0], sizes = [8, 8, 32], strides = [1, 1, 1]} : vector<10x10x32xbf16> to vector<8x8x32xbf16>
    %44 = vector.extract_strided_slice %38 {offsets = [1, 2, 0], sizes = [8, 8, 32], strides = [1, 1, 1]} : vector<10x10x32xbf16> to vector<8x8x32xbf16>
    %45 = vector.extract_strided_slice %38 {offsets = [2, 0, 0], sizes = [8, 8, 32], strides = [1, 1, 1]} : vector<10x10x32xbf16> to vector<8x8x32xbf16>
    %46 = vector.extract_strided_slice %38 {offsets = [2, 1, 0], sizes = [8, 8, 32], strides = [1, 1, 1]} : vector<10x10x32xbf16> to vector<8x8x32xbf16>
    %47 = vector.extract_strided_slice %38 {offsets = [2, 2, 0], sizes = [8, 8, 32], strides = [1, 1, 1]} : vector<10x10x32xbf16> to vector<8x8x32xbf16>
    %48 = tpu.concatenate %39, %40, %41, %42, %43, %44, %45, %46, %47 in 2 : vector<8x8x32xbf16>, vector<8x8x32xbf16>, vector<8x8x32xbf16>, vector<8x8x32xbf16>, vector<8x8x32xbf16>, vector<8x8x32xbf16>, vector<8x8x32xbf16>, vector<8x8x32xbf16>, vector<8x8x32xbf16> -> vector<8x8x288xbf16>
    %49 = vector.shape_cast %48 : vector<8x8x288xbf16> to vector<64x288xbf16>
    %cst_18 = arith.constant dense<0.000000e+00> : vector<64x32xf32>
    %50 = tpu.matmul %49, %33, %cst_18 {dimension_numbers = #tpu.dot_dimension_numbers<[1], [0], [0], [1], [0, 0, 1, 1], [], []>} : vector<64x288xbf16>, vector<288x32xbf16>, vector<64x32xf32> -> vector<64x32xf32>
    %51 = vector.broadcast %35 : vector<1x32xf32> to vector<64x32xf32>
    %52 = arith.addf %50, %51 : vector<64x32xf32>
    %cst_19 = arith.constant 0.000000e+00 : f32
    %53 = vector.broadcast %cst_19 : f32 to vector<64x32xf32>
    %54 = arith.cmpf oge, %52, %53 : vector<64x32xf32>
    %cst_20 = arith.constant 2.000000e-01 : f32
    %55 = vector.broadcast %cst_20 : f32 to vector<64x32xf32>
    %56 = arith.mulf %55, %52 : vector<64x32xf32>
    %57 = arith.select %54, %52, %56 : vector<64x32xi1>, vector<64x32xf32>
    %58 = vector.shape_cast %57 : vector<64x32xf32> to vector<8x8x32xf32>
    %59 = arith.addf %31, %58 : vector<8x8x32xf32>
    %c2 = arith.constant 2 : index
    %c0_21 = arith.constant 0 : index
    %c0_22 = arith.constant 0 : index
    %60 = vector.load %arg2[%c2, %c0_21, %c0_22] : memref<6x288x32xbf16, #tpu.memory_space<vmem>>, vector<1x288x32xbf16>
    %61 = vector.shape_cast %60 : vector<1x288x32xbf16> to vector<288x32xbf16>
    %c2_23 = arith.constant 2 : index
    %c0_24 = arith.constant 0 : index
    %c0_25 = arith.constant 0 : index
    %62 = vector.load %arg3[%c2_23, %c0_24, %c0_25] : memref<6x1x32xf32, #tpu.memory_space<vmem>>, vector<1x1x32xf32>
    %63 = vector.shape_cast %62 : vector<1x1x32xf32> to vector<1x32xf32>
    %64 = tpu.concatenate %0, %59, %0 in 1 : vector<8x1x32xf32>, vector<8x8x32xf32>, vector<8x1x32xf32> -> vector<8x10x32xf32>
    %65 = tpu.concatenate %1, %64, %1 in 0 : vector<1x10x32xf32>, vector<8x10x32xf32>, vector<1x10x32xf32> -> vector<10x10x32xf32>
    %66 = arith.truncf %65 : vector<10x10x32xf32> to vector<10x10x32xbf16>
    %67 = vector.extract_strided_slice %66 {offsets = [0, 0, 0], sizes = [8, 8, 32], strides = [1, 1, 1]} : vector<10x10x32xbf16> to vector<8x8x32xbf16>
    %68 = vector.extract_strided_slice %66 {offsets = [0, 1, 0], sizes = [8, 8, 32], strides = [1, 1, 1]} : vector<10x10x32xbf16> to vector<8x8x32xbf16>
    %69 = vector.extract_strided_slice %66 {offsets = [0, 2, 0], sizes = [8, 8, 32], strides = [1, 1, 1]} : vector<10x10x32xbf16> to vector<8x8x32xbf16>
    %70 = vector.extract_strided_slice %66 {offsets = [1, 0, 0], sizes = [8, 8, 32], strides = [1, 1, 1]} : vector<10x10x32xbf16> to vector<8x8x32xbf16>
    %71 = vector.extract_strided_slice %66 {offsets = [1, 1, 0], sizes = [8, 8, 32], strides = [1, 1, 1]} : vector<10x10x32xbf16> to vector<8x8x32xbf16>
    %72 = vector.extract_strided_slice %66 {offsets = [1, 2, 0], sizes = [8, 8, 32], strides = [1, 1, 1]} : vector<10x10x32xbf16> to vector<8x8x32xbf16>
    %73 = vector.extract_strided_slice %66 {offsets = [2, 0, 0], sizes = [8, 8, 32], strides = [1, 1, 1]} : vector<10x10x32xbf16> to vector<8x8x32xbf16>
    %74 = vector.extract_strided_slice %66 {offsets = [2, 1, 0], sizes = [8, 8, 32], strides = [1, 1, 1]} : vector<10x10x32xbf16> to vector<8x8x32xbf16>
    %75 = vector.extract_strided_slice %66 {offsets = [2, 2, 0], sizes = [8, 8, 32], strides = [1, 1, 1]} : vector<10x10x32xbf16> to vector<8x8x32xbf16>
    %76 = tpu.concatenate %67, %68, %69, %70, %71, %72, %73, %74, %75 in 2 : vector<8x8x32xbf16>, vector<8x8x32xbf16>, vector<8x8x32xbf16>, vector<8x8x32xbf16>, vector<8x8x32xbf16>, vector<8x8x32xbf16>, vector<8x8x32xbf16>, vector<8x8x32xbf16>, vector<8x8x32xbf16> -> vector<8x8x288xbf16>
    %77 = vector.shape_cast %76 : vector<8x8x288xbf16> to vector<64x288xbf16>
    %cst_26 = arith.constant dense<0.000000e+00> : vector<64x32xf32>
    %78 = tpu.matmul %77, %61, %cst_26 {dimension_numbers = #tpu.dot_dimension_numbers<[1], [0], [0], [1], [0, 0, 1, 1], [], []>} : vector<64x288xbf16>, vector<288x32xbf16>, vector<64x32xf32> -> vector<64x32xf32>
    %79 = vector.broadcast %63 : vector<1x32xf32> to vector<64x32xf32>
    %80 = arith.addf %78, %79 : vector<64x32xf32>
    %cst_27 = arith.constant 0.000000e+00 : f32
    %81 = vector.broadcast %cst_27 : f32 to vector<64x32xf32>
    %82 = arith.cmpf oge, %80, %81 : vector<64x32xf32>
    %cst_28 = arith.constant 2.000000e-01 : f32
    %83 = vector.broadcast %cst_28 : f32 to vector<64x32xf32>
    %84 = arith.mulf %83, %80 : vector<64x32xf32>
    %85 = arith.select %82, %80, %84 : vector<64x32xi1>, vector<64x32xf32>
    %86 = vector.shape_cast %85 : vector<64x32xf32> to vector<8x8x32xf32>
    %87 = arith.addf %59, %86 : vector<8x8x32xf32>
    %c3 = arith.constant 3 : index
    %c0_29 = arith.constant 0 : index
    %c0_30 = arith.constant 0 : index
    %88 = vector.load %arg2[%c3, %c0_29, %c0_30] : memref<6x288x32xbf16, #tpu.memory_space<vmem>>, vector<1x288x32xbf16>
    %89 = vector.shape_cast %88 : vector<1x288x32xbf16> to vector<288x32xbf16>
    %c3_31 = arith.constant 3 : index
    %c0_32 = arith.constant 0 : index
    %c0_33 = arith.constant 0 : index
    %90 = vector.load %arg3[%c3_31, %c0_32, %c0_33] : memref<6x1x32xf32, #tpu.memory_space<vmem>>, vector<1x1x32xf32>
    %91 = vector.shape_cast %90 : vector<1x1x32xf32> to vector<1x32xf32>
    %92 = tpu.concatenate %0, %87, %0 in 1 : vector<8x1x32xf32>, vector<8x8x32xf32>, vector<8x1x32xf32> -> vector<8x10x32xf32>
    %93 = tpu.concatenate %1, %92, %1 in 0 : vector<1x10x32xf32>, vector<8x10x32xf32>, vector<1x10x32xf32> -> vector<10x10x32xf32>
    %94 = arith.truncf %93 : vector<10x10x32xf32> to vector<10x10x32xbf16>
    %95 = vector.extract_strided_slice %94 {offsets = [0, 0, 0], sizes = [8, 8, 32], strides = [1, 1, 1]} : vector<10x10x32xbf16> to vector<8x8x32xbf16>
    %96 = vector.extract_strided_slice %94 {offsets = [0, 1, 0], sizes = [8, 8, 32], strides = [1, 1, 1]} : vector<10x10x32xbf16> to vector<8x8x32xbf16>
    %97 = vector.extract_strided_slice %94 {offsets = [0, 2, 0], sizes = [8, 8, 32], strides = [1, 1, 1]} : vector<10x10x32xbf16> to vector<8x8x32xbf16>
    %98 = vector.extract_strided_slice %94 {offsets = [1, 0, 0], sizes = [8, 8, 32], strides = [1, 1, 1]} : vector<10x10x32xbf16> to vector<8x8x32xbf16>
    %99 = vector.extract_strided_slice %94 {offsets = [1, 1, 0], sizes = [8, 8, 32], strides = [1, 1, 1]} : vector<10x10x32xbf16> to vector<8x8x32xbf16>
    %100 = vector.extract_strided_slice %94 {offsets = [1, 2, 0], sizes = [8, 8, 32], strides = [1, 1, 1]} : vector<10x10x32xbf16> to vector<8x8x32xbf16>
    %101 = vector.extract_strided_slice %94 {offsets = [2, 0, 0], sizes = [8, 8, 32], strides = [1, 1, 1]} : vector<10x10x32xbf16> to vector<8x8x32xbf16>
    %102 = vector.extract_strided_slice %94 {offsets = [2, 1, 0], sizes = [8, 8, 32], strides = [1, 1, 1]} : vector<10x10x32xbf16> to vector<8x8x32xbf16>
    %103 = vector.extract_strided_slice %94 {offsets = [2, 2, 0], sizes = [8, 8, 32], strides = [1, 1, 1]} : vector<10x10x32xbf16> to vector<8x8x32xbf16>
    %104 = tpu.concatenate %95, %96, %97, %98, %99, %100, %101, %102, %103 in 2 : vector<8x8x32xbf16>, vector<8x8x32xbf16>, vector<8x8x32xbf16>, vector<8x8x32xbf16>, vector<8x8x32xbf16>, vector<8x8x32xbf16>, vector<8x8x32xbf16>, vector<8x8x32xbf16>, vector<8x8x32xbf16> -> vector<8x8x288xbf16>
    %105 = vector.shape_cast %104 : vector<8x8x288xbf16> to vector<64x288xbf16>
    %cst_34 = arith.constant dense<0.000000e+00> : vector<64x32xf32>
    %106 = tpu.matmul %105, %89, %cst_34 {dimension_numbers = #tpu.dot_dimension_numbers<[1], [0], [0], [1], [0, 0, 1, 1], [], []>} : vector<64x288xbf16>, vector<288x32xbf16>, vector<64x32xf32> -> vector<64x32xf32>
    %107 = vector.broadcast %91 : vector<1x32xf32> to vector<64x32xf32>
    %108 = arith.addf %106, %107 : vector<64x32xf32>
    %cst_35 = arith.constant 0.000000e+00 : f32
    %109 = vector.broadcast %cst_35 : f32 to vector<64x32xf32>
    %110 = arith.cmpf oge, %108, %109 : vector<64x32xf32>
    %cst_36 = arith.constant 2.000000e-01 : f32
    %111 = vector.broadcast %cst_36 : f32 to vector<64x32xf32>
    %112 = arith.mulf %111, %108 : vector<64x32xf32>
    %113 = arith.select %110, %108, %112 : vector<64x32xi1>, vector<64x32xf32>
    %114 = vector.shape_cast %113 : vector<64x32xf32> to vector<8x8x32xf32>
    %115 = arith.addf %87, %114 : vector<8x8x32xf32>
    %c4 = arith.constant 4 : index
    %c0_37 = arith.constant 0 : index
    %c0_38 = arith.constant 0 : index
    %116 = vector.load %arg2[%c4, %c0_37, %c0_38] : memref<6x288x32xbf16, #tpu.memory_space<vmem>>, vector<1x288x32xbf16>
    %117 = vector.shape_cast %116 : vector<1x288x32xbf16> to vector<288x32xbf16>
    %c4_39 = arith.constant 4 : index
    %c0_40 = arith.constant 0 : index
    %c0_41 = arith.constant 0 : index
    %118 = vector.load %arg3[%c4_39, %c0_40, %c0_41] : memref<6x1x32xf32, #tpu.memory_space<vmem>>, vector<1x1x32xf32>
    %119 = vector.shape_cast %118 : vector<1x1x32xf32> to vector<1x32xf32>
    %120 = tpu.concatenate %0, %115, %0 in 1 : vector<8x1x32xf32>, vector<8x8x32xf32>, vector<8x1x32xf32> -> vector<8x10x32xf32>
    %121 = tpu.concatenate %1, %120, %1 in 0 : vector<1x10x32xf32>, vector<8x10x32xf32>, vector<1x10x32xf32> -> vector<10x10x32xf32>
    %122 = arith.truncf %121 : vector<10x10x32xf32> to vector<10x10x32xbf16>
    %123 = vector.extract_strided_slice %122 {offsets = [0, 0, 0], sizes = [8, 8, 32], strides = [1, 1, 1]} : vector<10x10x32xbf16> to vector<8x8x32xbf16>
    %124 = vector.extract_strided_slice %122 {offsets = [0, 1, 0], sizes = [8, 8, 32], strides = [1, 1, 1]} : vector<10x10x32xbf16> to vector<8x8x32xbf16>
    %125 = vector.extract_strided_slice %122 {offsets = [0, 2, 0], sizes = [8, 8, 32], strides = [1, 1, 1]} : vector<10x10x32xbf16> to vector<8x8x32xbf16>
    %126 = vector.extract_strided_slice %122 {offsets = [1, 0, 0], sizes = [8, 8, 32], strides = [1, 1, 1]} : vector<10x10x32xbf16> to vector<8x8x32xbf16>
    %127 = vector.extract_strided_slice %122 {offsets = [1, 1, 0], sizes = [8, 8, 32], strides = [1, 1, 1]} : vector<10x10x32xbf16> to vector<8x8x32xbf16>
    %128 = vector.extract_strided_slice %122 {offsets = [1, 2, 0], sizes = [8, 8, 32], strides = [1, 1, 1]} : vector<10x10x32xbf16> to vector<8x8x32xbf16>
    %129 = vector.extract_strided_slice %122 {offsets = [2, 0, 0], sizes = [8, 8, 32], strides = [1, 1, 1]} : vector<10x10x32xbf16> to vector<8x8x32xbf16>
    %130 = vector.extract_strided_slice %122 {offsets = [2, 1, 0], sizes = [8, 8, 32], strides = [1, 1, 1]} : vector<10x10x32xbf16> to vector<8x8x32xbf16>
    %131 = vector.extract_strided_slice %122 {offsets = [2, 2, 0], sizes = [8, 8, 32], strides = [1, 1, 1]} : vector<10x10x32xbf16> to vector<8x8x32xbf16>
    %132 = tpu.concatenate %123, %124, %125, %126, %127, %128, %129, %130, %131 in 2 : vector<8x8x32xbf16>, vector<8x8x32xbf16>, vector<8x8x32xbf16>, vector<8x8x32xbf16>, vector<8x8x32xbf16>, vector<8x8x32xbf16>, vector<8x8x32xbf16>, vector<8x8x32xbf16>, vector<8x8x32xbf16> -> vector<8x8x288xbf16>
    %133 = vector.shape_cast %132 : vector<8x8x288xbf16> to vector<64x288xbf16>
    %cst_42 = arith.constant dense<0.000000e+00> : vector<64x32xf32>
    %134 = tpu.matmul %133, %117, %cst_42 {dimension_numbers = #tpu.dot_dimension_numbers<[1], [0], [0], [1], [0, 0, 1, 1], [], []>} : vector<64x288xbf16>, vector<288x32xbf16>, vector<64x32xf32> -> vector<64x32xf32>
    %135 = vector.broadcast %119 : vector<1x32xf32> to vector<64x32xf32>
    %136 = arith.addf %134, %135 : vector<64x32xf32>
    %cst_43 = arith.constant 0.000000e+00 : f32
    %137 = vector.broadcast %cst_43 : f32 to vector<64x32xf32>
    %138 = arith.cmpf oge, %136, %137 : vector<64x32xf32>
    %cst_44 = arith.constant 2.000000e-01 : f32
    %139 = vector.broadcast %cst_44 : f32 to vector<64x32xf32>
    %140 = arith.mulf %139, %136 : vector<64x32xf32>
    %141 = arith.select %138, %136, %140 : vector<64x32xi1>, vector<64x32xf32>
    %142 = vector.shape_cast %141 : vector<64x32xf32> to vector<8x8x32xf32>
    %143 = arith.addf %115, %142 : vector<8x8x32xf32>
    %c5 = arith.constant 5 : index
    %c0_45 = arith.constant 0 : index
    %c0_46 = arith.constant 0 : index
    %144 = vector.load %arg2[%c5, %c0_45, %c0_46] : memref<6x288x32xbf16, #tpu.memory_space<vmem>>, vector<1x288x32xbf16>
    %145 = vector.shape_cast %144 : vector<1x288x32xbf16> to vector<288x32xbf16>
    %c5_47 = arith.constant 5 : index
    %c0_48 = arith.constant 0 : index
    %c0_49 = arith.constant 0 : index
    %146 = vector.load %arg3[%c5_47, %c0_48, %c0_49] : memref<6x1x32xf32, #tpu.memory_space<vmem>>, vector<1x1x32xf32>
    %147 = vector.shape_cast %146 : vector<1x1x32xf32> to vector<1x32xf32>
    %148 = tpu.concatenate %0, %143, %0 in 1 : vector<8x1x32xf32>, vector<8x8x32xf32>, vector<8x1x32xf32> -> vector<8x10x32xf32>
    %149 = tpu.concatenate %1, %148, %1 in 0 : vector<1x10x32xf32>, vector<8x10x32xf32>, vector<1x10x32xf32> -> vector<10x10x32xf32>
    %150 = arith.truncf %149 : vector<10x10x32xf32> to vector<10x10x32xbf16>
    %151 = vector.extract_strided_slice %150 {offsets = [0, 0, 0], sizes = [8, 8, 32], strides = [1, 1, 1]} : vector<10x10x32xbf16> to vector<8x8x32xbf16>
    %152 = vector.extract_strided_slice %150 {offsets = [0, 1, 0], sizes = [8, 8, 32], strides = [1, 1, 1]} : vector<10x10x32xbf16> to vector<8x8x32xbf16>
    %153 = vector.extract_strided_slice %150 {offsets = [0, 2, 0], sizes = [8, 8, 32], strides = [1, 1, 1]} : vector<10x10x32xbf16> to vector<8x8x32xbf16>
    %154 = vector.extract_strided_slice %150 {offsets = [1, 0, 0], sizes = [8, 8, 32], strides = [1, 1, 1]} : vector<10x10x32xbf16> to vector<8x8x32xbf16>
    %155 = vector.extract_strided_slice %150 {offsets = [1, 1, 0], sizes = [8, 8, 32], strides = [1, 1, 1]} : vector<10x10x32xbf16> to vector<8x8x32xbf16>
    %156 = vector.extract_strided_slice %150 {offsets = [1, 2, 0], sizes = [8, 8, 32], strides = [1, 1, 1]} : vector<10x10x32xbf16> to vector<8x8x32xbf16>
    %157 = vector.extract_strided_slice %150 {offsets = [2, 0, 0], sizes = [8, 8, 32], strides = [1, 1, 1]} : vector<10x10x32xbf16> to vector<8x8x32xbf16>
    %158 = vector.extract_strided_slice %150 {offsets = [2, 1, 0], sizes = [8, 8, 32], strides = [1, 1, 1]} : vector<10x10x32xbf16> to vector<8x8x32xbf16>
    %159 = vector.extract_strided_slice %150 {offsets = [2, 2, 0], sizes = [8, 8, 32], strides = [1, 1, 1]} : vector<10x10x32xbf16> to vector<8x8x32xbf16>
    %160 = tpu.concatenate %151, %152, %153, %154, %155, %156, %157, %158, %159 in 2 : vector<8x8x32xbf16>, vector<8x8x32xbf16>, vector<8x8x32xbf16>, vector<8x8x32xbf16>, vector<8x8x32xbf16>, vector<8x8x32xbf16>, vector<8x8x32xbf16>, vector<8x8x32xbf16>, vector<8x8x32xbf16> -> vector<8x8x288xbf16>
    %161 = vector.shape_cast %160 : vector<8x8x288xbf16> to vector<64x288xbf16>
    %cst_50 = arith.constant dense<0.000000e+00> : vector<64x32xf32>
    %162 = tpu.matmul %161, %145, %cst_50 {dimension_numbers = #tpu.dot_dimension_numbers<[1], [0], [0], [1], [0, 0, 1, 1], [], []>} : vector<64x288xbf16>, vector<288x32xbf16>, vector<64x32xf32> -> vector<64x32xf32>
    %163 = vector.broadcast %147 : vector<1x32xf32> to vector<64x32xf32>
    %164 = arith.addf %162, %163 : vector<64x32xf32>
    %cst_51 = arith.constant 0.000000e+00 : f32
    %165 = vector.broadcast %cst_51 : f32 to vector<64x32xf32>
    %166 = arith.cmpf oge, %164, %165 : vector<64x32xf32>
    %cst_52 = arith.constant 2.000000e-01 : f32
    %167 = vector.broadcast %cst_52 : f32 to vector<64x32xf32>
    %168 = arith.mulf %167, %164 : vector<64x32xf32>
    %169 = arith.select %166, %164, %168 : vector<64x32xi1>, vector<64x32xf32>
    %170 = vector.shape_cast %169 : vector<64x32xf32> to vector<8x8x32xf32>
    %171 = arith.addf %143, %170 : vector<8x8x32xf32>
    %c0_53 = arith.constant 0 : index
    %c0_54 = arith.constant 0 : index
    %172 = vector.load %arg4[%c0_53, %c0_54] : memref<288x32xbf16, #tpu.memory_space<vmem>>, vector<288x32xbf16>
    %c0_55 = arith.constant 0 : index
    %c0_56 = arith.constant 0 : index
    %173 = vector.load %arg5[%c0_55, %c0_56] : memref<1x32xf32, #tpu.memory_space<vmem>>, vector<1x32xf32>
    %174 = tpu.concatenate %0, %171, %0 in 1 : vector<8x1x32xf32>, vector<8x8x32xf32>, vector<8x1x32xf32> -> vector<8x10x32xf32>
    %175 = tpu.concatenate %1, %174, %1 in 0 : vector<1x10x32xf32>, vector<8x10x32xf32>, vector<1x10x32xf32> -> vector<10x10x32xf32>
    %176 = arith.truncf %175 : vector<10x10x32xf32> to vector<10x10x32xbf16>
    %177 = vector.extract_strided_slice %176 {offsets = [0, 0, 0], sizes = [8, 8, 32], strides = [1, 1, 1]} : vector<10x10x32xbf16> to vector<8x8x32xbf16>
    %178 = vector.extract_strided_slice %176 {offsets = [0, 1, 0], sizes = [8, 8, 32], strides = [1, 1, 1]} : vector<10x10x32xbf16> to vector<8x8x32xbf16>
    %179 = vector.extract_strided_slice %176 {offsets = [0, 2, 0], sizes = [8, 8, 32], strides = [1, 1, 1]} : vector<10x10x32xbf16> to vector<8x8x32xbf16>
    %180 = vector.extract_strided_slice %176 {offsets = [1, 0, 0], sizes = [8, 8, 32], strides = [1, 1, 1]} : vector<10x10x32xbf16> to vector<8x8x32xbf16>
    %181 = vector.extract_strided_slice %176 {offsets = [1, 1, 0], sizes = [8, 8, 32], strides = [1, 1, 1]} : vector<10x10x32xbf16> to vector<8x8x32xbf16>
    %182 = vector.extract_strided_slice %176 {offsets = [1, 2, 0], sizes = [8, 8, 32], strides = [1, 1, 1]} : vector<10x10x32xbf16> to vector<8x8x32xbf16>
    %183 = vector.extract_strided_slice %176 {offsets = [2, 0, 0], sizes = [8, 8, 32], strides = [1, 1, 1]} : vector<10x10x32xbf16> to vector<8x8x32xbf16>
    %184 = vector.extract_strided_slice %176 {offsets = [2, 1, 0], sizes = [8, 8, 32], strides = [1, 1, 1]} : vector<10x10x32xbf16> to vector<8x8x32xbf16>
    %185 = vector.extract_strided_slice %176 {offsets = [2, 2, 0], sizes = [8, 8, 32], strides = [1, 1, 1]} : vector<10x10x32xbf16> to vector<8x8x32xbf16>
    %186 = tpu.concatenate %177, %178, %179, %180, %181, %182, %183, %184, %185 in 2 : vector<8x8x32xbf16>, vector<8x8x32xbf16>, vector<8x8x32xbf16>, vector<8x8x32xbf16>, vector<8x8x32xbf16>, vector<8x8x32xbf16>, vector<8x8x32xbf16>, vector<8x8x32xbf16>, vector<8x8x32xbf16> -> vector<8x8x288xbf16>
    %187 = vector.shape_cast %186 : vector<8x8x288xbf16> to vector<64x288xbf16>
    %cst_57 = arith.constant dense<0.000000e+00> : vector<64x32xf32>
    %188 = tpu.matmul %187, %172, %cst_57 {dimension_numbers = #tpu.dot_dimension_numbers<[1], [0], [0], [1], [0, 0, 1, 1], [], []>} : vector<64x288xbf16>, vector<288x32xbf16>, vector<64x32xf32> -> vector<64x32xf32>
    %189 = vector.broadcast %173 : vector<1x32xf32> to vector<64x32xf32>
    %190 = arith.addf %188, %189 : vector<64x32xf32>
    %191 = vector.shape_cast %190 : vector<64x32xf32> to vector<8x8x32xf32>
    %c0_58 = arith.constant 0 : index
    %c0_59 = arith.constant 0 : index
    %c0_60 = arith.constant 0 : index
    %c0_61 = arith.constant 0 : index
    %192 = vector.load %arg6[%c0_58, %c0_59, %c0_60, %c0_61] : memref<1x8x8x32xf32, #tpu.memory_space<vmem>>, vector<1x8x8x32xf32>
    %193 = vector.shape_cast %192 : vector<1x8x8x32xf32> to vector<8x8x32xf32>
    %194 = vector.shape_cast %191 : vector<8x8x32xf32> to vector<1x8x8x32xf32>
    tpu.vector_store %arg6[%c0_58, %c0_59, %c0_60, %c0_61], %194 {strides = array<i32>} : memref<1x8x8x32xf32, #tpu.memory_space<vmem>>, vector<1x8x8x32xf32>,
    return
  }
  func.func @transform_0(%arg0: i32) -> (i32, i32, i32, i32) {
    %c0_i32 = arith.constant 0 : i32
    %c0_i32_0 = arith.constant 0 : i32
    %c0_i32_1 = arith.constant 0 : i32
    %c0_i32_2 = arith.constant 0 : i32
    return %arg0, %c0_i32, %c0_i32_0, %c0_i32_1 : i32, i32, i32, i32
  }
  func.func @transform_1(%arg0: i32) -> (i32, i32, i32) {
    %c0_i32 = arith.constant 0 : i32
    %c0_i32_0 = arith.constant 0 : i32
    %c0_i32_1 = arith.constant 0 : i32
    %c0_i32_2 = arith.constant 0 : i32
    return %c0_i32, %c0_i32_0, %c0_i32_1 : i32, i32, i32
  }
  func.func @transform_2(%arg0: i32) -> (i32, i32, i32) {
    %c0_i32 = arith.constant 0 : i32
    %c0_i32_0 = arith.constant 0 : i32
    %c0_i32_1 = arith.constant 0 : i32
    %c0_i32_2 = arith.constant 0 : i32
    return %c0_i32, %c0_i32_0, %c0_i32_1 : i32, i32, i32
  }
  func.func @transform_3(%arg0: i32) -> (i32, i32) {
    %c0_i32 = arith.constant 0 : i32
    %c0_i32_0 = arith.constant 0 : i32
    %c0_i32_1 = arith.constant 0 : i32
    return %c0_i32, %c0_i32_0 : i32, i32
  }
  func.func @transform_4(%arg0: i32) -> (i32, i32) {
    %c0_i32 = arith.constant 0 : i32
    %c0_i32_0 = arith.constant 0 : i32
    %c0_i32_1 = arith.constant 0 : i32
    return %c0_i32, %c0_i32_0 : i32, i32
  }
  func.func @transform_5(%arg0: i32) -> (i32, i32, i32, i32) {
    %c0_i32 = arith.constant 0 : i32
    %c0_i32_0 = arith.constant 0 : i32
    %c0_i32_1 = arith.constant 0 : i32
    %c0_i32_2 = arith.constant 0 : i32
    return %arg0, %c0_i32, %c0_i32_0, %c0_i32_1 : i32, i32, i32, i32
  }
}

</mosaic_0001>

<bundles_post_ra>
// kernel: feature_extraction_forward.3
= control target key start
LH: loop header
LB: loop body
LE: loop exit
PB: predicated region body
PF: predicated region fallthrough
CT: control target
= control target key end

     0   :  { %s2261_s12 = smov 0   ;;  %s4194_s0 = inlined_call_operand.vmem [shape: f32[2,18,18,12], index: 0, kind: input, shape index: {}]   ;;  %s4195_s1 = inlined_call_operand.vmem [shape: bf16[75,32], index: 1, kind: input, shape index: {}]   ;;  %s4196_s2 = inlined_call_operand.vmem [shape: f32[1,32], index: 2, kind: input, shape index: {}]   ;;  %s4197_s3 = inlined_call_operand.vmem [shape: f32[2,16,16,32], index: 3, kind: output, shape index: {}]  }
   0x1 LB: > { %s2124_s13 = sadd.s32 4294967295, %s2223_s12   ;;  %p2128_p0 = scmp.ge.s32.totalorder %s2223_s12, 1  ;;  %s2223_s12 = sphi %s2261_s12, %s13_s12  }
   0x2   : > { %p137_p1 = scmp.lt.s32.totalorder %s2223_s12, 3 }
   0x4   : > { %p138_p2 = pnand %p2128_p0, %p137_p1 }
   0x6   : > { %141 = sbr.rel (%p138_p2) target bundleno = 1065 (0x429), region = 32 }
   0xb   : > { %p161_p3 = scmp.lt.s32.totalorder %s2124_s13, 1  ;;  %vm408_vm0 = vsmask.f32 7424  ;;  %s2225_s18 = smov 6   ;;  %vm633_vm1 = vcmask 1046528   ;;  %vm962_vm2 = vcmask 48128  }
   0xc   : > { %s2226_s19 = smov 12   ;;  %s2227_s20 = smov 9   ;;  %vm995_vm3 = vcmask 72704   ;;  %vm1012_vm4 = vcmask 97280   ;;  %vm1045_vm5 = vcmask 121856   ;;  %vm1078_vm6 = vcmask 146432  }
   0xd   : > { %s4524_s13 = smov (!%p161_p3, %s2124_s13), 1  ;;  %s2228_s21 = smov 15   ;;  %vm1095_vm7 = vcmask 171008   ;;  %vm1128_vm8 = vcmask 195584   ;;  %vm1145_vm9 = vcmask 220160   ;;  %vm1178_vm10 = vcmask 244736  }
   0xe   : > { %s2191_s14 = smul.u32 432, %s4524_s13  ;;  %s2229_s22 = smov 21   ;;  %vm1211_vm11 = vcmask 269312   ;;  %vm1228_vm12 = vcmask 293888   ;;  %vm1261_vm13 = vcmask 318464   ;;  %vm1278_vm14 = vcmask 343040  }
   0xf   : > { %s2230_s23 = smov 30   ;;  %s2231_s24 = smov 36   ;;  %vm1311_vm15 = vcmask 367616  }
  0x10   : > { %s2275_s17 = scalar_lea.vmem %s4194_s0, %s2191_s14  ;;  %s2232_s25 = smov 42  }
  0x11   : > { %v184_v0 = vld [vmem:[%s2275_s17 + $0x60] sm:$0xff]  ;;  %v185_v1 = vld [vmem:[%s2275_s17 + $0x68] sm:$0xff]  ;;  %v186_v2 = vld [vmem:[%s2275_s17 + $0x70] sm:$0x3]  ;;  %s2233_s26 = smov 39   ;;  %s2234_s27 = smov 119  }
  0x12   : > { %v238_v3 = vpack.c.bf16 %v184_v0, %v184_v0  ;;  %v239_v4 = vpack.c.bf16 %v185_v1, %v185_v1  ;;  %v240_v5 = vpack.c.bf16 %v186_v2, %v186_v2  ;;  %v178_v6 = vld [vmem:[%s2275_s17 + $0x30] sm:$0xff]  ;;  %v179_v7 = vld [vmem:[%s2275_s17 + $0x38] sm:$0xff]  ;;  %v180_v8 = vld [vmem:[%s2275_s17 + $0x40] sm:$0x3]  ;;  %s2235_s28 = smov 125   ;;  %s2236_s29 = smov 3  }
  0x13   : > { %v232_v9 = vpack.c.bf16 %v178_v6, %v178_v6  ;;  %v233_v10 = vpack.c.bf16 %v179_v7, %v179_v7  ;;  %v234_v11 = vpack.c.bf16 %v180_v8, %v180_v8  ;;  %v172_v12 = vld [vmem:[%s2275_s17] sm:$0xff]  ;;  %v173_v13 = vld [vmem:[%s2275_s17 + $0x8] sm:$0xff]  ;;  %v174_v14 = vld [vmem:[%s2275_s17 + $0x10] sm:$0x3]  ;;  %s2237_s30 = smov 18   ;;  %s2238_s4 = smov 24  }
  0x14   : > { %v320_v15 = vunpack.c.l.b16 %v238_v3  ;;  %v321_v16 = vunpack.c.l.b16 %v239_v4  ;;  %v380_v17 = vunpack.c.l.b16 %v240_v5  ;;  %v226_v18 = vpack.c.bf16 %v172_v12, %v172_v12  ;;  %v187_v19 = vld [vmem:[%s2275_s17 + $0x78] sm:$0xff]  ;;  %v188_v31 = vld [vmem:[%s2275_s17 + $0x80] sm:$0xff]  ;;  %v189_v41 = vld [vmem:[%s2275_s17 + $0x88] sm:$0x3]  ;;  %s2239_s5 = smov 48  }
  0x15   : > { %v316_v20 = vunpack.c.l.b16 %v232_v9  ;;  %v317_v21 = vunpack.c.l.b16 %v233_v10  ;;  %v378_v22 = vunpack.c.l.b16 %v234_v11  ;;  %v227_v23 = vpack.c.bf16 %v173_v13, %v173_v13  ;;  %v181_v46 = vld [vmem:[%s2275_s17 + $0x48] sm:$0xff]  ;;  %v182_v51 = vld [vmem:[%s2275_s17 + $0x50] sm:$0xff]  ;;  %v183_v56 = vld [vmem:[%s2275_s17 + $0x58] sm:$0x3] }
  0x16   : > { %v2287_v24 = vpack.c.b16 %v321_v16, %v320_v15  ;;  %v2289_v25 = vpack.c.b16 %v380_v17, %v380_v17  ;;  %v228_v26 = vpack.c.bf16 %v174_v14, %v174_v14  ;;  %v312_v27 = vunpack.c.l.b16 %v226_v18  ;;  %v175_v61 = vld [vmem:[%s2275_s17 + $0x18] sm:$0xff]  ;;  %v176_v6 = vld [vmem:[%s2275_s17 + $0x20] sm:$0xff]  ;;  %v177_v7 = vld [vmem:[%s2275_s17 + $0x28] sm:$0x3] }
  0x17   : > { %v2291_v28 = vpack.c.b16 %v317_v21, %v316_v20  ;;  %v2293_v29 = vpack.c.b16 %v378_v22, %v378_v22  ;;  %v313_v30 = vunpack.c.l.b16 %v227_v23  ;;  %v241_v32 = vpack.c.bf16 %v187_v19, %v187_v19  ;;  %v196_v12 = vld [vmem:[%s2275_s17 + $0xc0] sm:$0xff]  ;;  %v197_v21 = vld [vmem:[%s2275_s17 + $0xc8] sm:$0xff] }
  0x18   : > { %v458_v33 = vshrl.u32 %v2287_v24, 16  ;;  %v460_v34 = vshll.u32 %v2287_v24, 16  ;;  %v465_v35 = vshll.u32 %v2289_v25, 16  ;;  %v376_v36 = vunpack.c.l.b16 %v228_v26 }
  0x19   : > { %v434_v37 = vshrl.u32 %v2291_v28, 16  ;;  %v436_v38 = vshll.u32 %v2291_v28, 16  ;;  %v441_v39 = vshll.u32 %v2293_v29, 16  ;;  %v2302_v40 = vpack.c.b16 %v313_v30, %v312_v27  ;;  %v198_v27 = vld [vmem:[%s2275_s17 + $0xd0] sm:$0x3] }
  0x1a   : > { %v462_v42 = vrot.slane %v460_v34, 1  ;;  %v467_v43 = vrot.slane %v465_v35, 1  ;;  %v2305_v44 = vpack.c.b16 %v376_v36, %v376_v36  ;;  %v242_v45 = vpack.c.bf16 %v188_v31, %v188_v31 }
  0x1b   : > { %v438_v47 = vrot.slane %v436_v38, 1  ;;  %v443_v48 = vrot.slane %v441_v39, 1  ;;  %v410_v49 = vshrl.u32 %v2302_v40, 16  ;;  %v412_v50 = vshll.u32 %v2302_v40, 16 }
  0x1c   : > { %v463_v52 = vor.u32 %v462_v42, %v458_v33  ;;  %v417_v53 = vshll.u32 %v2305_v44, 16  ;;  %v243_v54 = vpack.c.bf16 %v189_v41, %v189_v41  ;;  %v322_v55 = vunpack.c.l.b16 %v241_v32 }
  0x1d   : > { %v439_v57 = vor.u32 %v438_v47, %v434_v37  ;;  %v414_v58 = vrot.slane %v412_v50, 1  ;;  %v323_v59 = vunpack.c.l.b16 %v242_v45  ;;  %v235_v60 = vpack.c.bf16 %v181_v46, %v181_v46  ;;  %v193_v45 = vld [vmem:[%s2275_s17 + $0xa8] sm:$0xff]  ;;  %v194_v46 = vld [vmem:[%s2275_s17 + $0xb0] sm:$0xff] }
  0x1e   : > { %v2315_v62 = vsel %vm408_vm0, %v463_v52, %v467_v43  ;;  %v419_v63 = vrot.slane %v417_v53, 1  ;;  %v381_v0 = vunpack.c.l.b16 %v243_v54  ;;  %v236_v1 = vpack.c.bf16 %v182_v51, %v182_v51  ;;  %v195_v51 = vld [vmem:[%s2275_s17 + $0xb8] sm:$0x3] }
  0x1f   : > { %609 = vrot.lane.b32.xlu2 %v2315_v62, %s2225_s18  ;;  %v2320_v2 = vsel %vm408_vm0, %v439_v57, %v443_v48  ;;  %v415_v3 = vor.u32 %v414_v58, %v410_v49  ;;  %v2322_v4 = vpack.c.b16 %v323_v59, %v322_v55  ;;  %v237_v5 = vpack.c.bf16 %v183_v56, %v183_v56 }
  0x20   : > { %605 = vrot.lane.b32.xlu1 %v2320_v2, %s2225_s18  ;;  %v2328_v8 = vpack.c.b16 %v381_v0, %v381_v0  ;;  %v318_v9 = vunpack.c.l.b16 %v235_v60  ;;  %v319_v10 = vunpack.c.l.b16 %v236_v1  ;;  %v229_v11 = vpack.c.bf16 %v175_v61, %v175_v61  ;;  %v190_v1 = vld [vmem:[%s2275_s17 + $0x90] sm:$0xff] }
  0x21   : > { %v2332_v13 = vsel %vm408_vm0, %v415_v3, %v419_v63  ;;  %v470_v14 = vshrl.u32 %v2322_v4, 16  ;;  %v472_v15 = vshll.u32 %v2322_v4, 16  ;;  %v379_v16 = vunpack.c.l.b16 %v237_v5  ;;  %v191_v3 = vld [vmem:[%s2275_s17 + $0x98] sm:$0xff]  ;;  %v192_v5 = vld [vmem:[%s2275_s17 + $0xa0] sm:$0x3] }
  0x22   : > { %601 = vrot.lane.b32.xlu0 %v2332_v13, %s2225_s18  ;;  %v477_v17 = vshll.u32 %v2328_v8, 16  ;;  %v2339_v18 = vpack.c.b16 %v319_v10, %v318_v9  ;;  %v230_v19 = vpack.c.bf16 %v176_v6, %v176_v6  ;;  %v231_v20 = vpack.c.bf16 %v177_v7, %v177_v7 }
  0x23   : > { %v474_v22 = vrot.slane %v472_v15, 1  ;;  %v2342_v23 = vpack.c.b16 %v379_v16, %v379_v16  ;;  %v314_v26 = vunpack.c.l.b16 %v229_v11  ;;  %v250_v30 = vpack.c.bf16 %v196_v12, %v196_v12 }
  0x24   : > { %v479_v31 = vrot.slane %v477_v17, 1  ;;  %v446_v32 = vshrl.u32 %v2339_v18, 16  ;;  %v448_v33 = vshll.u32 %v2339_v18, 16  ;;  %v315_v34 = vunpack.c.l.b16 %v230_v19 }
  0x25   : > { %v475_v35 = vor.u32 %v474_v22, %v470_v14  ;;  %v453_v36 = vshll.u32 %v2342_v23, 16  ;;  %v377_v37 = vunpack.c.l.b16 %v231_v20  ;;  %v251_v38 = vpack.c.bf16 %v197_v21, %v197_v21  ;;  %v205_v21 = vld [vmem:[%s2275_s17 + $0x108] sm:$0xff] }
  0x26   : > { %v450_v39 = vrot.slane %v448_v33, 1  ;;  %v2348_v41 = vpack.c.b16 %v315_v34, %v314_v26  ;;  %v252_v42 = vpack.c.bf16 %v198_v27, %v198_v27  ;;  %v328_v43 = vunpack.c.l.b16 %v250_v30 }
  0x27   : > { %v2353_v47 = vsel %vm408_vm0, %v475_v35, %v479_v31  ;;  %v455_v48 = vrot.slane %v453_v36, 1  ;;  %v2355_v49 = vpack.c.b16 %v377_v37, %v377_v37  ;;  %v329_v50 = vunpack.c.l.b16 %v251_v38  ;;  %v206_v31 = vld [vmem:[%s2275_s17 + $0x110] sm:$0xff]  ;;  %v207_v36 = vld [vmem:[%s2275_s17 + $0x118] sm:$0x3] }
  0x28   : > { %4301 = vst [vmem:[#allocation2_spill] sm:$0xff] %v2353_v47  ;;  %611 = vrot.lane.b32.xlu2 %v2353_v47, %s2225_s18  ;;  %v451_v52 = vor.u32 %v450_v39, %v446_v32  ;;  %v422_v53 = vshrl.u32 %v2348_v41, 16  ;;  %v424_v54 = vshll.u32 %v2348_v41, 16  ;;  %v384_v55 = vunpack.c.l.b16 %v252_v42 }
  0x29   : > { %v429_v56 = vshll.u32 %v2355_v49, 16  ;;  %v2363_v57 = vpack.c.b16 %v329_v50, %v328_v43  ;;  %v247_v58 = vpack.c.bf16 %v193_v45, %v193_v45  ;;  %v248_v59 = vpack.c.bf16 %v194_v46, %v194_v46  ;;  %v202_v50 = vld [vmem:[%s2275_s17 + $0xf0] sm:$0xff] }
  0x2a   : > { %v2366_v60 = vsel %vm408_vm0, %v451_v52, %v455_v48  ;;  %v426_v61 = vrot.slane %v424_v54, 1  ;;  %v2368_v63 = vpack.c.b16 %v384_v55, %v384_v55  ;;  %v249_v0 = vpack.c.bf16 %v195_v51, %v195_v51  ;;  %v203_v51 = vld [vmem:[%s2275_s17 + $0xf8] sm:$0xff] }
  0x2b   : > { %4302 = vst [vmem:[#allocation3_spill] sm:$0xff] %v2366_v60  ;;  %607 = vrot.lane.b32.xlu1 %v2366_v60, %s2225_s18  ;;  %v431_v6 = vrot.slane %v429_v56, 1  ;;  %v506_v7 = vshrl.u32 %v2363_v57, 16  ;;  %v508_v9 = vshll.u32 %v2363_v57, 16  ;;  %v326_v10 = vunpack.c.l.b16 %v247_v58  ;;  %v204_v56 = vld [vmem:[%s2275_s17 + $0x100] sm:$0x3] }
  0x2c   : > { %v427_v11 = vor.u32 %v426_v61, %v422_v53  ;;  %v513_v12 = vshll.u32 %v2368_v63, 16  ;;  %v327_v14 = vunpack.c.l.b16 %v248_v59  ;;  %v383_v15 = vunpack.c.l.b16 %v249_v0 }
  0x2d   : > { %v510_v16 = vrot.slane %v508_v9, 1  ;;  %v244_v17 = vpack.c.bf16 %v190_v1, %v190_v1  ;;  %v245_v19 = vpack.c.bf16 %v191_v3, %v191_v3  ;;  %v246_v20 = vpack.c.bf16 %v192_v5, %v192_v5 }
  0x2e   : > { %v2380_v22 = vsel %vm408_vm0, %v427_v11, %v431_v6  ;;  %v515_v26 = vrot.slane %v513_v12, 1  ;;  %v2382_v27 = vpack.c.b16 %v327_v14, %v326_v10  ;;  %v2384_v30 = vpack.c.b16 %v383_v15, %v383_v15  ;;  %v199_v12 = vld [vmem:[%s2275_s17 + $0xd8] sm:$0xff]  ;;  %v200_v14 = vld [vmem:[%s2275_s17 + $0xe0] sm:$0xff] }
  0x2f   : > { %603 = vrot.lane.b32.xlu0 %v2380_v22, %s2225_s18  ;;  %v511_v32 = vor.u32 %v510_v16, %v506_v7  ;;  %v324_v33 = vunpack.c.l.b16 %v244_v17  ;;  %v325_v34 = vunpack.c.l.b16 %v245_v19  ;;  %v382_v35 = vunpack.c.l.b16 %v246_v20  ;;  %v201_v20 = vld [vmem:[%s2275_s17 + $0xe8] sm:$0x3] }
  0x30   : > { %v494_v37 = vshrl.u32 %v2382_v27, 16  ;;  %v496_v38 = vshll.u32 %v2382_v27, 16  ;;  %v501_v39 = vshll.u32 %v2384_v30, 16  ;;  %v259_v42 = vpack.c.bf16 %v205_v21, %v205_v21 }
  0x31   : > { %v2394_v43 = vsel %vm408_vm0, %v511_v32, %v515_v26  ;;  %v2396_v45 = vpack.c.b16 %v325_v34, %v324_v33  ;;  %v2398_v46 = vpack.c.b16 %v382_v35, %v382_v35  ;;  %v260_v48 = vpack.c.bf16 %v206_v31, %v206_v31 }
  0x32   : > { %4303 = vst [vmem:[#allocation4_spill] sm:$0xff] %v2394_v43  ;;  %617 = vrot.lane.b32.xlu2 %v2394_v43, %s2225_s18  ;;  %v498_v52 = vrot.slane %v496_v38, 1  ;;  %v503_v53 = vrot.slane %v501_v39, 1  ;;  %v261_v54 = vpack.c.bf16 %v207_v36, %v207_v36  ;;  %v334_v55 = vunpack.c.l.b16 %v259_v42 }
  0x33   : > { %v482_v58 = vshrl.u32 %v2396_v45, 16  ;;  %v484_v59 = vshll.u32 %v2396_v45, 16  ;;  %v489_v61 = vshll.u32 %v2398_v46, 16  ;;  %v335_v0 = vunpack.c.l.b16 %v260_v48  ;;  %v214_v48 = vld [vmem:[%s2275_s17 + $0x150] sm:$0xff] }
  0x34   : > { %v499_v1 = vor.u32 %v498_v52, %v494_v37  ;;  %v387_v3 = vunpack.c.l.b16 %v261_v54  ;;  %v256_v5 = vpack.c.bf16 %v202_v50, %v202_v50  ;;  %v257_v6 = vpack.c.bf16 %v203_v51, %v203_v51  ;;  %v215_v50 = vld [vmem:[%s2275_s17 + $0x158] sm:$0xff]  ;;  %v216_v51 = vld [vmem:[%s2275_s17 + $0x160] sm:$0x3] }
  0x35   : > { %v486_v7 = vrot.slane %v484_v59, 1  ;;  %v491_v9 = vrot.slane %v489_v61, 1  ;;  %v2408_v10 = vpack.c.b16 %v335_v0, %v334_v55  ;;  %v258_v11 = vpack.c.bf16 %v204_v56, %v204_v56 }
  0x36   : > { %v2413_v15 = vsel %vm408_vm0, %v499_v1, %v503_v53  ;;  %v2415_v16 = vpack.c.b16 %v387_v3, %v387_v3  ;;  %v332_v17 = vunpack.c.l.b16 %v256_v5  ;;  %v333_v19 = vunpack.c.l.b16 %v257_v6  ;;  %v211_v6 = vld [vmem:[%s2275_s17 + $0x138] sm:$0xff] }
  0x37   : > { %4304 = vst [vmem:[#allocation5_spill] sm:$0xff] %v2413_v15  ;;  %615 = vrot.lane.b32.xlu1 %v2413_v15, %s2225_s18  ;;  %v487_v21 = vor.u32 %v486_v7, %v482_v58  ;;  %v542_v26 = vshrl.u32 %v2408_v10, 16  ;;  %v544_v31 = vshll.u32 %v2408_v10, 16  ;;  %v386_v32 = vunpack.c.l.b16 %v258_v11 }
  0x38   : > { %v549_v33 = vshll.u32 %v2415_v16, 16  ;;  %v2423_v34 = vpack.c.b16 %v333_v19, %v332_v17  ;;  %v253_v35 = vpack.c.bf16 %v199_v12, %v199_v12  ;;  %v254_v36 = vpack.c.bf16 %v200_v14, %v200_v14  ;;  %v212_v14 = vld [vmem:[%s2275_s17 + $0x140] sm:$0xff] }
  0x39   : > { %v2426_v37 = vsel %vm408_vm0, %v487_v21, %v491_v9  ;;  %v546_v38 = vrot.slane %v544_v31, 1  ;;  %v2428_v39 = vpack.c.b16 %v386_v32, %v386_v32  ;;  %v255_v42 = vpack.c.bf16 %v201_v20, %v201_v20 }
  0x3a   : > { %4305 = vst [vmem:[#allocation6_spill] sm:$0xff] %v2426_v37  ;;  %613 = vrot.lane.b32.xlu0 %v2426_v37, %s2225_s18  ;;  %v551_v52 = vrot.slane %v549_v33, 1  ;;  %v530_v53 = vshrl.u32 %v2423_v34, 16  ;;  %v532_v54 = vshll.u32 %v2423_v34, 16  ;;  %v330_v55 = vunpack.c.l.b16 %v253_v35 }
  0x3b   : > { %v547_v56 = vor.u32 %v546_v38, %v542_v26  ;;  %v537_v58 = vshll.u32 %v2428_v39, 16  ;;  %v331_v59 = vunpack.c.l.b16 %v254_v36  ;;  %v385_v61 = vunpack.c.l.b16 %v255_v42  ;;  %v213_v26 = vld [vmem:[%s2275_s17 + $0x148] sm:$0x3] }
  0x3c   : > { %v534_v0 = vrot.slane %v532_v54, 1  ;;  %v268_v1 = vpack.c.bf16 %v214_v48, %v214_v48  ;;  %v269_v3 = vpack.c.bf16 %v215_v50, %v215_v50  ;;  %v270_v5 = vpack.c.bf16 %v216_v51, %v216_v51  ;;  %v208_v50 = vld [vmem:[%s2275_s17 + $0x120] sm:$0xff]  ;;  %v209_v51 = vld [vmem:[%s2275_s17 + $0x128] sm:$0xff] }
  0x3d   : > { %v2440_v7 = vsel %vm408_vm0, %v547_v56, %v551_v52  ;;  %v539_v9 = vrot.slane %v537_v58, 1  ;;  %v2442_v11 = vpack.c.b16 %v331_v59, %v330_v55  ;;  %v2444_v12 = vpack.c.b16 %v385_v61, %v385_v61  ;;  %v210_v56 = vld [vmem:[%s2275_s17 + $0x130] sm:$0x3] }
  0x3e   : > { %4306 = vst [vmem:[#allocation7_spill] sm:$0xff] %v2440_v7  ;;  %623 = vrot.lane.b32.xlu2 %v2440_v7, %s2225_s18  ;;  %v535_v17 = vor.u32 %v534_v0, %v530_v53  ;;  %v340_v19 = vunpack.c.l.b16 %v268_v1  ;;  %v341_v20 = vunpack.c.l.b16 %v269_v3  ;;  %v390_v21 = vunpack.c.l.b16 %v270_v5 }
  0x3f   : > { %v518_v31 = vshrl.u32 %v2442_v11, 16  ;;  %v520_v32 = vshll.u32 %v2442_v11, 16  ;;  %v525_v33 = vshll.u32 %v2444_v12, 16  ;;  %v265_v35 = vpack.c.bf16 %v211_v6, %v211_v6 }
  0x40   : > { %v2454_v36 = vsel %vm408_vm0, %v535_v17, %v539_v9  ;;  %v2456_v38 = vpack.c.b16 %v341_v20, %v340_v19  ;;  %v2458_v42 = vpack.c.b16 %v390_v21, %v390_v21  ;;  %v266_v48 = vpack.c.bf16 %v212_v14, %v212_v14 }
  0x41   : > { %4307 = vst [vmem:[#allocation8_spill] sm:$0xff] %v2454_v36  ;;  %621 = vrot.lane.b32.xlu1 %v2454_v36, %s2225_s18  ;;  %v522_v52 = vrot.slane %v520_v32, 1  ;;  %v527_v53 = vrot.slane %v525_v33, 1  ;;  %v267_v54 = vpack.c.bf16 %v213_v26, %v213_v26  ;;  %v338_v55 = vunpack.c.l.b16 %v265_v35 }
  0x42   : > { %v578_v58 = vshrl.u32 %v2456_v38, 16  ;;  %v580_v59 = vshll.u32 %v2456_v38, 16  ;;  %v585_v61 = vshll.u32 %v2458_v42, 16  ;;  %v339_v0 = vunpack.c.l.b16 %v266_v48 }
  0x43   : > { %v523_v1 = vor.u32 %v522_v52, %v518_v31  ;;  %v389_v3 = vunpack.c.l.b16 %v267_v54  ;;  %v262_v5 = vpack.c.bf16 %v208_v50, %v208_v50  ;;  %v263_v6 = vpack.c.bf16 %v209_v51, %v209_v51 }
  0x44   : > { %v582_v9 = vrot.slane %v580_v59, 1  ;;  %v587_v14 = vrot.slane %v585_v61, 1  ;;  %v2468_v17 = vpack.c.b16 %v339_v0, %v338_v55  ;;  %v264_v19 = vpack.c.bf16 %v210_v56, %v210_v56  ;;  %v217_v55 = vld [vmem:[%s2275_s17 + $0x168] sm:$0xff]  ;;  %v218_v56 = vld [vmem:[%s2275_s17 + $0x170] sm:$0xff]  ;;  %v219_v59 = vld [vmem:[%s2275_s17 + $0x178] sm:$0x3] }
  0x45   : > { %v2471_v20 = vsel %vm408_vm0, %v523_v1, %v527_v53  ;;  %v2473_v21 = vpack.c.b16 %v389_v3, %v389_v3  ;;  %v336_v26 = vunpack.c.l.b16 %v262_v5  ;;  %v337_v32 = vunpack.c.l.b16 %v263_v6 }
  0x46   : > { %619 = vrot.lane.b32.xlu0 %v2471_v20, %s2225_s18  ;;  %v583_v31 = vor.u32 %v582_v9, %v578_v58  ;;  %v566_v33 = vshrl.u32 %v2468_v17, 16  ;;  %v568_v35 = vshll.u32 %v2468_v17, 16  ;;  %v388_v48 = vunpack.c.l.b16 %v264_v19 }
  0x47   : > { %v573_v50 = vshll.u32 %v2473_v21, 16  ;;  %v2480_v51 = vpack.c.b16 %v337_v32, %v336_v26  ;;  %v637_v5 = vrot.slane %v2348_v41, 1  ;;  %v638_v6 = vrot.slane %v2355_v49, 1 }
  0x48   : > { %v2483_v52 = vsel %vm408_vm0, %v583_v31, %v587_v14  ;;  %v570_v53 = vrot.slane %v568_v35, 1  ;;  %v2485_v54 = vpack.c.b16 %v388_v48, %v388_v48  ;;  %v271_v14 = vpack.c.bf16 %v217_v55, %v217_v55 }
  0x49   : > { %4308 = vst [vmem:[#allocation9_spill] sm:$0xff] %v2483_v52  ;;  %629 = vrot.lane.b32.xlu2 %v2483_v52, %s2225_s18  ;;  %v575_v58 = vrot.slane %v573_v50, 1  ;;  %v554_v61 = vshrl.u32 %v2480_v51, 16  ;;  %v556_v0 = vshll.u32 %v2480_v51, 16  ;;  %v272_v19 = vpack.c.bf16 %v218_v56, %v218_v56 }
  0x4a   : > { %v571_v1 = vor.u32 %v570_v53, %v566_v33  ;;  %v561_v3 = vshll.u32 %v2485_v54, 16  ;;  %v273_v26 = vpack.c.bf16 %v219_v59, %v219_v59  ;;  %v342_v48 = vunpack.c.l.b16 %v271_v14 }
  0x4b   : > { %v558_v9 = vrot.slane %v556_v0, 1  ;;  %v343_v33 = vunpack.c.l.b16 %v272_v19  ;;  %v2503_v53 = vsel %vm633_vm1, %v637_v5, %v638_v6  ;;  %v634_v49 = vrot.slane %v2302_v40, 1 }
  0x4c   : > { %v2498_v32 = vsel %vm408_vm0, %v571_v1, %v575_v58  ;;  %v563_v31 = vrot.slane %v561_v3, 1  ;;  %v391_v50 = vunpack.c.l.b16 %v273_v26  ;;  %4309 = vst [vmem:[#allocation10_spill] sm:$0xff] %v2503_v53  ;;  %v635_v55 = vrot.slane %v2305_v44, 1 }
  0x4d   : > { %627 = vrot.lane.b32.xlu1 %v2498_v32, %s2225_s18  ;;  %v559_v35 = vor.u32 %v558_v9, %v554_v61  ;;  %v2510_v59 = vpack.c.b16 %v343_v33, %v342_v48  ;;  %v646_v3 = vrot.slane %v2287_v24, 1  ;;  %v647_v5 = vrot.slane %v2289_v25, 1 }
  0x4e   : > { %v2512_v58 = vpack.c.b16 %v391_v50, %v391_v50  ;;  %v2522_v1 = vsel %vm633_vm1, %v634_v49, %v635_v55  ;;  %v643_v26 = vrot.slane %v2339_v18, 1  ;;  %v640_v25 = vrot.slane %v2291_v28, 1 }
  0x4f   : > { %v2508_v56 = vsel %vm408_vm0, %v559_v35, %v563_v31  ;;  %v590_v61 = vshrl.u32 %v2510_v59, 16  ;;  %v592_v0 = vshll.u32 %v2510_v59, 16  ;;  %v2529_v19 = vsel %vm633_vm1, %v646_v3, %v647_v5 }
  0x50   : > { %4310 = vst [vmem:[#allocation11_spill] sm:$0xff] %v2508_v56  ;;  %625 = vrot.lane.b32.xlu0 %v2508_v56, %s2225_s18  ;;  %v597_v44 = vshll.u32 %v2512_v58, 16  ;;  %v644_v31 = vrot.slane %v2342_v23, 1  ;;  %v641_v48 = vrot.slane %v2293_v29, 1  ;;  %v655_v50 = vrot.slane %v2382_v27, 1 }
  0x51   : > { %684 = vrot.lane.b32.xlu2 %v2503_v53, %s2226_s19  ;;  %v594_v6 = vrot.slane %v592_v0, 1  ;;  %4311 = vst [vmem:[#allocation12_spill] sm:$0xff] %v2529_v19  ;;  %v656_v23 = vrot.slane %v2384_v30, 1  ;;  %v653_v29 = vrot.slane %v2398_v46, 1  ;;  %v649_v30 = vrot.slane %v2322_v4, 1 }
  0x52   : > { %v599_v9 = vrot.slane %v597_v44, 1  ;;  %v2543_v33 = vsel %vm633_vm1, %v643_v26, %v644_v31  ;;  %v2550_v49 = vsel %vm633_vm1, %v640_v25, %v641_v48  ;;  %v650_v0 = vrot.slane %v2328_v8, 1 }
  0x53   : > { %v595_v14 = vor.u32 %v594_v6, %v590_v61  ;;  %4313 = vst [vmem:[#allocation14_spill] sm:$0xff] %v2543_v33  ;;  %v2553_v55 = vsel %vm633_vm1, %v655_v50, %v656_v23  ;;  %v652_v61 = vrot.slane %v2396_v45, 1  ;;  %v664_v3 = vrot.slane %v2423_v34, 1 }
  0x54   : > { %4314 = vst [vmem:[#allocation15_spill] sm:$0xff] %v2550_v49  ;;  %v665_v5 = vrot.slane %v2428_v39, 1  ;;  %v2571_v46 = vsel %vm633_vm1, %v649_v30, %v650_v0  ;;  %v662_v8 = vrot.slane %v2444_v12, 1  ;;  %v658_v39 = vrot.slane %v2363_v57, 1 }
  0x55   : > { %682 = vrot.lane.b32.xlu1 %v2522_v1, %s2226_s19  ;;  %v2534_v35 = vsel %vm408_vm0, %v595_v14, %v599_v9  ;;  %4315 = vst [vmem:[#allocation16_spill] sm:$0xff] %v2553_v55  ;;  %v2564_v44 = vsel %vm633_vm1, %v652_v61, %v653_v29  ;;  %v661_v9 = vrot.slane %v2442_v11, 1  ;;  %v659_v14 = vrot.slane %v2368_v63, 1 }
  0x56   : > { %4312 = vst [vmem:[#allocation13_spill] sm:$0xff] %v2534_v35  ;;  %v2574_v6 = vsel %vm633_vm1, %v664_v3, %v665_v5  ;;  %v673_v31 = vrot.slane %v2468_v17, 1  ;;  %v674_v25 = vrot.slane %v2473_v21, 1  ;;  %v670_v50 = vrot.slane %v2480_v51, 1 }
  0x57   : > { %4316 = vst [vmem:[#allocation17_spill] sm:$0xff] %v2564_v44  ;;  %v2585_v26 = vsel %vm633_vm1, %v661_v9, %v662_v8  ;;  %v2592_v12 = vsel %vm633_vm1, %v658_v39, %v659_v14  ;;  %v671_v63 = vrot.slane %v2485_v54, 1  ;;  %v667_v21 = vrot.slane %v2408_v10, 1 }
  0x58   : > { %631 = vrot.lane.b32.xlu0 %v2534_v35, %s2225_s18  ;;  %4317 = vst [vmem:[#allocation18_spill] sm:$0xff] %v2571_v46  ;;  %v2595_v48 = vsel %vm633_vm1, %v673_v31, %v674_v25  ;;  %v668_v23 = vrot.slane %v2415_v16, 1  ;;  %v679_v54 = vrot.slane %v2510_v59, 1  ;;  %v680_v30 = vrot.slane %v2512_v58, 1 }
  0x59   : > { %690 = vrot.lane.b32.xlu2 %v2529_v19, %s2226_s19  ;;  %4318 = vst [vmem:[#allocation19_spill] sm:$0xff] %v2574_v6  ;;  %v2606_v61 = vsel %vm633_vm1, %v670_v50, %v671_v63  ;;  %v676_v16 = vrot.slane %v2456_v38, 1  ;;  %v677_v0 = vrot.slane %v2458_v42, 1 }
  0x5a   : > { %4319 = vst [vmem:[#allocation20_spill] sm:$0xff] %v2592_v12  ;;  %v2611_v29 = vsel %vm633_vm1, %v667_v21, %v668_v23  ;;  %v2622_v3 = vsel %vm633_vm1, %v679_v54, %v680_v30 }
  0x5b   : > { %4320 = vst [vmem:[#allocation21_spill] sm:$0xff] %v2606_v61  ;;  %v2629_v58 = vsel %vm633_vm1, %v676_v16, %v677_v0 }
  0x5c   : > { %4321 = vst [vmem:[#allocation22_spill] sm:$0xff] %v2611_v29 }
  0x5d   : > { %688 = vrot.lane.b32.xlu1 %v2543_v33, %s2226_s19  ;;  %4322 = vst [vmem:[#allocation23_spill] sm:$0xff] %v2622_v3 }
  0x5e   : > { %4324 = vst [vmem:[#allocation25_spill] sm:$0xff] %v2629_v58 }
  0x60   : > { %686 = vrot.lane.b32.xlu0 %v2550_v49, %s2226_s19 }
  0x61   : > { %696 = vrot.lane.b32.xlu2 %v2553_v55, %s2226_s19 }
  0x65   : > { %694 = vrot.lane.b32.xlu1 %v2564_v44, %s2226_s19 }
  0x68   : > { %692 = vrot.lane.b32.xlu0 %v2571_v46, %s2226_s19 }
  0x69   : > { %702 = vrot.lane.b32.xlu2 %v2574_v6, %s2226_s19 }
  0x6d   : > { %700 = vrot.lane.b32.xlu1 %v2585_v26, %s2226_s19 }
  0x70   : > { %698 = vrot.lane.b32.xlu0 %v2592_v12, %s2226_s19 }
  0x71   : > { %708 = vrot.lane.b32.xlu2 %v2595_v48, %s2226_s19 }
  0x75   : > { %706 = vrot.lane.b32.xlu1 %v2606_v61, %s2226_s19 }
  0x78   : > { %704 = vrot.lane.b32.xlu0 %v2611_v29, %s2226_s19 }
  0x79   : > { %714 = vrot.lane.b32.xlu2 %v2302_v40, %s2227_s20  ;;  %v2624_v5 = vpop.permute.xlu2 %609 }
  0x7a   : > { %4323 = vst [vmem:[#allocation24_spill] sm:$0xff] %v2624_v5 }
  0x7d   : > { %712 = vrot.lane.b32.xlu1 %v2622_v3, %s2226_s19 }
  0x80   : > { %710 = vrot.lane.b32.xlu0 %v2629_v58, %s2226_s19 }
  0x81   : > { %720 = vrot.lane.b32.xlu2 %v2339_v18, %s2227_s20 }
  0x82   : > { %v2637_v42 = vpop.permute.xlu2 %611 }
  0x83   : > { %4325 = vst [vmem:[#allocation26_spill] sm:$0xff] %v2637_v42 }
  0x85   : > { %718 = vrot.lane.b32.xlu1 %v2291_v28, %s2227_s20 }
  0x88   : > { %716 = vrot.lane.b32.xlu0 %v2348_v41, %s2227_s20 }
  0x89   : > { %726 = vrot.lane.b32.xlu2 %v2396_v45, %s2227_s20 }
  0x8c   : > { %v2645_v9 = vpop.permute.xlu2 %617 }
  0x8d   : > { %724 = vrot.lane.b32.xlu1 %v2322_v4, %s2227_s20  ;;  %4326 = vst [vmem:[#allocation27_spill] sm:$0xff] %v2645_v9 }
  0x90   : > { %722 = vrot.lane.b32.xlu0 %v2287_v24, %s2227_s20 }
  0x91   : > { %732 = vrot.lane.b32.xlu2 %v2442_v11, %s2227_s20 }
  0x92   : > { %v2653_v8 = vpop.permute.xlu1 %605 }
  0x93   : > { %4327 = vst [vmem:[#allocation28_spill] sm:$0xff] %v2653_v8 }
  0x94   : > { %v2661_v14 = vpop.permute.xlu0 %601 }
  0x95   : > { %730 = vrot.lane.b32.xlu1 %v2363_v57, %s2227_s20 }
  0x98   : > { %728 = vrot.lane.b32.xlu0 %v2382_v27, %s2227_s20  ;;  %v2659_v39 = vpop.permute.xlu2 %623 }
  0x99   : > { %738 = vrot.lane.b32.xlu2 %v2480_v51, %s2227_s20  ;;  %4328 = vst [vmem:[#allocation29_spill] sm:$0xff] %v2659_v39 }
  0x9d   : > { %736 = vrot.lane.b32.xlu1 %v2408_v10, %s2227_s20  ;;  %v2669_v31 = vpop.permute.xlu1 %607 }
  0xa0   : > { %734 = vrot.lane.b32.xlu0 %v2423_v34, %s2227_s20 }
  0xa1   : > { %744 = vrot.lane.b32.xlu2 %v2510_v59, %s2227_s20  ;;  %v2673_v50 = vpop.permute.xlu0 %603 }
  0xa2   : > { %4330 = vst [vmem:[#allocation31_spill] sm:$0xff] %v2673_v50 }
  0xa3   : > { %v2671_v25 = vpop.permute.xlu2 %629 }
  0xa4   : > { %4329 = vst [vmem:[#allocation30_spill] sm:$0xff] %v2671_v25 }
  0xa5   : > { %742 = vrot.lane.b32.xlu1 %v2456_v38, %s2227_s20 }
  0xa8   : > { %740 = vrot.lane.b32.xlu0 %v2468_v17, %s2227_s20  ;;  %s2170_s20 = sshll.u32 %s4524_s13, 8 }
  0xa9   : > { %750 = vrot.lane.b32.xlu2 %v2320_v2, %s2228_s21  ;;  %v2681_v63 = vpop.permute.xlu1 %615 }
  0xaa   : > { %4331 = vst [vmem:[#allocation32_spill] sm:$0xff] %v2681_v63 }
  0xab   : > { %v2683_v21 = vpop.permute.xlu2 %684 }
  0xac   : > { %4332 = vst [vmem:[#allocation33_spill] sm:$0xff] %v2683_v21  ;;  %v2687_v23 = vpop.permute.xlu0 %613 }
  0xad   : > { %748 = vrot.lane.b32.xlu1 %v2380_v22, %s2228_s21  ;;  %4333 = vst [vmem:[#allocation34_spill] sm:$0xff] %v2687_v23 }
  0xb0   : > { %746 = vrot.lane.b32.xlu0 %v2332_v13, %s2228_s21 }
  0xb1   : > { %756 = vrot.lane.b32.xlu2 %v2353_v47, %s2228_s21 }
  0xb3   : > { %v2693_v54 = vpop.permute.xlu2 %690  ;;  %v2697_v30 = vpop.permute.xlu1 %621 }
  0xb4   : > { %4334 = vst [vmem:[#allocation35_spill] sm:$0xff] %v2693_v54 }
  0xb5   : > { %754 = vrot.lane.b32.xlu1 %v2315_v62, %s2228_s21  ;;  %4335 = vst [vmem:[#allocation36_spill] sm:$0xff] %v2697_v30 }
  0xb8   : > { %752 = vrot.lane.b32.xlu0 %v2366_v60, %s2228_s21  ;;  %v2701_v16 = vpop.permute.xlu0 %619 }
  0xb9   : > { %4336 = vst [vmem:[#allocation37_spill] sm:$0xff] %v2701_v16  ;;  %762 = vrot.lane.b32.xlu2 %v2394_v43, %s2228_s21 }
  0xbb   : > { %v2705_v0 = vpop.permute.xlu2 %696 }
  0xbc   : > { %4337 = vst [vmem:[#allocation38_spill] sm:$0xff] %v2705_v0 }
  0xbd   : > { %760 = vrot.lane.b32.xlu1 %v2413_v15, %s2228_s21 }
  0xbf   : > { %v2709_v13 = vpop.permute.xlu1 %627 }
  0xc0   : > { %758 = vrot.lane.b32.xlu0 %v2426_v37, %s2228_s21 }
  0xc1   : > { %768 = vrot.lane.b32.xlu2 %v2440_v7, %s2228_s21 }
  0xc2   : > { %v2715_v30 = vpop.permute.xlu0 %625 }
  0xc3   : > { %4338 = vst [vmem:[#allocation39_spill] sm:$0xff] %v2715_v30  ;;  %v2717_v39 = vpop.permute.xlu2 %702 }
  0xc4   : > { %4339 = vst [vmem:[#allocation40_spill] sm:$0xff] %v2717_v39 }
  0xc5   : > { %766 = vrot.lane.b32.xlu1 %v2454_v36, %s2228_s21 }
  0xc7   : > { %v2721_v63 = vpop.permute.xlu1 %682 }
  0xc8   : > { %764 = vrot.lane.b32.xlu0 %v2471_v20, %s2228_s21 }
  0xc9   : > { %774 = vrot.lane.b32.xlu2 %v2483_v52, %s2228_s21 }
  0xca   : > { %v2727_v0 = vpop.permute.xlu0 %631 }
  0xcb   : > { %4340 = vst [vmem:[#allocation41_spill] sm:$0xff] %v2727_v0  ;;  %v2729_v9 = vpop.permute.xlu2 %708 }
  0xcd   : > { %772 = vrot.lane.b32.xlu1 %v2498_v32, %s2228_s21 }
  0xcf   : > { %v2733_v54 = vpop.permute.xlu1 %688 }
  0xd0   : > { %770 = vrot.lane.b32.xlu0 %v2508_v56, %s2228_s21 }
  0xd1   : > { %780 = vrot.lane.b32.xlu2 %v2503_v53, %s2229_s22 }
  0xd2   : > { %v2739_v39 = vpop.permute.xlu0 %686 }
  0xd3   : > { %4341 = vst [vmem:[#allocation42_spill] sm:$0xff] %v2739_v39  ;;  %v2741_v21 = vpop.permute.xlu2 %714 }
  0xd5   : > { %778 = vrot.lane.b32.xlu1 %v2522_v1, %s2229_s22 }
  0xd7   : > { %v2745_v5 = vpop.permute.xlu1 %694 }
  0xd8   : > { %4342 = vst [vmem:[#allocation43_spill] sm:$0xff] %v2745_v5  ;;  %776 = vrot.lane.b32.xlu0 %v2534_v35, %s2228_s21 }
  0xd9   : > { %786 = vrot.lane.b32.xlu2 %v2529_v19, %s2229_s22 }
  0xda   : > { %v2751_v42 = vpop.permute.xlu0 %692 }
  0xdb   : > { %4343 = vst [vmem:[#allocation44_spill] sm:$0xff] %v2751_v42  ;;  %v2753_v50 = vpop.permute.xlu2 %720 }
  0xdd   : > { %784 = vrot.lane.b32.xlu1 %v2543_v33, %s2229_s22 }
  0xdf   : > { %v2757_v39 = vpop.permute.xlu1 %700 }
  0xe0   : > { %4344 = vst [vmem:[#allocation45_spill] sm:$0xff] %v2757_v39  ;;  %782 = vrot.lane.b32.xlu0 %v2550_v49, %s2229_s22  ;;  %v221_v39 = vld [vmem:[%s2275_s17 + $0x188] sm:$0xff] }
  0xe1   : > { %792 = vrot.lane.b32.xlu2 %v2553_v55, %s2229_s22 }
  0xe2   : > { %v2763_v1 = vpop.permute.xlu0 %698 }
  0xe3   : > { %4345 = vst [vmem:[#allocation46_spill] sm:$0xff] %v2763_v1  ;;  %v2765_v8 = vpop.permute.xlu2 %726 }
  0xe4   : > { %4346 = vst [vmem:[#allocation47_spill] sm:$0xff] %v2765_v8 }
  0xe5   : > { %790 = vrot.lane.b32.xlu1 %v2564_v44, %s2229_s22 }
  0xe7   : > { %v2769_v42 = vpop.permute.xlu1 %706 }
  0xe8   : > { %4347 = vst [vmem:[#allocation48_spill] sm:$0xff] %v2769_v42  ;;  %788 = vrot.lane.b32.xlu0 %v2571_v46, %s2229_s22 }
  0xe9   : > { %798 = vrot.lane.b32.xlu2 %v2574_v6, %s2229_s22 }
  0xea   : > { %v2775_v25 = vpop.permute.xlu0 %704 }
  0xeb   : > { %4348 = vst [vmem:[#allocation49_spill] sm:$0xff] %v2775_v25  ;;  %v2777_v30 = vpop.permute.xlu2 %732 }
  0xec   : > { %4349 = vst [vmem:[#allocation50_spill] sm:$0xff] %v2777_v30 }
  0xed   : > { %796 = vrot.lane.b32.xlu1 %v2585_v26, %s2229_s22 }
  0xef   : > { %v2781_v1 = vpop.permute.xlu1 %712 }
  0xf0   : > { %4350 = vst [vmem:[#allocation51_spill] sm:$0xff] %v2781_v1  ;;  %794 = vrot.lane.b32.xlu0 %v2592_v12, %s2229_s22 }
  0xf1   : > { %804 = vrot.lane.b32.xlu2 %v2595_v48, %s2229_s22 }
  0xf2   : > { %v2787_v42 = vpop.permute.xlu0 %710 }
  0xf3   : > { %4351 = vst [vmem:[#allocation52_spill] sm:$0xff] %v2787_v42  ;;  %v2789_v0 = vpop.permute.xlu2 %738 }
  0xf4   : > { %4352 = vst [vmem:[#allocation53_spill] sm:$0xff] %v2789_v0 }
  0xf5   : > { %802 = vrot.lane.b32.xlu1 %v2606_v61, %s2229_s22 }
  0xf7   : > { %v2793_v25 = vpop.permute.xlu1 %718 }
  0xf8   : > { %4353 = vst [vmem:[#allocation54_spill] sm:$0xff] %v2793_v25  ;;  %800 = vrot.lane.b32.xlu0 %v2611_v29, %s2229_s22 }
  0xf9   : > { %815 = vrot.lane.b32.xlu2 %v2348_v41, %s2230_s23 }
  0xfa   : > { %v2799_v1 = vpop.permute.xlu0 %716 }
  0xfb   : > { %4354 = vst [vmem:[#allocation55_spill] sm:$0xff] %v2799_v1  ;;  %v2801_v30 = vpop.permute.xlu2 %744 }
  0xfc   : > { %4355 = vst [vmem:[#allocation56_spill] sm:$0xff] %v2801_v30 }
  0xfd   : > { %808 = vrot.lane.b32.xlu1 %v2622_v3, %s2229_s22 }
  0xff   : > { %v2805_v0 = vpop.permute.xlu1 %724 }
 0x100   : > { %4356 = vst [vmem:[#allocation57_spill] sm:$0xff] %v2805_v0  ;;  %806 = vrot.lane.b32.xlu0 %v2629_v58, %s2229_s22 }
 0x101   : > { %821 = vrot.lane.b32.xlu2 %v2287_v24, %s2230_s23 }
 0x102   : > { %v2811_v25 = vpop.permute.xlu0 %722 }
 0x103   : > { %4357 = vst [vmem:[#allocation58_spill] sm:$0xff] %v2811_v25  ;;  %v2813_v42 = vpop.permute.xlu2 %750 }
 0x104   : > { %4358 = vst [vmem:[#allocation59_spill] sm:$0xff] %v2813_v42  ;;  %v220_v42 = vld [vmem:[%s2275_s17 + $0x180] sm:$0xff] }
 0x105   : > { %819 = vrot.lane.b32.xlu1 %v2339_v18, %s2230_s23 }
 0x107   : > { %v2817_v1 = vpop.permute.xlu1 %730 }
 0x108   : > { %4359 = vst [vmem:[#allocation60_spill] sm:$0xff] %v2817_v1  ;;  %817 = vrot.lane.b32.xlu0 %v2291_v28, %s2230_s23 }
 0x109   : > { %827 = vrot.lane.b32.xlu2 %v2382_v27, %s2230_s23 }
 0x10a   : > { %v2823_v0 = vpop.permute.xlu0 %728 }
 0x10b   : > { %4360 = vst [vmem:[#allocation61_spill] sm:$0xff] %v2823_v0  ;;  %v2825_v30 = vpop.permute.xlu2 %756  ;;  %v274_v0 = vpack.c.bf16 %v220_v42, %v220_v42 }
 0x10c   : > { %4361 = vst [vmem:[#allocation62_spill] sm:$0xff] %v2825_v30  ;;  %v275_v30 = vpack.c.bf16 %v221_v39, %v221_v39 }
 0x10d   : > { %825 = vrot.lane.b32.xlu1 %v2396_v45, %s2230_s23 }
 0x10e   : > { %v813_v5 = vunpack.c.l.b16 %v275_v30 }
 0x10f   : > { %v2829_v25 = vpop.permute.xlu1 %736 }
 0x110   : > { %4362 = vst [vmem:[#allocation63_spill] sm:$0xff] %v2829_v25  ;;  %823 = vrot.lane.b32.xlu0 %v2322_v4, %s2230_s23  ;;  %v812_v25 = vunpack.c.l.b16 %v274_v0 }
 0x111   : > { %833 = vrot.lane.b32.xlu2 %v2423_v34, %s2230_s23 }
 0x112   : > { %v2835_v1 = vpop.permute.xlu0 %734 }
 0x113   : > { %4363 = vst [vmem:[#allocation64_spill] sm:$0xff] %v2835_v1  ;;  %v2839_v16 = vpop.permute.xlu2 %762 }
 0x114   : > { %4364 = vst [vmem:[#allocation65_spill] sm:$0xff] %v2839_v16  ;;  %v2855_v16 = vpack.c.b16 %v813_v5, %v812_v25 }
 0x115   : > { %831 = vrot.lane.b32.xlu1 %v2442_v11, %s2230_s23 }
 0x117   : > { %v2843_v8 = vpop.permute.xlu1 %742 }
 0x118   : > { %4365 = vst [vmem:[#allocation66_spill] sm:$0xff] %v2843_v8  ;;  %829 = vrot.lane.b32.xlu0 %v2363_v57, %s2230_s23 }
 0x119   : > { %839 = vrot.lane.b32.xlu2 %v2468_v17, %s2230_s23 }
 0x11a   : > { %v2849_v1 = vpop.permute.xlu0 %740 }
 0x11b   : > { %v2851_v23 = vpop.permute.xlu2 %768 }
 0x11c   : > { %4366 = vst [vmem:[#allocation67_spill] sm:$0xff] %v2851_v23 }
 0x11d   : > { %837 = vrot.lane.b32.xlu1 %v2480_v51, %s2230_s23 }
 0x11f   : > { %v2857_v42 = vpop.permute.xlu1 %748 }
 0x120   : > { %4367 = vst [vmem:[#allocation68_spill] sm:$0xff] %v2857_v42  ;;  %835 = vrot.lane.b32.xlu0 %v2408_v10, %s2230_s23 }
 0x121   : > { %845 = vrot.lane.b32.xlu2 %v2855_v16, %s2230_s23 }
 0x122   : > { %v2863_v39 = vpop.permute.xlu0 %746 }
 0x123   : > { %v2865_v30 = vpop.permute.xlu2 %774 }
 0x124   : > { %4368 = vst [vmem:[#allocation69_spill] sm:$0xff] %v2865_v30 }
 0x125   : > { %843 = vrot.lane.b32.xlu1 %v2510_v59, %s2230_s23 }
 0x127   : > { %v2869_v0 = vpop.permute.xlu1 %754 }
 0x128   : > { %4369 = vst [vmem:[#allocation70_spill] sm:$0xff] %v2869_v0  ;;  %841 = vrot.lane.b32.xlu0 %v2456_v38, %s2230_s23 }
 0x129   : > { %866 = vrot.lane.b32.xlu2 %v2366_v60, %s2231_s24 }
 0x12a   : > { %v2875_v5 = vpop.permute.xlu0 %752 }
 0x12b   : > { %v2877_v25 = vpop.permute.xlu2 %780 }
 0x12c   : > { %4370 = vst [vmem:[#allocation71_spill] sm:$0xff] %v2877_v25 }
 0x12d   : > { %864 = vrot.lane.b32.xlu1 %v2320_v2, %s2231_s24 }
 0x12f   : > { %v2881_v23 = vpop.permute.xlu1 %760 }
 0x130   : > { %4371 = vst [vmem:[#allocation72_spill] sm:$0xff] %v2881_v23  ;;  %862 = vrot.lane.b32.xlu0 %v2380_v22, %s2231_s24 }
 0x131   : > { %872 = vrot.lane.b32.xlu2 %v2426_v37, %s2231_s24  ;;  %v222_v37 = vld [vmem:[%s2275_s17 + $0x190] sm:$0x3] }
 0x132   : > { %v2887_v0 = vpop.permute.xlu0 %758 }
 0x133   : > { %v2889_v42 = vpop.permute.xlu2 %786 }
 0x134   : > { %4372 = vst [vmem:[#allocation73_spill] sm:$0xff] %v2889_v42 }
 0x135   : > { %870 = vrot.lane.b32.xlu1 %v2353_v47, %s2231_s24 }
 0x137   : > { %v2893_v30 = vpop.permute.xlu1 %766 }
 0x138   : > { %4373 = vst [vmem:[#allocation74_spill] sm:$0xff] %v2893_v30  ;;  %868 = vrot.lane.b32.xlu0 %v2315_v62, %s2231_s24  ;;  %v276_v30 = vpack.c.bf16 %v222_v37, %v222_v37 }
 0x139   : > { %878 = vrot.lane.b32.xlu2 %v2471_v20, %s2231_s24 }
 0x13a   : > { %v2899_v23 = vpop.permute.xlu0 %764 }
 0x13b   : > { %v2901_v25 = vpop.permute.xlu2 %792 }
 0x13c   : > { %4374 = vst [vmem:[#allocation75_spill] sm:$0xff] %v2901_v25  ;;  %v848_v25 = vunpack.c.l.b16 %v276_v30  ;;  %v851_v30 = vshrl.u32 %v2855_v16, 16 }
 0x13d   : > { %876 = vrot.lane.b32.xlu1 %v2394_v43, %s2231_s24 }
 0x13e   : > { %v849_v43 = vpack.c.b16 %v848_v25, %v848_v25 }
 0x13f   : > { %v2906_v42 = vpop.permute.xlu1 %772 }
 0x140   : > { %874 = vrot.lane.b32.xlu0 %v2413_v15, %s2231_s24 }
 0x141   : > { %884 = vrot.lane.b32.xlu2 %v2508_v56, %s2231_s24  ;;  %v853_v56 = vshll.u32 %v2855_v16, 16 }
 0x142   : > { %v2912_v47 = vpop.permute.xlu0 %770 }
 0x143   : > { %4375 = vst [vmem:[#allocation76_spill] sm:$0xff] %v2912_v47  ;;  %v2914_v8 = vpop.permute.xlu2 %798 }
 0x144   : > { %4376 = vst [vmem:[#allocation77_spill] sm:$0xff] %v2914_v8  ;;  %v858_v8 = vshll.u32 %v849_v43, 16 }
 0x145   : > { %882 = vrot.lane.b32.xlu1 %v2440_v7, %s2231_s24  ;;  %v855_v7 = vrot.slane %v853_v56, 1 }
 0x147   : > { %v2918_v60 = vpop.permute.xlu1 %778  ;;  %v856_v25 = vor.u32 %v855_v7, %v851_v30 }
 0x148   : > { %880 = vrot.lane.b32.xlu0 %v2454_v36, %s2231_s24 }
 0x149   : > { %890 = vrot.lane.b32.xlu2 %v2534_v35, %s2231_s24  ;;  %v860_v35 = vrot.slane %v858_v8, 1 }
 0x14a   : > { %v2925_v37 = vpop.permute.xlu0 %776 }
 0x14b   : > { %4377 = vst [vmem:[#allocation78_spill] sm:$0xff] %v2925_v37  ;;  %v2927_v15 = vpop.permute.xlu2 %804  ;;  %v2945_v56 = vsel %vm408_vm0, %v856_v25, %v860_v35 }
 0x14c   : > { %4379 = vst [vmem:[#allocation80_spill] sm:$0xff] %v2945_v56 }
 0x14d   : > { %888 = vrot.lane.b32.xlu1 %v2483_v52, %s2231_s24 }
 0x14f   : > { %v2932_v47 = vpop.permute.xlu1 %784 }
 0x150   : > { %886 = vrot.lane.b32.xlu0 %v2498_v32, %s2231_s24 }
 0x151   : > { %899 = vrot.lane.b32.xlu2 %v2550_v49, %s2232_s25 }
 0x152   : > { %v2938_v36 = vpop.permute.xlu0 %782 }
 0x153   : > { %4378 = vst [vmem:[#allocation79_spill] sm:$0xff] %v2938_v36  ;;  %v2940_v37 = vpop.permute.xlu2 %815  ;;  %v964_v36 = vsel %vm962_vm2, %v2302_v40, %v2661_v14 }
 0x155   : > { %897 = vrot.lane.b32.xlu1 %v2503_v53, %s2232_s25 }
 0x157   : > { %v2947_v52 = vpop.permute.xlu1 %790 }
 0x158   : > { %892 = vrot.lane.b32.xlu0 %v2945_v56, %s2231_s24 }
 0x159   : > { %905 = vrot.lane.b32.xlu2 %v2571_v46, %s2232_s25 }
 0x15a   : > { %v2953_v7 = vpop.permute.xlu0 %788 }
 0x15b   : > { %4380 = vst [vmem:[#allocation81_spill] sm:$0xff] %v2953_v7  ;;  %v2955_v8 = vpop.permute.xlu2 %821 }
 0x15d   : > { %903 = vrot.lane.b32.xlu1 %v2529_v19, %s2232_s25 }
 0x15f   : > { %v2959_v30 = vpop.permute.xlu1 %796 }
 0x160   : > { %901 = vrot.lane.b32.xlu0 %v2543_v33, %s2232_s25 }
 0x161   : > { %911 = vrot.lane.b32.xlu2 %v2592_v12, %s2232_s25 }
 0x162   : > { %v2965_v35 = vpop.permute.xlu0 %794 }
 0x163   : > { %4381 = vst [vmem:[#allocation82_spill] sm:$0xff] %v2965_v35  ;;  %v2967_v25 = vpop.permute.xlu2 %827 }
 0x165   : > { %909 = vrot.lane.b32.xlu1 %v2553_v55, %s2232_s25 }
 0x167   : > { %v2971_v56 = vpop.permute.xlu1 %802 }
 0x168   : > { %907 = vrot.lane.b32.xlu0 %v2564_v44, %s2232_s25  ;;  %v895_v44 = vrot.slane %v849_v43, 1 }
 0x169   : > { %917 = vrot.lane.b32.xlu2 %v2611_v29, %s2232_s25  ;;  %v894_v29 = vrot.slane %v2855_v16, 1 }
 0x16a   : > { %v2977_v19 = vpop.permute.xlu0 %800 }
 0x16b   : > { %4382 = vst [vmem:[#allocation83_spill] sm:$0xff] %v2977_v19  ;;  %v2979_v33 = vpop.permute.xlu2 %833  ;;  %v3005_v35 = vsel %vm633_vm1, %v894_v29, %v895_v44 }
 0x16c   : > { %4385 = vst [vmem:[#allocation86_spill] sm:$0xff] %v3005_v35 }
 0x16d   : > { %915 = vrot.lane.b32.xlu1 %v2574_v6, %s2232_s25 }
 0x16f   : > { %v2983_v12 = vpop.permute.xlu1 %808 }
 0x170   : > { %913 = vrot.lane.b32.xlu0 %v2585_v26, %s2232_s25 }
 0x171   : > { %923 = vrot.lane.b32.xlu2 %v2629_v58, %s2232_s25 }
 0x172   : > { %v2989_v55 = vpop.permute.xlu0 %806 }
 0x173   : > { %v2991_v49 = vpop.permute.xlu2 %839 }
 0x175   : > { %921 = vrot.lane.b32.xlu1 %v2595_v48, %s2232_s25 }
 0x177   : > { %v2996_v19 = vpop.permute.xlu1 %819 }
 0x178   : > { %4383 = vst [vmem:[#allocation84_spill] sm:$0xff] %v2996_v19  ;;  %919 = vrot.lane.b32.xlu0 %v2606_v61, %s2232_s25 }
 0x179   : > { %929 = vrot.lane.b32.xlu2 %v2348_v41, %s2233_s26 }
 0x17a   : > { %v3002_v58 = vpop.permute.xlu0 %817 }
 0x17b   : > { %4384 = vst [vmem:[#allocation85_spill] sm:$0xff] %v3002_v58  ;;  %v3007_v53 = vpop.permute.xlu2 %845 }
 0x17d   : > { %927 = vrot.lane.b32.xlu1 %v3005_v35, %s2232_s25 }
 0x17f   : > { %v3011_v43 = vpop.permute.xlu1 %825 }
 0x180   : > { %4386 = vst [vmem:[#allocation87_spill] sm:$0xff] %v3011_v43  ;;  %925 = vrot.lane.b32.xlu0 %v2622_v3, %s2232_s25  ;;  %s4078_s25 = scalar_lea.vmem %s4197_s3, %s2170_s20 }
 0x181   : > { %935 = vrot.lane.b32.xlu2 %v2287_v24, %s2233_s26 }
 0x182   : > { %v3017_v61 = vpop.permute.xlu0 %823 }
 0x183   : > { %4387 = vst [vmem:[#allocation88_spill] sm:$0xff] %v3017_v61  ;;  %v3019_v46 = vpop.permute.xlu2 %866 }
 0x184   : > { %4388 = vst [vmem:[#allocation89_spill] sm:$0xff] %v3019_v46 }
 0x185   : > { %933 = vrot.lane.b32.xlu1 %v2339_v18, %s2233_s26 }
 0x187   : > { %v3023_v44 = vpop.permute.xlu1 %831 }
 0x188   : > { %4389 = vst [vmem:[#allocation90_spill] sm:$0xff] %v3023_v44  ;;  %931 = vrot.lane.b32.xlu0 %v2291_v28, %s2233_s26 }
 0x189   : > { %941 = vrot.lane.b32.xlu2 %v2382_v27, %s2233_s26 }
 0x18a   : > { %v3029_v29 = vpop.permute.xlu0 %829 }
 0x18b   : > { %4390 = vst [vmem:[#allocation91_spill] sm:$0xff] %v3029_v29  ;;  %v3031_v35 = vpop.permute.xlu2 %872 }
 0x18c   : > { %4391 = vst [vmem:[#allocation92_spill] sm:$0xff] %v3031_v35 }
 0x18d   : > { %939 = vrot.lane.b32.xlu1 %v2396_v45, %s2233_s26 }
 0x18f   : > { %v3035_v3 = vpop.permute.xlu1 %837 }
 0x190   : > { %4392 = vst [vmem:[#allocation93_spill] sm:$0xff] %v3035_v3  ;;  %937 = vrot.lane.b32.xlu0 %v2322_v4, %s2233_s26 }
 0x191   : > { %947 = vrot.lane.b32.xlu2 %v2423_v34, %s2233_s26 }
 0x192   : > { %v3041_v44 = vpop.permute.xlu0 %835 }
 0x193   : > { %4393 = vst [vmem:[#allocation94_spill] sm:$0xff] %v3041_v44  ;;  %v3043_v61 = vpop.permute.xlu2 %878 }
 0x194   : > { %4394 = vst [vmem:[#allocation95_spill] sm:$0xff] %v3043_v61 }
 0x195   : > { %945 = vrot.lane.b32.xlu1 %v2442_v11, %s2233_s26 }
 0x197   : > { %v3047_v29 = vpop.permute.xlu1 %843 }
 0x198   : > { %943 = vrot.lane.b32.xlu0 %v2363_v57, %s2233_s26 }
 0x199   : > { %953 = vrot.lane.b32.xlu2 %v2468_v17, %s2233_s26 }
 0x19a   : > { %v842_v3 = vpop.permute.xlu0 %841 }
 0x19b   : > { %v3053_v35 = vpop.permute.xlu2 %884 }
 0x19c   : > { %4395 = vst [vmem:[#allocation96_spill] sm:$0xff] %v3053_v35 }
 0x19d   : > { %951 = vrot.lane.b32.xlu1 %v2480_v51, %s2233_s26 }
 0x19f   : > { %v3057_v44 = vpop.permute.xlu1 %864 }
 0x1a0   : > { %4396 = vst [vmem:[#allocation97_spill] sm:$0xff] %v3057_v44  ;;  %949 = vrot.lane.b32.xlu0 %v2408_v10, %s2233_s26 }
 0x1a1   : > { %959 = vrot.lane.b32.xlu2 %v2855_v16, %s2233_s26 }
 0x1a2   : > { %v3063_v61 = vpop.permute.xlu0 %862 }
 0x1a3   : > { %v3065_v43 = vpop.permute.xlu2 %890 }
 0x1a4   : > { %4397 = vst [vmem:[#allocation98_spill] sm:$0xff] %v3065_v43 }
 0x1a5   : > { %957 = vrot.lane.b32.xlu1 %v2510_v59, %s2233_s26 }
 0x1a7   : > { %v3069_v7 = vpop.permute.xlu1 %870 }
 0x1a8   : > { %4398 = vst [vmem:[#allocation99_spill] sm:$0xff] %v3069_v7  ;;  %955 = vrot.lane.b32.xlu0 %v2456_v38, %s2233_s26 }
 0x1a9   : > { %1348 = vrot.lane.b32.xlu2 %v2339_v18, %s2234_s27 }
 0x1aa   : > { %v3075_v35 = vpop.permute.xlu0 %868 }
 0x1ab   : > { %v3077_v44 = vpop.permute.xlu2 %899 }
 0x1ac   : > { %4399 = vst [vmem:[#allocation100_spill] sm:$0xff] %v3077_v44  ;;  %v990_v44 = vsel %vm962_vm2, %v2468_v17, %v2709_v13 }
 0x1ad   : > { %1346 = vrot.lane.b32.xlu1 %v2291_v28, %s2234_s27 }
 0x1af   : > { %v3081_v46 = vpop.permute.xlu1 %876 }
 0x1b0   : > { %4400 = vst [vmem:[#allocation101_spill] sm:$0xff] %v3081_v46  ;;  %1344 = vrot.lane.b32.xlu0 %v2348_v41, %s2234_s27  ;;  %v1009_v46 = vsel %vm995_vm3, %v990_v44, %v2709_v13 }
 0x1b1   : > { %1354 = vrot.lane.b32.xlu2 %v2396_v45, %s2234_s27 }
 0x1b2   : > { %v3087_v7 = vpop.permute.xlu0 %874 }
 0x1b3   : > { %v3089_v58 = vpop.permute.xlu2 %905 }
 0x1b4   : > { %4401 = vst [vmem:[#allocation102_spill] sm:$0xff] %v3089_v58  ;;  %v1040_v58 = vsel %vm1012_vm4, %v1009_v46, %v2729_v9 }
 0x1b5   : > { %1352 = vrot.lane.b32.xlu1 %v2322_v4, %s2234_s27 }
 0x1b7   : > { %v3096_v6 = vpop.permute.xlu1 %882 }
 0x1b8   : > { %4402 = vst [vmem:[#allocation103_spill] sm:$0xff] %v3096_v6  ;;  %1350 = vrot.lane.b32.xlu0 %v2287_v24, %s2234_s27  ;;  %v1073_v6 = vsel %vm1045_vm5, %v1040_v58, %v2849_v1  ;;  %v996_v58 = vsel %vm995_vm3, %v964_v36, %v2661_v14 }
 0x1b9   : > { %1360 = vrot.lane.b32.xlu2 %v2442_v11, %s2234_s27  ;;  %v1092_v46 = vsel %vm1078_vm6, %v1073_v6, %v2849_v1  ;;  %v1014_v40 = vsel %vm1012_vm4, %v996_v58, %v2721_v63 }
 0x1ba   : > { %v3106_v43 = vpop.permute.xlu0 %880  ;;  %v1123_v9 = vsel %vm1095_vm7, %v1092_v46, %v2906_v42  ;;  %v1047_v6 = vsel %vm1045_vm5, %v1014_v40, %v2741_v21  ;;  %v970_v46 = vsel %vm962_vm2, %v2339_v18, %v2669_v31 }
 0x1bb   : > { %v3110_v19 = vpop.permute.xlu2 %911  ;;  %v1142_v1 = vsel %vm1128_vm8, %v1123_v9, %v2906_v42  ;;  %v1079_v58 = vsel %vm1078_vm6, %v1047_v6, %v2741_v21  ;;  %v999_v40 = vsel %vm995_vm3, %v970_v46, %v2669_v31 }
 0x1bc   : > { %v1173_v36 = vsel %vm1145_vm9, %v1142_v1, %v2927_v15  ;;  %v1097_v42 = vsel %vm1095_vm7, %v1079_v58, %v2863_v39  ;;  %v1020_v21 = vsel %vm1012_vm4, %v999_v40, %v2733_v54  ;;  %v4403_v58 = vld [vmem:[#allocation34_spill] sm:$0xff] }
 0x1bd   : > { %1358 = vrot.lane.b32.xlu1 %v2363_v57, %s2234_s27  ;;  %v1206_v63 = vsel %vm1178_vm10, %v1173_v36, %v842_v3  ;;  %v1129_v6 = vsel %vm1128_vm8, %v1097_v42, %v2863_v39  ;;  %v976_v42 = vsel %vm962_vm2, %v2396_v45, %v4403_v58 }
 0x1be   : > { %v1225_v15 = vsel %vm1211_vm11, %v1206_v63, %v842_v3  ;;  %v1053_v3 = vsel %vm1045_vm5, %v1020_v21, %v2753_v50  ;;  %v1147_v31 = vsel %vm1145_vm9, %v1129_v6, %v2918_v60  ;;  %v1002_v21 = vsel %vm995_vm3, %v976_v42, %v4403_v58 }
 0x1bf   : > { %v889_v13 = vpop.permute.xlu1 %888  ;;  %v1180_v63 = vsel %vm1178_vm10, %v1147_v31, %v2940_v37  ;;  %v1082_v60 = vsel %vm1078_vm6, %v1053_v3, %v2753_v50  ;;  %v4404_v50 = vld [vmem:[#allocation43_spill] sm:$0xff] }
 0x1c0   : > { %1356 = vrot.lane.b32.xlu0 %v2382_v27, %s2234_s27  ;;  %v1256_v1 = vsel %vm1228_vm12, %v1225_v15, %v889_v13  ;;  %v1103_v15 = vsel %vm1095_vm7, %v1082_v60, %v2875_v5  ;;  %v1026_v6 = vsel %vm1012_vm4, %v1002_v21, %v4404_v50 }
 0x1c1   : > { %1366 = vrot.lane.b32.xlu2 %v2480_v51, %s2234_s27  ;;  %v1275_v54 = vsel %vm1261_vm13, %v1256_v1, %v889_v13  ;;  %v1212_v13 = vsel %vm1211_vm11, %v1180_v63, %v2940_v37  ;;  %v1132_v3 = vsel %vm1128_vm8, %v1103_v15, %v2875_v5  ;;  %v4405_v37 = vld [vmem:[#allocation47_spill] sm:$0xff]  ;;  %v4406_v15 = vld [vmem:[#allocation37_spill] sm:$0xff] }
 0x1c2   : > { %v3133_v44 = vpop.permute.xlu0 %886  ;;  %v1230_v40 = vsel %vm1228_vm12, %v1212_v13, %v3063_v61  ;;  %v1059_v31 = vsel %vm1045_vm5, %v1026_v6, %v4405_v37  ;;  %v1153_v63 = vsel %vm1145_vm9, %v1132_v3, %v2932_v47  ;;  %v982_v13 = vsel %vm962_vm2, %v2442_v11, %v4406_v15  ;;  %v4407_v6 = vld [vmem:[#allocation45_spill] sm:$0xff] }
 0x1c3   : > { %v3137_v14 = vpop.permute.xlu2 %917  ;;  %v1186_v58 = vsel %vm1178_vm10, %v1153_v63, %v2955_v8  ;;  %v1085_v47 = vsel %vm1078_vm6, %v1059_v31, %v4405_v37  ;;  %v1005_v50 = vsel %vm995_vm3, %v982_v13, %v4406_v15  ;;  %v4409_v31 = vld [vmem:[#allocation50_spill] sm:$0xff]  ;;  %v4410_v13 = vld [vmem:[#allocation39_spill] sm:$0xff] }
 0x1c4   : > { %v1032_v3 = vsel %vm1012_vm4, %v1005_v50, %v4407_v6 }
 0x1c5   : > { %1364 = vrot.lane.b32.xlu1 %v2408_v10, %s2234_s27  ;;  %v1065_v63 = vsel %vm1045_vm5, %v1032_v3, %v4409_v31 }
 0x1c7   : > { %v898_v9 = vpop.permute.xlu1 %897 }
 0x1c8   : > { %1362 = vrot.lane.b32.xlu0 %v2423_v34, %s2234_s27 }
 0x1c9   : > { %1372 = vrot.lane.b32.xlu2 %v2510_v59, %s2234_s27 }
 0x1ca   : > { %v3165_v36 = vpop.permute.xlu0 %892 }
 0x1cb   : > { %v924_v46 = vpop.permute.xlu2 %923 }
 0x1cc   : > { %v3171_v39 = vsel %vm1278_vm14, %v1275_v54, %v924_v46  ;;  %v1262_v54 = vsel %vm1261_vm13, %v1230_v40, %v3063_v61  ;;  %v1109_v61 = vsel %vm1095_vm7, %v1085_v47, %v2887_v0  ;;  %v988_v47 = vsel %vm962_vm2, %v2480_v51, %v4410_v13 }
 0x1cd   : > { %1370 = vrot.lane.b32.xlu1 %v2456_v38, %s2234_s27  ;;  %v1280_v5 = vsel %vm1278_vm14, %v1262_v54, %v898_v9  ;;  %v1215_v9 = vsel %vm1211_vm11, %v1186_v58, %v2955_v8  ;;  %v4408_v8 = vld [vmem:[#allocation41_spill] sm:$0xff] }
 0x1ce   : > { %v1236_v40 = vsel %vm1228_vm12, %v1215_v9, %v3075_v35  ;;  %v994_v37 = vsel %vm962_vm2, %v2510_v59, %v4408_v8  ;;  %v4412_v9 = vld [vmem:[#allocation30_spill] sm:$0xff] }
 0x1cf   : > { %v904_v1 = vpop.permute.xlu1 %903  ;;  %v1265_v58 = vsel %vm1261_vm13, %v1236_v40, %v3075_v35  ;;  %v1011_v35 = vsel %vm995_vm3, %v994_v37, %v4408_v8  ;;  %v1088_v40 = vsel %vm1078_vm6, %v1065_v63, %v4409_v31  ;;  %v4415_v63 = vld [vmem:[#allocation28_spill] sm:$0xff] }
 0x1d0   : > { %1368 = vrot.lane.b32.xlu0 %v2468_v17, %s2234_s27  ;;  %v1115_v6 = vsel %vm1095_vm7, %v1088_v40, %v2899_v23 }
 0x1d1   : > { %1378 = vrot.lane.b32.xlu2 %v2320_v2, %s2235_s28 }
 0x1d2   : > { %v3202_v46 = vpop.permute.xlu0 %901 }
 0x1d3   : > { %v930_v42 = vpop.permute.xlu2 %929 }
 0x1d4   : > { %v3208_v60 = vsel %vm1311_vm15, %v1280_v5, %v930_v42  ;;  %v1286_v42 = vsel %vm1278_vm14, %v1265_v58, %v904_v1  ;;  %v4413_v1 = vld [vmem:[#allocation51_spill] sm:$0xff]  ;;  %v968_v58 = vsel %vm962_vm2, %v2291_v28, %v4415_v63 }
 0x1d5   : > { %1376 = vrot.lane.b32.xlu1 %v2380_v22, %s2235_s28  ;;  %v1135_v22 = vsel %vm1128_vm8, %v1109_v61, %v2887_v0  ;;  %v1044_v50 = vsel %vm1012_vm4, %v1011_v35, %v4413_v1  ;;  %v4419_v35 = vld [vmem:[#allocation53_spill] sm:$0xff]  ;;  %v1138_v1 = vsel %vm1128_vm8, %v1115_v6, %v2899_v23  ;;  %v998_v23 = vsel %vm995_vm3, %v968_v58, %v4415_v63  ;;  %v4421_v6 = vld [vmem:[#allocation78_spill] sm:$0xff] }
 0x1d6   : > { %v1159_v54 = vsel %vm1145_vm9, %v1135_v22, %v2947_v52  ;;  %v992_v52 = vsel %vm962_vm2, %v2456_v38, %v4412_v9  ;;  %v1008_v22 = vsel %vm995_vm3, %v988_v47, %v4410_v13  ;;  %v4418_v13 = vld [vmem:[#allocation52_spill] sm:$0xff]  ;;  %v4425_v63 = vld [vmem:[#allocation26_spill] sm:$0xff] }
 0x1d7   : > { %v910_v21 = vpop.permute.xlu1 %909  ;;  %v1192_v0 = vsel %vm1178_vm10, %v1159_v54, %v2967_v25  ;;  %v4414_v54 = vld [vmem:[#allocation56_spill] sm:$0xff]  ;;  %v974_v58 = vsel %vm962_vm2, %v2322_v4, %v4425_v63 }
 0x1d8   : > { %1374 = vrot.lane.b32.xlu0 %v2855_v16, %s2234_s27  ;;  %v1218_v3 = vsel %vm1211_vm11, %v1192_v0, %v2967_v25  ;;  %v1077_v8 = vsel %vm1045_vm5, %v1044_v50, %v4414_v54  ;;  %v4417_v0 = vld [vmem:[#allocation3_spill] sm:$0xff] }
 0x1d9   : > { %1392 = vrot.lane.b32.xlu2 %v2471_v20, %s2235_s28  ;;  %v1242_v37 = vsel %vm1228_vm12, %v1218_v3, %v3087_v7  ;;  %v1165_v3 = vsel %vm1145_vm9, %v1138_v1, %v2959_v30 }
 0x1da   : > { %v3242_v5 = vpop.permute.xlu0 %907 }
 0x1db   : > { %v936_v15 = vpop.permute.xlu2 %935 }
 0x1dc   : > { %v3251_v61 = vsel %vm1311_vm15, %v1286_v42, %v936_v15  ;;  %v1010_v42 = vsel %vm995_vm3, %v992_v52, %v4412_v9  ;;  %v4416_v15 = vld [vmem:[#allocation48_spill] sm:$0xff]  ;;  %v1094_v9 = vsel %vm1078_vm6, %v1077_v8, %v4414_v54  ;;  %v4420_v52 = vld [vmem:[#allocation66_spill] sm:$0xff]  ;;  %v1198_v54 = vsel %vm1178_vm10, %v1165_v3, %v2979_v33 }
 0x1dd   : > { %4411 = vst [vmem:[#allocation34_spill] sm:$0xff] %v3251_v61  ;;  %1382 = vrot.lane.b32.xlu1 %v2315_v62, %s2235_s28  ;;  %v1038_v25 = vsel %vm1012_vm4, %v1008_v22, %v4416_v15  ;;  %v1042_v47 = vsel %vm1012_vm4, %v1010_v42, %v4418_v13  ;;  %v1268_v22 = vsel %vm1261_vm13, %v1242_v37, %v3087_v7  ;;  %v4422_v13 = vld [vmem:[#allocation31_spill] sm:$0xff] }
 0x1de   : > { %v1071_v40 = vsel %vm1045_vm5, %v1038_v25, %v4419_v35  ;;  %v1075_v50 = vsel %vm1045_vm5, %v1042_v47, %v4420_v52  ;;  %v1127_v15 = vsel %vm1095_vm7, %v1094_v9, %v4421_v6  ;;  %v1292_v8 = vsel %vm1278_vm14, %v1268_v22, %v910_v21  ;;  %v4423_v47 = vld [vmem:[#allocation42_spill] sm:$0xff] }
 0x1df   : > { %v916_v31 = vpop.permute.xlu1 %915  ;;  %v966_v30 = vsel %vm962_vm2, %v2348_v41, %v4422_v13  ;;  %v1018_v7 = vsel %vm1012_vm4, %v998_v23, %v4423_v47  ;;  %v1091_v1 = vsel %vm1078_vm6, %v1071_v40, %v4419_v35  ;;  %v4426_v9 = vld [vmem:[#allocation54_spill] sm:$0xff]  ;;  %v1093_v3 = vsel %vm1078_vm6, %v1075_v50, %v4420_v52  ;;  %v4427_v41 = vld [vmem:[#allocation69_spill] sm:$0xff]  ;;  %v4428_v23 = vld [vmem:[#allocation76_spill] sm:$0xff] }
 0x1e0   : > { %1380 = vrot.lane.b32.xlu0 %v4417_v0, %s2235_s28  ;;  %v1051_v21 = vsel %vm1045_vm5, %v1018_v7, %v4426_v9  ;;  %v1125_v22 = vsel %vm1095_vm7, %v1093_v3, %v4427_v41  ;;  %v1221_v35 = vsel %vm1211_vm11, %v1198_v54, %v2979_v33  ;;  %v997_v40 = vsel %vm995_vm3, %v966_v30, %v4422_v13  ;;  %v4429_v7 = vld [vmem:[#allocation24_spill] sm:$0xff]  ;;  %v4431_v13 = vld [vmem:[#allocation55_spill] sm:$0xff] }
 0x1e1   : > { %1432 = vrot.lane.b32.xlu2 %v2595_v48, %s2236_s29  ;;  %v1248_v50 = vsel %vm1228_vm12, %v1221_v35, %v3106_v43  ;;  %v1143_v3 = vsel %vm1128_vm8, %v1125_v22, %v4427_v41 }
 0x1e2   : > { %v3299_v42 = vpop.permute.xlu0 %913 }
 0x1e3   : > { %v942_v25 = vpop.permute.xlu2 %941 }
 0x1e4   : > { %v3314_v37 = vsel %vm1311_vm15, %v1292_v8, %v942_v25  ;;  %v1121_v8 = vsel %vm1095_vm7, %v1091_v1, %v4428_v23  ;;  %v1144_v25 = vsel %vm1128_vm8, %v1127_v15, %v4421_v6  ;;  %v972_v1 = vsel %vm962_vm2, %v2287_v24, %v4429_v7  ;;  %v4430_v15 = vld [vmem:[#allocation33_spill] sm:$0xff] }
 0x1e5   : > { %4424 = vst [vmem:[#allocation43_spill] sm:$0xff] %v3314_v37  ;;  %1424 = vrot.lane.b32.xlu1 %v2585_v26, %s2236_s29  ;;  %v1177_v52 = vsel %vm1145_vm9, %v1144_v25, %v2983_v12  ;;  %v1001_v6 = vsel %vm995_vm3, %v974_v58, %v4425_v63  ;;  %v1016_v33 = vsel %vm1012_vm4, %v997_v40, %v4430_v15  ;;  %v4432_v58 = vld [vmem:[#allocation8_spill] sm:$0xff]  ;;  %v4433_v25 = vld [vmem:[#allocation59_spill] sm:$0xff] }
 0x1e6   : > { %v1210_v54 = vsel %vm1178_vm10, %v1177_v52, %v3007_v53  ;;  %v1081_v12 = vsel %vm1078_vm6, %v1051_v21, %v4426_v9  ;;  %v1049_v30 = vsel %vm1045_vm5, %v1016_v33, %v4431_v13  ;;  %v1141_v63 = vsel %vm1128_vm8, %v1121_v8, %v4428_v23  ;;  %v4434_v15 = vld [vmem:[#allocation44_spill] sm:$0xff] }
 0x1e7   : > { %v922_v47 = vpop.permute.xlu1 %921  ;;  %v1101_v35 = vsel %vm1095_vm7, %v1081_v12, %v4433_v25  ;;  %v1171_v40 = vsel %vm1145_vm9, %v1141_v63, %v2971_v56  ;;  %v1175_v9 = vsel %vm1145_vm9, %v1143_v3, %v2989_v55  ;;  %v1271_v21 = vsel %vm1261_vm13, %v1248_v50, %v3106_v43  ;;  %v4435_v12 = vld [vmem:[#allocation57_spill] sm:$0xff] }
 0x1e8   : > { %1400 = vrot.lane.b32.xlu0 %v2498_v32, %s2235_s28  ;;  %v1204_v22 = vsel %vm1178_vm10, %v1171_v40, %v2991_v49  ;;  %v1227_v23 = vsel %vm1211_vm11, %v1210_v54, %v3007_v53  ;;  %v1208_v8 = vsel %vm1178_vm10, %v1175_v9, %v3047_v29  ;;  %v1298_v52 = vsel %vm1278_vm14, %v1271_v21, %v916_v31  ;;  %v4436_v31 = vld [vmem:[#allocation68_spill] sm:$0xff] }
 0x1e9   : > { %1508 = vrot.lane.b32.xlu2 %v4432_v58, %s2237_s30  ;;  %v1024_v55 = vsel %vm1012_vm4, %v1001_v6, %v4434_v15  ;;  %v1080_v43 = vsel %vm1078_vm6, %v1049_v30, %v4431_v13  ;;  %v1260_v50 = vsel %vm1228_vm12, %v1227_v23, %v3165_v36  ;;  %v1131_v54 = vsel %vm1128_vm8, %v1101_v35, %v4433_v25  ;;  %v4437_v13 = vld [vmem:[#allocation79_spill] sm:$0xff]  ;;  %v4438_v9 = vld [vmem:[#allocation84_spill] sm:$0xff]  ;;  %v4439_v35 = vld [vmem:[#allocation98_spill] sm:$0xff] }
 0x1ea   : > { %v3370_v41 = vpop.permute.xlu0 %919  ;;  %v1057_v53 = vsel %vm1045_vm5, %v1024_v55, %v4435_v12  ;;  %v1099_v3 = vsel %vm1095_vm7, %v1080_v43, %v4436_v31  ;;  %v1000_v6 = vsel %vm995_vm3, %v972_v1, %v4429_v7  ;;  %v1151_v30 = vsel %vm1145_vm9, %v1131_v54, %v4437_v13  ;;  %v4440_v23 = vld [vmem:[#allocation35_spill] sm:$0xff]  ;;  %v4443_v55 = vld [vmem:[#allocation62_spill] sm:$0xff] }
 0x1eb   : > { %v948_v56 = vpop.permute.xlu2 %947  ;;  %v1224_v63 = vsel %vm1211_vm11, %v1204_v22, %v2991_v49  ;;  %v1226_v40 = vsel %vm1211_vm11, %v1208_v8, %v3047_v29  ;;  %v1184_v25 = vsel %vm1178_vm10, %v1151_v30, %v4438_v9  ;;  %v1277_v7 = vsel %vm1261_vm13, %v1260_v50, %v3165_v36  ;;  %v4441_v8 = vld [vmem:[#allocation27_spill] sm:$0xff]  ;;  %v4442_v36 = vld [vmem:[#allocation58_spill] sm:$0xff] }
 0x1ec   : > { %v3386_v33 = vsel %vm1311_vm15, %v1298_v52, %v948_v56  ;;  %v1258_v21 = vsel %vm1228_vm12, %v1226_v40, %v4439_v35  ;;  %v1022_v52 = vsel %vm1012_vm4, %v1000_v6, %v4440_v23  ;;  %v1084_v49 = vsel %vm1078_vm6, %v1057_v53, %v4435_v12  ;;  %v4444_v50 = vld [vmem:[#allocation71_spill] sm:$0xff] }
 0x1ed   : > { %1469 = vrot.lane.b32.xlu1 %v2456_v38, %s2226_s19  ;;  %v1254_v38 = vsel %vm1228_vm12, %v1224_v63, %v3133_v44  ;;  %v1130_v29 = vsel %vm1128_vm8, %v1099_v3, %v4436_v31  ;;  %v980_v56 = vsel %vm962_vm2, %v2363_v57, %v4441_v8  ;;  %v1055_v15 = vsel %vm1045_vm5, %v1022_v52, %v4442_v36  ;;  %v4445_v53 = vld [vmem:[#allocation19_spill] sm:$0xff]  ;;  %v4446_v31 = vld [vmem:[#allocation85_spill] sm:$0xff] }
 0x1ee   : > { %v1107_v43 = vsel %vm1095_vm7, %v1084_v49, %v4443_v55  ;;  %v1149_v12 = vsel %vm1145_vm9, %v1130_v29, %v4444_v50  ;;  %v1214_v54 = vsel %vm1211_vm11, %v1184_v25, %v4438_v9  ;;  %v1276_v6 = vsel %vm1261_vm13, %v1258_v21, %v4439_v35  ;;  %v4447_v63 = vld [vmem:[#allocation89_spill] sm:$0xff]  ;;  %v4448_v25 = vld [vmem:[#allocation32_spill] sm:$0xff]  ;;  %v4450_v49 = vld [vmem:[#allocation70_spill] sm:$0xff] }
 0x1ef   : > { %v928_v1 = vpop.permute.xlu1 %927  ;;  %v1182_v3 = vsel %vm1178_vm10, %v1149_v12, %v4446_v31  ;;  %v1274_v13 = vsel %vm1261_vm13, %v1254_v38, %v3133_v44  ;;  %v1234_v40 = vsel %vm1228_vm12, %v1214_v54, %v4447_v63  ;;  %v1004_v9 = vsel %vm995_vm3, %v980_v56, %v4441_v8  ;;  %v4449_v38 = vld [vmem:[#allocation46_spill] sm:$0xff]  ;;  %v4452_v50 = vld [vmem:[#allocation60_spill] sm:$0xff] }
 0x1f0   : > { %1461 = vrot.lane.b32.xlu0 %v2423_v34, %s2226_s19  ;;  %v1310_v22 = vsel %vm1278_vm14, %v1277_v7, %v928_v1  ;;  %v1304_v7 = vsel %vm1278_vm14, %v1274_v13, %v922_v47  ;;  %v978_v35 = vsel %vm962_vm2, %v2382_v27, %v4448_v25  ;;  %v1083_v44 = vsel %vm1078_vm6, %v1055_v15, %v4442_v36  ;;  %v4451_v56 = vld [vmem:[#allocation2_spill] sm:$0xff]  ;;  %v4453_v15 = vld [vmem:[#allocation81_spill] sm:$0xff]  ;;  %v4455_v13 = vld [vmem:[#allocation87_spill] sm:$0xff] }
 0x1f1   : > { %1543 = vrot.lane.b32.xlu2 %v4445_v53, %s2238_s4  ;;  %v1030_v47 = vsel %vm1012_vm4, %v1004_v9, %v4449_v38  ;;  %v1134_v52 = vsel %vm1128_vm8, %v1107_v43, %v4443_v55  ;;  %v1105_v29 = vsel %vm1095_vm7, %v1083_v44, %v4450_v49  ;;  %v1213_v8 = vsel %vm1211_vm11, %v1182_v3, %v4446_v31  ;;  %v4457_v9 = vld [vmem:[#allocation38_spill] sm:$0xff]  ;;  %v4458_v44 = vld [vmem:[#allocation9_spill] sm:$0xff] }
 0x1f2   : > { %v926_v30 = vpop.permute.xlu0 %925  ;;  %v1063_v36 = vsel %vm1045_vm5, %v1030_v47, %v4452_v50  ;;  %v1157_v12 = vsel %vm1145_vm9, %v1134_v52, %v4453_v15  ;;  %v1264_v54 = vsel %vm1261_vm13, %v1234_v40, %v4447_v63  ;;  %v1003_v43 = vsel %vm995_vm3, %v978_v35, %v4448_v25  ;;  %v4460_v35 = vld [vmem:[#allocation61_spill] sm:$0xff] }
 0x1f3   : > { %v3444_v1 = vsel %vm1278_vm14, %v1276_v6, %v926_v30  ;;  %v954_v23 = vpop.permute.xlu2 %953  ;;  %v4454_v6 = vld [vmem:[#allocation97_spill] sm:$0xff]  ;;  %v1190_v31 = vsel %vm1178_vm10, %v1157_v12, %v4455_v13  ;;  %v1284_v3 = vsel %vm1278_vm14, %v1264_v54, %v3202_v46  ;;  %v1028_v63 = vsel %vm1012_vm4, %v1003_v43, %v4457_v9  ;;  %v4464_v54 = vld [vmem:[#allocation88_spill] sm:$0xff] }
 0x1f4   : > { %v3454_v21 = vsel %vm1311_vm15, %v1304_v7, %v954_v23  ;;  %v1232_v55 = vsel %vm1228_vm12, %v1213_v8, %v4454_v6  ;;  %v4456_v7 = vld [vmem:[#allocation29_spill] sm:$0xff]  ;;  %v1133_v40 = vsel %vm1128_vm8, %v1105_v29, %v4450_v49  ;;  %v1087_v46 = vsel %vm1078_vm6, %v1063_v36, %v4452_v50  ;;  %v4462_v49 = vld [vmem:[#allocation18_spill] sm:$0xff]  ;;  %v4465_v36 = vld [vmem:[#allocation100_spill] sm:$0xff] }
 0x1f5   : > { %1384 = vrot.lane.b32.xlu1 %v4451_v56, %s2235_s28  ;;  %v986_v23 = vsel %vm962_vm2, %v2408_v10, %v4456_v7  ;;  %v1061_v38 = vsel %vm1045_vm5, %v1028_v63, %v4460_v35  ;;  %v4461_v47 = vld [vmem:[#allocation73_spill] sm:$0xff]  ;;  %v1263_v8 = vsel %vm1261_vm13, %v1232_v55, %v4454_v6  ;;  %v1217_v12 = vsel %vm1211_vm11, %v1190_v31, %v4455_v13 }
 0x1f6   : > { %v1155_v52 = vsel %vm1145_vm9, %v1133_v40, %v4461_v47  ;;  %v4463_v29 = vld [vmem:[#allocation65_spill] sm:$0xff]  ;;  %v1282_v43 = vsel %vm1278_vm14, %v1263_v8, %v4465_v36  ;;  %v1007_v63 = vsel %vm995_vm3, %v986_v23, %v4456_v7  ;;  %v4468_v40 = vld [vmem:[#allocation36_spill] sm:$0xff]  ;;  %v1086_v31 = vsel %vm1078_vm6, %v1061_v38, %v4460_v35  ;;  %v4473_v23 = vld [vmem:[#allocation63_spill] sm:$0xff] }
 0x1f7   : > { %v934_v30 = vpop.permute.xlu1 %933  ;;  %v1113_v15 = vsel %vm1095_vm7, %v1087_v46, %v4463_v29  ;;  %v1188_v50 = vsel %vm1178_vm10, %v1155_v52, %v4464_v54  ;;  %v984_v13 = vsel %vm962_vm2, %v2423_v34, %v4468_v40  ;;  %v4470_v47 = vld [vmem:[#allocation49_spill] sm:$0xff]  ;;  %v4472_v34 = vld [vmem:[#allocation10_spill] sm:$0xff] }
 0x1f8   : > { %1516 = vrot.lane.b32.xlu0 %v4458_v44, %s2237_s30  ;;  %v3490_v25 = vsel %vm1311_vm15, %v1284_v3, %v934_v30  ;;  %v4466_v30 = vld [vmem:[#allocation92_spill] sm:$0xff]  ;;  %v1036_v52 = vsel %vm1012_vm4, %v1007_v63, %v4470_v47  ;;  %v1137_v8 = vsel %vm1128_vm8, %v1113_v15, %v4463_v29  ;;  %v1216_v7 = vsel %vm1211_vm11, %v1188_v50, %v4464_v54 }
 0x1f9   : > { %4459 = vst [vmem:[#allocation47_spill] sm:$0xff] %v3490_v25  ;;  %1416 = vrot.lane.b32.xlu2 %v4462_v49, %s2236_s29  ;;  %v1240_v9 = vsel %vm1228_vm12, %v1217_v12, %v4466_v30  ;;  %v4471_v12 = vld [vmem:[#allocation72_spill] sm:$0xff]  ;;  %v1069_v35 = vsel %vm1045_vm5, %v1036_v52, %v4473_v23  ;;  %v1006_v15 = vsel %vm995_vm3, %v984_v13, %v4468_v40  ;;  %v225_v25 = vld [vmem:[%s2275_s17 + $0x1a8] sm:$0x3] }
 0x1fa   : > { %v932_v3 = vpop.permute.xlu0 %931  ;;  %v1111_v36 = vsel %vm1095_vm7, %v1086_v31, %v4471_v12  ;;  %v4477_v31 = vld [vmem:[#allocation40_spill] sm:$0xff]  ;;  %v1090_v40 = vsel %vm1078_vm6, %v1069_v35, %v4473_v23  ;;  %v4483_v35 = vld [vmem:[#allocation102_spill] sm:$0xff] }
 0x1fb   : > { %v3513_v6 = vsel %vm1311_vm15, %v1282_v43, %v932_v3  ;;  %v960_v55 = vpop.permute.xlu2 %959  ;;  %v1267_v43 = vsel %vm1261_vm13, %v1240_v9, %v4466_v30  ;;  %v4475_v3 = vld [vmem:[#allocation99_spill] sm:$0xff]  ;;  %v1034_v47 = vsel %vm1012_vm4, %v1006_v15, %v4477_v31  ;;  %v1136_v52 = vsel %vm1128_vm8, %v1111_v36, %v4471_v12  ;;  %v4478_v30 = vld [vmem:[#allocation25_spill] sm:$0xff]  ;;  %v4479_v13 = vld [vmem:[#allocation64_spill] sm:$0xff] }
 0x1fc   : > { %4467 = vst [vmem:[#allocation37_spill] sm:$0xff] %v3513_v6  ;;  %v3523_v46 = vsel %vm1311_vm15, %v1310_v22, %v960_v55  ;;  %v4474_v22 = vld [vmem:[#allocation82_spill] sm:$0xff]  ;;  %v1238_v29 = vsel %vm1228_vm12, %v1216_v7, %v4475_v3  ;;  %v1290_v50 = vsel %vm1278_vm14, %v1267_v43, %v3242_v5  ;;  %v4480_v5 = vld [vmem:[#allocation75_spill] sm:$0xff] }
 0x1fd   : > { %4469 = vst [vmem:[#allocation45_spill] sm:$0xff] %v3523_v46  ;;  %1408 = vrot.lane.b32.xlu1 %v4472_v34, %s2236_s29  ;;  %v1163_v38 = vsel %vm1145_vm9, %v1137_v8, %v4474_v22  ;;  %v4476_v55 = vld [vmem:[#allocation90_spill] sm:$0xff]  ;;  %v1067_v8 = vsel %vm1045_vm5, %v1034_v47, %v4479_v13  ;;  %v1161_v7 = vsel %vm1145_vm9, %v1136_v52, %v4480_v5  ;;  %v4481_v12 = vld [vmem:[#allocation67_spill] sm:$0xff] }
 0x1fe   : > { %v1196_v54 = vsel %vm1178_vm10, %v1163_v38, %v4476_v55  ;;  %v1266_v34 = vsel %vm1261_vm13, %v1238_v29, %v4475_v3  ;;  %v1119_v36 = vsel %vm1095_vm7, %v1090_v40, %v4481_v12  ;;  %v4482_v38 = vld [vmem:[#allocation91_spill] sm:$0xff]  ;;  %v1089_v29 = vsel %vm1078_vm6, %v1067_v8, %v4479_v13  ;;  %v4488_v8 = vld [vmem:[#allocation93_spill] sm:$0xff] }
 0x1ff   : > { %v940_v63 = vpop.permute.xlu1 %939  ;;  %v1220_v22 = vsel %vm1211_vm11, %v1196_v54, %v4476_v55  ;;  %v1194_v23 = vsel %vm1178_vm10, %v1161_v7, %v4482_v38  ;;  %v1288_v43 = vsel %vm1278_vm14, %v1266_v34, %v4483_v35  ;;  %v1140_v55 = vsel %vm1128_vm8, %v1119_v36, %v4481_v12  ;;  %v4485_v54 = vld [vmem:[#allocation74_spill] sm:$0xff]  ;;  %v4486_v52 = vld [vmem:[#allocation83_spill] sm:$0xff]  ;;  %v4487_v7 = vld [vmem:[#allocation101_spill] sm:$0xff] }
 0x200   : > { %1551 = vrot.lane.b32.xlu0 %v4478_v30, %s2238_s4  ;;  %v3556_v9 = vsel %vm1311_vm15, %v1290_v50, %v940_v63  ;;  %v4484_v50 = vld [vmem:[#allocation95_spill] sm:$0xff]  ;;  %v1117_v31 = vsel %vm1095_vm7, %v1089_v29, %v4485_v54  ;;  %v1219_v47 = vsel %vm1211_vm11, %v1194_v23, %v4482_v38  ;;  %v1169_v40 = vsel %vm1145_vm9, %v1140_v55, %v4486_v52  ;;  %v4489_v38 = vld [vmem:[#allocation77_spill] sm:$0xff]  ;;  %v4492_v29 = vld [vmem:[#allocation96_spill] sm:$0xff] }
 0x201   : > { %1492 = vrot.lane.b32.xlu2 %v2320_v2, %s2237_s30  ;;  %v1246_v63 = vsel %vm1228_vm12, %v1220_v22, %v4484_v50  ;;  %v1244_v13 = vsel %vm1228_vm12, %v1219_v47, %v4487_v7  ;;  %v1202_v34 = vsel %vm1178_vm10, %v1169_v40, %v4488_v8  ;;  %v1139_v22 = vsel %vm1128_vm8, %v1117_v31, %v4485_v54  ;;  %v4494_v52 = vld [vmem:[#allocation15_spill] sm:$0xff] }
 0x202   : > { %v938_v15 = vpop.permute.xlu0 %937  ;;  %v1270_v5 = vsel %vm1261_vm13, %v1246_v63, %v4484_v50  ;;  %v1167_v23 = vsel %vm1145_vm9, %v1139_v22, %v4489_v38  ;;  %v1269_v35 = vsel %vm1261_vm13, %v1244_v13, %v4487_v7  ;;  %vm961_vm9 = vcmask 23552  }
 0x203   : > { %v3579_v3 = vsel %vm1311_vm15, %v1288_v43, %v938_v15  ;;  %v3581_v2 = vpop.permute.xlu2 %1348  ;;  %v1296_v12 = vsel %vm1278_vm14, %v1270_v5, %v3299_v42  ;;  %v4490_v43 = vld [vmem:[#allocation17_spill] sm:$0xff]  ;;  %v1223_v42 = vsel %vm1211_vm11, %v1202_v34, %v4488_v8  ;;  %v4491_v15 = vld [vmem:[#allocation94_spill] sm:$0xff]  ;;  %v4495_v5 = vld [vmem:[#allocation103_spill] sm:$0xff] }
 0x204   : > { %v1200_v50 = vsel %vm1178_vm10, %v1167_v23, %v4491_v15  ;;  %v1252_v55 = vsel %vm1228_vm12, %v1223_v42, %v4492_v29  ;;  %v4496_v8 = vld [vmem:[#allocation6_spill] sm:$0xff]  ;;  %vm1941_vm10 = vcmask 1045504  }
 0x205   : > { %1453 = vrot.lane.b32.xlu1 %v2396_v45, %s2226_s19  ;;  %v1222_v47 = vsel %vm1211_vm11, %v1200_v50, %v4491_v15  ;;  %v1273_v40 = vsel %vm1261_vm13, %v1252_v55, %v4492_v29  ;;  %v4501_v15 = vld [vmem:[#allocation7_spill] sm:$0xff]  ;;  %v4503_v55 = vld [vmem:[#allocation22_spill] sm:$0xff]  ;;  %vm1907_vm11 = vcmask 613376  }
 0x206   : > { %v1302_v7 = vsel %vm1278_vm14, %v1273_v40, %v3370_v41 }
 0x207   : > { %v946_v36 = vpop.permute.xlu1 %945 }
 0x208   : > { %1445 = vrot.lane.b32.xlu0 %v2291_v28, %s2226_s19  ;;  %v3608_v45 = vsel %vm1311_vm15, %v1296_v12, %v946_v36  ;;  %v1294_v28 = vsel %vm1278_vm14, %v1269_v35, %v3110_v19  ;;  %v1250_v19 = vsel %vm1228_vm12, %v1222_v47, %v4495_v5 }
 0x209   : > { %1535 = vrot.lane.b32.xlu2 %v4490_v43, %s2238_s4  ;;  %v1272_v12 = vsel %vm1261_vm13, %v1250_v19, %v4495_v5  ;;  %v4504_v5 = vld [vmem:[#allocation14_spill] sm:$0xff] }
 0x20a   : > { %v944_v63 = vpop.permute.xlu0 %943  ;;  %v1300_v36 = vsel %vm1278_vm14, %v1272_v12, %v3137_v14  ;;  %v4506_v12 = vld [vmem:[#allocation16_spill] sm:$0xff] }
 0x20b   : > { %v3625_v54 = vsel %vm1311_vm15, %v1294_v28, %v944_v63  ;;  %v3627_v31 = vpop.permute.xlu2 %1354  ;;  %v4502_v28 = vld [vmem:[#allocation23_spill] sm:$0xff] }
 0x20c   : > { %4493 = vst [vmem:[#allocation41_spill] sm:$0xff] %v3625_v54 }
 0x20d   : > { %1527 = vrot.lane.b32.xlu1 %v4494_v52, %s2238_s4 }
 0x20f   : > { %v952_v13 = vpop.permute.xlu1 %951 }
 0x210   : > { %1500 = vrot.lane.b32.xlu0 %v4496_v8, %s2237_s30  ;;  %v3642_v34 = vsel %vm1311_vm15, %v1302_v7, %v952_v13 }
 0x211   : > { %4497 = vst [vmem:[#allocation50_spill] sm:$0xff] %v3642_v34  ;;  %1426 = vrot.lane.b32.xlu2 %v4445_v53, %s2236_s29 }
 0x212   : > { %v950_v22 = vpop.permute.xlu0 %949 }
 0x213   : > { %v3651_v38 = vsel %vm1311_vm15, %v1300_v36, %v950_v22  ;;  %v3653_v41 = vpop.permute.xlu2 %1360 }
 0x214   : > { %4498 = vst [vmem:[#allocation39_spill] sm:$0xff] %v3651_v38 }
 0x215   : > { %1402 = vrot.lane.b32.xlu1 %v4458_v44, %s2235_s28 }
 0x217   : > { %v958_v23 = vpop.permute.xlu1 %957 }
 0x218   : > { %1394 = vrot.lane.b32.xlu0 %v4432_v58, %s2235_s28  ;;  %v3661_v35 = vsel %vm1311_vm15, %v3444_v1, %v958_v23 }
 0x219   : > { %4499 = vst [vmem:[#allocation30_spill] sm:$0xff] %v3661_v35  ;;  %1471 = vrot.lane.b32.xlu2 %v2510_v59, %s2226_s19  ;;  %v4500_v59 = vld [vmem:[#allocation13_spill] sm:$0xff]  ;;  %v279_v35 = vpack.c.bf16 %v225_v25, %v225_v25 }
 0x21a   : > { %v956_v14 = vpop.permute.xlu0 %955 }
 0x21b   : > { %v3667_v53 = vsel %vm1311_vm15, %v3171_v39, %v956_v14  ;;  %v3669_v42 = vpop.permute.xlu2 %1366 }
 0x21d   : > { %1463 = vrot.lane.b32.xlu1 %v2408_v10, %s2226_s19 }
 0x21f   : > { %v1347_v44 = vpop.permute.xlu1 %1346 }
 0x220   : > { %1434 = vrot.lane.b32.xlu0 %v4478_v30, %s2236_s29 }
 0x221   : > { %1386 = vrot.lane.b32.xlu2 %v4496_v8, %s2235_s28 }
 0x222   : > { %v1345_v58 = vpop.permute.xlu0 %1344 }
 0x223   : > { %v3677_v1 = vpop.permute.xlu2 %1372 }
 0x225   : > { %1518 = vrot.lane.b32.xlu1 %v4500_v59, %s2237_s30 }
 0x227   : > { %v3681_v39 = vpop.permute.xlu1 %1352 }
 0x228   : > { %1510 = vrot.lane.b32.xlu0 %v4501_v15, %s2237_s30 }
 0x229   : > { %1410 = vrot.lane.b32.xlu2 %v4494_v52, %s2236_s29 }
 0x22a   : > { %v1351_v10 = vpop.permute.xlu0 %1350 }
 0x22b   : > { %v1379_v30 = vpop.permute.xlu2 %1378 }
 0x22c   : > { %v1564_v50 = vsel %vm961_vm9, %v1347_v44, %v1379_v30 }
 0x22d   : > { %1553 = vrot.lane.b32.xlu1 %v4502_v28, %s2238_s4  ;;  %v3691_v63 = vsel %vm962_vm2, %v1564_v50, %v1379_v30  ;;  %v4508_v30 = vld [vmem:[#allocation11_spill] sm:$0xff] }
 0x22f   : > { %v3693_v29 = vpop.permute.xlu1 %1358 }
 0x230   : > { %1545 = vrot.lane.b32.xlu0 %v4503_v55, %s2238_s4 }
 0x231   : > { %1455 = vrot.lane.b32.xlu2 %v2382_v27, %s2226_s19  ;;  %v4505_v27 = vld [vmem:[#allocation5_spill] sm:$0xff] }
 0x232   : > { %v3699_v47 = vpop.permute.xlu0 %1356 }
 0x233   : > { %v1393_v52 = vpop.permute.xlu2 %1392 }
 0x235   : > { %1447 = vrot.lane.b32.xlu1 %v2339_v18, %s2226_s19 }
 0x237   : > { %v3703_v40 = vpop.permute.xlu1 %1364 }
 0x238   : > { %1418 = vrot.lane.b32.xlu0 %v4490_v43, %s2236_s29 }
 0x239   : > { %1529 = vrot.lane.b32.xlu2 %v4504_v5, %s2238_s4 }
 0x23a   : > { %v3709_v19 = vpop.permute.xlu0 %1362 }
 0x23b   : > { %v3711_v7 = vpop.permute.xlu2 %1432 }
 0x23d   : > { %1502 = vrot.lane.b32.xlu1 %v4505_v27, %s2237_s30 }
 0x23f   : > { %v3715_v13 = vpop.permute.xlu1 %1370 }
 0x240   : > { %1494 = vrot.lane.b32.xlu0 %v4417_v0, %s2237_s30 }
 0x241   : > { %1404 = vrot.lane.b32.xlu2 %v4500_v59, %s2235_s28  ;;  %v4507_v59 = vld [vmem:[#allocation80_spill] sm:$0xff] }
 0x242   : > { %v1369_v18 = vpop.permute.xlu0 %1368 }
 0x243   : > { %v1509_v43 = vpop.permute.xlu2 %1508 }
 0x245   : > { %1396 = vrot.lane.b32.xlu1 %v4501_v15, %s2235_s28 }
 0x247   : > { %v1377_v8 = vpop.permute.xlu1 %1376 }
 0x248   : > { %1537 = vrot.lane.b32.xlu0 %v4506_v12, %s2238_s4  ;;  %v1561_v36 = vsel %vm961_vm9, %v1345_v58, %v1377_v8 }
 0x249   : > { %v3727_v22 = vsel %vm962_vm2, %v1561_v36, %v1377_v8  ;;  %1465 = vrot.lane.b32.xlu2 %v2480_v51, %s2226_s19  ;;  %v4510_v8 = vld [vmem:[#allocation21_spill] sm:$0xff]  ;;  %v1585_v36 = vsel %vm961_vm9, %v3653_v41, %v1393_v52 }
 0x24a   : > { %v3731_v0 = vpop.permute.xlu0 %1374 }
 0x24b   : > { %v1544_v23 = vpop.permute.xlu2 %1543 }
 0x24d   : > { %1436 = vrot.lane.b32.xlu1 %v4502_v28, %s2236_s29  ;;  %v4509_v28 = vld [vmem:[#allocation86_spill] sm:$0xff] }
 0x24f   : > { %v1383_v14 = vpop.permute.xlu1 %1382 }
 0x250   : > { %1428 = vrot.lane.b32.xlu0 %v4503_v55, %s2236_s29  ;;  %v1570_v44 = vsel %vm961_vm9, %v1351_v10, %v1383_v14 }
 0x251   : > { %v3739_v58 = vsel %vm962_vm2, %v1570_v44, %v1383_v14  ;;  %1520 = vrot.lane.b32.xlu2 %v4507_v59, %s2237_s30 }
 0x252   : > { %v3743_v15 = vpop.permute.xlu0 %1380 }
 0x253   : > { %v3745_v51 = vpop.permute.xlu2 %1416 }
 0x255   : > { %1512 = vrot.lane.b32.xlu1 %v4508_v30, %s2237_s30 }
 0x257   : > { %v1425_v50 = vpop.permute.xlu1 %1424 }
 0x258   : > { %1473 = vrot.lane.b32.xlu0 %v2855_v16, %s2226_s19  ;;  %v1615_v16 = vsel %vm962_vm2, %v1585_v36, %v1393_v52 }
 0x259   : > { %1555 = vrot.lane.b32.xlu2 %v4509_v28, %s2238_s4  ;;  %v1640_v54 = vsel %vm995_vm3, %v1615_v16, %v1425_v50  ;;  %v223_v16 = vld [vmem:[%s2275_s17 + $0x198] sm:$0xff] }
 0x25a   : > { %v1401_v10 = vpop.permute.xlu0 %1400 }
 0x25b   : > { %v3753_v55 = vpop.permute.xlu2 %1492 }
 0x25d   : > { %1547 = vrot.lane.b32.xlu1 %v4510_v8, %s2238_s4 }
 0x25f   : > { %v1470_v14 = vpop.permute.xlu1 %1469 }
 0x260   : > { %1388 = vrot.lane.b32.xlu0 %v4505_v27, %s2235_s28 }
 0x261   : > { %1449 = vrot.lane.b32.xlu2 %v2287_v24, %s2226_s19  ;;  %v4511_v24 = vld [vmem:[#allocation4_spill] sm:$0xff] }
 0x262   : > { %v1462_v44 = vpop.permute.xlu0 %1461 }
 0x263   : > { %v3765_v34 = vpop.permute.xlu2 %1535  ;;  %v1672_v46 = vsel %vm1012_vm4, %v1640_v54, %v1462_v44  ;;  %v224_v54 = vld [vmem:[%s2275_s17 + $0x1a0] sm:$0xff] }
 0x264   : > { %v1695_v41 = vsel %vm1045_vm5, %v1672_v46, %v1462_v44  ;;  %v277_v46 = vpack.c.bf16 %v223_v16, %v223_v16  ;;  %v278_v44 = vpack.c.bf16 %v224_v54, %v224_v54  ;;  %v4512_v16 = vld [vmem:[#allocation20_spill] sm:$0xff]  ;;  %v1478_v54 = vunpack.c.l.b16 %v279_v35 }
 0x265   : > { %1420 = vrot.lane.b32.xlu1 %v4506_v12, %s2236_s29  ;;  %v1720_v52 = vsel %vm1078_vm6, %v1695_v41, %v1509_v43 }
 0x266   : > { %v1743_v12 = vsel %vm1095_vm7, %v1720_v52, %v1509_v43  ;;  %v1442_v38 = vunpack.c.l.b16 %v277_v46  ;;  %v1479_v46 = vpack.c.b16 %v1478_v54, %v1478_v54 }
 0x267   : > { %v1385_v27 = vpop.permute.xlu1 %1384  ;;  %v1768_v41 = vsel %vm1128_vm8, %v1743_v12, %v1544_v23 }
 0x268   : > { %1412 = vrot.lane.b32.xlu0 %v4504_v5, %s2236_s29  ;;  %v1597_v5 = vsel %vm961_vm9, %v1369_v18, %v1401_v10 }
 0x269   : > { %1504 = vrot.lane.b32.xlu2 %v4511_v24, %s2237_s30  ;;  %v1619_v43 = vsel %vm962_vm2, %v1597_v5, %v1401_v10 }
 0x26a   : > { %v1517_v50 = vpop.permute.xlu0 %1516  ;;  %v1648_v18 = vsel %vm995_vm3, %v1619_v43, %v3711_v7 }
 0x26b   : > { %v3776_v36 = vpop.permute.xlu2 %1426  ;;  %v1680_v23 = vsel %vm1012_vm4, %v1648_v18, %v1470_v14 }
 0x26c   : > { %v1699_v25 = vsel %vm1045_vm5, %v1680_v23, %v1470_v14  ;;  %v1573_v23 = vsel %vm961_vm9, %v3681_v39, %v1385_v27 }
 0x26d   : > { %1496 = vrot.lane.b32.xlu1 %v2315_v62, %s2237_s30  ;;  %v1443_v62 = vunpack.c.l.b16 %v278_v44  ;;  %v1728_v5 = vsel %vm1078_vm6, %v1699_v25, %v1517_v50 }
 0x26f   : > { %v1409_v61 = vpop.permute.xlu1 %1408 }
 0x270   : > { %1457 = vrot.lane.b32.xlu0 %v2363_v57, %s2226_s19  ;;  %v1444_v57 = vpack.c.b16 %v1443_v62, %v1442_v38  ;;  %v1747_v38 = vsel %vm1095_vm7, %v1728_v5, %v1517_v50  ;;  %v1488_v62 = vshll.u32 %v1479_v46, 16  ;;  %v1611_v50 = vsel %vm962_vm2, %v1573_v23, %v1385_v27 }
 0x271   : > { %1815 = vrot.lane.b32.xlu2 %v1768_v41, %s2239_s5  ;;  %v4513_v41 = vld [vmem:[#allocation12_spill] sm:$0xff] }
 0x272   : > { %v1552_v37 = vpop.permute.xlu0 %1551  ;;  %v1483_v44 = vshll.u32 %v1444_v57, 16  ;;  %v1481_v35 = vshrl.u32 %v1444_v57, 16  ;;  %v1490_v54 = vrot.slane %v1488_v62, 1  ;;  %v1524_v62 = vrot.slane %v1444_v57, 1 }
 0x273   : > { %v3790_v52 = vpop.permute.xlu2 %1471  ;;  %v1776_v43 = vsel %vm1128_vm8, %v1747_v38, %v1552_v37 }
 0x274   : > { %v1485_v7 = vrot.slane %v1483_v44, 1 }
 0x275   : > { %1539 = vrot.lane.b32.xlu1 %v4512_v16, %s2238_s4 }
 0x276   : > { %v1486_v18 = vor.u32 %v1485_v7, %v1481_v35 }
 0x277   : > { %v1454_v12 = vpop.permute.xlu1 %1453 }
 0x278   : > { %1531 = vrot.lane.b32.xlu0 %v4513_v41, %s2238_s4  ;;  %v1491_v37 = vsel %vm408_vm0, %v1486_v18, %v1490_v54  ;;  %vm1940_vm0 = vcmask 1044480  }
 0x279   : > { %1406 = vrot.lane.b32.xlu2 %v4507_v59, %s2235_s28 }
 0x27a   : > { %v1446_v10 = vpop.permute.xlu0 %1445 }
 0x27b   : > { %v3803_v6 = vpop.permute.xlu2 %1386 }
 0x27d   : > { %1398 = vrot.lane.b32.xlu1 %v4508_v30, %s2235_s28 }
 0x27f   : > { %v1528_v59 = vpop.permute.xlu1 %1527 }
 0x280   : > { %1823 = vrot.lane.b32.xlu0 %v1776_v43, %s2239_s5  ;;  %v1525_v43 = vrot.slane %v1479_v46, 1 }
 0x281   : > { %1467 = vrot.lane.b32.xlu2 %v2468_v17, %s2226_s19  ;;  %v1632_v17 = vsel %vm995_vm3, %v1611_v50, %v3745_v51 }
 0x282   : > { %v1501_v14 = vpop.permute.xlu0 %1500  ;;  %v1664_v39 = vsel %vm1012_vm4, %v1632_v17, %v1454_v12  ;;  %v1526_v54 = vsel %vm633_vm1, %v1524_v62, %v1525_v43  ;;  %vm1831_vm1 = vcmask 392192  }
 0x283   : > { %v3814_v30 = vpop.permute.xlu2 %1410  ;;  %v1691_v27 = vsel %vm1045_vm5, %v1664_v39, %v1454_v12 }
 0x285   : > { %1438 = vrot.lane.b32.xlu1 %v4509_v28, %s2236_s29  ;;  %v1624_v28 = vsel %vm995_vm3, %v3727_v22, %v1409_v61 }
 0x286   : > { %v1656_v38 = vsel %vm1012_vm4, %v1624_v28, %v1446_v10 }
 0x287   : > { %v1403_v25 = vpop.permute.xlu1 %1402  ;;  %v1687_v35 = vsel %vm1045_vm5, %v1656_v38, %v1446_v10 }
 0x288   : > { %1430 = vrot.lane.b32.xlu0 %v4510_v8, %s2236_s29  ;;  %v1712_v8 = vsel %vm1078_vm6, %v1691_v27, %v1501_v14  ;;  %v1704_v22 = vsel %vm1078_vm6, %v1687_v35, %v3753_v55  ;;  %v1600_v17 = vsel %vm961_vm9, %v3715_v13, %v1403_v25  ;;  %v2174_v27 = vld [vmem:[%s4195_s1 + $0x18] sm:$0xff] }
 0x289   : > { %1522 = vrot.lane.b32.xlu2 %v1491_v37, %s2237_s30  ;;  %v1739_v7 = vsel %vm1095_vm7, %v1712_v8, %v1501_v14  ;;  %v1735_v10 = vsel %vm1095_vm7, %v1704_v22, %v3753_v55  ;;  %v2150_v55 = vld [vmem:[%s4195_s1 + $0x20] sm:$0xf]  ;;  %v1620_v38 = vsel %vm962_vm2, %v1600_v17, %v1403_v25  ;;  %v1576_v22 = vsel %vm961_vm9, %v3627_v31, %v3803_v6 }
 0x28a   : > { %v1395_v44 = vpop.permute.xlu0 %1394  ;;  %v1752_v14 = vsel %vm1128_vm8, %v1735_v10, %v1528_v59  ;;  %v2171_v10 = vld [vmem:[%s4195_s1] sm:$0xff]  ;;  %v1612_v31 = vsel %vm962_vm2, %v1576_v22, %v3803_v6 }
 0x28b   : > { %v3826_v5 = vpop.permute.xlu2 %1455 }
 0x28d   : > { %1514 = vrot.lane.b32.xlu1 %v2498_v32, %s2237_s30  ;;  %v1760_v32 = vsel %vm1128_vm8, %v1739_v7, %v3765_v34 }
 0x28f   : > { %v3835_v51 = vpop.permute.xlu1 %1463 }
 0x290   : > { %1475 = vrot.lane.b32.xlu0 %v1444_v57, %s2226_s19  ;;  %v2175_v57 = vld [vmem:[%s4195_s1 + $0x20] sm:$0x30] }
 0x291   : > { %1390 = vrot.lane.b32.xlu2 %v4511_v24, %s2235_s28  ;;  %v2151_v46 = vor.u32 %v2175_v57, %v2150_v55 }
 0x292   : > { %v1435_v61 = vpop.permute.xlu0 %1434 }
 0x293   : > { %v3844_v12 = vpop.permute.xlu2 %1529  ;;  %v1650_v13 = vsel %vm995_vm3, %v1620_v38, %v1435_v61  ;;  %v2172_v61 = vld [vmem:[%s4195_s1 + $0x8] sm:$0xff] }
 0x294   : > { %v1682_v25 = vsel %vm1012_vm4, %v1650_v13, %v3790_v52 }
 0x295   : > { %1807 = vrot.lane.b32.xlu1 %v1760_v32, %s2239_s5  ;;  %v1700_v7 = vsel %vm1045_vm5, %v1682_v25, %v3790_v52 }
 0x297   : > { %v1519_v18 = vpop.permute.xlu1 %1518 }
 0x298   : > { %1799 = vrot.lane.b32.xlu0 %v1752_v14, %s2239_s5 }
 0x299   : > { %1414 = vrot.lane.b32.xlu2 %v4513_v41, %s2236_s29  ;;  %v2240_v41 = vmov 65535  }
 0x29a   : > { %v3855_v24 = vpop.permute.xlu0 %1510  ;;  %v1942_v59 = vsel %vm1940_vm0, 4294967295, %v2240_v41 }
 0x29b   : > { %v3858_v34 = vpop.permute.xlu2 %1404  ;;  %v1943_v23 = vsel %vm1941_vm10, %v1942_v59, 0 }
 0x29c   : > { %v1945_v37 = vand.u32 %v2151_v46, %v1943_v23  ;;  %v1603_v13 = vsel %vm961_vm9, %v3677_v1, %v3858_v34 }
 0x29d   : > { %1557 = vrot.lane.b32.xlu1 %v1526_v54, %s2238_s4 }
 0x29e   : > { %2177 = vmatpush.bf16.msra.mxu2 %v1945_v37  ;;  %2178 = vmatpush.bf16.msra.mxu3 %v1945_v37 }
 0x29f   : > { %v1554_v50 = vpop.permute.xlu1 %1553  ;;  %1950 = vmatpush.bf16.msra.mxu0 %v1945_v37  ;;  %2176 = vmatpush.bf16.msra.mxu1 %v1945_v37 }
 0x2a0   : > { %1549 = vrot.lane.b32.xlu0 %v2595_v48, %s2238_s4  ;;  %v1588_v48 = vsel %vm961_vm9, %v3709_v19, %v1395_v44 }
 0x2a1   : > { %1459 = vrot.lane.b32.xlu2 %v2442_v11, %s2226_s19  ;;  %v2173_v11 = vld [vmem:[%s4195_s1 + $0x10] sm:$0xff]  ;;  %v1616_v35 = vsel %vm962_vm2, %v1588_v48, %v1395_v44 }
 0x2a2   : > { %v1546_v39 = vpop.permute.xlu0 %1545  ;;  %2180 = vmatpush.bf16.msra.mxu2 %v2174_v27  ;;  %2181 = vmatpush.bf16.msra.mxu3 %v2174_v27  ;;  %v1642_v19 = vsel %vm995_vm3, %v1616_v35, %v3776_v36 }
 0x2a3   : > { %v3873_v28 = vpop.permute.xlu2 %1465  ;;  %1951 = vmatpush.bf16.msra.mxu0 %v2174_v27  ;;  %2179 = vmatpush.bf16.msra.mxu1 %v2174_v27 }
 0x2a5   : > { %1451 = vrot.lane.b32.xlu1 %v2322_v4, %s2226_s19 }
 0x2a6   : > { %2183 = vmatpush.bf16.msra.mxu2 %v2173_v11  ;;  %2184 = vmatpush.bf16.msra.mxu3 %v2173_v11 }
 0x2a7   : > { %v1448_v8 = vpop.permute.xlu1 %1447  ;;  %1952 = vmatpush.bf16.msra.mxu0 %v2173_v11  ;;  %2182 = vmatpush.bf16.msra.mxu1 %v2173_v11 }
 0x2a8   : > { %1422 = vrot.lane.b32.xlu0 %v4512_v16, %s2236_s29  ;;  %v1730_v16 = vsel %vm1078_vm6, %v1700_v7, %v1519_v18 }
 0x2a9   : > { %1533 = vrot.lane.b32.xlu2 %v4462_v49, %s2238_s4  ;;  %v1674_v49 = vsel %vm1012_vm4, %v1642_v19, %v3835_v51  ;;  %v1748_v52 = vsel %vm1095_vm7, %v1730_v16, %v1519_v18  ;;  %v1626_v18 = vsel %vm995_vm3, %v3691_v63, %v3814_v30 }
 0x2aa   : > { %v1419_v4 = vpop.permute.xlu0 %1418  ;;  %2186 = vmatpush.bf16.msra.mxu2 %v2172_v61  ;;  %2187 = vmatpush.bf16.msra.mxu3 %v2172_v61  ;;  %v1696_v36 = vsel %vm1045_vm5, %v1674_v49, %v3835_v51  ;;  %v1778_v62 = vsel %vm1128_vm8, %v1748_v52, %v1554_v50  ;;  %v1658_v55 = vsel %vm1012_vm4, %v1626_v18, %v1448_v8 }
 0x2ab   : > { %v3898_v44 = vpop.permute.xlu2 %1520  ;;  %1953 = vmatpush.bf16.msra.mxu0 %v2172_v61  ;;  %2185 = vmatpush.bf16.msra.mxu1 %v2172_v61  ;;  %v1634_v51 = vsel %vm995_vm3, %v1612_v31, %v1419_v4 }
 0x2ad   : > { %1506 = vrot.lane.b32.xlu1 %v2471_v20, %s2237_s30  ;;  %v1722_v20 = vsel %vm1078_vm6, %v1696_v36, %v3855_v24 }
 0x2ae   : > { %2189 = vmatpush.bf16.msra.mxu2 %v2171_v10  ;;  %2190 = vmatpush.bf16.msra.mxu3 %v2171_v10  ;;  %v1744_v14 = vsel %vm1095_vm7, %v1722_v20, %v3855_v24  ;;  %v1688_v24 = vsel %vm1045_vm5, %v1658_v55, %v1448_v8  ;;  %v1621_v8 = vsel %vm962_vm2, %v1603_v13, %v3858_v34 }
 0x2af   : > { %v1503_v32 = vpop.permute.xlu1 %1502  ;;  %1954 = vmatpush.bf16.msra.mxu0 %v2171_v10  ;;  %2188 = vmatpush.bf16.msra.mxu1 %v2171_v10  ;;  %v1770_v54 = vsel %vm1128_vm8, %v1744_v14, %v1546_v39 }
 0x2b0   : > { %1498 = vrot.lane.b32.xlu0 %v4451_v56, %s2237_s30  ;;  %v1666_v56 = vsel %vm1012_vm4, %v1634_v51, %v3826_v5 }
 0x2b1   : > { %1825 = vrot.lane.b32.xlu2 %v1778_v62, %s2239_s5  ;;  %v1692_v57 = vsel %vm1045_vm5, %v1666_v56, %v3826_v5 }
 0x2b2   : > { %v1495_v43 = vpop.permute.xlu0 %1494  ;;  %v1714_v41 = vsel %vm1078_vm6, %v1692_v57, %v1503_v32 }
 0x2b3   : > { %v1556_v6 = vpop.permute.xlu2 %1555  ;;  %v1706_v63 = vsel %vm1078_vm6, %v1688_v24, %v1495_v43  ;;  %v1740_v59 = vsel %vm1095_vm7, %v1714_v41, %v1503_v32 }
 0x2b4   : > { %v1736_v50 = vsel %vm1095_vm7, %v1706_v63, %v1495_v43 }
 0x2b5   : > { %1817 = vrot.lane.b32.xlu1 %v1770_v54, %s2239_s5  ;;  %v1754_v5 = vsel %vm1128_vm8, %v1736_v50, %v3844_v12 }
 0x2b7   : > { %v1397_v46 = vpop.permute.xlu1 %1396 }
 0x2b8   : > { %1541 = vrot.lane.b32.xlu0 %v2585_v26, %s2238_s4  ;;  %v1591_v26 = vsel %vm961_vm9, %v3703_v40, %v1397_v46 }
 0x2b9   : > { %v1617_v38 = vsel %vm962_vm2, %v1591_v26, %v1397_v46 }
 0x2ba   : > { %v1538_v30 = vpop.permute.xlu0 %1537 }
 0x2bb   : > { %v1450_v23 = vpop.permute.xlu2 %1449  ;;  %v1762_v37 = vsel %vm1128_vm8, %v1740_v59, %v1538_v30 }
 0x2bd   : > { %1809 = vrot.lane.b32.xlu1 %v1762_v37, %s2239_s5 }
 0x2bf   : > { %v1437_v17 = vpop.permute.xlu1 %1436 }
 0x2c0   : > { %1801 = vrot.lane.b32.xlu0 %v1754_v5, %s2239_s5  ;;  %v1652_v40 = vsel %vm995_vm3, %v1621_v8, %v1437_v17 }
 0x2c2   : > { %v1429_v39 = vpop.permute.xlu0 %1428 }
 0x2c3   : > { %v1505_v27 = vpop.permute.xlu2 %1504  ;;  %v1644_v48 = vsel %vm995_vm3, %v1617_v38, %v1429_v39 }
 0x2c4   : > { %v1676_v12 = vsel %vm1012_vm4, %v1644_v48, %v3873_v28 }
 0x2c5   : > { %v1697_v25 = vsel %vm1045_vm5, %v1676_v12, %v3873_v28 }
 0x2c7   : > { %v1513_v11 = vpop.permute.xlu1 %1512 }
 0x2c8   : > { %v1724_v1 = vsel %vm1078_vm6, %v1697_v25, %v1513_v11 }
 0x2c9   : > { %v1745_v28 = vsel %vm1095_vm7, %v1724_v1, %v1513_v11 }
 0x2ca   : > { %v1474_v35 = vpop.permute.xlu0 %1473 }
 0x2cb   : > { %v1684_v4 = vsel %vm1012_vm4, %v1652_v40, %v1474_v35  ;;  %v1816_v19 = vpop.permute.xlu2 %1815 }
 0x2cc   : > { %v1701_v7 = vsel %vm1045_vm5, %v1684_v4, %v1474_v35  ;;  %v1849_v61 = vsel %vm1831_vm1, %v3608_v45, %v1816_v19 }
 0x2cd   : > { %v1732_v34 = vsel %vm1078_vm6, %v1701_v7, %v3898_v44  ;;  %2160 = vmatmul.msk.bf16.vlgmr.msra.gmra.mxu2 %vm1907_vm11, %v1849_v61 }
 0x2ce   : > { %v1749_v49 = vsel %vm1095_vm7, %v1732_v34, %v3898_v44  ;;  %v1567_v44 = vsel %vm961_vm9, %v3581_v2, %v3743_v15 }
 0x2cf   : > { %v1780_v16 = vsel %vm1128_vm8, %v1749_v49, %v1556_v6  ;;  %v1548_v22 = vpop.permute.xlu1 %1547  ;;  %v1609_v62 = vsel %vm962_vm2, %v1567_v44, %v3743_v15 }
 0x2d0   : > { %1827 = vrot.lane.b32.xlu0 %v1780_v16, %s2239_s5  ;;  %v1772_v36 = vsel %vm1128_vm8, %v1745_v28, %v1548_v22 }
 0x2d1   : > { %1819 = vrot.lane.b32.xlu2 %v1772_v36, %s2239_s5 }
 0x2d2   : > { %v1389_v45 = vpop.permute.xlu0 %1388 }
 0x2d3   : > { %v1407_v52 = vpop.permute.xlu2 %1406  ;;  %v1579_v20 = vsel %vm961_vm9, %v3699_v47, %v1389_v45 }
 0x2d4   : > { %v1613_v14 = vsel %vm962_vm2, %v1579_v20, %v1389_v45  ;;  %v1606_v48 = vsel %vm961_vm9, %v3731_v0, %v1407_v52 }
 0x2d5   : > { %v1622_v12 = vsel %vm962_vm2, %v1606_v48, %v1407_v52 }
 0x2d7   : > { %v1421_v32 = vpop.permute.xlu1 %1420 }
 0x2d8   : > { %v1636_v6 = vsel %vm995_vm3, %v1613_v14, %v1421_v32 }
 0x2da   : > { %v1413_v10 = vpop.permute.xlu0 %1412 }
 0x2db   : > { %v1468_v31 = vpop.permute.xlu2 %1467  ;;  %v1628_v43 = vsel %vm995_vm3, %v1609_v62, %v1413_v10 }
 0x2dc   : > { %v1660_v54 = vsel %vm1012_vm4, %v1628_v43, %v1450_v23 }
 0x2dd   : > { %v1689_v57 = vsel %vm1045_vm5, %v1660_v54, %v1450_v23 }
 0x2df   : > { %v1497_v51 = vpop.permute.xlu1 %1496 }
 0x2e0   : > { %v1708_v15 = vsel %vm1078_vm6, %v1689_v57, %v1497_v51 }
 0x2e1   : > { %v1737_v63 = vsel %vm1095_vm7, %v1708_v15, %v1497_v51 }
 0x2e2   : > { %v1458_v18 = vpop.permute.xlu0 %1457 }
 0x2e3   : > { %v1668_v56 = vsel %vm1012_vm4, %v1636_v6, %v1458_v18  ;;  %v1523_v55 = vpop.permute.xlu2 %1522 }
 0x2e4   : > { %v1693_v2 = vsel %vm1045_vm5, %v1668_v56, %v1458_v18 }
 0x2e5   : > { %v1716_v47 = vsel %vm1078_vm6, %v1693_v2, %v1505_v27 }
 0x2e6   : > { %v1741_v24 = vsel %vm1095_vm7, %v1716_v47, %v1505_v27 }
 0x2e7   : > { %v1540_v46 = vpop.permute.xlu1 %1539 }
 0x2e8   : > { %v1764_v41 = vsel %vm1128_vm8, %v1741_v24, %v1540_v46 }
 0x2e9   : > { %1811 = vrot.lane.b32.xlu2 %v1764_v41, %s2239_s5 }
 0x2ea   : > { %v1532_v30 = vpop.permute.xlu0 %1531 }
 0x2eb   : > { %v1756_v59 = vsel %vm1128_vm8, %v1737_v63, %v1532_v30  ;;  %v1391_v50 = vpop.permute.xlu2 %1390  ;;  %v4514_v63 = vld [vmem:[#allocation37_spill] sm:$0xff] }
 0x2ec   : > { %1803 = vrot.lane.b32.xlu1 %v1756_v59, %s2239_s5  ;;  %v1582_v10 = vsel %vm961_vm9, %v3693_v29, %v1391_v50  ;;  %v4515_v59 = vld [vmem:[#allocation39_spill] sm:$0xff] }
 0x2ed   : > { %v1614_v44 = vsel %vm962_vm2, %v1582_v10, %v1391_v50 }
 0x2ef   : > { %v1399_v37 = vpop.permute.xlu1 %1398 }
 0x2f0   : > { %v1594_v8 = vsel %vm961_vm9, %v3669_v42, %v1399_v37 }
 0x2f1   : > { %v1618_v35 = vsel %vm962_vm2, %v1594_v8, %v1399_v37  ;;  %vm2036_vm2 = vcmask 261120  }
 0x2f2   : > { %v1824_v5 = vpop.permute.xlu0 %1823 }
 0x2f3   : > { %v1857_v23 = vsel %vm1831_vm1, %v3454_v21, %v1824_v5  ;;  %v1415_v17 = vpop.permute.xlu2 %1414  ;;  %v4516_v5 = vld [vmem:[#allocation30_spill] sm:$0xff] }
 0x2f4   : > { %2164 = vmatmul.msk.bf16.vlgmr.msra.gmra.mxu3 %vm1907_vm11, %v1857_v23 }
 0x2f7   : > { %v1439_v26 = vpop.permute.xlu1 %1438 }
 0x2f8   : > { %v1654_v40 = vsel %vm995_vm3, %v1622_v12, %v1439_v26  ;;  %v4518_v12 = vld [vmem:[#allocation47_spill] sm:$0xff] }
 0x2fa   : > { %v1431_v39 = vpop.permute.xlu0 %1430 }
 0x2fb   : > { %v1460_v27 = vpop.permute.xlu2 %1459  ;;  %v1646_v4 = vsel %vm995_vm3, %v1618_v35, %v1431_v39  ;;  %v4073_v39 = vld [vmem:[%s4196_s2] ss:$0 sm:$0xff] }
 0x2fc   : > { %v1678_v7 = vsel %vm1012_vm4, %v1646_v4, %v1468_v31 }
 0x2ff   : > { %v1515_v38 = vpop.permute.xlu1 %1514 }
 0x302   : > { %v1476_v13 = vpop.permute.xlu0 %1475 }
 0x303   : > { %v1534_v11 = vpop.permute.xlu2 %1533  ;;  %v1686_v21 = vsel %vm1012_vm4, %v1654_v40, %v1476_v13 }
 0x304   : > { %v1702_v0 = vsel %vm1045_vm5, %v1686_v21, %v1476_v13 }
 0x305   : > { %v1734_v34 = vsel %vm1078_vm6, %v1702_v0, %v1523_v55 }
 0x306   : > { %v1750_v22 = vsel %vm1095_vm7, %v1734_v34, %v1523_v55 }
 0x307   : > { %v1808_v25 = vpop.permute.xlu1 %1807 }
 0x308   : > { %v1841_v19 = vsel %vm1831_vm1, %v3579_v3, %v1808_v25  ;;  %v1698_v3 = vsel %vm1045_vm5, %v1678_v7, %v1468_v31  ;;  %v1630_v31 = vsel %vm995_vm3, %v3739_v58, %v1415_v17  ;;  %v4520_v7 = vld [vmem:[#allocation45_spill] sm:$0xff] }
 0x309   : > { %2156 = vmatmul.msk.bf16.vlgmr.msra.gmra.mxu1 %vm1907_vm11, %v1841_v19  ;;  %v1726_v28 = vsel %vm1078_vm6, %v1698_v3, %v1515_v38  ;;  %v4519_v19 = vld [vmem:[#allocation34_spill] sm:$0xff] }
 0x30a   : > { %v1800_v1 = vpop.permute.xlu0 %1799 }
 0x30b   : > { %v1833_v42 = vsel %vm1831_vm1, %v3208_v60, %v1800_v1  ;;  %v1826_v61 = vpop.permute.xlu2 %1825  ;;  %v1746_v60 = vsel %vm1095_vm7, %v1726_v28, %v1515_v38 }
 0x30c   : > { %2152 = vmatmul.msk.bf16.vlgmr.msra.gmra.mxu0 %vm1907_vm11, %v1833_v42  ;;  %v1859_v49 = vsel %vm1831_vm1, %v3667_v53, %v1826_v61 }
 0x30d   : > { %2165 = vmatmul.msk.bf16.gmra.mxu3 %vm1907_vm11, %v1859_v49  ;;  %v4521_v49 = vld [vmem:[#allocation50_spill] sm:$0xff] }
 0x30f   : > { %v1558_v16 = vpop.permute.xlu1 %1557 }
 0x310   : > { %v1782_v36 = vsel %vm1128_vm8, %v1750_v22, %v1558_v16 }
 0x311   : > { %1829 = vrot.lane.b32.xlu1 %v1782_v36, %s2239_s5 }
 0x312   : > { %v1550_v45 = vpop.permute.xlu0 %1549 }
 0x313   : > { %v1774_v52 = vsel %vm1128_vm8, %v1746_v60, %v1550_v45 }
 0x314   : > { %1821 = vrot.lane.b32.xlu0 %v1774_v52, %s2239_s5 }
 0x317   : > { %v1452_v53 = vpop.permute.xlu1 %1451 }
 0x318   : > { %v1662_v20 = vsel %vm1012_vm4, %v1630_v31, %v1452_v53 }
 0x319   : > { %v1690_v43 = vsel %vm1045_vm5, %v1662_v20, %v1452_v53  ;;  %v4522_v20 = vld [vmem:[#allocation41_spill] sm:$0xff] }
 0x31a   : > { %v1423_v32 = vpop.permute.xlu0 %1422 }
 0x31b   : > { %v1638_v51 = vsel %vm995_vm3, %v1614_v44, %v1423_v32 }
 0x31c   : > { %v1670_v6 = vsel %vm1012_vm4, %v1638_v51, %v1460_v27 }
 0x31d   : > { %v1694_v58 = vsel %vm1045_vm5, %v1670_v6, %v1460_v27 }
 0x31f   : > { %v1507_v62 = vpop.permute.xlu1 %1506 }
 0x320   : > { %v1718_v56 = vsel %vm1078_vm6, %v1694_v58, %v1507_v62 }
 0x321   : > { %v1742_v47 = vsel %vm1095_vm7, %v1718_v56, %v1507_v62 }
 0x322   : > { %v1499_v14 = vpop.permute.xlu0 %1498 }
 0x323   : > { %v1710_v18 = vsel %vm1078_vm6, %v1690_v43, %v1499_v14 }
 0x324   : > { %v1738_v54 = vsel %vm1095_vm7, %v1710_v18, %v1499_v14 }
 0x325   : > { %v1758_v29 = vsel %vm1128_vm8, %v1738_v54, %v1534_v11 }
 0x326   : > { %1805 = vrot.lane.b32.xlu2 %v1758_v29, %s2239_s5 }
 0x327   : > { %v1818_v55 = vpop.permute.xlu1 %1817 }
 0x328   : > { %v1851_v2 = vsel %vm1831_vm1, %v3386_v33, %v1818_v55 }
 0x329   : > { %2161 = vmatmul.msk.bf16.gmra.mxu2 %vm1907_vm11, %v1851_v2 }
 0x32a   : > { %v1542_v57 = vpop.permute.xlu0 %1541 }
 0x32b   : > { %v1766_v15 = vsel %vm1128_vm8, %v1742_v47, %v1542_v57  ;;  %v1820_v30 = vpop.permute.xlu2 %1819 }
 0x32c   : > { %1813 = vrot.lane.b32.xlu0 %v1766_v15, %s2239_s5  ;;  %v1853_v50 = vsel %vm1831_vm1, %v4515_v59, %v1820_v30 }
 0x32f   : > { %v1810_v46 = vpop.permute.xlu1 %1809 }
 0x330   : > { %v1843_v24 = vsel %vm1831_vm1, %v3556_v9, %v1810_v46  ;;  %v4517_v9 = vld [vmem:[#allocation43_spill] sm:$0xff] }
 0x331   : > { %2157 = vmatmul.msk.bf16.gmra.mxu1 %vm1907_vm11, %v1843_v24 }
 0x332   : > { %v1802_v41 = vpop.permute.xlu0 %1801 }
 0x333   : > { %v1835_v33 = vsel %vm1831_vm1, %v4514_v63, %v1802_v41 }
 0x334   : > { %2153 = vmatmul.msk.bf16.gmra.mxu0 %vm1907_vm11, %v1835_v33 }
 0x339   : > { %2162 = vmatmul.msk.bf16.gmra.mxu2 %vm1907_vm11, %v1853_v50 }
 0x342   : > { %v1828_v37 = vpop.permute.xlu0 %1827 }
 0x343   : > { %v1861_v23 = vsel %vm1831_vm1, %v4516_v5, %v1828_v37  ;;  %v1812_v17 = vpop.permute.xlu2 %1811 }
 0x344   : > { %2166 = vmatmul.msk.bf16.gmra.mxu3 %vm1907_vm11, %v1861_v23  ;;  %v1845_v26 = vsel %vm1831_vm1, %v4517_v9, %v1812_v17 }
 0x345   : > { %2158 = vmatmul.msk.bf16.gmra.mxu1 %vm1907_vm11, %v1845_v26 }
 0x350   : > { %v1996_v27 = vpop.f32.mrf.mxu2 }
 0x351   : > { %v1997_v38 = vadd.f32 %v4073_v39, %v1996_v27 }
 0x353   : > { %2053 = vst.msk [vmem:[%s4078_s25 + $0x80] sm:$0xff] %vm2036_vm2, %v1997_v38 }
 0x358   : > { %v1998_v48 = vpop.f32.mrf.mxu2 }
 0x359   : > { %v1999_v13 = vadd.f32 %v4073_v39, %v1998_v48 }
 0x35b   : > { %2054 = vst.msk [vmem:[%s4078_s25 + $0x88] sm:$0xff] %vm2036_vm2, %v1999_v13 }
 0x35e   : > { %v1804_v11 = vpop.permute.xlu1 %1803 }
 0x35f   : > { %v1837_v8 = vsel %vm1831_vm1, %v4518_v12, %v1804_v11 }
 0x360   : > { %2154 = vmatmul.msk.bf16.gmra.mxu0 %vm1907_vm11, %v1837_v8 }
 0x377   : > { %v2016_v40 = vpop.f32.mrf.mxu3 }
 0x378   : > { %v2017_v21 = vadd.f32 %v4073_v39, %v2016_v40 }
 0x37a   : > { %2061 = vst.msk [vmem:[%s4078_s25 + $0xc0] sm:$0xff] %vm2036_vm2, %v2017_v21 }
 0x37f   : > { %v2018_v35 = vpop.f32.mrf.mxu3 }
 0x380   : > { %v2019_v25 = vadd.f32 %v4073_v39, %v2018_v35  ;;  %v1806_v4 = vpop.permute.xlu2 %1805 }
 0x381   : > { %v1839_v0 = vsel %vm1831_vm1, %v4519_v19, %v1806_v4 }
 0x382   : > { %2062 = vst.msk [vmem:[%s4078_s25 + $0xc8] sm:$0xff] %vm2036_vm2, %v2019_v25  ;;  %2155 = vmatmul.msk.bf16.gmra.mxu0 %vm1907_vm11, %v1839_v0 }
 0x383   : > { %v1830_v1 = vpop.permute.xlu1 %1829 }
 0x384   : > { %v1863_v42 = vsel %vm1831_vm1, %v4520_v7, %v1830_v1 }
 0x385   : > { %2167 = vmatmul.msk.bf16.gmra.mxu3 %vm1907_vm11, %v1863_v42 }
 0x386   : > { %v1822_v61 = vpop.permute.xlu0 %1821  ;;  %v1976_v34 = vpop.f32.mrf.mxu1 }
 0x387   : > { %v1855_v3 = vsel %vm1831_vm1, %v4521_v49, %v1822_v61  ;;  %v1977_v28 = vadd.f32 %v4073_v39, %v1976_v34 }
 0x388   : > { %2163 = vmatmul.msk.bf16.gmra.mxu2 %vm1907_vm11, %v1855_v3 }
 0x389   : > { %v1956_v16 = vpop.f32.mrf.mxu0  ;;  %2045 = vst.msk [vmem:[%s4078_s25 + $0x40] sm:$0xff] %vm2036_vm2, %v1977_v28 }
 0x38a   : > { %v1957_v22 = vadd.f32 %v4073_v39, %v1956_v16 }
 0x38c   : > { %2037 = vst.msk [vmem:[%s4078_s25] sm:$0xff] %vm2036_vm2, %v1957_v22 }
 0x38e   : > { %v1978_v36 = vpop.f32.mrf.mxu1 }
 0x38f   : > { %v1979_v60 = vadd.f32 %v4073_v39, %v1978_v36 }
 0x390   : > { %v2021_v45 = vpop.f32.mrf.mxu3 }
 0x391   : > { %v1958_v52 = vpop.f32.mrf.mxu0  ;;  %2046 = vst.msk [vmem:[%s4078_s25 + $0x48] sm:$0xff] %vm2036_vm2, %v1979_v60  ;;  %v2022_v53 = vadd.f32 %v4073_v39, %v2021_v45 }
 0x392   : > { %v1959_v32 = vadd.f32 %v4073_v39, %v1958_v52 }
 0x393   : > { %2063 = vst.msk [vmem:[%s4078_s25 + $0xd0] sm:$0xff] %vm2036_vm2, %v2022_v53 }
 0x394   : > { %2038 = vst.msk [vmem:[%s4078_s25 + $0x8] sm:$0xff] %vm2036_vm2, %v1959_v32 }
 0x398   : > { %v2023_v10 = vpop.f32.mrf.mxu3 }
 0x399   : > { %v2024_v31 = vadd.f32 %v4073_v39, %v2023_v10 }
 0x39b   : > { %2064 = vst.msk [vmem:[%s4078_s25 + $0xd8] sm:$0xff] %vm2036_vm2, %v2024_v31 }
 0x39e   : > { %v1814_v44 = vpop.permute.xlu0 %1813 }
 0x39f   : > { %v1847_v62 = vsel %vm1831_vm1, %v4522_v20, %v1814_v44 }
 0x3a0   : > { %2159 = vmatmul.msk.bf16.gmra.mxu1 %vm1907_vm11, %v1847_v62 }
 0x3ac   : > { %v2001_v51 = vpop.f32.mrf.mxu2 }
 0x3ad   : > { %v2002_v43 = vadd.f32 %v4073_v39, %v2001_v51 }
 0x3ae   : > { %v1981_v14 = vpop.f32.mrf.mxu1 }
 0x3af   : > { %2055 = vst.msk [vmem:[%s4078_s25 + $0x90] sm:$0xff] %vm2036_vm2, %v2002_v43  ;;  %v1982_v6 = vadd.f32 %v4073_v39, %v1981_v14 }
 0x3b1   : > { %v1961_v18 = vpop.f32.mrf.mxu0  ;;  %2047 = vst.msk [vmem:[%s4078_s25 + $0x50] sm:$0xff] %vm2036_vm2, %v1982_v6 }
 0x3b2   : > { %v1962_v54 = vadd.f32 %v4073_v39, %v1961_v18 }
 0x3b4   : > { %2039 = vst.msk [vmem:[%s4078_s25 + $0x10] sm:$0xff] %vm2036_vm2, %v1962_v54  ;;  %v2003_v29 = vpop.f32.mrf.mxu2 }
 0x3b5   : > { %v2004_v58 = vadd.f32 %v4073_v39, %v2003_v29 }
 0x3b6   : > { %v1983_v56 = vpop.f32.mrf.mxu1 }
 0x3b7   : > { %2056 = vst.msk [vmem:[%s4078_s25 + $0x98] sm:$0xff] %vm2036_vm2, %v2004_v58  ;;  %v1984_v55 = vadd.f32 %v4073_v39, %v1983_v56 }
 0x3b9   : > { %v1963_v2 = vpop.f32.mrf.mxu0  ;;  %2048 = vst.msk [vmem:[%s4078_s25 + $0x58] sm:$0xff] %vm2036_vm2, %v1984_v55 }
 0x3ba   : > { %v1964_v47 = vadd.f32 %v4073_v39, %v1963_v2 }
 0x3bc   : > { %2040 = vst.msk [vmem:[%s4078_s25 + $0x18] sm:$0xff] %vm2036_vm2, %v1964_v47  ;;  %v2006_v57 = vpop.f32.mrf.mxu2 }
 0x3bd   : > { %v2007_v15 = vadd.f32 %v4073_v39, %v2006_v57 }
 0x3bf   : > { %2057 = vst.msk [vmem:[%s4078_s25 + $0xa0] sm:$0xff] %vm2036_vm2, %v2007_v15 }
 0x3c2   : > { %v1986_v46 = vpop.f32.mrf.mxu1 }
 0x3c3   : > { %v1987_v24 = vadd.f32 %v4073_v39, %v1986_v46 }
 0x3c4   : > { %v2008_v41 = vpop.f32.mrf.mxu2 }
 0x3c5   : > { %2049 = vst.msk [vmem:[%s4078_s25 + $0x60] sm:$0xff] %vm2036_vm2, %v1987_v24  ;;  %v2009_v63 = vadd.f32 %v4073_v39, %v2008_v41 }
 0x3c7   : > { %2058 = vst.msk [vmem:[%s4078_s25 + $0xa8] sm:$0xff] %vm2036_vm2, %v2009_v63  ;;  %v2026_v33 = vpop.f32.mrf.mxu3 }
 0x3c8   : > { %v2027_v30 = vadd.f32 %v4073_v39, %v2026_v33 }
 0x3ca   : > { %2065 = vst.msk [vmem:[%s4078_s25 + $0xe0] sm:$0xff] %vm2036_vm2, %v2027_v30  ;;  %v1988_v59 = vpop.f32.mrf.mxu1 }
 0x3cb   : > { %v1989_v50 = vadd.f32 %v4073_v39, %v1988_v59 }
 0x3cd   : > { %2050 = vst.msk [vmem:[%s4078_s25 + $0x68] sm:$0xff] %vm2036_vm2, %v1989_v50 }
 0x3cf   : > { %v2028_v37 = vpop.f32.mrf.mxu3 }
 0x3d0   : > { %v2029_v5 = vadd.f32 %v4073_v39, %v2028_v37 }
 0x3d2   : > { %2066 = vst.msk [vmem:[%s4078_s25 + $0xe8] sm:$0xff] %vm2036_vm2, %v2029_v5 }
 0x3dd   : > { %v1966_v23 = vpop.f32.mrf.mxu0 }
 0x3de   : > { %v1967_v17 = vadd.f32 %v4073_v39, %v1966_v23 }
 0x3e0   : > { %2041 = vst.msk [vmem:[%s4078_s25 + $0x20] sm:$0xff] %vm2036_vm2, %v1967_v17 }
 0x3e5   : > { %v1968_v9 = vpop.f32.mrf.mxu0 }
 0x3e6   : > { %v1969_v26 = vadd.f32 %v4073_v39, %v1968_v9 }
 0x3e8   : > { %2042 = vst.msk [vmem:[%s4078_s25 + $0x28] sm:$0xff] %vm2036_vm2, %v1969_v26 }
 0x3ff   : > { %v1971_v27 = vpop.f32.mrf.mxu0 }
 0x400   : > { %v1972_v38 = vadd.f32 %v4073_v39, %v1971_v27 }
 0x402   : > { %2043 = vst.msk [vmem:[%s4078_s25 + $0x30] sm:$0xff] %vm2036_vm2, %v1972_v38 }
 0x407   : > { %v1973_v48 = vpop.f32.mrf.mxu0 }
 0x408   : > { %v1974_v13 = vadd.f32 %v4073_v39, %v1973_v48  ;;  %v2031_v11 = vpop.f32.mrf.mxu3 }
 0x409   : > { %v2032_v12 = vadd.f32 %v4073_v39, %v2031_v11 }
 0x40a   : > { %2044 = vst.msk [vmem:[%s4078_s25 + $0x38] sm:$0xff] %vm2036_vm2, %v1974_v13 }
 0x40b   : > { %v2011_v8 = vpop.f32.mrf.mxu2  ;;  %2067 = vst.msk [vmem:[%s4078_s25 + $0xf0] sm:$0xff] %vm2036_vm2, %v2032_v12 }
 0x40c   : > { %v2012_v40 = vadd.f32 %v4073_v39, %v2011_v8 }
 0x40e   : > { %2059 = vst.msk [vmem:[%s4078_s25 + $0xb0] sm:$0xff] %vm2036_vm2, %v2012_v40 }
 0x410   : > { %v2033_v21 = vpop.f32.mrf.mxu3 }
 0x411   : > { %v2034_v35 = vadd.f32 %v4073_v39, %v2033_v21 }
 0x413   : > { %v2013_v25 = vpop.f32.mrf.mxu2  ;;  %2068 = vst.msk [vmem:[%s4078_s25 + $0xf8] sm:$0xff] %vm2036_vm2, %v2034_v35 }
 0x414   : > { %v2014_v4 = vadd.f32 %v4073_v39, %v2013_v25 }
 0x416   : > { %2060 = vst.msk [vmem:[%s4078_s25 + $0xb8] sm:$0xff] %vm2036_vm2, %v2014_v4 }
 0x41d   : > { %v1991_v19 = vpop.f32.mrf.mxu1 }
 0x41e   : > { %v1992_v0 = vadd.f32 %v4073_v39, %v1991_v19 }
 0x420   : > { %2051 = vst.msk [vmem:[%s4078_s25 + $0x70] sm:$0xff] %vm2036_vm2, %v1992_v0 }
 0x425   : > { %v1993_v1 = vpop.f32.mrf.mxu1 }
 0x426   : > { %v1994_v7 = vadd.f32 %v4073_v39, %v1993_v1 }
 0x428   : > { %2052 = vst.msk [vmem:[%s4078_s25 + $0x78] sm:$0xff] %vm2036_vm2, %v1994_v7 }
 0x429 PF: > { %s13_s12 = sadd.s32 1, %s2223_s12  }
 0x42a   : > { %p10_p4 = scmp.ge.s32.totalorder %s13_s12, 4  }
 0x42c   :  { %12 = sbr.rel (!%p10_p4) target bundleno = 1 (0x1), region = 62 }

// kernel: feature_extraction_forward.4
= control target key start
LH: loop header
LB: loop body
LE: loop exit
PB: predicated region body
PF: predicated region fallthrough
CT: control target
= control target key end

     0   :  { %s1857_s12 = smov 0   ;;  %s2591_s0 = inlined_call_operand.vmem [shape: f32[2,10,10,128], index: 0, kind: input, shape index: {}]   ;;  %s2592_s1 = inlined_call_operand.vmem [shape: bf16[800,32], index: 1, kind: input, shape index: {}]   ;;  %s2593_s2 = inlined_call_operand.vmem [shape: f32[1,32], index: 2, kind: input, shape index: {}]   ;;  %s2594_s3 = inlined_call_operand.vmem [shape: f32[2,8,8,32], index: 3, kind: output, shape index: {}]  }
   0x1 LB: > { %s1530_s13 = sadd.s32 4294967295, %s1832_s12   ;;  %p1534_p0 = scmp.ge.s32.totalorder %s1832_s12, 1  ;;  %s1832_s12 = sphi %s1857_s12, %s13_s12  }
   0x2   : > { %p137_p1 = scmp.lt.s32.totalorder %s1832_s12, 3 }
   0x4   : > { %p138_p2 = pnand %p1534_p0, %p137_p1 }
   0x5   : > { %p161_p3 = scmp.lt.s32.totalorder (!%p138_p2), %s1530_s13, 1  ;;  %s1834_s18 = smov (!%p138_p2), 64  }
   0x6   : > { %141 = sbr.rel (%p138_p2) target bundleno = 483 (0x1e3), region = 32  ;;  %s1835_s19 = smov (!%p138_p2), 96  }
   0x7   : > { %s1836_s20 = smov (!%p138_p2), 32  }
   0xb   : > { %s2596_s13 = smov (!%p161_p3, %s1530_s13), 1  ;;  %vm459_vm0 = vcmask 523264   ;;  %vm476_vm1 = vcmask 785408   ;;  %vm450_vm2 = vcmask 261120  }
   0xc   : > { %s1813_s14 = smul.u32 160, %s2596_s13  ;;  %s1744_s6 = sshll.u32 %s2596_s13, 6 }
   0xe   : > { %s1871_s17 = scalar_lea.vmem %s2591_s0, %s1813_s14 }
   0xf   : > { %v176_v0 = vld [vmem:[%s1871_s17 + $0x20] sm:$0xff]  ;;  %v174_v1 = vld [vmem:[%s1871_s17 + $0x10] sm:$0xff]  ;;  %v175_v3 = vld [vmem:[%s1871_s17 + $0x18] sm:$0x3] }
  0x10   : > { %v1875_v2 = vpack.c.bf16 %v176_v0, %v176_v0  ;;  %v1878_v4 = vpack.c.bf16 %v174_v1, %v174_v1  ;;  %v172_v5 = vld [vmem:[%s1871_s17] sm:$0xff]  ;;  %v173_v6 = vld [vmem:[%s1871_s17 + $0x8] sm:$0x3]  ;;  %v195_v7 = vpack.c.bf16 %v175_v3, %v175_v3  ;;  %v182_v19 = vld [vmem:[%s1871_s17 + $0x50] sm:$0xff] }
  0x11   : > { %v1882_v8 = vpack.c.bf16 %v172_v5, %v172_v5  ;;  %v193_v9 = vpack.c.bf16 %v173_v6, %v173_v6  ;;  %v180_v10 = vld [vmem:[%s1871_s17 + $0x40] sm:$0xff]  ;;  %v181_v11 = vld [vmem:[%s1871_s17 + $0x48] sm:$0x3]  ;;  %v183_v20 = vld [vmem:[%s1871_s17 + $0x58] sm:$0x3]  ;;  %v1906_v28 = vpack.c.bf16 %v182_v19, %v182_v19 }
  0x12   : > { %v232_v12 = vunpack.c.l.b16 %v1875_v2  ;;  %v230_v13 = vunpack.c.l.b16 %v1878_v4  ;;  %v1888_v14 = vpack.c.bf16 %v180_v10, %v180_v10  ;;  %v231_v15 = vunpack.c.l.b16 %v195_v7  ;;  %v177_v38 = vld [vmem:[%s1871_s17 + $0x28] sm:$0x3]  ;;  %v178_v44 = vld [vmem:[%s1871_s17 + $0x30] sm:$0xff]  ;;  %v179_v45 = vld [vmem:[%s1871_s17 + $0x38] sm:$0x3] }
  0x13   : > { %v228_v16 = vunpack.c.l.b16 %v1882_v8  ;;  %v229_v17 = vunpack.c.l.b16 %v193_v9  ;;  %v201_v18 = vpack.c.bf16 %v181_v11, %v181_v11  ;;  %v203_v29 = vpack.c.bf16 %v183_v20, %v183_v20  ;;  %v184_v61 = vld [vmem:[%s1871_s17 + $0x60] sm:$0xff]  ;;  %v185_v62 = vld [vmem:[%s1871_s17 + $0x68] sm:$0x3]  ;;  %v186_v63 = vld [vmem:[%s1871_s17 + $0x70] sm:$0xff] }
  0x14   : > { %v1893_v21 = vpack.c.b16 %v232_v12, %v232_v12  ;;  %v1895_v22 = vpack.c.b16 %v230_v13, %v230_v13  ;;  %v1898_v23 = vunpack.c.l.b16 %v1888_v14  ;;  %v245_v27 = vpack.c.b16 %v231_v15, %v230_v13  ;;  %v187_v0 = vld [vmem:[%s1871_s17 + $0x78] sm:$0x3] }
  0x15   : > { %v332_v24 = vpack.c.b16 %v228_v16, %v228_v16  ;;  %v1900_v25 = vpack.c.b16 %v229_v17, %v228_v16  ;;  %v237_v26 = vunpack.c.l.b16 %v201_v18  ;;  %v1915_v33 = vunpack.c.l.b16 %v1906_v28 }
  0x16   : > { %393 = vrot.lane.b32.xlu1 %v1893_v21, %s1834_s18  ;;  %391 = vrot.lane.b32.xlu0 %v1895_v22, %s1834_s18  ;;  %v239_v34 = vunpack.c.l.b16 %v203_v29  ;;  %v262_v41 = vshll.u32 %v245_v27, 16  ;;  %v197_v47 = vpack.c.bf16 %v177_v38, %v177_v38  ;;  %v260_v49 = vshrl.u32 %v245_v27, 16 }
  0x17   : > { %340 = vrot.lane.b32.xlu2 %v332_v24, %s1835_s19  ;;  %v1910_v30 = vpack.c.b16 %v237_v26, %v1898_v23  ;;  %v253_v31 = vshrl.u32 %v1900_v25, 16  ;;  %v255_v32 = vshll.u32 %v1900_v25, 16  ;;  %v324_v39 = vrot.slane %v1900_v25, 1 }
  0x18   : > { %v1922_v40 = vpack.c.b16 %v239_v34, %v1915_v33  ;;  %v264_v50 = vrot.slane %v262_v41, 1  ;;  %v1933_v51 = vpack.c.bf16 %v178_v44, %v178_v44  ;;  %v199_v52 = vpack.c.bf16 %v179_v45, %v179_v45 }
  0x19   : > { %v281_v35 = vshrl.u32 %v1910_v30, 16  ;;  %v283_v36 = vshll.u32 %v1910_v30, 16  ;;  %v257_v37 = vrot.slane %v255_v32, 1  ;;  %v233_v55 = vunpack.c.l.b16 %v197_v47  ;;  %v1751_v47 = vld [vmem:[%s2592_s1 + $0x30] sm:$0xff] }
  0x1a   : > { %v290_v46 = vshll.u32 %v1922_v40, 16  ;;  %v288_v53 = vshrl.u32 %v1922_v40, 16  ;;  %v1938_v56 = vrot.slane %v245_v27, 1  ;;  %v1940_v57 = vor.u32 %v264_v50, %v260_v49  ;;  %v1750_v49 = vld [vmem:[%s2592_s1 + $0x28] sm:$0xff] }
  0x1b   : > { %v285_v42 = vrot.slane %v283_v36, 1  ;;  %v258_v43 = vor.u32 %v257_v37, %v253_v31  ;;  %v234_v58 = vunpack.c.l.b16 %v1933_v51  ;;  %v235_v59 = vunpack.c.l.b16 %v199_v52 }
  0x1c   : > { %v292_v54 = vrot.slane %v290_v46, 1  ;;  %v246_v1 = vpack.c.b16 %v233_v55, %v232_v12  ;;  %v1953_v5 = vpack.c.bf16 %v184_v61, %v184_v61  ;;  %v205_v6 = vpack.c.bf16 %v185_v62, %v185_v62  ;;  %v1767_v55 = vld [vmem:[%s2592_s1 + $0xb0] sm:$0xff]  ;;  %v1766_v61 = vld [vmem:[%s2592_s1 + $0xa8] sm:$0xff] }
  0x1d   : > { %v1927_v48 = vor.u32 %v285_v42, %v281_v35  ;;  %v247_v3 = vpack.c.b16 %v235_v59, %v234_v58  ;;  %v1957_v7 = vpack.c.bf16 %v186_v63, %v186_v63  ;;  %v207_v9 = vpack.c.bf16 %v187_v0, %v187_v0  ;;  %v1760_v59 = vld [vmem:[%s2592_s1 + $0x78] sm:$0xff]  ;;  %v1759_v62 = vld [vmem:[%s2592_s1 + $0x70] sm:$0xff]  ;;  %v1765_v63 = vld [vmem:[%s2592_s1 + $0xa0] sm:$0xff] }
  0x1e   : > { %372 = vrot.lane.b32.xlu1 %v324_v39, %s1835_s19  ;;  %356 = vrot.lane.b32.xlu0 %v258_v43, %s1836_s20  ;;  %v1943_v60 = vor.u32 %v292_v54, %v288_v53  ;;  %v269_v11 = vshll.u32 %v246_v1, 16  ;;  %v240_v12 = vunpack.c.l.b16 %v1953_v5  ;;  %v241_v13 = vunpack.c.l.b16 %v205_v6  ;;  %v1749_v53 = vld [vmem:[%s2592_s1 + $0x20] sm:$0xff]  ;;  %v1747_v54 = vld [vmem:[%s2592_s1 + $0x10] sm:$0xff] }
  0x1f   : > { %316 = vrot.lane.b32.xlu2 %v1927_v48, %s1834_s18  ;;  %v276_v10 = vshll.u32 %v247_v3, 16  ;;  %v1961_v15 = vunpack.c.l.b16 %v1957_v7  ;;  %v243_v16 = vunpack.c.l.b16 %v207_v9  ;;  %v267_v17 = vshrl.u32 %v246_v1, 16  ;;  %1293 = vmatpush.bf16.msra.mxu1 %v1760_v59  ;;  %v1758_v0 = vld [vmem:[%s2592_s1 + $0x68] sm:$0xff]  ;;  %v1763_v6 = vld [vmem:[%s2592_s1 + $0x90] sm:$0xff]  ;;  %v1756_v9 = vld [vmem:[%s2592_s1 + $0x58] sm:$0xff] }
  0x20   : > { %v274_v18 = vshrl.u32 %v247_v3, 16  ;;  %v271_v20 = vrot.slane %v269_v11, 1  ;;  %v1966_v24 = vpack.c.b16 %v241_v13, %v240_v12  ;;  %v1978_v32 = vrot.slane %v246_v1, 1  ;;  %v1764_v1 = vld [vmem:[%s2592_s1 + $0x98] sm:$0xff]  ;;  %v1755_v13 = vld [vmem:[%s2592_s1 + $0x50] sm:$0xff] }
  0x21   : > { %v278_v19 = vrot.slane %v276_v10, 1  ;;  %v1971_v26 = vpack.c.b16 %v243_v16, %v1961_v15  ;;  %v1991_v42 = vrot.slane %v247_v3, 1  ;;  %v2003_v44 = vpack.c.b16 %v1898_v23, %v1898_v23  ;;  %v1752_v23 = vld [vmem:[%s2592_s1 + $0x38] sm:$0xff]  ;;  %v1762_v10 = vld [vmem:[%s2592_s1 + $0x88] sm:$0xff]  ;;  %v1761_v16 = vld [vmem:[%s2592_s1 + $0x80] sm:$0xff] }
  0x22   : > { %v1975_v29 = vor.u32 %v271_v20, %v267_v17  ;;  %v297_v31 = vshll.u32 %v1966_v24, 16  ;;  %v295_v35 = vshrl.u32 %v1966_v24, 16  ;;  %v2005_v45 = vpack.c.b16 %v234_v58, %v234_v58  ;;  %1795 = vmatpush.bf16.msra.mxu3 %v1752_v23  ;;  %1264 = vmatpush.bf16.msra.mxu0 %v1752_v23  ;;  %v1746_v58 = vld [vmem:[%s2592_s1 + $0x8] sm:$0xff] }
  0x23   : > { %v1973_v27 = vor.u32 %v278_v19, %v274_v18  ;;  %v304_v34 = vshll.u32 %v1971_v26, 16  ;;  %v302_v37 = vshrl.u32 %v1971_v26, 16  ;;  %v2023_v46 = vrot.slane %v1910_v30, 1  ;;  %1294 = vmatpush.bf16.msra.mxu1 %v1759_v62  ;;  %v1754_v18 = vld [vmem:[%s2592_s1 + $0x48] sm:$0xff] }
  0x24   : > { %v299_v36 = vrot.slane %v297_v31, 1  ;;  %v2039_v30 = vpack.c.b16 %v1915_v33, %v1915_v33  ;;  %v2042_v50 = vrot.slane %v1922_v40, 1  ;;  %v2044_v52 = vpack.c.b16 %v240_v12, %v240_v12  ;;  %v1748_v33 = vld [vmem:[%s2592_s1 + $0x18] sm:$0xff] }
  0x25   : > { %v306_v38 = vrot.slane %v304_v34, 1  ;;  %v1768_v40 = vld [vmem:[%s2592_s1 + $0xb8] sm:$0xff]  ;;  %v2143_v20 = vrot.slane %v1971_v26, 1  ;;  %v1753_v26 = vld [vmem:[%s2592_s1 + $0x40] sm:$0xff] }
  0x26   : > { %374 = vrot.lane.b32.xlu1 %v1938_v56, %s1835_s19  ;;  %358 = vrot.lane.b32.xlu0 %v1940_v57, %s1836_s20  ;;  %v1989_v41 = vor.u32 %v299_v36, %v295_v35  ;;  %v2148_v35 = vrot.slane %v1966_v24, 1 }
  0x27   : > { %318 = vrot.lane.b32.xlu2 %v1943_v60, %s1834_s18  ;;  %1796 = vmatpush.bf16.msra.mxu3 %v1751_v47 }
  0x28   : > { %1265 = vmatpush.bf16.msra.mxu0 %v1751_v47  ;;  %1322 = vmatpush.bf16.msra.mxu2 %v1768_v40 }
  0x29   : > { %1295 = vmatpush.bf16.msra.mxu1 %v1758_v0 }
  0x2b   : > { %1797 = vmatpush.bf16.msra.mxu3 %v1750_v49 }
  0x2c   : > { %1266 = vmatpush.bf16.msra.mxu0 %v1750_v49  ;;  %1323 = vmatpush.bf16.msra.mxu2 %v1767_v55 }
  0x2e   : > { %308 = vrot.lane.b32.xlu1 %v258_v43, %s1834_s18  ;;  %342 = vrot.lane.b32.xlu0 %v1895_v22, %s1835_s19  ;;  %v1993_v43 = vor.u32 %v306_v38, %v302_v37  ;;  %v2155_v38 = vpack.c.b16 %v1961_v15, %v1961_v15 }
  0x2f   : > { %310 = vrot.lane.b32.xlu2 %v1940_v57, %s1834_s18  ;;  %1798 = vmatpush.bf16.msra.mxu3 %v1749_v53 }
  0x30   : > { %1267 = vmatpush.bf16.msra.mxu0 %v1749_v53  ;;  %1324 = vmatpush.bf16.msra.mxu2 %v1766_v61 }
  0x33   : > { %1799 = vmatpush.bf16.msra.mxu3 %v1748_v33 }
  0x34   : > { %1268 = vmatpush.bf16.msra.mxu0 %v1748_v33  ;;  %1325 = vmatpush.bf16.msra.mxu2 %v1765_v63 }
  0x36   : > { %362 = vrot.lane.b32.xlu1 %v1973_v27, %s1836_s20  ;;  %360 = vrot.lane.b32.xlu0 %v1975_v29, %s1836_s20 }
  0x37   : > { %376 = vrot.lane.b32.xlu2 %v1978_v32, %s1835_s19  ;;  %1800 = vmatpush.bf16.msra.mxu3 %v1747_v54 }
  0x38   : > { %1269 = vmatpush.bf16.msra.mxu0 %v1747_v54  ;;  %1326 = vmatpush.bf16.msra.mxu2 %v1764_v1 }
  0x3b   : > { %1801 = vmatpush.bf16.msra.mxu3 %v1746_v58 }
  0x3c   : > { %1270 = vmatpush.bf16.msra.mxu0 %v1746_v58  ;;  %1327 = vmatpush.bf16.msra.mxu2 %v1763_v6 }
  0x3e   : > { %320 = vrot.lane.b32.xlu1 %v1989_v41, %s1834_s18  ;;  %378 = vrot.lane.b32.xlu0 %v1991_v42, %s1835_s19 }
  0x3f   : > { %322 = vrot.lane.b32.xlu2 %v1993_v43, %s1834_s18 }
  0x40   : > { %1328 = vmatpush.bf16.msra.mxu2 %v1762_v10 }
  0x44   : > { %1329 = vmatpush.bf16.msra.mxu2 %v1761_v16 }
  0x46   : > { %397 = vrot.lane.b32.xlu1 %v2003_v44, %s1834_s18  ;;  %395 = vrot.lane.b32.xlu0 %v2005_v45, %s1834_s18 }
  0x47   : > { %344 = vrot.lane.b32.xlu2 %v1893_v21, %s1835_s19 }
  0x4e   : > { %312 = vrot.lane.b32.xlu1 %v1975_v29, %s1834_s18  ;;  %346 = vrot.lane.b32.xlu0 %v2005_v45, %s1835_s19 }
  0x4f   : > { %314 = vrot.lane.b32.xlu2 %v1973_v27, %s1834_s18 }
  0x56   : > { %366 = vrot.lane.b32.xlu1 %v1943_v60, %s1836_s20  ;;  %364 = vrot.lane.b32.xlu0 %v1927_v48, %s1836_s20 }
  0x57   : > { %380 = vrot.lane.b32.xlu2 %v2023_v46, %s1835_s19 }
  0x5e   : > { %399 = vrot.lane.b32.xlu1 %v2039_v30, %s1834_s18  ;;  %382 = vrot.lane.b32.xlu0 %v2042_v50, %s1835_s19 }
  0x5f   : > { %401 = vrot.lane.b32.xlu2 %v2044_v52, %s1834_s18 }
  0x66   : > { %420 = vrot.lane.b32.xlu1 %v1978_v32, %s1834_s18  ;;  %418 = vrot.lane.b32.xlu0 %v1938_v56, %s1834_s18 }
  0x67   : > { %434 = vrot.lane.b32.xlu2 %v1895_v22, %s1836_s20  ;;  %v1745_v22 = vld [vmem:[%s2592_s1] sm:$0xff] }
  0x68   : > { %1802 = vmatpush.bf16.msra.mxu3 %v1745_v22  ;;  %1271 = vmatpush.bf16.msra.mxu0 %v1745_v22 }
  0x6e   : > { %348 = vrot.lane.b32.xlu1 %v2003_v44, %s1835_s19  ;;  %436 = vrot.lane.b32.xlu0 %v1893_v21, %s1836_s20  ;;  %v1757_v21 = vld [vmem:[%s2592_s1 + $0x60] sm:$0xff] }
  0x6f   : > { %350 = vrot.lane.b32.xlu2 %v2039_v30, %s1835_s19  ;;  %1296 = vmatpush.bf16.msra.mxu1 %v1757_v21 }
  0x71   : > { %v2103_v3 = vpop.permute.xlu2 %340 }
  0x73   : > { %1297 = vmatpush.bf16.msra.mxu1 %v1756_v9 }
  0x76   : > { %615 = vrot.lane.b32.xlu1 %v1975_v29, %s1835_s19  ;;  %613 = vrot.lane.b32.xlu0 %v1940_v57, %s1835_s19 }
  0x77   : > { %629 = vrot.lane.b32.xlu2 %v1938_v56, %s1836_s20  ;;  %1298 = vmatpush.bf16.msra.mxu1 %v1755_v13 }
  0x79   : > { %v317_v11 = vpop.permute.xlu2 %316 }
  0x7a   : > { %v469_v12 = vsel %vm459_vm0, %v1888_v14, %v317_v11  ;;  %v188_v14 = vld [vmem:[%s1871_s17 + $0x80] sm:$0xff] }
  0x7b   : > { %v481_v17 = vsel %vm476_vm1, %v469_v12, %v317_v11  ;;  %v2150_v36 = vpack.c.bf16 %v188_v14, %v188_v14  ;;  %1299 = vmatpush.bf16.msra.mxu1 %v1754_v18 }
  0x7c   : > { %v770_v31 = vunpack.c.l.b16 %v481_v17 }
  0x7e   : > { %368 = vrot.lane.b32.xlu1 %v1989_v41, %s1836_s20  ;;  %631 = vrot.lane.b32.xlu0 %v1978_v32, %s1836_s20 }
  0x7f   : > { %370 = vrot.lane.b32.xlu2 %v1993_v43, %s1836_s20  ;;  %1300 = vmatpush.bf16.msra.mxu1 %v1753_v26 }
  0x81   : > { %v319_v19 = vpop.permute.xlu2 %318 }
  0x82   : > { %v471_v34 = vsel %vm459_vm0, %v1906_v28, %v319_v19  ;;  %v2165_v28 = vunpack.c.l.b16 %v2150_v36 }
  0x83   : > { %v482_v37 = vsel %vm476_vm1, %v471_v34, %v319_v19 }
  0x84   : > { %v776_v23 = vunpack.c.l.b16 %v482_v37  ;;  %v2174_v53 = vpack.c.b16 %v2165_v28, %v2165_v28 }
  0x86   : > { %386 = vrot.lane.b32.xlu1 %v2143_v20, %s1835_s19  ;;  %384 = vrot.lane.b32.xlu0 %v2148_v35, %s1835_s19  ;;  %v2167_v24 = vpack.c.b16 %v776_v23, %v770_v31  ;;  %v189_v23 = vld [vmem:[%s1871_s17 + $0x88] sm:$0x3] }
  0x87   : > { %403 = vrot.lane.b32.xlu2 %v2155_v38, %s1834_s18 }
  0x88   : > { %v394_v15 = vpop.permute.xlu1 %393  ;;  %v392_v47 = vpop.permute.xlu0 %391  ;;  %1282 = vmatmul.bf16.vlgmr.msra.gmra.mxu3 %v2167_v24 }
  0x89   : > { %v311_v49 = vpop.permute.xlu2 %310 }
  0x8a   : > { %v463_v1 = vsel %vm459_vm0, %v1878_v4, %v311_v49 }
  0x8b   : > { %v478_v9 = vsel %vm476_vm1, %v463_v1, %v311_v49  ;;  %v1774_v1 = vld [vmem:[%s2592_s1 + $0xe8] sm:$0xff] }
  0x8e   : > { %422 = vrot.lane.b32.xlu1 %v1991_v42, %s1834_s18  ;;  %405 = vrot.lane.b32.xlu0 %v2174_v53, %s1834_s18 }
  0x8f   : > { %424 = vrot.lane.b32.xlu2 %v2023_v46, %s1834_s18 }
  0x90   : > { %v373_v33 = vpop.permute.xlu1 %372  ;;  %v357_v40 = vpop.permute.xlu0 %356 }
  0x91   : > { %v2182_v54 = vpop.permute.xlu2 %376  ;;  %v534_v55 = vsel %vm450_vm2, %v357_v40, %v373_v33  ;;  %v1775_v33 = vld [vmem:[%s2592_s1 + $0xf0] sm:$0xff] }
  0x92   : > { %v550_v58 = vsel %vm459_vm0, %v534_v55, %v392_v47  ;;  %v191_v55 = vld [vmem:[%s1871_s17 + $0x98] sm:$0x3] }
  0x93   : > { %v565_v63 = vsel %vm476_vm1, %v550_v58, %v392_v47  ;;  %v209_v47 = vpack.c.bf16 %v189_v23, %v189_v23 }
  0x94   : > { %v754_v21 = vunpack.c.l.b16 %v565_v63 }
  0x96   : > { %440 = vrot.lane.b32.xlu1 %v2003_v44, %s1836_s20  ;;  %438 = vrot.lane.b32.xlu0 %v2005_v45, %s1836_s20  ;;  %v487_v45 = vsel %vm450_vm2, %v324_v39, %v2103_v3  ;;  %v759_v39 = vunpack.c.l.b16 %v478_v9 }
  0x97   : > { %352 = vrot.lane.b32.xlu2 %v2044_v52, %s1835_s19  ;;  %v509_v4 = vsel %vm459_vm0, %v487_v45, %v2103_v3 }
  0x98   : > { %v375_v59 = vpop.permute.xlu1 %374  ;;  %v359_v61 = vpop.permute.xlu0 %358  ;;  %v518_v12 = vsel %vm476_vm1, %v509_v4, %v357_v40  ;;  %v190_v40 = vld [vmem:[%s1871_s17 + $0x90] sm:$0xff] }
  0x99   : > { %v323_v22 = vpop.permute.xlu2 %322  ;;  %v536_v62 = vsel %vm450_vm2, %v359_v61, %v375_v59  ;;  %v753_v31 = vunpack.c.l.b16 %v518_v12  ;;  %v2244_v59 = vpack.c.bf16 %v190_v40, %v190_v40  ;;  %v1772_v12 = vld [vmem:[%s2592_s1 + $0xd8] sm:$0xff] }
  0x9a   : > { %v552_v0 = vsel %vm459_vm0, %v536_v62, %v394_v15  ;;  %v475_v58 = vsel %vm459_vm0, %v1957_v7, %v323_v22  ;;  %v408_v62 = vunpack.c.l.b16 %v209_v47 }
  0x9b   : > { %v566_v44 = vsel %vm476_vm1, %v552_v0, %v394_v15  ;;  %v647_v63 = vunpack.c.l.b16 %v2244_v59  ;;  %v484_v0 = vsel %vm476_vm1, %v475_v58, %v323_v22  ;;  %v1770_v58 = vld [vmem:[%s2592_s1 + $0xc8] sm:$0xff] }
  0x9c   : > { %v761_v6 = vunpack.c.l.b16 %v566_v44  ;;  %v788_v22 = vunpack.c.l.b16 %v484_v0 }
  0x9e   : > { %617 = vrot.lane.b32.xlu1 %v1973_v27, %s1835_s19  ;;  %354 = vrot.lane.b32.xlu0 %v2155_v38, %s1835_s19  ;;  %v908_v10 = vpack.c.b16 %v761_v6, %v754_v21  ;;  %v2258_v6 = vpack.c.b16 %v408_v62, %v2165_v28 }
  0x9f   : > { %619 = vrot.lane.b32.xlu2 %v1927_v48, %s1835_s19 }
  0xa0   : > { %v309_v11 = vpop.permute.xlu1 %308  ;;  %1330 = vmatmul.bf16.vlgmr.msra.gmra.mxu2 %v908_v10  ;;  %v343_v25 = vpop.permute.xlu0 %342 }
  0xa1   : > { %v2212_v13 = vpop.permute.xlu2 %344  ;;  %v461_v16 = vsel %vm459_vm0, %v1882_v8, %v309_v11  ;;  %v490_v17 = vsel %vm450_vm2, %v1938_v56, %v343_v25  ;;  %v1776_v56 = vld [vmem:[%s2592_s1 + $0xf8] sm:$0xff] }
  0xa2   : > { %v477_v14 = vsel %vm476_vm1, %v461_v16, %v309_v11  ;;  %v510_v18 = vsel %vm459_vm0, %v490_v17, %v343_v25  ;;  %1351 = vmatpush.bf16.msrb.mxu3 %v1776_v56  ;;  %v2271_v11 = vrot.slane %v2258_v6, 1  ;;  %v1784_v16 = vld [vmem:[%s2592_s1 + $0x138] sm:$0xff]  ;;  %v1783_v56 = vld [vmem:[%s2592_s1 + $0x130] sm:$0xff]  ;;  %v493_v47 = vsel %vm450_vm2, %v1978_v32, %v2212_v13 }
  0xa3   : > { %v752_v3 = vunpack.c.l.b16 %v477_v14  ;;  %v520_v19 = vsel %vm476_vm1, %v510_v18, %v359_v61  ;;  %v211_v61 = vpack.c.bf16 %v191_v55, %v191_v55  ;;  %1380 = vmatpush.bf16.msrb.mxu0 %v1784_v16  ;;  %v411_v16 = vshrl.u32 %v2258_v6, 16 }
  0xa4   : > { %v760_v34 = vunpack.c.l.b16 %v520_v19 }
  0xa5   : > { %v906_v37 = vpack.c.b16 %v759_v39, %v752_v3  ;;  %v648_v7 = vunpack.c.l.b16 %v211_v61  ;;  %v795_v39 = vunpack.c.l.b16 %v2271_v11  ;;  %v1782_v61 = vld [vmem:[%s2592_s1 + $0x128] sm:$0xff] }
  0xa6   : > { %635 = vrot.lane.b32.xlu1 %v2023_v46, %s1836_s20  ;;  %633 = vrot.lane.b32.xlu0 %v1991_v42, %s1836_s20  ;;  %v907_v8 = vpack.c.b16 %v760_v34, %v753_v31 }
  0xa7   : > { %1272 = vmatmul.bf16.vlgmr.msra.gmra.mxu0 %v906_v37  ;;  %426 = vrot.lane.b32.xlu2 %v2042_v50, %s1834_s18  ;;  %v2264_v9 = vpack.c.b16 %v648_v7, %v647_v63  ;;  %v511_v63 = vsel %vm459_vm0, %v493_v47, %v2212_v13 }
  0xa8   : > { %v2231_v26 = vpop.permute.xlu1 %362  ;;  %1301 = vmatmul.bf16.vlgmr.msra.gmra.mxu1 %v907_v8  ;;  %v2233_v15 = vpop.permute.xlu0 %360  ;;  %1352 = vmatpush.bf16.msrb.mxu3 %v1775_v33 }
  0xa9   : > { %v2235_v49 = vpop.permute.xlu2 %314  ;;  %v661_v28 = vrot.slane %v2264_v9, 1  ;;  %v538_v14 = vsel %vm450_vm2, %v2233_v15, %v2182_v54  ;;  %v1771_v54 = vld [vmem:[%s2592_s1 + $0xd0] sm:$0xff]  ;;  %1381 = vmatpush.bf16.msrb.mxu0 %v1783_v56  ;;  %v522_v13 = vsel %vm476_vm1, %v511_v63, %v2233_v15  ;;  %v1781_v15 = vld [vmem:[%s2592_s1 + $0x120] sm:$0xff] }
  0xaa   : > { %v467_v33 = vsel %vm459_vm0, %v1933_v51, %v2235_v49 }
  0xab   : > { %v480_v0 = vsel %vm476_vm1, %v467_v33, %v2235_v49 }
  0xac   : > { %1353 = vmatpush.bf16.msrb.mxu3 %v1774_v1  ;;  %v764_v7 = vunpack.c.l.b16 %v480_v0  ;;  %v1792_v0 = vld [vmem:[%s2592_s1 + $0x178] sm:$0xff] }
  0xad   : > { %1382 = vmatpush.bf16.msrb.mxu0 %v1782_v61  ;;  %1803 = vmatpush.bf16.msrb.mxu1 %v1792_v0 }
  0xae   : > { %442 = vrot.lane.b32.xlu1 %v2039_v30, %s1836_s20  ;;  %428 = vrot.lane.b32.xlu0 %v2148_v35, %s1834_s18 }
  0xaf   : > { %444 = vrot.lane.b32.xlu2 %v2044_v52, %s1836_s20  ;;  %v1773_v52 = vld [vmem:[%s2592_s1 + $0xe0] sm:$0xff] }
  0xb0   : > { %v321_v44 = vpop.permute.xlu1 %320  ;;  %v379_v21 = vpop.permute.xlu0 %378  ;;  %1354 = vmatpush.bf16.msrb.mxu3 %v1773_v52 }
  0xb1   : > { %v2260_v45 = vpop.permute.xlu2 %380  ;;  %v473_v30 = vsel %vm459_vm0, %v1953_v5, %v321_v44  ;;  %v801_v5 = vunpack.c.l.b16 %v661_v28  ;;  %v540_v18 = vsel %vm450_vm2, %v2231_v26, %v379_v21  ;;  %v766_v28 = vunpack.c.l.b16 %v522_v13  ;;  %1383 = vmatpush.bf16.msrb.mxu0 %v1781_v15 }
  0xb2   : > { %v483_v10 = vsel %vm476_vm1, %v473_v30, %v321_v44  ;;  %v413_v30 = vshll.u32 %v2258_v6, 16  ;;  %v1779_v6 = vld [vmem:[%s2592_s1 + $0x110] sm:$0xff] }
  0xb3   : > { %v782_v4 = vunpack.c.l.b16 %v483_v10  ;;  %v2290_v17 = vpack.c.b16 %v801_v5, %v795_v39  ;;  %v1769_v10 = vld [vmem:[%s2592_s1 + $0xc0] sm:$0xff] }
  0xb4   : > { %1355 = vmatpush.bf16.msrb.mxu3 %v1772_v12 }
  0xb5   : > { %v2274_v25 = vpack.c.b16 %v788_v22, %v782_v4 }
  0xb6   : > { %623 = vrot.lane.b32.xlu1 %v1989_v41, %s1835_s19  ;;  %621 = vrot.lane.b32.xlu0 %v1943_v60, %s1835_s19 }
  0xb7   : > { %1287 = vmatmul.bf16.gmra.mxu3 %v2274_v25  ;;  %637 = vrot.lane.b32.xlu2 %v2042_v50, %s1836_s20 }
  0xb8   : > { %v398_v3 = vpop.permute.xlu1 %397  ;;  %v396_v19 = vpop.permute.xlu0 %395  ;;  %1356 = vmatpush.bf16.msrb.mxu3 %v1771_v54 }
  0xb9   : > { %v2297_v31 = vpop.permute.xlu2 %401  ;;  %v556_v34 = vsel %vm459_vm0, %v540_v18, %v398_v3  ;;  %v554_v37 = vsel %vm459_vm0, %v538_v14, %v396_v19  ;;  %v415_v14 = vrot.slane %v413_v30, 1 }
  0xba   : > { %v568_v23 = vsel %vm476_vm1, %v556_v34, %v398_v3  ;;  %v567_v8 = vsel %vm476_vm1, %v554_v37, %v396_v19  ;;  %v1778_v19 = vld [vmem:[%s2592_s1 + $0x108] sm:$0xff]  ;;  %v651_v37 = vshrl.u32 %v2264_v9, 16 }
  0xbb   : > { %v773_v40 = vunpack.c.l.b16 %v568_v23  ;;  %v767_v55 = vunpack.c.l.b16 %v567_v8 }
  0xbc   : > { %1357 = vmatpush.bf16.msrb.mxu3 %v1770_v58 }
  0xbd   : > { %v914_v62 = vpack.c.b16 %v773_v40, %v767_v55 }
  0xbe   : > { %430 = vrot.lane.b32.xlu1 %v2143_v20, %s1834_s18  ;;  %639 = vrot.lane.b32.xlu0 %v2148_v35, %s1836_s20 }
  0xbf   : > { %1335 = vmatmul.bf16.gmra.mxu2 %v914_v62  ;;  %432 = vrot.lane.b32.xlu2 %v2271_v11, %s1834_s18  ;;  %v1794_v62 = vld [vmem:[%s2592_s1 + $0x188] sm:$0xff] }
  0xc0   : > { %v313_v51 = vpop.permute.xlu1 %312  ;;  %v347_v1 = vpop.permute.xlu0 %346  ;;  %1358 = vmatpush.bf16.msrb.mxu3 %v1769_v10  ;;  %1444 = vmatpush.bf16.msrb.mxu2 %v1794_v62 }
  0xc1   : > { %v465_v49 = vsel %vm459_vm0, %v1875_v2, %v313_v51  ;;  %v496_v44 = vsel %vm450_vm2, %v1991_v42, %v347_v1  ;;  %v2346_v52 = vpop.permute.xlu2 %434 }
  0xc2   : > { %v479_v21 = vsel %vm476_vm1, %v465_v49, %v313_v51  ;;  %v512_v22 = vsel %vm459_vm0, %v496_v44, %v347_v1 }
  0xc3   : > { %v757_v2 = vunpack.c.l.b16 %v479_v21  ;;  %v524_v4 = vsel %vm476_vm1, %v512_v22, %v2231_v26  ;;  %v1780_v26 = vld [vmem:[%s2592_s1 + $0x118] sm:$0xff] }
  0xc4   : > { %v772_v39 = vunpack.c.l.b16 %v524_v4  ;;  %1384 = vmatpush.bf16.msrb.mxu0 %v1780_v26  ;;  %1811 = vmatpush.bf16.msra.mxu3 %v1794_v62 }
  0xc5   : > { %v2350_v5 = vpack.c.b16 %v764_v7, %v757_v2  ;;  %v1791_v7 = vld [vmem:[%s2592_s1 + $0x170] sm:$0xff] }
  0xc6   : > { %448 = vrot.lane.b32.xlu1 %v2174_v53, %s1836_s20  ;;  %446 = vrot.lane.b32.xlu0 %v2155_v38, %s1836_s20  ;;  %v913_v12 = vpack.c.b16 %v772_v39, %v766_v28  ;;  %v2363_v53 = vor.u32 %v415_v14, %v411_v16  ;;  %v653_v38 = vshll.u32 %v2264_v9, 16 }
  0xc7   : > { %1277 = vmatmul.bf16.gmra.mxu0 %v2350_v5  ;;  %625 = vrot.lane.b32.xlu2 %v1993_v43, %s1835_s19 }
  0xc8   : > { %v367_v18 = vpop.permute.xlu1 %366  ;;  %1306 = vmatmul.bf16.gmra.mxu1 %v913_v12  ;;  %v365_v3 = vpop.permute.xlu0 %364  ;;  %1385 = vmatpush.bf16.msrb.mxu0 %v1779_v6  ;;  %v655_v23 = vrot.slane %v653_v38, 1 }
  0xc9   : > { %v351_v34 = vpop.permute.xlu2 %350  ;;  %v542_v8 = vsel %vm450_vm2, %v365_v3, %v2260_v45  ;;  %1804 = vmatpush.bf16.msrb.mxu1 %v1791_v7 }
  0xca   : > { %v656_v9 = vor.u32 %v655_v23, %v651_v37  ;;  %v502_v13 = vsel %vm450_vm2, %v2042_v50, %v351_v34 }
  0xcb   : > { %v514_v44 = vsel %vm459_vm0, %v502_v13, %v351_v34 }
  0xcc   : > { %1386 = vmatpush.bf16.msrb.mxu0 %v1778_v19  ;;  %v528_v15 = vsel %vm476_vm1, %v514_v44, %v367_v18  ;;  %v1786_v44 = vld [vmem:[%s2592_s1 + $0x148] sm:$0xff] }
  0xcd   : > { %v784_v14 = vunpack.c.l.b16 %v528_v15  ;;  %v1785_v15 = vld [vmem:[%s2592_s1 + $0x140] sm:$0xff] }
  0xce   : > { %641 = vrot.lane.b32.xlu1 %v2143_v20, %s1836_s20  ;;  %627 = vrot.lane.b32.xlu0 %v2363_v53, %s1835_s19 }
  0xcf   : > { %643 = vrot.lane.b32.xlu2 %v2271_v11, %s1836_s20  ;;  %v1777_v11 = vld [vmem:[%s2592_s1 + $0x100] sm:$0xff]  ;;  %s2556_s20 = scalar_lea.vmem %s2594_s3, %s1744_s6 }
  0xd0   : > { %v400_v54 = vpop.permute.xlu1 %399  ;;  %v383_v56 = vpop.permute.xlu0 %382  ;;  %1387 = vmatpush.bf16.msrb.mxu0 %v1777_v11 }
  0xd1   : > { %v558_v47 = vsel %vm459_vm0, %v542_v8, %v400_v54  ;;  %v544_v33 = vsel %vm450_vm2, %v367_v18, %v383_v56  ;;  %v630_v51 = vpop.permute.xlu2 %629  ;;  %v1790_v18 = vld [vmem:[%s2592_s1 + $0x168] sm:$0xff]  ;;  %v1789_v8 = vld [vmem:[%s2592_s1 + $0x160] sm:$0xff] }
  0xd2   : > { %v569_v40 = vsel %vm476_vm1, %v558_v47, %v400_v54  ;;  %v560_v55 = vsel %vm459_vm0, %v544_v33, %v2297_v31  ;;  %1805 = vmatpush.bf16.msrb.mxu1 %v1790_v18 }
  0xd3   : > { %v779_v58 = vunpack.c.l.b16 %v569_v40  ;;  %v570_v45 = vsel %vm476_vm1, %v560_v55, %v2297_v31 }
  0xd4   : > { %v785_v61 = vunpack.c.l.b16 %v570_v45  ;;  %1409 = vmatpush.bf16.msra.mxu0 %v1792_v0  ;;  %v1788_v45 = vld [vmem:[%s2592_s1 + $0x158] sm:$0xff]  ;;  %v1787_v0 = vld [vmem:[%s2592_s1 + $0x150] sm:$0xff] }
  0xd6   : > { %659 = vrot.lane.b32.xlu1 %v656_v9, %s1834_s18  ;;  %657 = vrot.lane.b32.xlu0 %v2363_v53, %s1834_s18  ;;  %v920_v63 = vpack.c.b16 %v785_v61, %v779_v58  ;;  %v1793_v9 = vld [vmem:[%s2592_s1 + $0x180] sm:$0xff] }
  0xd7   : > { %1806 = vmatpush.bf16.msrb.mxu1 %v1789_v8  ;;  %1445 = vmatpush.bf16.msrb.mxu2 %v1793_v9 }
  0xd8   : > { %v421_v31 = vpop.permute.xlu1 %420  ;;  %1340 = vmatmul.bf16.gmra.mxu2 %v920_v63  ;;  %v419_v1 = vpop.permute.xlu0 %418  ;;  %1410 = vmatpush.bf16.msra.mxu0 %v1791_v7 }
  0xd9   : > { %v582_v49 = vsel %vm459_vm0, %v1940_v57, %v419_v1  ;;  %v584_v22 = vsel %vm459_vm0, %v1975_v29, %v421_v31  ;;  %v2413_v2 = vpop.permute.xlu2 %370  ;;  %1812 = vmatpush.bf16.msra.mxu3 %v1793_v9 }
  0xda   : > { %v598_v21 = vsel %vm476_vm1, %v582_v49, %v2346_v52 }
  0xdb   : > { %v755_v28 = vunpack.c.l.b16 %v598_v21  ;;  %1807 = vmatpush.bf16.msrb.mxu1 %v1788_v45 }
  0xdc   : > { %1411 = vmatpush.bf16.msra.mxu0 %v1790_v18 }
  0xdf   : > { %1808 = vmatpush.bf16.msrb.mxu1 %v1787_v0 }
  0xe0   : > { %v349_v30 = vpop.permute.xlu1 %348  ;;  %v437_v10 = vpop.permute.xlu0 %436  ;;  %1412 = vmatpush.bf16.msra.mxu0 %v1789_v8 }
  0xe1   : > { %v499_v4 = vsel %vm450_vm2, %v2023_v46, %v349_v30  ;;  %v600_v57 = vsel %vm476_vm1, %v584_v22, %v437_v10  ;;  %v404_v37 = vpop.permute.xlu2 %403 }
  0xe2   : > { %v513_v39 = vsel %vm459_vm0, %v499_v4, %v349_v30  ;;  %v762_v12 = vunpack.c.l.b16 %v600_v57 }
  0xe3   : > { %v526_v16 = vsel %vm476_vm1, %v513_v39, %v365_v3  ;;  %1809 = vmatpush.bf16.msrb.mxu1 %v1786_v44 }
  0xe4   : > { %v909_v26 = vpack.c.b16 %v762_v12, %v755_v28  ;;  %v778_v29 = vunpack.c.l.b16 %v526_v16  ;;  %1413 = vmatpush.bf16.msra.mxu0 %v1788_v45 }
  0xe6   : > { %1359 = vmatmul.bf16.vlgmr.msrb.gmra.mxu3 %v909_v26  ;;  %v919_v38 = vpack.c.b16 %v784_v14, %v778_v29 }
  0xe7   : > { %1810 = vmatpush.bf16.msrb.mxu1 %v1785_v15 }
  0xe8   : > { %v616_v6 = vpop.permute.xlu1 %615  ;;  %1311 = vmatmul.bf16.gmra.mxu1 %v919_v38  ;;  %v614_v19 = vpop.permute.xlu0 %613  ;;  %1414 = vmatpush.bf16.msra.mxu0 %v1787_v0 }
  0xe9   : > { %v663_v34 = vsel %vm450_vm2, %v2346_v52, %v614_v19  ;;  %v665_v23 = vsel %vm450_vm2, %v437_v10, %v616_v6  ;;  %v425_v58 = vpop.permute.xlu2 %424 }
  0xea   : > { %v678_v3 = vsel %vm459_vm0, %v663_v34, %v614_v19  ;;  %v679_v56 = vsel %vm459_vm0, %v665_v23, %v616_v6  ;;  %v588_v28 = vsel %vm459_vm0, %v1927_v48, %v425_v58  ;;  %v758_v48 = vunpack.c.l.b16 %v1978_v32 }
  0xeb   : > { %v687_v54 = vsel %vm476_vm1, %v678_v3, %v630_v51  ;;  %v765_v34 = vunpack.c.l.b16 %v1991_v42 }
  0xec   : > { %v756_v40 = vunpack.c.l.b16 %v687_v54  ;;  %1415 = vmatpush.bf16.msra.mxu0 %v1786_v44 }
  0xf0   : > { %v369_v47 = vpop.permute.xlu1 %368  ;;  %v632_v33 = vpop.permute.xlu0 %631  ;;  %1416 = vmatpush.bf16.msra.mxu0 %v1785_v15 }
  0xf1   : > { %v689_v52 = vsel %vm476_vm1, %v679_v56, %v632_v33  ;;  %v353_v31 = vpop.permute.xlu2 %352  ;;  %v912_v56 = vpack.c.b16 %v765_v34, %v758_v48 }
  0xf2   : > { %v763_v55 = vunpack.c.l.b16 %v689_v52  ;;  %v505_v18 = vsel %vm450_vm2, %v2148_v35, %v353_v31 }
  0xf3   : > { %v515_v19 = vsel %vm459_vm0, %v505_v18, %v353_v31  ;;  %v777_v31 = vunpack.c.l.b16 %v2042_v50 }
  0xf4   : > { %v910_v11 = vpack.c.b16 %v763_v55, %v756_v40  ;;  %v530_v23 = vsel %vm476_vm1, %v515_v19, %v369_v47 }
  0xf5   : > { %v790_v52 = vunpack.c.l.b16 %v530_v23 }
  0xf6   : > { %1388 = vmatmul.bf16.vlgmr.msrb.gmra.mxu0 %v910_v11 }
  0xf8   : > { %v387_v61 = vpop.permute.xlu1 %386  ;;  %v385_v62 = vpop.permute.xlu0 %384 }
  0xf9   : > { %v546_v63 = vsel %vm450_vm2, %v369_v47, %v385_v62  ;;  %v548_v1 = vsel %vm450_vm2, %v2413_v2, %v387_v61  ;;  %v620_v57 = vpop.permute.xlu2 %619 }
  0xfa   : > { %v562_v51 = vsel %vm459_vm0, %v546_v63, %v404_v37 }
  0xfb   : > { %v571_v49 = vsel %vm476_vm1, %v562_v51, %v404_v37  ;;  %v771_v51 = vunpack.c.l.b16 %v2023_v46 }
  0xfc   : > { %v791_v10 = vunpack.c.l.b16 %v571_v49 }
  0xfd   : > { %v918_v50 = vpack.c.b16 %v777_v31, %v771_v51 }
 0x100   : > { %v423_v7 = vpop.permute.xlu1 %422  ;;  %v406_v13 = vpop.permute.xlu0 %405 }
 0x101   : > { %v564_v21 = vsel %vm459_vm0, %v548_v1, %v406_v13  ;;  %v586_v39 = vsel %vm459_vm0, %v1973_v27, %v423_v7  ;;  %v427_v27 = vpop.permute.xlu2 %426 }
 0x102   : > { %v572_v22 = vsel %vm476_vm1, %v564_v21, %v406_v13  ;;  %v590_v1 = vsel %vm459_vm0, %v1943_v60, %v427_v27 }
 0x103   : > { %v797_v30 = vunpack.c.l.b16 %v572_v22 }
 0x105   : > { %v926_v4 = vpack.c.b16 %v797_v30, %v791_v10  ;;  %v2490_v30 = vld [vmem:[%s2593_s2] ss:$0 sm:$0xff] }
 0x107   : > { %1345 = vmatmul.bf16.gmra.mxu2 %v926_v4 }
 0x108   : > { %v441_v12 = vpop.permute.xlu1 %440  ;;  %v439_v16 = vpop.permute.xlu0 %438 }
 0x109   : > { %v604_v14 = vsel %vm476_vm1, %v588_v28, %v441_v12  ;;  %v602_v26 = vsel %vm476_vm1, %v586_v39, %v439_v16  ;;  %v669_v32 = vsel %vm450_vm2, %v441_v12, %v620_v57  ;;  %v445_v61 = vpop.permute.xlu2 %444 }
 0x10a   : > { %v774_v29 = vunpack.c.l.b16 %v604_v14  ;;  %v768_v38 = vunpack.c.l.b16 %v602_v26  ;;  %v681_v47 = vsel %vm459_vm0, %v669_v32, %v620_v57 }
 0x10c   : > { %v915_v6 = vpack.c.b16 %v774_v29, %v768_v38 }
 0x10e   : > { %1364 = vmatmul.bf16.gmra.mxu3 %v915_v6 }
 0x110   : > { %v618_v37 = vpop.permute.xlu1 %617  ;;  %v355_v3 = vpop.permute.xlu0 %354 }
 0x111   : > { %v508_v8 = vsel %vm450_vm2, %v2143_v20, %v355_v3  ;;  %v667_v42 = vsel %vm450_vm2, %v439_v16, %v618_v37  ;;  %v638_v10 = vpop.permute.xlu2 %637 }
 0x112   : > { %v516_v54 = vsel %vm459_vm0, %v508_v8, %v355_v3  ;;  %v680_v9 = vsel %vm459_vm0, %v667_v42, %v618_v37  ;;  %v789_v37 = vunpack.c.l.b16 %v2143_v20 }
 0x113   : > { %v532_v33 = vsel %vm476_vm1, %v516_v54, %v2413_v2 }
 0x114   : > { %v796_v40 = vunpack.c.l.b16 %v532_v33 }
 0x116   : > { %v925_v55 = vpack.c.b16 %v796_v40, %v790_v52 }
 0x117   : > { %1738 = vmatmul.msk.bf16.vlgmr.msrb.gmra.mxu2 %vm450_vm2, %v912_v56 }
 0x118   : > { %v636_v11 = vpop.permute.xlu1 %635  ;;  %1316 = vmatmul.bf16.gmra.mxu1 %v925_v55  ;;  %v634_v58 = vpop.permute.xlu0 %633 }
 0x119   : > { %v693_v45 = vsel %vm476_vm1, %v681_v47, %v636_v11  ;;  %v691_v2 = vsel %vm476_vm1, %v680_v9, %v634_v58  ;;  %v433_v19 = vpop.permute.xlu2 %432 }
 0x11a   : > { %v775_v62 = vunpack.c.l.b16 %v693_v45  ;;  %v769_v63 = vunpack.c.l.b16 %v691_v2 }
 0x11c   : > { %v916_v0 = vpack.c.b16 %v775_v62, %v769_v63 }
 0x11e   : > { %1393 = vmatmul.bf16.gmra.mxu0 %v916_v0 }
 0x120   : > { %v443_v7 = vpop.permute.xlu1 %442  ;;  %v429_v13 = vpop.permute.xlu0 %428 }
 0x121   : > { %v606_v49 = vsel %vm476_vm1, %v590_v1, %v443_v7  ;;  %v592_v44 = vsel %vm459_vm0, %v1989_v41, %v429_v13  ;;  %v626_v42 = vpop.permute.xlu2 %625  ;;  %v1283_v13 = vpop.f32.mrf.mxu3 }
 0x122   : > { %v780_v21 = vunpack.c.l.b16 %v606_v49  ;;  %v608_v22 = vsel %vm476_vm1, %v592_v44, %v445_v61 }
 0x123   : > { %v786_v46 = vunpack.c.l.b16 %v608_v22  ;;  %v1331_v60 = vpop.f32.mrf.mxu2 }
 0x124   : > { %v1273_v15 = vpop.f32.mrf.mxu0 }
 0x125   : > { %v1274_v4 = vadd.f32 %v2490_v30, %v1273_v15  ;;  %v1302_v57 = vpop.f32.mrf.mxu1  ;;  %v921_v28 = vpack.c.b16 %v786_v46, %v780_v21 }
 0x127   : > { %v1303_v39 = vadd.f32 %v1302_v57, %v1274_v4  ;;  %1369 = vmatmul.bf16.gmra.mxu3 %v921_v28  ;;  %1739 = vmatmul.msk.bf16.gmra.mxu2 %vm450_vm2, %v918_v50 }
 0x128   : > { %v624_v41 = vpop.permute.xlu1 %623  ;;  %1422 = vmatmul.bf16.vlgmr.msrb.gmra.mxu1 %v2167_v24  ;;  %v622_v12 = vpop.permute.xlu0 %621  ;;  %v783_v24 = vunpack.c.l.b16 %v2148_v35  ;;  %v596_v35 = vsel %vm459_vm0, %v2363_v53, %v433_v19 }
 0x129   : > { %v671_v16 = vsel %vm450_vm2, %v443_v7, %v622_v12  ;;  %v2496_v14 = vadd.f32 %v1331_v60, %v1303_v39  ;;  %v673_v38 = vsel %vm450_vm2, %v445_v61, %v624_v41  ;;  %v644_v62 = vpop.permute.xlu2 %643  ;;  %v1285_v57 = vpop.f32.mrf.mxu3 }
 0x12a   : > { %v682_v26 = vsel %vm459_vm0, %v671_v16, %v622_v12  ;;  %v683_v3 = vsel %vm459_vm0, %v673_v38, %v624_v41  ;;  %v924_v40 = vpack.c.b16 %v789_v37, %v783_v24 }
 0x12b   : > { %v1333_v48 = vpop.f32.mrf.mxu2  ;;  %v695_v27 = vsel %vm476_vm1, %v682_v26, %v638_v10 }
 0x12c   : > { %v1275_v29 = vpop.f32.mrf.mxu0  ;;  %v781_v52 = vunpack.c.l.b16 %v695_v27 }
 0x12d   : > { %v1276_v18 = vadd.f32 %v2490_v30, %v1275_v29  ;;  %v1304_v6 = vpop.f32.mrf.mxu1 }
 0x12f   : > { %v1305_v34 = vadd.f32 %v1304_v6, %v1276_v18 }
 0x130   : > { %v431_v23 = vpop.permute.xlu1 %430  ;;  %v640_v8 = vpop.permute.xlu0 %639 }
 0x131   : > { %v697_v54 = vsel %vm476_vm1, %v683_v3, %v640_v8  ;;  %v1334_v56 = vadd.f32 %v1333_v48, %v1305_v34  ;;  %v594_v20 = vsel %vm459_vm0, %v1993_v43, %v431_v23 }
 0x132   : > { %v787_v33 = vunpack.c.l.b16 %v697_v54 }
 0x134   : > { %v922_v32 = vpack.c.b16 %v787_v33, %v781_v52 }
 0x136   : > { %1398 = vmatmul.bf16.gmra.mxu0 %v922_v32 }
 0x137   : > { %1740 = vmatmul.msk.bf16.gmra.mxu2 %vm450_vm2, %v924_v40 }
 0x138   : > { %v449_v55 = vpop.permute.xlu1 %448  ;;  %1427 = vmatmul.bf16.gmra.mxu1 %v2274_v25  ;;  %v447_v47 = vpop.permute.xlu0 %446 }
 0x139   : > { %v612_v9 = vsel %vm476_vm1, %v596_v35, %v449_v55  ;;  %v610_v11 = vsel %vm476_vm1, %v594_v20, %v447_v47  ;;  %v675_v61 = vsel %vm450_vm2, %v447_v47, %v626_v42 }
 0x13a   : > { %v798_v58 = vunpack.c.l.b16 %v612_v9  ;;  %v792_v45 = vunpack.c.l.b16 %v610_v11  ;;  %v684_v53 = vsel %vm459_vm0, %v675_v61, %v626_v42  ;;  %v2528_v28 = vpop.f32.mrf.mxu3 }
 0x13c   : > { %v927_v2 = vpack.c.b16 %v798_v58, %v792_v45  ;;  %v1284_v58 = vadd.f32 %v2490_v30, %v1283_v13 }
 0x13e   : > { %1374 = vmatmul.bf16.gmra.mxu3 %v927_v2 }
 0x140   : > { %v642_v63 = vpop.permute.xlu1 %641  ;;  %v628_v0 = vpop.permute.xlu0 %627 }
 0x141   : > { %v699_v43 = vsel %vm476_vm1, %v684_v53, %v642_v63  ;;  %v677_v25 = vsel %vm450_vm2, %v449_v55, %v628_v0 }
 0x142   : > { %v685_v51 = vsel %vm459_vm0, %v677_v25, %v628_v0  ;;  %v793_v1 = vunpack.c.l.b16 %v699_v43  ;;  %v1336_v39 = vpop.f32.mrf.mxu2 }
 0x143   : > { %v701_v31 = vsel %vm476_vm1, %v685_v51, %v644_v62 }
 0x144   : > { %v799_v7 = vunpack.c.l.b16 %v701_v31  ;;  %v1278_v18 = vpop.f32.mrf.mxu0 }
 0x145   : > { %v1307_v16 = vpop.f32.mrf.mxu1  ;;  %v1279_v23 = vadd.f32 %v2490_v30, %v1278_v18 }
 0x146   : > { %v928_v49 = vpack.c.b16 %v799_v7, %v793_v1  ;;  %v1286_v1 = vadd.f32 %v2490_v30, %v1285_v57 }
 0x148   : > { %v660_v44 = vpop.permute.xlu1 %659  ;;  %1403 = vmatmul.bf16.gmra.mxu0 %v928_v49  ;;  %v658_v21 = vpop.permute.xlu0 %657 }
 0x149   : > { %v707_v22 = vsel %vm459_vm0, %v2244_v59, %v660_v44  ;;  %v705_v46 = vsel %vm459_vm0, %v2150_v36, %v658_v21  ;;  %v2531_v59 = vpop.f32.mrf.mxu3 }
 0x14a   : > { %v709_v50 = vsel %vm476_vm1, %v707_v22, %v660_v44  ;;  %v708_v10 = vsel %vm476_vm1, %v705_v46, %v658_v21  ;;  %v1338_v12 = vpop.f32.mrf.mxu2 }
 0x14b   : > { %v800_v15 = vunpack.c.l.b16 %v709_v50  ;;  %v794_v60 = vunpack.c.l.b16 %v708_v10 }
 0x14c   : > { %v1280_v48 = vpop.f32.mrf.mxu0 }
 0x14d   : > { %v929_v4 = vpack.c.b16 %v800_v15, %v794_v60  ;;  %v1281_v40 = vadd.f32 %v2490_v30, %v1280_v48 }
 0x14e   : > { %1741 = vmatmul.msk.bf16.vlgmr.msra.gmra.mxu3 %vm450_vm2, %v2290_v17  ;;  %v1309_v17 = vpop.f32.mrf.mxu1 }
 0x14f   : > { %1432 = vmatmul.bf16.gmra.mxu1 %v929_v4  ;;  %v1310_v55 = vadd.f32 %v1309_v17, %v1281_v40  ;;  %v1289_v17 = vadd.f32 %v2490_v30, %v2528_v28 }
 0x151   : > { %v1339_v45 = vadd.f32 %v1338_v12, %v1310_v55 }
 0x158   : > { %1417 = vmatmul.bf16.vlgmr.msra.gmra.mxu0 %v2350_v5 }
 0x15b   : > { %v1341_v38 = vpop.f32.mrf.mxu2 }
 0x163   : > { %v1343_v6 = vpop.f32.mrf.mxu2 }
 0x165   : > { %v1312_v19 = vpop.f32.mrf.mxu1 }
 0x166   : > { %v1313_v62 = vadd.f32 %v1312_v19, %v1284_v58 }
 0x168   : > { %v1342_v25 = vadd.f32 %v1341_v38, %v1313_v62 }
 0x169   : > { %v1360_v36 = vpop.f32.mrf.mxu3 }
 0x16a   : > { %v2534_v41 = vadd.f32 %v1360_v36, %v2496_v14 }
 0x16d   : > { %v1314_v5 = vpop.f32.mrf.mxu1 }
 0x16e   : > { %v1315_v44 = vadd.f32 %v1314_v5, %v1286_v1  ;;  %v1291_v5 = vadd.f32 %v2490_v30, %v2531_v59 }
 0x170   : > { %v1344_v50 = vadd.f32 %v1343_v6, %v1315_v44 }
 0x171   : > { %v1362_v26 = vpop.f32.mrf.mxu3 }
 0x172   : > { %v2536_v29 = vadd.f32 %v1362_v26, %v1334_v56  ;;  %v1308_v56 = vadd.f32 %v1307_v16, %v1279_v23 }
 0x173   : > { %v2540_v27 = vpop.f32.mrf.mxu0 }
 0x174   : > { %v1337_v32 = vadd.f32 %v1336_v39, %v1308_v56 }
 0x17b   : > { %v2544_v37 = vpop.f32.mrf.mxu0 }
 0x18a   : > { %v2538_v34 = vpop.f32.mrf.mxu2 }
 0x191   : > { %v1365_v8 = vpop.f32.mrf.mxu3 }
 0x192   : > { %v2542_v24 = vpop.f32.mrf.mxu2  ;;  %v1366_v42 = vadd.f32 %v1365_v8, %v1337_v32 }
 0x195   : > { %v1317_v14 = vpop.f32.mrf.mxu1 }
 0x196   : > { %v1318_v6 = vadd.f32 %v1317_v14, %v1289_v17  ;;  %v1390_v14 = vadd.f32 %v2540_v27, %v2534_v41 }
 0x198   : > { %v1347_v48 = vadd.f32 %v2538_v34, %v1318_v6 }
 0x199   : > { %v1367_v20 = vpop.f32.mrf.mxu3 }
 0x19a   : > { %v2546_v3 = vpop.f32.mrf.mxu2  ;;  %v1368_v63 = vadd.f32 %v1367_v20, %v1339_v45 }
 0x19b   : > { %v1394_v33 = vpop.f32.mrf.mxu0 }
 0x19c   : > { %v1395_v47 = vadd.f32 %v1394_v33, %v1366_v42 }
 0x19d   : > { %v1319_v54 = vpop.f32.mrf.mxu1 }
 0x19e   : > { %v1320_v33 = vadd.f32 %v1319_v54, %v1291_v5 }
 0x1a0   : > { %v1349_v28 = vadd.f32 %v2542_v24, %v1320_v33  ;;  %v1392_v24 = vadd.f32 %v2544_v37, %v2536_v29 }
 0x1a2   : > { %v2549_v52 = vpop.f32.mrf.mxu2 }
 0x1a3   : > { %v1396_v2 = vpop.f32.mrf.mxu0 }
 0x1a4   : > { %v1397_v43 = vadd.f32 %v1396_v2, %v1368_v63 }
 0x1a5   : > { %v1423_v35 = vpop.f32.mrf.mxu1 }
 0x1a6   : > { %v1424_v9 = vadd.f32 %v1423_v35, %v1395_v47 }
 0x1aa   : > { %v1452_v11 = vpop.f32.mrf.mxu2  ;;  %v1370_v0 = vpop.f32.mrf.mxu3 }
 0x1ab   : > { %v1453_v61 = vadd.f32 %v1452_v11, %v1424_v9  ;;  %v1371_v7 = vadd.f32 %v1370_v0, %v1342_v25 }
 0x1ad   : > { %1469 = vst.msk [vmem:[%s2556_s20 + $0x10] sm:$0xff] %vm450_vm2, %v1453_v61  ;;  %v1425_v53 = vpop.f32.mrf.mxu1 }
 0x1ae   : > { %v1426_v51 = vadd.f32 %v1425_v53, %v1397_v43 }
 0x1b2   : > { %v1454_v31 = vpop.f32.mrf.mxu2  ;;  %v1372_v46 = vpop.f32.mrf.mxu3 }
 0x1b3   : > { %v1455_v49 = vadd.f32 %v1454_v31, %v1426_v51  ;;  %v1399_v13 = vpop.f32.mrf.mxu0  ;;  %v1373_v60 = vadd.f32 %v1372_v46, %v1344_v50 }
 0x1b4   : > { %v1400_v21 = vadd.f32 %v1399_v13, %v1371_v7 }
 0x1b5   : > { %1470 = vst.msk [vmem:[%s2556_s20 + $0x18] sm:$0xff] %vm450_vm2, %v1455_v49  ;;  %v1428_v22 = vpop.f32.mrf.mxu1 }
 0x1b6   : > { %v1429_v10 = vadd.f32 %v1428_v22, %v1400_v21 }
 0x1ba   : > { %v1457_v15 = vpop.f32.mrf.mxu2 }
 0x1bb   : > { %v1458_v4 = vadd.f32 %v1457_v15, %v1429_v10  ;;  %v1401_v39 = vpop.f32.mrf.mxu0 }
 0x1bc   : > { %v1402_v36 = vadd.f32 %v1401_v39, %v1373_v60 }
 0x1bd   : > { %1471 = vst.msk [vmem:[%s2556_s20 + $0x20] sm:$0xff] %vm450_vm2, %v1458_v4  ;;  %v1430_v57 = vpop.f32.mrf.mxu1 }
 0x1be   : > { %v1431_v12 = vadd.f32 %v1430_v57, %v1402_v36 }
 0x1c1   : > { %v1375_v16 = vpop.f32.mrf.mxu3 }
 0x1c2   : > { %v1459_v26 = vpop.f32.mrf.mxu2  ;;  %v1376_v23 = vadd.f32 %v1375_v16, %v1347_v48 }
 0x1c3   : > { %v1460_v38 = vadd.f32 %v1459_v26, %v1431_v12 }
 0x1c5   : > { %1472 = vst.msk [vmem:[%s2556_s20 + $0x28] sm:$0xff] %vm450_vm2, %v1460_v38  ;;  %v1404_v18 = vpop.f32.mrf.mxu0 }
 0x1c6   : > { %v1405_v40 = vadd.f32 %v1404_v18, %v1376_v23 }
 0x1c9   : > { %v1377_v19 = vpop.f32.mrf.mxu3 }
 0x1ca   : > { %v1378_v20 = vadd.f32 %v1377_v19, %v1349_v28 }
 0x1cc   : > { %v1433_v8 = vpop.f32.mrf.mxu1 }
 0x1cd   : > { %v1406_v56 = vpop.f32.mrf.mxu0  ;;  %v1434_v32 = vadd.f32 %v1433_v8, %v1405_v40 }
 0x1ce   : > { %v1407_v34 = vadd.f32 %v1406_v56, %v1378_v20 }
 0x1d1   : > { %v1462_v42 = vpop.f32.mrf.mxu3 }
 0x1d2   : > { %v1463_v35 = vadd.f32 %v1462_v42, %v1434_v32 }
 0x1d4   : > { %1473 = vst.msk [vmem:[%s2556_s20 + $0x30] sm:$0xff] %vm450_vm2, %v1463_v35  ;;  %v1435_v30 = vpop.f32.mrf.mxu1 }
 0x1d5   : > { %v1418_v59 = vpop.f32.mrf.mxu0  ;;  %v1436_v54 = vadd.f32 %v1435_v30, %v1407_v34 }
 0x1d6   : > { %v1419_v55 = vadd.f32 %v1418_v59, %v1390_v14 }
 0x1d8   : > { %v1448_v47 = vadd.f32 %v2546_v3, %v1419_v55 }
 0x1d9   : > { %v1464_v9 = vpop.f32.mrf.mxu3 }
 0x1da   : > { %1467 = vst.msk [vmem:[%s2556_s20] sm:$0xff] %vm450_vm2, %v1448_v47  ;;  %v1465_v11 = vadd.f32 %v1464_v9, %v1436_v54 }
 0x1dc   : > { %1474 = vst.msk [vmem:[%s2556_s20 + $0x38] sm:$0xff] %vm450_vm2, %v1465_v11 }
 0x1dd   : > { %v1420_v41 = vpop.f32.mrf.mxu0 }
 0x1de   : > { %v1421_v27 = vadd.f32 %v1420_v41, %v1392_v24 }
 0x1e0   : > { %v1450_v58 = vadd.f32 %v2549_v52, %v1421_v27 }
 0x1e2   : > { %1468 = vst.msk [vmem:[%s2556_s20 + $0x8] sm:$0xff] %vm450_vm2, %v1450_v58 }
 0x1e3 PF: > { %s13_s12 = sadd.s32 1, %s1832_s12  }
 0x1e4   : > { %p10_p4 = scmp.ge.s32.totalorder %s13_s12, 4  }
 0x1e6   :  { %12 = sbr.rel (!%p10_p4) target bundleno = 1 (0x1), region = 62 }

// kernel: feature_extraction_forward.5
= control target key start
LH: loop header
LB: loop body
LE: loop exit
PB: predicated region body
PF: predicated region fallthrough
CT: control target
= control target key end

     0   :  { %10 = vsyncpa [#allocation3], 0  ;;  %s8507_s0 = inlined_call_operand.vmem [shape: f32[2,8,8,32], index: 0, kind: input, shape index: {}]   ;;  %s8508_s1 = inlined_call_operand.vmem [shape: bf16[6,288,32], index: 1, kind: input, shape index: {}]   ;;  %s8509_s2 = inlined_call_operand.vmem [shape: f32[6,1,32], index: 2, kind: input, shape index: {}]   ;;  %s8510_s3 = inlined_call_operand.vmem [shape: bf16[288,32], index: 3, kind: input, shape index: {}]   ;;  %s8511_s4 = inlined_call_operand.vmem [shape: f32[1,32], index: 4, kind: input, shape index: {}]   ;;  %s8512_s5 = inlined_call_operand.hbm [shape: f32[2,8,8,32], index: 5, kind: output, shape index: {}]  }
   0x1   :  { %12 = vsyncpa [#allocation3 + $0x1], 0  ;;  %s6232_s18 = smov 0   ;;  %s6234_s19 = smov 0  }
   0x2   :  { %s6236_s20 = smov 0   ;;  %s6238_s21 = smov 0  }
   0x3 LB: > { %s6253_s22 = sadd.s32 4294967295, %s6194_s21   ;;  %s5221_s23 = sadd.s32 4294967294, %s6194_s21   ;;  %s6194_s21 = sphi %s6238_s21, %s8518_s21   ;;  %s6190_s20 = sphi %s6236_s20, %s8517_s20   ;;  %s6186_s19 = sphi %s6234_s19, %s8516_s19   ;;  %s6182_s18 = sphi %s6232_s18, %s8515_s18  }
   0x4   : > { %s6257_s24 = sadd.s32 1, %s6194_s21   ;;  %s135_s25 = sadd.s32 1, %s6190_s20 }
   0x5   : > { %s132_s26 = ssub.s32 %s6194_s21, %s6257_s24  ;;  %p145_p0 = scmp.ne.s32.totalorder %s6190_s20, %s6186_s19 }
   0x6   : > { %p133_p1 = scmp.eq.s32.totalorder %s132_s26, 0  ;;  %p146_p2 = scmp.eq.s32.totalorder %s6253_s22, 1 }
   0x7   : > { %p151_p3 = scmp.ne.s32.totalorder %s6186_s19, %s6182_s18  ;;  %p152_p4 = scmp.eq.s32.totalorder %s5221_s23, 1 }
   0x8   : > { %s6268_s27 = scalar_select %p133_p1, %s6190_s20, %s135_s25  }
   0x9   : > { %p6270_p5 = por %p146_p2, %p145_p0  ;;  %p6274_p6 = por %p152_p4, %p151_p3 }
   0xa   : > { %p5224_p7 = scmp.ge.s32.totalorder %s6194_s21, 1  ;;  %p190_p8 = scmp.lt.s32.totalorder %s6194_s21, 3 }
   0xc   : > { %p191_p9 = pnand %p5224_p7, %p190_p8 }
   0xd   : > { %p218_p10 = scmp.lt.s32.totalorder (!%p191_p9), %s6253_s22, 1  ;;  %s6197_s10 = smov (!%p191_p9), 64  }
   0xe   : > { %194 = sbr.rel (%p191_p9) target bundleno = 2306 (0x902), region = 40  ;;  %s6198_s11 = smov (!%p191_p9), 32  }
   0xf   : > { %s6199_s12 = smov (!%p191_p9), 96   ;;  %s215_s16 = sand.u32 (!%p191_p9), 1, %s6186_s19  }
  0x10   : > { %s5225_s17 = sshll.u32 (!%p191_p9), %s215_s16, 6  ;;  %s6077_s25 = sshll.u32 (!%p191_p9), %s6253_s22, 6 }
  0x11   : > { %s8455_s23 = scalar_lea.vmem (!%p191_p9), [#allocation2], %s5225_s17  ;;  %s6152_s15 = scalar_lea.hbm (!%p191_p9), %s8512_s5, 128 }
  0x12   : > { %s5156_s7 = sshll.u32 (!%p191_p9), %s8455_s23, 4  ;;  %s5157_s7 = int_to_ptr.vmem [resolvable:$true] %s5156_s7 }
  0x13   : > { %v6196_v0 = vmov 0.0|0.0   ;;  %s219_s30 = scalar_select %p218_p10, %s6253_s22, 1  ;;  %vm293_vm0 = vcmask 1040384   ;;  %vm546_vm1 = vcmask 261120   ;;  %vm571_vm2 = vcmask 523264  }
  0x14   : > { %v342_v1 = vunpack.c.l.b16 %v6196_v0  ;;  %vm588_vm3 = vcmask 785408   ;;  %s5144_s22 = scalar_lea.sflag [#allocation3], %s215_s16 }
  0x15   : > { %s5950_s6 = sshll.u32 %s219_s30, 6 }
  0x16   : > { %v6281_v2 = vpack.c.b16 %v342_v1, %v342_v1  ;;  %s6290_s9 = scalar_lea.vmem %s8507_s0, %s5950_s6  ;;  %s5155_s6 = scalar_lea.hbm %s8512_s5, %s6077_s25 }
  0x17   : > { %v6296_v7 = vld [vmem:[%s6290_s9] sm:$0xff]  ;;  %v6299_v8 = vld [vmem:[%s6290_s9 + $0x10] sm:$0xff]  ;;  %v6302_v9 = vld [vmem:[%s6290_s9 + $0x8] sm:$0xff]  ;;  %s5158_s8 = sshll.u32 %s5155_s6, 4  ;;  %s5159_s8 = int_to_ptr.hbm [resolvable:$true] %s5158_s8 }
  0x18   : > { %v437_v3 = vrot.slane %v6281_v2, 1  ;;  %v366_v4 = vshrl.u32 %v6281_v2, 16  ;;  %v368_v5 = vshll.u32 %v6281_v2, 16  ;;  %v277_v10 = vrot.slane %v6296_v7, 7  ;;  %v6308_v13 = vld [vmem:[%s6290_s9 + $0x20] sm:$0xff]  ;;  %v6328_v30 = vld [vmem:[%s6290_s9 + $0x18] sm:$0xff] }
  0x19   : > { %v279_v11 = vrot.slane %v6299_v8, 7  ;;  %v278_v12 = vrot.slane %v6302_v9, 7  ;;  %v281_v15 = vrot.slane %v6308_v13, 7  ;;  %v280_v40 = vrot.slane %v6328_v30, 7  ;;  %v6363_v63 = vld [vmem:[%s6290_s9 + $0x30] sm:$0xff] }
  0x1a   : > { %445 = vrot.lane.b32.xlu1 %v437_v3, %s6197_s10  ;;  %v370_v6 = vrot.slane %v368_v5, 1  ;;  %v294_v16 = vsel %vm293_vm0, 0.0, %v277_v10  ;;  %v302_v17 = vsel %vm293_vm0, %v277_v10, 0.0  ;;  %v6372_v10 = vld [vmem:[%s6290_s9 + $0x28] sm:$0xff] }
  0x1b   : > { %v296_v18 = vsel %vm293_vm0, 0.0, %v279_v11  ;;  %v304_v19 = vsel %vm293_vm0, %v279_v11, 0.0  ;;  %v6319_v20 = vpack.c.bf16 %v294_v16, %v294_v16  ;;  %v312_v21 = vpack.c.bf16 %v302_v17, %v302_v17 }
  0x1c   : > { %v6310_v14 = vor.u32 %v370_v6, %v366_v4  ;;  %v6321_v22 = vpack.c.bf16 %v296_v18, %v296_v18  ;;  %v316_v23 = vpack.c.bf16 %v304_v19, %v304_v19  ;;  %v295_v24 = vsel %vm293_vm0, 0.0, %v278_v12 }
  0x1d   : > { %v303_v25 = vsel %vm293_vm0, %v278_v12, 0.0  ;;  %v343_v26 = vunpack.c.l.b16 %v6319_v20  ;;  %v344_v27 = vunpack.c.l.b16 %v312_v21  ;;  %v6330_v31 = vpack.c.bf16 %v295_v24, %v295_v24 }
  0x1e   : > { %421 = vrot.lane.b32.xlu0 %v6310_v14, %s6198_s11  ;;  %v347_v28 = vunpack.c.l.b16 %v6321_v22  ;;  %v348_v29 = vunpack.c.l.b16 %v316_v23  ;;  %v314_v32 = vpack.c.bf16 %v303_v25, %v303_v25  ;;  %v298_v33 = vsel %vm293_vm0, 0.0, %v281_v15 }
  0x1f   : > { %v6333_v34 = vpack.c.b16 %v344_v27, %v343_v26  ;;  %v463_v36 = vpack.c.b16 %v343_v26, %v343_v26  ;;  %v306_v37 = vsel %vm293_vm0, %v281_v15, 0.0  ;;  %v345_v38 = vunpack.c.l.b16 %v6330_v31 }
  0x20   : > { %v360_v35 = vpack.c.b16 %v348_v29, %v347_v28  ;;  %v346_v39 = vunpack.c.l.b16 %v314_v32  ;;  %v6342_v46 = vpack.c.bf16 %v298_v33, %v298_v33  ;;  %v320_v47 = vpack.c.bf16 %v306_v37, %v306_v37 }
  0x21   : > { %v438_v41 = vrot.slane %v6333_v34, 1  ;;  %v373_v42 = vshrl.u32 %v6333_v34, 16  ;;  %v375_v43 = vshll.u32 %v6333_v34, 16  ;;  %471 = vrot.lane.b32.xlu2 %v463_v36, %s6199_s12  ;;  %v297_v52 = vsel %vm293_vm0, 0.0, %v280_v40  ;;  %v5956_v34 = vld [vmem:[%s8508_s1 + $0x28] sm:$0xff] }
  0x22   : > { %v389_v44 = vshll.u32 %v360_v35, 16  ;;  %v359_v45 = vpack.c.b16 %v346_v39, %v345_v38  ;;  %v387_v49 = vshrl.u32 %v360_v35, 16  ;;  %v305_v53 = vsel %vm293_vm0, %v280_v40, 0.0 }
  0x23   : > { %447 = vrot.lane.b32.xlu1 %v438_v41, %s6197_s10  ;;  %v377_v48 = vrot.slane %v375_v43, 1  ;;  %v6351_v55 = vpack.c.b16 %v345_v38, %v345_v38  ;;  %v351_v57 = vunpack.c.l.b16 %v6342_v46  ;;  %v352_v58 = vunpack.c.l.b16 %v320_v47 }
  0x24   : > { %v391_v50 = vrot.slane %v389_v44, 1  ;;  %v382_v51 = vshll.u32 %v359_v45, 16  ;;  %v380_v56 = vshrl.u32 %v359_v45, 16  ;;  %v6358_v61 = vpack.c.bf16 %v297_v52, %v297_v52 }
  0x25   : > { %v6349_v54 = vor.u32 %v377_v48, %v373_v42  ;;  %v318_v62 = vpack.c.bf16 %v305_v53, %v305_v53  ;;  %v362_v0 = vpack.c.b16 %v352_v58, %v351_v57  ;;  %v283_v6 = vrot.slane %v6363_v63, 7 }
  0x26   : > { %v6356_v59 = vor.u32 %v391_v50, %v387_v49  ;;  %v384_v60 = vrot.slane %v382_v51, 1  ;;  %v349_v4 = vunpack.c.l.b16 %v6358_v61  ;;  %v6374_v11 = vrot.slane %v359_v45, 1 }
  0x27   : > { %423 = vrot.lane.b32.xlu0 %v6349_v54, %s6198_s11  ;;  %v350_v5 = vunpack.c.l.b16 %v318_v62  ;;  %v403_v12 = vshll.u32 %v362_v0, 16  ;;  %v6378_v15 = vpack.c.b16 %v347_v28, %v347_v28  ;;  %v282_v17 = vrot.slane %v6372_v10, 7 }
  0x28   : > { %v6367_v1 = vor.u32 %v384_v60, %v380_v56  ;;  %v300_v18 = vsel %vm293_vm0, 0.0, %v283_v6  ;;  %v308_v19 = vsel %vm293_vm0, %v283_v6, 0.0  ;;  %v6385_v21 = vrot.slane %v360_v35, 1  ;;  %v6419_v60 = vld [vmem:[%s6290_s9 + $0x38] sm:$0xff]  ;;  %s6146_s9 = sshra.s32 %s5159_s8, 4  ;;  %s6147_s9 = int_to_ptr.hbm [resolvable:$true] %s6146_s9 }
  0x29   : > { %473 = vrot.lane.b32.xlu2 %v6351_v55, %s6199_s12  ;;  %v361_v16 = vpack.c.b16 %v350_v5, %v349_v4  ;;  %v401_v23 = vshrl.u32 %v362_v0, 16  ;;  %v405_v24 = vrot.slane %v403_v12, 1  ;;  %v6389_v26 = vpack.c.bf16 %v300_v18, %v300_v18  ;;  %p6153_p0 = scmp.lt.s32.totalorder %s6147_s9, %s8512_s5 }
  0x2a   : > { %v324_v27 = vpack.c.bf16 %v308_v19, %v308_v19  ;;  %v299_v28 = vsel %vm293_vm0, 0.0, %v282_v17  ;;  %v307_v29 = vsel %vm293_vm0, %v282_v17, 0.0  ;;  %v6393_v32 = vpack.c.b16 %v349_v4, %v349_v4 }
  0x2b   : > { %427 = vrot.lane.b32.xlu1 %v6356_v59, %s6198_s11  ;;  %v396_v25 = vshll.u32 %v361_v16, 16  ;;  %v6395_v33 = vor.u32 %v405_v24, %v401_v23  ;;  %v394_v36 = vshrl.u32 %v361_v16, 16  ;;  %v6397_v35 = vpack.c.bf16 %v299_v28, %v299_v28  ;;  %v5958_v24 = vld [vmem:[%s8508_s1 + $0x38] sm:$0xff]  ;;  %v5952_v28 = vld [vmem:[%s8508_s1 + $0x8] sm:$0xff] }
  0x2c   : > { %v355_v38 = vunpack.c.l.b16 %v6389_v26  ;;  %v356_v39 = vunpack.c.l.b16 %v324_v27  ;;  %v322_v40 = vpack.c.bf16 %v307_v29, %v307_v29  ;;  %v6409_v47 = vrot.slane %v361_v16, 1  ;;  %844 = vmatpush.bf16.msra.mxu0 %v5958_v24 }
  0x2d   : > { %v398_v37 = vrot.slane %v396_v25, 1  ;;  %v353_v44 = vunpack.c.l.b16 %v6397_v35  ;;  %v467_v48 = vpack.c.b16 %v351_v57, %v351_v57  ;;  %v6416_v51 = vrot.slane %v362_v0, 1  ;;  %v5957_v25 = vld [vmem:[%s8508_s1 + $0x30] sm:$0xff] }
  0x2e   : > { %v364_v43 = vpack.c.b16 %v356_v39, %v355_v38  ;;  %v354_v45 = vunpack.c.l.b16 %v322_v40  ;;  %v284_v5 = vrot.slane %v6419_v60, 7  ;;  %v469_v17 = vpack.c.b16 %v355_v38, %v355_v38 }
  0x2f   : > { %425 = vrot.lane.b32.xlu0 %v6367_v1, %s6198_s11  ;;  %v6406_v42 = vor.u32 %v398_v37, %v394_v36  ;;  %v468_v58 = vpack.c.b16 %v353_v44, %v353_v44  ;;  %v5951_v36 = vld [vmem:[%s8508_s1] sm:$0xff] }
  0x30   : > { %v417_v49 = vshll.u32 %v364_v43, 16  ;;  %v363_v50 = vpack.c.b16 %v354_v45, %v353_v44  ;;  %v415_v52 = vshrl.u32 %v364_v43, 16  ;;  %v301_v0 = vsel %vm293_vm0, 0.0, %v284_v5  ;;  %845 = vmatpush.bf16.msra.mxu0 %v5957_v25 }
  0x31   : > { %449 = vrot.lane.b32.xlu2 %v6374_v11, %s6197_s10  ;;  %v325_v16 = vpack.c.bf16 %v301_v0, %v301_v0  ;;  %v6439_v19 = vrot.slane %v364_v43, 1  ;;  %v309_v27 = vsel %vm293_vm0, %v284_v5, 0.0 }
  0x32   : > { %v419_v53 = vrot.slane %v417_v49, 1  ;;  %v410_v56 = vshll.u32 %v363_v50, 16  ;;  %v408_v57 = vshrl.u32 %v363_v50, 16  ;;  %v6432_v12 = vrot.slane %v363_v50, 1 }
  0x33   : > { %475 = vrot.lane.b32.xlu1 %v6378_v15, %s6199_s12  ;;  %v462_v18 = vunpack.c.l.b16 %v325_v16  ;;  %v326_v29 = vpack.c.bf16 %v309_v27, %v309_v27 }
  0x34   : > { %v6423_v62 = vor.u32 %v419_v53, %v415_v52  ;;  %v412_v4 = vrot.slane %v410_v56, 1  ;;  %846 = vmatpush.bf16.msra.mxu0 %v5956_v34 }
  0x35   : > { %v470_v23 = vpack.c.b16 %v462_v18, %v462_v18  ;;  %v488_v37 = vunpack.c.l.b16 %v326_v29 }
  0x36   : > { %v6430_v6 = vor.u32 %v412_v4, %v408_v57 }
  0x37   : > { %451 = vrot.lane.b32.xlu0 %v6385_v21, %s6197_s10  ;;  %v6498_v38 = vpack.c.b16 %v488_v37, %v462_v18 }
  0x39   : > { %477 = vrot.lane.b32.xlu2 %v6393_v32, %s6199_s12  ;;  %v497_v40 = vrot.slane %v6498_v38, 1  ;;  %v493_v43 = vshll.u32 %v6498_v38, 16  ;;  %v491_v45 = vshrl.u32 %v6498_v38, 16 }
  0x3b   : > { %431 = vrot.lane.b32.xlu1 %v6395_v33, %s6198_s11 }
  0x3f   : > { %429 = vrot.lane.b32.xlu0 %v6406_v42, %s6198_s11 }
  0x41   : > { %453 = vrot.lane.b32.xlu2 %v6409_v47, %s6197_s10 }
  0x43   : > { %479 = vrot.lane.b32.xlu1 %v467_v48, %s6199_s12 }
  0x47   : > { %455 = vrot.lane.b32.xlu0 %v6416_v51, %s6197_s10 }
  0x49   : > { %481 = vrot.lane.b32.xlu2 %v468_v58, %s6199_s12 }
  0x4b   : > { %435 = vrot.lane.b32.xlu1 %v6423_v62, %s6198_s11 }
  0x4f   : > { %433 = vrot.lane.b32.xlu0 %v6430_v6, %s6198_s11 }
  0x51   : > { %457 = vrot.lane.b32.xlu2 %v6432_v12, %s6197_s10 }
  0x53   : > { %483 = vrot.lane.b32.xlu1 %v469_v17, %s6199_s12 }
  0x57   : > { %459 = vrot.lane.b32.xlu0 %v6439_v19, %s6197_s10 }
  0x59   : > { %485 = vrot.lane.b32.xlu2 %v470_v23, %s6199_s12 }
  0x5b   : > { %500 = vrot.lane.b32.xlu1 %v6374_v11, %s6198_s11 }
  0x5f   : > { %498 = vrot.lane.b32.xlu0 %v438_v41, %s6198_s11  ;;  %v5955_v41 = vld [vmem:[%s8508_s1 + $0x20] sm:$0xff] }
  0x60   : > { %847 = vmatpush.bf16.msra.mxu0 %v5955_v41  ;;  %v5966_v41 = vld [vmem:[%s8508_s1 + $0x78] sm:$0xff] }
  0x61   : > { %514 = vrot.lane.b32.xlu2 %v6351_v55, %s6197_s10  ;;  %v5954_v55 = vld [vmem:[%s8508_s1 + $0x18] sm:$0xff]  ;;  %873 = vmatpush.bf16.msra.mxu1 %v5966_v41 }
  0x63   : > { %530 = vrot.lane.b32.xlu1 %v6367_v1, %s6199_s12 }
  0x64   : > { %848 = vmatpush.bf16.msra.mxu0 %v5954_v55 }
  0x67   : > { %516 = vrot.lane.b32.xlu0 %v6378_v15, %s6197_s10  ;;  %v5953_v15 = vld [vmem:[%s8508_s1 + $0x10] sm:$0xff] }
  0x68   : > { %849 = vmatpush.bf16.msra.mxu0 %v5953_v15 }
  0x69   : > { %532 = vrot.lane.b32.xlu2 %v6356_v59, %s6199_s12 }
  0x6b   : > { %504 = vrot.lane.b32.xlu1 %v6409_v47, %s6198_s11 }
  0x6c   : > { %850 = vmatpush.bf16.msra.mxu0 %v5952_v28  ;;  %v5964_v28 = vld [vmem:[%s8508_s1 + $0x68] sm:$0xff] }
  0x6f   : > { %502 = vrot.lane.b32.xlu0 %v6385_v21, %s6198_s11 }
  0x70   : > { %851 = vmatpush.bf16.msra.mxu0 %v5951_v36 }
  0x71   : > { %518 = vrot.lane.b32.xlu2 %v6393_v32, %s6197_s10 }
  0x73   : > { %534 = vrot.lane.b32.xlu1 %v6406_v42, %s6199_s12 }
  0x77   : > { %520 = vrot.lane.b32.xlu0 %v467_v48, %s6197_s10  ;;  %v495_v48 = vrot.slane %v493_v43, 1 }
  0x79   : > { %536 = vrot.lane.b32.xlu2 %v6395_v33, %s6199_s12  ;;  %v6513_v52 = vor.u32 %v495_v48, %v491_v45 }
  0x7b   : > { %508 = vrot.lane.b32.xlu1 %v6432_v12, %s6198_s11  ;;  %v472_v32 = vpop.permute.xlu2 %471 }
  0x7f   : > { %506 = vrot.lane.b32.xlu0 %v6416_v51, %s6198_s11 }
  0x81   : > { %522 = vrot.lane.b32.xlu2 %v468_v58, %s6197_s10 }
  0x83   : > { %538 = vrot.lane.b32.xlu1 %v6430_v6, %s6199_s12  ;;  %v474_v39 = vpop.permute.xlu2 %473 }
  0x87   : > { %524 = vrot.lane.b32.xlu0 %v469_v17, %s6197_s10 }
  0x89   : > { %540 = vrot.lane.b32.xlu2 %v6423_v62, %s6199_s12 }
  0x8b   : > { %512 = vrot.lane.b32.xlu1 %v497_v40, %s6198_s11  ;;  %v450_v49 = vpop.permute.xlu2 %449 }
  0x8c   : > { %v446_v44 = vpop.permute.xlu1 %445 }
  0x8f   : > { %510 = vrot.lane.b32.xlu0 %v6439_v19, %s6198_s11 }
  0x90   : > { %v422_v50 = vpop.permute.xlu0 %421 }
  0x91   : > { %526 = vrot.lane.b32.xlu2 %v470_v23, %s6197_s10  ;;  %v549_v56 = vsel %vm546_vm1, 0.0|0.0, %v422_v50 }
  0x92   : > { %v6520_v57 = vsel %vm571_vm2, %v549_v56, %v446_v44 }
  0x93   : > { %542 = vrot.lane.b32.xlu1 %v6513_v52, %s6199_s12  ;;  %v478_v53 = vpop.permute.xlu2 %477  ;;  %v590_v5 = vsel %vm588_vm3, %v6520_v57, %v472_v32 }
  0x94   : > { %v677_v23 = vunpack.c.l.b16 %v590_v5  ;;  %v5960_v5 = vld [vmem:[%s8508_s1 + $0x48] sm:$0xff] }
  0x95   : > { %v448_v58 = vpop.permute.xlu1 %447 }
  0x97   : > { %528 = vrot.lane.b32.xlu0 %v6281_v2, %s6197_s10 }
  0x99   : > { %v424_v4 = vpop.permute.xlu0 %423  ;;  %544 = vrot.lane.b32.xlu2 %v6310_v14, %s6199_s12 }
  0x9a   : > { %v552_v0 = vsel %vm546_vm1, %v6319_v20, %v424_v4  ;;  %v5965_v20 = vld [vmem:[%s8508_s1 + $0x70] sm:$0xff] }
  0x9b   : > { %v575_v16 = vsel %vm571_vm2, %v552_v0, %v448_v58  ;;  %v454_v17 = vpop.permute.xlu2 %453  ;;  %874 = vmatpush.bf16.msra.mxu1 %v5965_v20  ;;  %v5967_v20 = vld [vmem:[%s8508_s1 + $0x80] sm:$0xff] }
  0x9c   : > { %v592_v18 = vsel %vm588_vm3, %v575_v16, %v474_v39 }
  0x9d   : > { %v680_v24 = vunpack.c.l.b16 %v592_v18  ;;  %v428_v25 = vpop.permute.xlu1 %427 }
  0x9e   : > { %v558_v32 = vsel %vm546_vm1, %v6321_v22, %v428_v25  ;;  %v5962_v22 = vld [vmem:[%s8508_s1 + $0x58] sm:$0xff] }
  0x9f   : > { %v704_v34 = vpack.c.b16 %v680_v24, %v677_v23  ;;  %875 = vmatpush.bf16.msra.mxu1 %v5964_v28 }
  0xa1   : > { %852 = vmatmul.bf16.vlgmr.msra.gmra.mxu0 %v704_v34  ;;  %v426_v14 = vpop.permute.xlu0 %425 }
  0xa2   : > { %v555_v15 = vsel %vm546_vm1, %v6330_v31, %v426_v14  ;;  %v5963_v31 = vld [vmem:[%s8508_s1 + $0x60] sm:$0xff] }
  0xa3   : > { %v482_v55 = vpop.permute.xlu2 %481  ;;  %v577_v29 = vsel %vm571_vm2, %v555_v15, %v450_v49  ;;  %876 = vmatpush.bf16.msra.mxu1 %v5963_v31 }
  0xa5   : > { %v476_v27 = vpop.permute.xlu1 %475 }
  0xa6   : > { %v594_v36 = vsel %vm588_vm3, %v577_v29, %v476_v27  ;;  %v685_v27 = vunpack.c.l.b16 %v6409_v47 }
  0xa7   : > { %v683_v44 = vunpack.c.l.b16 %v594_v36  ;;  %877 = vmatpush.bf16.msra.mxu1 %v5962_v22 }
  0xa9   : > { %v452_v37 = vpop.permute.xlu0 %451 }
  0xaa   : > { %v579_v39 = vsel %vm571_vm2, %v558_v32, %v452_v37 }
  0xab   : > { %v596_v43 = vsel %vm588_vm3, %v579_v39, %v478_v53  ;;  %v458_v50 = vpop.permute.xlu2 %457  ;;  %v5961_v53 = vld [vmem:[%s8508_s1 + $0x50] sm:$0xff] }
  0xac   : > { %v686_v45 = vunpack.c.l.b16 %v596_v43  ;;  %878 = vmatpush.bf16.msra.mxu1 %v5961_v53 }
  0xad   : > { %v432_v48 = vpop.permute.xlu1 %431 }
  0xae   : > { %v707_v49 = vpack.c.b16 %v686_v45, %v683_v44  ;;  %v564_v18 = vsel %vm546_vm1, %v6342_v46, %v432_v48 }
  0xb0   : > { %879 = vmatpush.bf16.msra.mxu1 %v5960_v5  ;;  %v694_v5 = vunpack.c.l.b16 %v6439_v19 }
  0xb1   : > { %857 = vmatmul.bf16.gmra.mxu0 %v707_v49  ;;  %v430_v56 = vpop.permute.xlu0 %429 }
  0xb2   : > { %v561_v58 = vsel %vm546_vm1, %v6358_v61, %v430_v56  ;;  %v5968_v61 = vld [vmem:[%s8508_s1 + $0x88] sm:$0xff] }
  0xb3   : > { %v581_v0 = vsel %vm571_vm2, %v561_v58, %v454_v17  ;;  %v486_v16 = vpop.permute.xlu2 %485  ;;  %908 = vmatpush.bf16.msrb.mxu0 %v5968_v61  ;;  %v5959_v17 = vld [vmem:[%s8508_s1 + $0x40] sm:$0xff]  ;;  %6078 = vmatpush.bf16.msra.mxu2 %v5968_v61 }
  0xb4   : > { %880 = vmatpush.bf16.msra.mxu1 %v5959_v17 }
  0xb5   : > { %v480_v4 = vpop.permute.xlu1 %479 }
  0xb6   : > { %v598_v23 = vsel %vm588_vm3, %v581_v0, %v480_v4  ;;  %v691_v4 = vunpack.c.l.b16 %v6432_v12  ;;  %v682_v0 = vunpack.c.l.b16 %v6385_v21 }
  0xb7   : > { %v689_v41 = vunpack.c.l.b16 %v598_v23  ;;  %909 = vmatpush.bf16.msrb.mxu0 %v5967_v20  ;;  %6079 = vmatpush.bf16.msra.mxu2 %v5967_v20 }
  0xb8   : > { %v712_v61 = vpack.c.b16 %v694_v5, %v691_v4 }
  0xb9   : > { %v456_v24 = vpop.permute.xlu0 %455 }
  0xba   : > { %v583_v25 = vsel %vm571_vm2, %v564_v18, %v456_v24 }
  0xbb   : > { %v600_v34 = vsel %vm588_vm3, %v583_v25, %v482_v55  ;;  %v688_v55 = vunpack.c.l.b16 %v6416_v51  ;;  %v515_v29 = vpop.permute.xlu2 %514 }
  0xbc   : > { %v692_v46 = vunpack.c.l.b16 %v600_v34 }
  0xbd   : > { %v436_v14 = vpop.permute.xlu1 %435  ;;  %v709_v32 = vpack.c.b16 %v688_v55, %v685_v27 }
  0xbe   : > { %v710_v15 = vpack.c.b16 %v692_v46, %v689_v41  ;;  %v570_v43 = vsel %vm546_vm1, %v6389_v26, %v436_v14  ;;  %v6607_v14 = vunpack.c.l.b16 %v437_v3 }
  0xbf   : > { %5301 = vmatmul.msk.bf16.vlgmr.msra.gmra.mxu2 %vm546_vm1, %v709_v32 }
  0xc1   : > { %862 = vmatmul.bf16.gmra.mxu0 %v710_v15  ;;  %v434_v28 = vpop.permute.xlu0 %433  ;;  %v697_v15 = vunpack.c.l.b16 %v497_v40 }
  0xc2   : > { %v567_v36 = vsel %vm546_vm1, %v6397_v35, %v434_v28 }
  0xc3   : > { %v585_v39 = vsel %vm571_vm2, %v567_v36, %v458_v50  ;;  %v533_v49 = vpop.permute.xlu2 %532 }
  0xc5   : > { %v484_v37 = vpop.permute.xlu1 %483 }
  0xc6   : > { %v602_v31 = vsel %vm588_vm3, %v585_v39, %v484_v37 }
  0xc7   : > { %v695_v45 = vunpack.c.l.b16 %v602_v31 }
  0xc9   : > { %v460_v47 = vpop.permute.xlu0 %459 }
  0xca   : > { %v587_v51 = vsel %vm571_vm2, %v570_v43, %v460_v47 }
  0xcb   : > { %v604_v44 = vsel %vm588_vm3, %v587_v51, %v486_v16  ;;  %v519_v58 = vpop.permute.xlu2 %518  ;;  %v679_v16 = vunpack.c.l.b16 %v6374_v11 }
  0xcc   : > { %v698_v48 = vunpack.c.l.b16 %v604_v44 }
  0xcd   : > { %v501_v22 = vpop.permute.xlu1 %500  ;;  %v706_v19 = vpack.c.b16 %v682_v0, %v679_v16 }
  0xce   : > { %v713_v56 = vpack.c.b16 %v698_v48, %v695_v45  ;;  %v610_v18 = vsel %vm546_vm1, %v6367_v1, %v501_v22 }
  0xcf   : > { %5302 = vmatmul.msk.bf16.gmra.mxu2 %vm546_vm1, %v712_v61 }
  0xd1   : > { %867 = vmatmul.bf16.gmra.mxu0 %v713_v56  ;;  %v499_v35 = vpop.permute.xlu0 %498 }
  0xd2   : > { %v607_v50 = vsel %vm546_vm1, %v6349_v54, %v499_v35 }
  0xd3   : > { %v630_v26 = vsel %vm571_vm2, %v607_v50, %v515_v29  ;;  %v537_v11 = vpop.permute.xlu2 %536 }
  0xd5   : > { %v531_v53 = vpop.permute.xlu1 %530 }
  0xd6   : > { %v646_v23 = vsel %vm588_vm3, %v630_v26, %v531_v53 }
  0xd7   : > { %v678_v34 = vunpack.c.l.b16 %v646_v23 }
  0xd9   : > { %v517_v24 = vpop.permute.xlu0 %516 }
  0xda   : > { %v632_v54 = vsel %vm571_vm2, %v610_v18, %v517_v24 }
  0xdb   : > { %v648_v25 = vsel %vm588_vm3, %v632_v54, %v533_v49  ;;  %v523_v32 = vpop.permute.xlu2 %522 }
  0xdc   : > { %v681_v17 = vunpack.c.l.b16 %v648_v25 }
  0xdd   : > { %v505_v12 = vpop.permute.xlu1 %504 }
  0xde   : > { %v705_v21 = vpack.c.b16 %v681_v17, %v678_v34  ;;  %v616_v27 = vsel %vm546_vm1, %v6406_v42, %v505_v12 }
  0xe0   : > { %881 = vmatmul.bf16.vlgmr.msra.gmra.mxu1 %v705_v21 }
  0xe1   : > { %v503_v41 = vpop.permute.xlu0 %502  ;;  %5300 = vmatmul.msk.bf16.vlgmr.msrb.gmra.mxu0 %vm546_vm1, %v706_v19 }
  0xe2   : > { %v613_v1 = vsel %vm546_vm1, %v6356_v59, %v503_v41  ;;  %v715_v59 = vpack.c.b16 %v6607_v14, %v697_v15 }
  0xe3   : > { %v634_v20 = vsel %vm571_vm2, %v613_v1, %v519_v58  ;;  %v541_v43 = vpop.permute.xlu2 %540  ;;  %v5985_v1 = vld [vmem:[%s8508_s1 + $0x110] sm:$0xff] }
  0xe4   : > { %5303 = vmatmul.msk.bf16.gmra.mxu2 %vm546_vm1, %v715_v59 }
  0xe5   : > { %v535_v46 = vpop.permute.xlu1 %534 }
  0xe6   : > { %v650_v55 = vsel %vm588_vm3, %v634_v20, %v535_v46  ;;  %v6656_v46 = vld [vmem:[%s8509_s2] ss:$0 sm:$0xff] }
  0xe7   : > { %v684_v3 = vunpack.c.l.b16 %v650_v55 }
  0xe9   : > { %v521_v28 = vpop.permute.xlu0 %520 }
  0xea   : > { %v636_v29 = vsel %vm571_vm2, %v616_v27, %v521_v28 }
  0xeb   : > { %v652_v2 = vsel %vm588_vm3, %v636_v29, %v537_v11  ;;  %v527_v50 = vpop.permute.xlu2 %526  ;;  %v5986_v11 = vld [vmem:[%s8508_s1 + $0x118] sm:$0xff] }
  0xec   : > { %v687_v36 = vunpack.c.l.b16 %v652_v2  ;;  %1609 = vmatpush.bf16.msra.mxu0 %v5986_v11 }
  0xed   : > { %v509_v37 = vpop.permute.xlu1 %508 }
  0xee   : > { %v708_v38 = vpack.c.b16 %v687_v36, %v684_v3  ;;  %v622_v47 = vsel %vm546_vm1, %v6430_v6, %v509_v37 }
  0xf0   : > { %886 = vmatmul.bf16.gmra.mxu1 %v708_v38  ;;  %1610 = vmatpush.bf16.msra.mxu0 %v5985_v1 }
  0xf1   : > { %v507_v40 = vpop.permute.xlu0 %506 }
  0xf2   : > { %v619_v42 = vsel %vm546_vm1, %v6395_v33, %v507_v40 }
  0xf3   : > { %v638_v39 = vsel %vm571_vm2, %v619_v42, %v523_v32  ;;  %v6633_v5 = vpop.permute.xlu2 %544 }
  0xf5   : > { %v539_v31 = vpop.permute.xlu1 %538 }
  0xf6   : > { %v654_v51 = vsel %vm588_vm3, %v638_v39, %v539_v31 }
  0xf7   : > { %v690_v48 = vunpack.c.l.b16 %v654_v51 }
  0xf9   : > { %v525_v44 = vpop.permute.xlu0 %524 }
  0xfa   : > { %v640_v45 = vsel %vm571_vm2, %v622_v47, %v525_v44 }
  0xfb   : > { %v656_v49 = vsel %vm588_vm3, %v640_v45, %v541_v43 }
  0xfc   : > { %v693_v22 = vunpack.c.l.b16 %v656_v49 }
  0xfd   : > { %v513_v56 = vpop.permute.xlu1 %512 }
  0xfe   : > { %v711_v35 = vpack.c.b16 %v693_v22, %v690_v48  ;;  %v628_v26 = vsel %vm546_vm1, %v6513_v52, %v513_v56 }
 0x100   : > { %891 = vmatmul.bf16.gmra.mxu1 %v711_v35 }
 0x101   : > { %v511_v33 = vpop.permute.xlu0 %510 }
 0x102   : > { %v625_v53 = vsel %vm546_vm1, %v6423_v62, %v511_v33 }
 0x103   : > { %v642_v58 = vsel %vm571_vm2, %v625_v53, %v527_v50 }
 0x105   : > { %v543_v6 = vpop.permute.xlu1 %542 }
 0x106   : > { %v658_v4 = vsel %vm588_vm3, %v642_v58, %v543_v6 }
 0x107   : > { %v696_v16 = vunpack.c.l.b16 %v658_v4 }
 0x109   : > { %v6635_v0 = vpop.permute.xlu0 %528 }
 0x10a   : > { %v644_v18 = vsel %vm571_vm2, %v628_v26, %v6635_v0 }
 0x10b   : > { %v660_v23 = vsel %vm588_vm3, %v644_v18, %v6633_v5 }
 0x10c   : > { %v699_v62 = vunpack.c.l.b16 %v660_v23 }
 0x10e   : > { %v714_v24 = vpack.c.b16 %v699_v62, %v696_v16 }
 0x110   : > { %896 = vmatmul.bf16.gmra.mxu1 %v714_v24 }
 0x11e   : > { %v853_v54 = vpop.f32.mrf.mxu0 }
 0x11f   : > { %v854_v53 = vadd.f32 %v6656_v46, %v853_v54 }
 0x126   : > { %v855_v61 = vpop.f32.mrf.mxu0 }
 0x127   : > { %v856_v20 = vadd.f32 %v6656_v46, %v855_v61 }
 0x12e   : > { %v858_v25 = vpop.f32.mrf.mxu0 }
 0x12f   : > { %v859_v59 = vadd.f32 %v6656_v46, %v858_v25 }
 0x136   : > { %v860_v52 = vpop.f32.mrf.mxu0 }
 0x137   : > { %v861_v44 = vadd.f32 %v6656_v46, %v860_v52 }
 0x13e   : > { %v863_v34 = vpop.f32.mrf.mxu0 }
 0x13f   : > { %v864_v18 = vadd.f32 %v6656_v46, %v863_v34 }
 0x142   : > { %v916_v27 = vpop.f32.mrf.mxu2 }
 0x146   : > { %v6641_v17 = vpop.f32.mrf.mxu0 }
 0x14a   : > { %v918_v40 = vpop.f32.mrf.mxu2 }
 0x14e   : > { %v6643_v12 = vpop.f32.mrf.mxu0 }
 0x152   : > { %v921_v50 = vpop.f32.mrf.mxu2 }
 0x156   : > { %v6645_v19 = vpop.f32.mrf.mxu0 }
 0x15d   : > { %v882_v21 = vpop.f32.mrf.mxu1 }
 0x15e   : > { %v911_v41 = vpop.f32.mrf.mxu0  ;;  %v883_v23 = vadd.f32 %v882_v21, %v854_v53 }
 0x165   : > { %v884_v15 = vpop.f32.mrf.mxu1 }
 0x166   : > { %v885_v55 = vadd.f32 %v884_v15, %v856_v20  ;;  %v913_v28 = vpop.f32.mrf.mxu0 }
 0x168   : > { %v914_v29 = vadd.f32 %v913_v28, %v885_v55 }
 0x16a   : > { %vm932_vm4 = vcmp.ge.f32.partialorder %v914_v29, 0.0  ;;  %v940_v32 = vmul.f32 0.2, %v914_v29 }
 0x16c   : > { %v948_v2 = vsel %vm932_vm4, %v914_v29, %v940_v32  ;;  %v923_v29 = vpop.f32.mrf.mxu2 }
 0x16d   : > { %v6661_v3 = vadd.f32 %v948_v2, %v6302_v9  ;;  %v887_v36 = vpop.f32.mrf.mxu1 }
 0x16e   : > { %v888_v37 = vadd.f32 %v887_v36, %v859_v59 }
 0x16f   : > { %v1011_v38 = vrot.slane %v6661_v3, 7 }
 0x170   : > { %v917_v42 = vadd.f32 %v916_v27, %v888_v37  ;;  %v912_v27 = vadd.f32 %v911_v41, %v883_v23  ;;  %v866_v41 = vadd.f32 %v6656_v46, %v6641_v17 }
 0x171   : > { %v1027_v39 = vsel %vm293_vm0, 0.0, %v1011_v38  ;;  %v1035_v43 = vsel %vm293_vm0, %v1011_v38, 0.0 }
 0x172   : > { %v6666_v31 = vpack.c.bf16 %v1027_v39, %v1027_v39  ;;  %v1045_v47 = vpack.c.bf16 %v1035_v43, %v1035_v43  ;;  %vm933_vm5 = vcmp.ge.f32.partialorder %v917_v42, 0.0  ;;  %v941_v51 = vmul.f32 0.2, %v917_v42 }
 0x173   : > { %vm931_vm8 = vcmp.ge.f32.partialorder %v912_v27, 0.0 }
 0x174   : > { %v949_v45 = vsel %vm933_vm5, %v917_v42, %v941_v51  ;;  %v6670_v9 = vunpack.c.l.b16 %v6666_v31  ;;  %v1075_v48 = vunpack.c.l.b16 %v1045_v47  ;;  %v939_v42 = vmul.f32 0.2, %v912_v27 }
 0x175   : > { %v6673_v49 = vadd.f32 %v949_v45, %v6299_v8  ;;  %v889_v22 = vpop.f32.mrf.mxu1 }
 0x176   : > { %v890_v56 = vadd.f32 %v889_v22, %v861_v44  ;;  %v6678_v58 = vpack.c.b16 %v1075_v48, %v6670_v9 }
 0x177   : > { %v1012_v35 = vrot.slane %v6673_v49, 7 }
 0x178   : > { %v919_v33 = vadd.f32 %v918_v40, %v890_v56  ;;  %v6690_v52 = vrot.slane %v6678_v58, 1  ;;  %v947_v56 = vsel %vm931_vm8, %v912_v27, %v939_v42 }
 0x179   : > { %v1028_v6 = vsel %vm293_vm0, 0.0, %v1012_v35  ;;  %v1036_v26 = vsel %vm293_vm0, %v1012_v35, 0.0 }
 0x17a   : > { %vm934_vm6 = vcmp.ge.f32.partialorder %v919_v33, 0.0  ;;  %v942_v4 = vmul.f32 0.2, %v919_v33  ;;  %v6682_v16 = vpack.c.bf16 %v1028_v6, %v1028_v6  ;;  %v1047_v8 = vpack.c.bf16 %v1036_v26, %v1036_v26 }
 0x17c   : > { %v950_v62 = vsel %vm934_vm6, %v919_v33, %v942_v4  ;;  %v1076_v24 = vunpack.c.l.b16 %v6682_v16  ;;  %v1077_v61 = vunpack.c.l.b16 %v1047_v8  ;;  %v869_v4 = vadd.f32 %v6656_v46, %v6643_v12 }
 0x17d   : > { %v6687_v54 = vadd.f32 %v950_v62, %v6328_v30  ;;  %v892_v25 = vpop.f32.mrf.mxu1  ;;  %v1381_v30 = vunpack.c.l.b16 %v6690_v52  ;;  %v6722_v8 = vadd.f32 %v947_v56, %v6296_v7 }
 0x17e   : > { %v893_v11 = vadd.f32 %v892_v25, %v864_v18  ;;  %v1181_v1 = vpack.c.b16 %v1076_v24, %v1076_v24  ;;  %v1088_v20 = vpack.c.b16 %v1077_v61, %v1076_v24  ;;  %v926_v18 = vpop.f32.mrf.mxu2 }
 0x17f   : > { %v1013_v15 = vrot.slane %v6687_v54, 7  ;;  %v1010_v7 = vrot.slane %v6722_v8, 7 }
 0x180   : > { %v922_v55 = vadd.f32 %v921_v50, %v893_v11  ;;  %1191 = vrot.lane.b32.xlu2 %v1181_v1, %s6199_s12  ;;  %v1158_v34 = vrot.slane %v1088_v20, 1  ;;  %1232 = vrot.lane.b32.xlu1 %v1181_v1, %s6197_s10  ;;  %v1110_v21 = vshll.u32 %v1088_v20, 16  ;;  %v1108_v28 = vshrl.u32 %v1088_v20, 16 }
 0x181   : > { %v1029_v32 = vsel %vm293_vm0, 0.0, %v1013_v15  ;;  %v1037_v59 = vsel %vm293_vm0, %v1013_v15, 0.0 }
 0x182   : > { %vm935_vm7 = vcmp.ge.f32.partialorder %v922_v55, 0.0  ;;  %v943_v2 = vmul.f32 0.2, %v922_v55  ;;  %v1384_v36 = vunpack.c.l.b16 %v1158_v34  ;;  %v1112_v37 = vrot.slane %v1110_v21, 1 }
 0x183   : > { %v6700_v38 = vpack.c.bf16 %v1029_v32, %v1029_v32  ;;  %v1049_v40 = vpack.c.bf16 %v1037_v59, %v1037_v59 }
 0x184   : > { %v951_v39 = vsel %vm935_vm7, %v922_v55, %v943_v2  ;;  %v1407_v43 = vpack.c.b16 %v1384_v36, %v1381_v30  ;;  %v6702_v47 = vor.u32 %v1112_v37, %v1108_v28  ;;  %v871_v2 = vadd.f32 %v6656_v46, %v6645_v19 }
 0x185   : > { %v6705_v51 = vadd.f32 %v951_v39, %v6308_v13  ;;  %v894_v44 = vpop.f32.mrf.mxu1  ;;  %v1078_v45 = vunpack.c.l.b16 %v6700_v38  ;;  %v1079_v48 = vunpack.c.l.b16 %v1049_v40  ;;  %v1034_v36 = vsel %vm293_vm0, %v1010_v7, 0.0 }
 0x186   : > { %v895_v22 = vadd.f32 %v894_v44, %v866_v41  ;;  %5413 = vmatmul.msk.bf16.vlgmr.msra.gmra.mxu0 %vm546_vm1, %v1407_v43  ;;  %1246 = vrot.lane.b32.xlu0 %v6702_v47, %s6199_s12  ;;  %v1026_v39 = vsel %vm293_vm0, 0.0, %v1010_v7  ;;  %v928_v19 = vpop.f32.mrf.mxu2  ;;  %v1043_v56 = vpack.c.bf16 %v1034_v36, %v1034_v36 }
 0x187   : > { %v1014_v17 = vrot.slane %v6705_v51, 7  ;;  %v1089_v33 = vpack.c.b16 %v1079_v48, %v1078_v45  ;;  %v1182_v61 = vpack.c.b16 %v1078_v45, %v1078_v45 }
 0x188   : > { %v924_v35 = vadd.f32 %v923_v29, %v895_v22  ;;  %1167 = vrot.lane.b32.xlu1 %v1158_v34, %s6197_s10  ;;  %1146 = vrot.lane.b32.xlu2 %v6702_v47, %s6198_s11 }
 0x189   : > { %v1030_v13 = vsel %vm293_vm0, 0.0, %v1014_v17  ;;  %v1038_v50 = vsel %vm293_vm0, %v1014_v17, 0.0  ;;  %v1117_v1 = vshll.u32 %v1089_v33, 16  ;;  %v1159_v12 = vrot.slane %v1089_v33, 1 }
 0x18a   : > { %v6717_v53 = vpack.c.bf16 %v1030_v13, %v1030_v13  ;;  %v1051_v6 = vpack.c.bf16 %v1038_v50, %v1038_v50  ;;  %vm936_vm9 = vcmp.ge.f32.partialorder %v924_v35, 0.0  ;;  %v944_v26 = vmul.f32 0.2, %v924_v35 }
 0x18b   : > { %v1119_v28 = vrot.slane %v1117_v1, 1  ;;  %v1115_v40 = vshrl.u32 %v1089_v33, 16  ;;  %v6758_v13 = vpack.c.bf16 %v1026_v39, %v1026_v39 }
 0x18c   : > { %v6725_v23 = vunpack.c.l.b16 %v6717_v53  ;;  %v1081_v62 = vunpack.c.l.b16 %v1051_v6  ;;  %v952_v24 = vsel %vm936_vm9, %v924_v35, %v944_v26 }
 0x18d   : > { %v6728_v25 = vadd.f32 %v952_v24, %v6372_v10  ;;  %v897_v11 = vpop.f32.mrf.mxu1  ;;  %v6754_v17 = vor.u32 %v1119_v28, %v1115_v40  ;;  %v1072_v24 = vunpack.c.l.b16 %v6758_v13 }
 0x18e   : > { %v1090_v20 = vpack.c.b16 %v1081_v62, %v6725_v23  ;;  %v898_v15 = vadd.f32 %v897_v11, %v869_v4  ;;  %1193 = vrot.lane.b32.xlu0 %v1182_v61, %s6199_s12 }
 0x18f   : > { %v1015_v27 = vrot.slane %v6728_v25, 7  ;;  %v1179_v39 = vpack.c.b16 %v1072_v24, %v1072_v24 }
 0x190   : > { %v927_v55 = vadd.f32 %v926_v18, %v898_v15  ;;  %1218 = vrot.lane.b32.xlu1 %v1158_v34, %s6198_s11  ;;  %1220 = vrot.lane.b32.xlu2 %v1159_v12, %s6198_s11  ;;  %v6736_v21 = vrot.slane %v1090_v20, 1  ;;  %v1387_v34 = vunpack.c.l.b16 %v1159_v12  ;;  %v1124_v42 = vshll.u32 %v1090_v20, 16 }
 0x191   : > { %v1031_v10 = vsel %vm293_vm0, 0.0, %v1015_v27  ;;  %v1039_v30 = vsel %vm293_vm0, %v1015_v27, 0.0  ;;  %v1122_v7 = vshrl.u32 %v1090_v20, 16 }
 0x192   : > { %v6740_v29 = vpack.c.bf16 %v1031_v10, %v1031_v10  ;;  %v1053_v32 = vpack.c.bf16 %v1039_v30, %v1039_v30  ;;  %vm937_vm10 = vcmp.ge.f32.partialorder %v927_v55, 0.0  ;;  %v945_v59 = vmul.f32 0.2, %v927_v55 }
 0x193   : > { %v1390_v37 = vunpack.c.l.b16 %v6736_v21  ;;  %v1126_v26 = vrot.slane %v1124_v42, 1  ;;  %v1183_v10 = vpack.c.b16 %v6725_v23, %v6725_v23 }
 0x194   : > { %v953_v41 = vsel %vm937_vm10, %v927_v55, %v945_v59  ;;  %v6748_v43 = vunpack.c.l.b16 %v6740_v29  ;;  %v1083_v44 = vunpack.c.l.b16 %v1053_v32 }
 0x195   : > { %v6751_v45 = vadd.f32 %v953_v41, %v6363_v63  ;;  %v899_v48 = vpop.f32.mrf.mxu1  ;;  %v1410_v22 = vpack.c.b16 %v1390_v37, %v1387_v34  ;;  %v6781_v30 = vor.u32 %v1126_v26, %v1122_v7  ;;  %v1101_v26 = vshrl.u32 %v6678_v58, 16 }
 0x196   : > { %v900_v46 = vadd.f32 %v899_v48, %v871_v2  ;;  %1234 = vrot.lane.b32.xlu0 %v1182_v61, %s6197_s10  ;;  %v6765_v63 = vpack.c.b16 %v1083_v44, %v6748_v43  ;;  %v1073_v61 = vunpack.c.l.b16 %v1043_v56 }
 0x197   : > { %v1016_v35 = vrot.slane %v6751_v45, 7  ;;  %5414 = vmatmul.msk.bf16.gmra.mxu0 %vm546_vm1, %v1410_v22 }
 0x198   : > { %v929_v50 = vadd.f32 %v928_v19, %v900_v46  ;;  %1148 = vrot.lane.b32.xlu1 %v6754_v17, %s6198_s11  ;;  %1248 = vrot.lane.b32.xlu2 %v6754_v17, %s6199_s12  ;;  %v6784_v28 = vrot.slane %v6765_v63, 1  ;;  %v1086_v20 = vpack.c.b16 %v1073_v61, %v1072_v24  ;;  %v1184_v24 = vpack.c.b16 %v6748_v43, %v6748_v43 }
 0x199   : > { %v1032_v33 = vsel %vm293_vm0, 0.0, %v1016_v35  ;;  %v1040_v6 = vsel %vm293_vm0, %v1016_v35, 0.0  ;;  %v1103_v35 = vshll.u32 %v6678_v58, 16  ;;  %v1129_v61 = vshrl.u32 %v6765_v63, 16 }
 0x19a   : > { %v6769_v4 = vpack.c.bf16 %v1032_v33, %v1032_v33  ;;  %v1055_v18 = vpack.c.bf16 %v1040_v6, %v1040_v6  ;;  %vm938_vm11 = vcmp.ge.f32.partialorder %v929_v50, 0.0  ;;  %v946_v62 = vmul.f32 0.2, %v929_v50 }
 0x19b   : > { %v1393_v36 = vunpack.c.l.b16 %v6784_v28  ;;  %v1096_v41 = vshll.u32 %v1086_v20, 16  ;;  %v1094_v22 = vshrl.u32 %v1086_v20, 16  ;;  %v1156_v56 = vrot.slane %v1086_v20, 1 }
 0x19c   : > { %v1084_v11 = vunpack.c.l.b16 %v6769_v4  ;;  %v1085_v1 = vunpack.c.l.b16 %v1055_v18  ;;  %v954_v15 = vsel %vm938_vm11, %v929_v50, %v946_v62  ;;  %v1105_v33 = vrot.slane %v1103_v35, 1  ;;  %v5971_v35 = vld [vmem:[%s8508_s1 + $0xa0] sm:$0xff] }
 0x19d   : > { %v6774_v27 = vadd.f32 %v954_v15, %v6419_v60  ;;  %v1098_v44 = vrot.slane %v1096_v41, 1  ;;  %v1180_v6 = vpack.c.b16 %v6670_v9, %v6670_v9  ;;  %v1131_v9 = vshll.u32 %v6765_v63, 16 }
 0x19e   : > { %v6776_v55 = vpack.c.b16 %v1085_v1, %v1084_v11  ;;  %1169 = vrot.lane.b32.xlu0 %v1159_v12, %s6197_s10  ;;  %v6816_v62 = vor.u32 %v1105_v33, %v1101_v26  ;;  %v1185_v1 = vpack.c.b16 %v1084_v11, %v1084_v11  ;;  %v5984_v11 = vld [vmem:[%s8508_s1 + $0x108] sm:$0xff] }
 0x19f   : > { %v1017_v32 = vrot.slane %v6774_v27, 7  ;;  %v6803_v19 = vor.u32 %v1098_v44, %v1094_v22  ;;  %v1133_v58 = vrot.slane %v1131_v9, 1  ;;  %1574 = vmatpush.bf16.msrb.mxu2 %v5984_v11  ;;  %v5973_v44 = vld [vmem:[%s8508_s1 + $0xb0] sm:$0xff]  ;;  %v5972_v22 = vld [vmem:[%s8508_s1 + $0xa8] sm:$0xff] }
 0x1a0   : > { %1236 = vrot.lane.b32.xlu1 %v1183_v10, %s6197_s10  ;;  %1150 = vrot.lane.b32.xlu2 %v6781_v30, %s6198_s11  ;;  %v6791_v60 = vrot.slane %v6776_v55, 1  ;;  %v1136_v7 = vshrl.u32 %v6776_v55, 16  ;;  %v5969_v9 = vld [vmem:[%s8508_s1 + $0x90] sm:$0xff] }
 0x1a1   : > { %v1033_v12 = vsel %vm293_vm0, 0.0, %v1017_v32  ;;  %v1041_v23 = vsel %vm293_vm0, %v1017_v32, 0.0 }
 0x1a2   : > { %v1056_v59 = vpack.c.bf16 %v1033_v12, %v1033_v12  ;;  %v1057_v2 = vpack.c.bf16 %v1041_v23, %v1041_v23  ;;  %v1396_v34 = vunpack.c.l.b16 %v6791_v60  ;;  %v5983_v23 = vld [vmem:[%s8508_s1 + $0x100] sm:$0xff] }
 0x1a3   : > { %1575 = vmatpush.bf16.msrb.mxu2 %v5983_v23 }
 0x1a4   : > { %v1413_v37 = vpack.c.b16 %v1396_v34, %v1393_v36  ;;  %v1178_v40 = vunpack.c.l.b16 %v1056_v59  ;;  %v1204_v42 = vunpack.c.l.b16 %v1057_v2  ;;  %v5975_v36 = vld [vmem:[%s8508_s1 + $0xc0] sm:$0xff]  ;;  %v5982_v34 = vld [vmem:[%s8508_s1 + $0xf8] sm:$0xff] }
 0x1a6   : > { %1250 = vrot.lane.b32.xlu0 %v6781_v30, %s6199_s12  ;;  %v1205_v48 = vpack.c.b16 %v1204_v42, %v1178_v40  ;;  %v1186_v20 = vpack.c.b16 %v1178_v40, %v1178_v40  ;;  %v5981_v42 = vld [vmem:[%s8508_s1 + $0xf0] sm:$0xff] }
 0x1a7   : > { %5415 = vmatmul.msk.bf16.gmra.mxu0 %vm546_vm1, %v1413_v37  ;;  %1576 = vmatpush.bf16.msrb.mxu2 %v5982_v34  ;;  %v5974_v37 = vld [vmem:[%s8508_s1 + $0xb8] sm:$0xff] }
 0x1a8   : > { %1171 = vrot.lane.b32.xlu1 %v6736_v21, %s6197_s10  ;;  %1187 = vrot.lane.b32.xlu2 %v1179_v39, %s6199_s12  ;;  %v1213_v46 = vrot.slane %v1205_v48, 1  ;;  %v1207_v12 = vshrl.u32 %v1205_v48, 16 }
 0x1aa   : > { %v1399_v50 = vunpack.c.l.b16 %v1213_v46 }
 0x1ab   : > { %1577 = vmatpush.bf16.msrb.mxu2 %v5981_v42 }
 0x1ac   : > { %v1416_v18 = vpack.c.b16 %v6607_v14, %v1399_v50  ;;  %v5979_v50 = vld [vmem:[%s8508_s1 + $0xe0] sm:$0xff] }
 0x1ae   : > { %1142 = vrot.lane.b32.xlu0 %v6803_v19, %s6198_s11 }
 0x1b0   : > { %1163 = vrot.lane.b32.xlu1 %v1156_v56, %s6197_s10  ;;  %1216 = vrot.lane.b32.xlu2 %v6690_v52, %s6198_s11 }
 0x1b6   : > { %1189 = vrot.lane.b32.xlu0 %v1180_v6, %s6199_s12 }
 0x1b7   : > { %5416 = vmatmul.msk.bf16.gmra.mxu0 %vm546_vm1, %v1416_v18 }
 0x1b8   : > { %1214 = vrot.lane.b32.xlu1 %v1156_v56, %s6198_s11  ;;  %1244 = vrot.lane.b32.xlu2 %v6816_v62, %s6199_s12 }
 0x1be   : > { %1230 = vrot.lane.b32.xlu0 %v1180_v6, %s6197_s10  ;;  %v5970_v6 = vld [vmem:[%s8508_s1 + $0x98] sm:$0xff] }
 0x1c0   : > { %1222 = vrot.lane.b32.xlu1 %v6736_v21, %s6198_s11  ;;  %1195 = vrot.lane.b32.xlu2 %v1183_v10, %s6199_s12  ;;  %v6837_v21 = vor.u32 %v1133_v58, %v1129_v61  ;;  %v5978_v58 = vld [vmem:[%s8508_s1 + $0xd8] sm:$0xff] }
 0x1c6   : > { %1165 = vrot.lane.b32.xlu0 %v6690_v52, %s6197_s10  ;;  %v1138_v52 = vshll.u32 %v6776_v55, 16  ;;  %v1209_v55 = vshll.u32 %v1205_v48, 16  ;;  %v5980_v48 = vld [vmem:[%s8508_s1 + $0xe8] sm:$0xff] }
 0x1c7   : > { %1578 = vmatpush.bf16.msrb.mxu2 %v5980_v48 }
 0x1c8   : > { %1144 = vrot.lane.b32.xlu1 %v6816_v62, %s6198_s11  ;;  %1224 = vrot.lane.b32.xlu2 %v6784_v28, %s6198_s11  ;;  %v1140_v15 = vrot.slane %v1138_v52, 1  ;;  %v1211_v32 = vrot.slane %v1209_v55, 1  ;;  %v5977_v52 = vld [vmem:[%s8508_s1 + $0xd0] sm:$0xff] }
 0x1ca   : > { %v6845_v43 = vor.u32 %v1140_v15, %v1136_v7  ;;  %v6875_v59 = vor.u32 %v1211_v32, %v1207_v12 }
 0x1cb   : > { %1579 = vmatpush.bf16.msrb.mxu2 %v5979_v50 }
 0x1ce   : > { %1197 = vrot.lane.b32.xlu0 %v1184_v24, %s6199_s12 }
 0x1cf   : > { %1580 = vmatpush.bf16.msrb.mxu2 %v5978_v58 }
 0x1d0   : > { %1252 = vrot.lane.b32.xlu2 %v6837_v21, %s6199_s12  ;;  %1240 = vrot.lane.b32.xlu1 %v1185_v1, %s6197_s10 }
 0x1d3   : > { %1581 = vmatpush.bf16.msrb.mxu2 %v5977_v52 }
 0x1d6   : > { %1238 = vrot.lane.b32.xlu0 %v1184_v24, %s6197_s10 }
 0x1d8   : > { %1152 = vrot.lane.b32.xlu1 %v6837_v21, %s6198_s11  ;;  %1154 = vrot.lane.b32.xlu2 %v6845_v43, %s6198_s11 }
 0x1da   : > { %v6851_v63 = vpop.permute.xlu2 %1191 }
 0x1de   : > { %1254 = vrot.lane.b32.xlu0 %v6845_v43, %s6199_s12 }
 0x1e0   : > { %1175 = vrot.lane.b32.xlu1 %v6791_v60, %s6197_s10  ;;  %1199 = vrot.lane.b32.xlu2 %v1185_v1, %s6199_s12 }
 0x1e2   : > { %v6863_v10 = vpop.permute.xlu2 %1146 }
 0x1e6   : > { %1173 = vrot.lane.b32.xlu0 %v6784_v28, %s6197_s10  ;;  %v5976_v28 = vld [vmem:[%s8508_s1 + $0xc8] sm:$0xff] }
 0x1e7   : > { %1545 = vmatpush.bf16.msra.mxu3 %v5976_v28 }
 0x1e8   : > { %1226 = vrot.lane.b32.xlu1 %v6791_v60, %s6198_s11  ;;  %1228 = vrot.lane.b32.xlu2 %v1213_v46, %s6198_s11 }
 0x1ea   : > { %v6879_v60 = vpop.permute.xlu2 %1220 }
 0x1eb   : > { %1546 = vmatpush.bf16.msra.mxu3 %v5975_v36 }
 0x1ee   : > { %1201 = vrot.lane.b32.xlu0 %v1186_v20, %s6199_s12 }
 0x1ef   : > { %1547 = vmatpush.bf16.msra.mxu3 %v5974_v37 }
 0x1f0   : > { %1256 = vrot.lane.b32.xlu1 %v6875_v59, %s6199_s12 }
 0x1f2   : > { %v1233_v2 = vpop.permute.xlu1 %1232  ;;  %v6896_v39 = vpop.permute.xlu2 %1248 }
 0x1f3   : > { %1548 = vmatpush.bf16.msra.mxu3 %v5973_v44 }
 0x1f6   : > { %1242 = vrot.lane.b32.xlu0 %v1186_v20, %s6197_s10 }
 0x1f7   : > { %1549 = vmatpush.bf16.msra.mxu3 %v5972_v22 }
 0x1f8   : > { %v1247_v41 = vpop.permute.xlu0 %1246 }
 0x1fa   : > { %v6891_v40 = vpop.permute.xlu1 %1167  ;;  %v6913_v33 = vpop.permute.xlu2 %1150 }
 0x1fb   : > { %1550 = vmatpush.bf16.msra.mxu3 %v5971_v35 }
 0x1ff   : > { %1551 = vmatpush.bf16.msra.mxu3 %v5970_v6 }
 0x200   : > { %v1194_v46 = vpop.permute.xlu0 %1193 }
 0x202   : > { %v1219_v56 = vpop.permute.xlu1 %1218  ;;  %v1188_v24 = vpop.permute.xlu2 %1187 }
 0x203   : > { %1552 = vmatpush.bf16.msra.mxu3 %v5969_v9  ;;  %v1294_v23 = vsel %vm588_vm3, %v6520_v57, %v1188_v24 }
 0x204   : > { %v1379_v37 = vunpack.c.l.b16 %v1294_v23 }
 0x208   : > { %v1235_v26 = vpop.permute.xlu0 %1234 }
 0x20a   : > { %v6918_v18 = vpop.permute.xlu1 %1148  ;;  %v1217_v7 = vpop.permute.xlu2 %1216 }
 0x20b   : > { %v1314_v42 = vsel %vm546_vm1, %v6816_v62, %v1217_v7 }
 0x20c   : > { %v1336_v35 = vsel %vm571_vm2, %v1314_v42, %v1233_v2  ;;  %v1266_v2 = vsel %vm546_vm1, %v6682_v16, %v6863_v10 }
 0x20d   : > { %v1351_v9 = vsel %vm588_vm3, %v1336_v35, %v1247_v41 }
 0x20e   : > { %v1383_v62 = vunpack.c.l.b16 %v1351_v9 }
 0x210   : > { %v6926_v61 = vpop.permute.xlu0 %1169 }
 0x212   : > { %v1237_v1 = vpop.permute.xlu1 %1236  ;;  %v1245_v20 = vpop.permute.xlu2 %1244 }
 0x218   : > { %v1251_v15 = vpop.permute.xlu0 %1250 }
 0x21a   : > { %v1172_v11 = vpop.permute.xlu1 %1171  ;;  %v1196_v50 = vpop.permute.xlu2 %1195 }
 0x220   : > { %v1143_v55 = vpop.permute.xlu0 %1142 }
 0x221   : > { %v1260_v12 = vsel %vm546_vm1, %v6758_v13, %v1143_v55 }
 0x222   : > { %v1164_v32 = vpop.permute.xlu1 %1163 }
 0x223   : > { %v1280_v28 = vsel %vm571_vm2, %v1260_v12, %v1164_v32  ;;  %v1225_v32 = vpop.permute.xlu2 %1224 }
 0x228   : > { %v1190_v36 = vpop.permute.xlu0 %1189 }
 0x229   : > { %v1296_v34 = vsel %vm588_vm3, %v1280_v28, %v1190_v36  ;;  %v1320_v28 = vsel %vm546_vm1, %v6754_v17, %v6879_v60  ;;  %v1317_v36 = vsel %vm546_vm1, %v6702_v47, %v1219_v56 }
 0x22a   : > { %v1382_v44 = vunpack.c.l.b16 %v1296_v34  ;;  %v1215_v48 = vpop.permute.xlu1 %1214  ;;  %v1338_v16 = vsel %vm571_vm2, %v1317_v36, %v1235_v26  ;;  %v1340_v10 = vsel %vm571_vm2, %v1320_v28, %v1237_v1  ;;  %v1272_v1 = vsel %vm546_vm1, %v6717_v53, %v6913_v33 }
 0x22b   : > { %v1311_v13 = vsel %vm546_vm1, %v6803_v19, %v1215_v48  ;;  %v1284_v19 = vsel %vm571_vm2, %v1266_v2, %v6891_v40  ;;  %v1353_v17 = vsel %vm588_vm3, %v1338_v16, %v6896_v39  ;;  %v1253_v47 = vpop.permute.xlu2 %1252 }
 0x22c   : > { %v1405_v22 = vpack.c.b16 %v1382_v44, %v1379_v37  ;;  %v1300_v41 = vsel %vm588_vm3, %v1284_v19, %v1194_v46  ;;  %v1355_v37 = vsel %vm588_vm3, %v1340_v10, %v1251_v15  ;;  %v1386_v48 = vunpack.c.l.b16 %v1353_v17 }
 0x22d   : > { %v1388_v46 = vunpack.c.l.b16 %v1300_v41  ;;  %v1389_v60 = vunpack.c.l.b16 %v1355_v37 }
 0x22e   : > { %1553 = vmatmul.bf16.vlgmr.msra.gmra.mxu3 %v1405_v22  ;;  %v1269_v22 = vsel %vm546_vm1, %v6700_v38, %v6918_v18 }
 0x22f   : > { %v1409_v26 = vpack.c.b16 %v1389_v60, %v1386_v48  ;;  %v1286_v35 = vsel %vm571_vm2, %v1269_v22, %v6926_v61 }
 0x230   : > { %v1231_v6 = vpop.permute.xlu0 %1230 }
 0x231   : > { %v1334_v58 = vsel %vm571_vm2, %v1311_v13, %v1231_v6  ;;  %v1302_v13 = vsel %vm588_vm3, %v1286_v35, %v1196_v50  ;;  %v6004_v35 = vld [vmem:[%s8508_s1 + $0x1a8] sm:$0xff] }
 0x232   : > { %v1349_v24 = vsel %vm588_vm3, %v1334_v58, %v1245_v20  ;;  %v1223_v52 = vpop.permute.xlu1 %1222  ;;  %v1391_v58 = vunpack.c.l.b16 %v1302_v13  ;;  %2310 = vmatpush.bf16.msra.mxu2 %v6004_v35 }
 0x233   : > { %v1380_v55 = vunpack.c.l.b16 %v1349_v24  ;;  %v1323_v6 = vsel %vm546_vm1, %v6781_v30, %v1223_v52  ;;  %v1155_v9 = vpop.permute.xlu2 %1154  ;;  %v1326_v24 = vsel %vm546_vm1, %v6837_v21, %v1225_v32 }
 0x234   : > { %v1278_v32 = vsel %vm546_vm1, %v6769_v4, %v1155_v9 }
 0x235   : > { %v1406_v7 = vpack.c.b16 %v1383_v62, %v1380_v55 }
 0x237   : > { %1582 = vmatmul.bf16.vlgmr.msrb.gmra.mxu2 %v1406_v7 }
 0x238   : > { %v1166_v12 = vpop.permute.xlu0 %1165 }
 0x23a   : > { %v1145_v23 = vpop.permute.xlu1 %1144 }
 0x23b   : > { %v1263_v20 = vsel %vm546_vm1, %v6666_v31, %v1145_v23  ;;  %v1200_v7 = vpop.permute.xlu2 %1199 }
 0x23c   : > { %v1282_v34 = vsel %vm571_vm2, %v1263_v20, %v1166_v12 }
 0x23d   : > { %v1298_v40 = vsel %vm588_vm3, %v1282_v34, %v6851_v63  ;;  %v1288_v63 = vsel %vm571_vm2, %v1272_v1, %v1172_v11 }
 0x23e   : > { %v1385_v31 = vunpack.c.l.b16 %v1298_v40 }
 0x240   : > { %v1198_v42 = vpop.permute.xlu0 %1197  ;;  %v1408_v44 = vpack.c.b16 %v1388_v46, %v1385_v31 }
 0x241   : > { %v1304_v39 = vsel %vm588_vm3, %v1288_v63, %v1198_v42 }
 0x242   : > { %v1241_v56 = vpop.permute.xlu1 %1240  ;;  %1558 = vmatmul.bf16.gmra.mxu3 %v1408_v44  ;;  %v1394_v33 = vunpack.c.l.b16 %v1304_v39 }
 0x243   : > { %v1344_v18 = vsel %vm571_vm2, %v1326_v24, %v1241_v56  ;;  %v1229_v23 = vpop.permute.xlu2 %1228  ;;  %v1612_v56 = vpop.f32.mrf.mxu0 }
 0x244   : > { %v1411_v61 = vpack.c.b16 %v1394_v33, %v1391_v58  ;;  %v1332_v16 = vsel %vm546_vm1, %v6875_v59, %v1229_v23 }
 0x245   : > { %v1347_v46 = vsel %vm571_vm2, %v1332_v16, %v6635_v0 }
 0x246   : > { %v1362_v31 = vsel %vm588_vm3, %v1347_v46, %v6633_v5 }
 0x247   : > { %1587 = vmatmul.bf16.gmra.mxu2 %v1409_v26  ;;  %v1401_v60 = vunpack.c.l.b16 %v1362_v31  ;;  %v7006_v26 = vld [vmem:[%s8509_s2 + $0x1] ss:$0 sm:$0xff] }
 0x248   : > { %v1239_v15 = vpop.permute.xlu0 %1238 }
 0x249   : > { %v1342_v11 = vsel %vm571_vm2, %v1323_v6, %v1239_v15 }
 0x24a   : > { %v1153_v53 = vpop.permute.xlu1 %1152  ;;  %v1357_v38 = vsel %vm588_vm3, %v1342_v11, %v1253_v47 }
 0x24b   : > { %v1392_v30 = vunpack.c.l.b16 %v1357_v38  ;;  %v1275_v19 = vsel %vm546_vm1, %v6740_v29, %v1153_v53  ;;  %v1614_v15 = vpop.f32.mrf.mxu0  ;;  %v6003_v53 = vld [vmem:[%s8508_s1 + $0x1a0] sm:$0xff] }
 0x24c   : > { %2311 = vmatpush.bf16.msra.mxu2 %v6003_v53 }
 0x250   : > { %v1255_v55 = vpop.permute.xlu0 %1254 }
 0x251   : > { %v1359_v50 = vsel %vm588_vm3, %v1344_v18, %v1255_v55 }
 0x252   : > { %v1395_v62 = vunpack.c.l.b16 %v1359_v50  ;;  %1563 = vmatmul.bf16.gmra.mxu3 %v1411_v61  ;;  %v1176_v12 = vpop.permute.xlu1 %1175 }
 0x253   : > { %v1292_v28 = vsel %vm571_vm2, %v1278_v32, %v1176_v12  ;;  %v1617_v55 = vpop.f32.mrf.mxu0 }
 0x254   : > { %v1412_v52 = vpack.c.b16 %v1395_v62, %v1392_v30 }
 0x257   : > { %1592 = vmatmul.bf16.gmra.mxu2 %v1412_v52 }
 0x258   : > { %v1174_v2 = vpop.permute.xlu0 %1173 }
 0x259   : > { %v1290_v21 = vsel %vm571_vm2, %v1275_v19, %v1174_v2 }
 0x25a   : > { %v1227_v41 = vpop.permute.xlu1 %1226  ;;  %v1306_v20 = vsel %vm588_vm3, %v1290_v21, %v1200_v7 }
 0x25b   : > { %v1397_v40 = vunpack.c.l.b16 %v1306_v20  ;;  %v1329_v4 = vsel %vm546_vm1, %v6845_v43, %v1227_v41 }
 0x260   : > { %v1202_v36 = vpop.permute.xlu0 %1201 }
 0x261   : > { %v1308_v34 = vsel %vm588_vm3, %v1292_v28, %v1202_v36 }
 0x262   : > { %v1400_v10 = vunpack.c.l.b16 %v1308_v34  ;;  %v1257_v42 = vpop.permute.xlu1 %1256 }
 0x264   : > { %v1414_v29 = vpack.c.b16 %v1400_v10, %v1397_v40 }
 0x266   : > { %1568 = vmatmul.bf16.gmra.mxu3 %v1414_v29 }
 0x268   : > { %v1243_v37 = vpop.permute.xlu0 %1242 }
 0x269   : > { %v1346_v44 = vsel %vm571_vm2, %v1329_v4, %v1243_v37  ;;  %v1619_v4 = vpop.f32.mrf.mxu0 }
 0x26a   : > { %v1361_v17 = vsel %vm588_vm3, %v1346_v44, %v1257_v42 }
 0x26b   : > { %v1398_v59 = vunpack.c.l.b16 %v1361_v17 }
 0x26d   : > { %v1415_v47 = vpack.c.b16 %v1401_v60, %v1398_v59 }
 0x26f   : > { %1597 = vmatmul.bf16.gmra.mxu2 %v1415_v47 }
 0x2b1   : > { %v1554_v48 = vpop.f32.mrf.mxu3 }
 0x2b2   : > { %v1555_v43 = vadd.f32 %v7006_v26, %v1554_v48 }
 0x2b9   : > { %v1556_v22 = vpop.f32.mrf.mxu3 }
 0x2ba   : > { %v1583_v1 = vpop.f32.mrf.mxu2  ;;  %v1557_v6 = vadd.f32 %v7006_v26, %v1556_v22 }
 0x2bb   : > { %v1584_v63 = vadd.f32 %v1583_v1, %v1555_v43 }
 0x2bd   : > { %v1613_v39 = vadd.f32 %v1612_v56, %v1584_v63 }
 0x2bf   : > { %vm1632_vm12 = vcmp.ge.f32.partialorder %v1613_v39, 0.0  ;;  %v1640_v13 = vmul.f32 0.2, %v1613_v39 }
 0x2c1   : > { %v1648_v9 = vsel %vm1632_vm12, %v1613_v39, %v1640_v13 }
 0x2c2   : > { %v7017_v33 = vadd.f32 %v1648_v9, %v6722_v8  ;;  %v1585_v11 = vpop.f32.mrf.mxu2 }
 0x2c3   : > { %v1586_v58 = vadd.f32 %v1585_v11, %v1557_v6 }
 0x2c4   : > { %v1711_v24 = vrot.slane %v7017_v33, 7 }
 0x2c5   : > { %v1615_v38 = vadd.f32 %v1614_v15, %v1586_v58  ;;  %v1559_v18 = vpop.f32.mrf.mxu3 }
 0x2c6   : > { %v1727_v61 = vsel %vm293_vm0, 0.0, %v1711_v24  ;;  %v1735_v50 = vsel %vm293_vm0, %v1711_v24, 0.0  ;;  %v1560_v8 = vadd.f32 %v7006_v26, %v1559_v18  ;;  %v1622_v18 = vpop.f32.mrf.mxu0 }
 0x2c7   : > { %vm1633_vm13 = vcmp.ge.f32.partialorder %v1615_v38, 0.0  ;;  %v1641_v62 = vmul.f32 0.2, %v1615_v38  ;;  %v7022_v30 = vpack.c.bf16 %v1727_v61, %v1727_v61  ;;  %v1744_v52 = vpack.c.bf16 %v1735_v50, %v1735_v50 }
 0x2c9   : > { %v1649_v7 = vsel %vm1633_vm13, %v1615_v38, %v1641_v62  ;;  %v1773_v12 = vunpack.c.l.b16 %v7022_v30  ;;  %v1774_v2 = vunpack.c.l.b16 %v1744_v52 }
 0x2ca   : > { %v7027_v19 = vadd.f32 %v1649_v7, %v6661_v3  ;;  %v1588_v21 = vpop.f32.mrf.mxu2 }
 0x2cb   : > { %v1589_v32 = vadd.f32 %v1588_v21, %v1560_v8  ;;  %v1880_v23 = vpack.c.b16 %v1773_v12, %v1773_v12  ;;  %v1787_v41 = vpack.c.b16 %v1774_v2, %v1773_v12 }
 0x2cc   : > { %v1712_v20 = vrot.slane %v7027_v19, 7 }
 0x2cd   : > { %v1618_v28 = vadd.f32 %v1617_v55, %v1589_v32  ;;  %1888 = vrot.lane.b32.xlu1 %v1880_v23, %s6199_s12  ;;  %v1561_v36 = vpop.f32.mrf.mxu3  ;;  %v1857_v34 = vrot.slane %v1787_v41, 1  ;;  %v1797_v16 = vshll.u32 %v1787_v41, 16  ;;  %v1795_v43 = vshrl.u32 %v1787_v41, 16 }
 0x2ce   : > { %v1728_v10 = vsel %vm293_vm0, 0.0, %v1712_v20  ;;  %v1736_v40 = vsel %vm293_vm0, %v1712_v20, 0.0  ;;  %v1562_v37 = vadd.f32 %v7006_v26, %v1561_v36 }
 0x2cf   : > { %vm1634_vm14 = vcmp.ge.f32.partialorder %v1618_v28, 0.0  ;;  %v1642_v29 = vmul.f32 0.2, %v1618_v28  ;;  %1864 = vrot.lane.b32.xlu0 %v1857_v34, %s6197_s10  ;;  %1915 = vrot.lane.b32.xlu2 %v1857_v34, %s6198_s11  ;;  %v7035_v3 = vpack.c.bf16 %v1728_v10, %v1728_v10  ;;  %v1746_v46 = vpack.c.bf16 %v1736_v40, %v1736_v40 }
 0x2d0   : > { %v1799_v17 = vrot.slane %v1797_v16, 1 }
 0x2d1   : > { %v1650_v31 = vsel %vm1634_vm14, %v1618_v28, %v1642_v29  ;;  %v1775_v42 = vunpack.c.l.b16 %v7035_v3  ;;  %v1776_v44 = vunpack.c.l.b16 %v1746_v46 }
 0x2d2   : > { %v7040_v59 = vadd.f32 %v1650_v31, %v6673_v49  ;;  %v1590_v60 = vpop.f32.mrf.mxu2  ;;  %v7046_v39 = vor.u32 %v1799_v17, %v1795_v43 }
 0x2d3   : > { %v1591_v47 = vadd.f32 %v1590_v60, %v1562_v37  ;;  %v1788_v56 = vpack.c.b16 %v1776_v44, %v1775_v42  ;;  %v1881_v48 = vpack.c.b16 %v1775_v42, %v1775_v42 }
 0x2d4   : > { %v1713_v1 = vrot.slane %v7040_v59, 7 }
 0x2d5   : > { %v1620_v63 = vadd.f32 %v1619_v4, %v1591_v47  ;;  %1931 = vrot.lane.b32.xlu1 %v1881_v48, %s6197_s10  ;;  %v1564_v15 = vpop.f32.mrf.mxu3  ;;  %v7044_v22 = vrot.slane %v1788_v56, 1  ;;  %v1804_v35 = vshll.u32 %v1788_v56, 16  ;;  %v1802_v7 = vshrl.u32 %v1788_v56, 16  ;;  %v1624_v47 = vpop.f32.mrf.mxu0 }
 0x2d6   : > { %v1729_v13 = vsel %vm293_vm0, 0.0, %v1713_v1  ;;  %v1737_v49 = vsel %vm293_vm0, %v1713_v1, 0.0  ;;  %v1565_v58 = vadd.f32 %v7006_v26, %v1564_v15 }
 0x2d7   : > { %vm1635_vm15 = vcmp.ge.f32.partialorder %v1620_v63, 0.0  ;;  %v1643_v6 = vmul.f32 0.2, %v1620_v63  ;;  %1917 = vrot.lane.b32.xlu0 %v7044_v22, %s6198_s11  ;;  %1843 = vrot.lane.b32.xlu2 %v7046_v39, %s6198_s11  ;;  %v7054_v9 = vpack.c.bf16 %v1729_v13, %v1729_v13  ;;  %v1748_v53 = vpack.c.bf16 %v1737_v49, %v1737_v49 }
 0x2d8   : > { %v1806_v38 = vrot.slane %v1804_v35, 1  ;;  %v2082_v34 = vunpack.c.l.b16 %v7044_v22 }
 0x2d9   : > { %v1651_v11 = vsel %vm1635_vm15, %v1620_v63, %v1643_v6  ;;  %v1777_v24 = vunpack.c.l.b16 %v7054_v9  ;;  %v1778_v50 = vunpack.c.l.b16 %v1748_v53 }
 0x2da   : > { %v7059_v55 = vadd.f32 %v1651_v11, %v6687_v54  ;;  %v1593_v61 = vpop.f32.mrf.mxu2  ;;  %v7063_v21 = vor.u32 %v1806_v38, %v1802_v7 }
 0x2db   : > { %v1594_v62 = vadd.f32 %v1593_v61, %v1565_v58  ;;  %v1882_v52 = vpack.c.b16 %v1777_v24, %v1777_v24  ;;  %v1789_v12 = vpack.c.b16 %v1778_v50, %v1777_v24 }
 0x2dc   : > { %v1714_v8 = vrot.slane %v7059_v55, 7 }
 0x2dd   : > { %v1623_v2 = vadd.f32 %v1622_v18, %v1594_v62  ;;  %1892 = vrot.lane.b32.xlu1 %v1882_v52, %s6199_s12  ;;  %v7067_v41 = vrot.slane %v1789_v12, 1  ;;  %v1566_v54 = vpop.f32.mrf.mxu3  ;;  %v1811_v10 = vshll.u32 %v1789_v12, 16  ;;  %v1809_v4 = vshrl.u32 %v1789_v12, 16  ;;  %v1627_v7 = vpop.f32.mrf.mxu0 }
 0x2de   : > { %v1730_v32 = vsel %vm293_vm0, 0.0, %v1714_v8  ;;  %v1738_v23 = vsel %vm293_vm0, %v1714_v8, 0.0  ;;  %v1567_v46 = vadd.f32 %v7006_v26, %v1566_v54 }
 0x2df   : > { %v7069_v20 = vpack.c.bf16 %v1730_v32, %v1730_v32  ;;  %v1750_v28 = vpack.c.bf16 %v1738_v23, %v1738_v23  ;;  %vm1636_vm4 = vcmp.ge.f32.partialorder %v1623_v2, 0.0  ;;  %v1644_v36 = vmul.f32 0.2, %v1623_v2  ;;  %1945 = vrot.lane.b32.xlu0 %v7063_v21, %s6199_s12  ;;  %1890 = vrot.lane.b32.xlu2 %v1881_v48, %s6199_s12 }
 0x2e0   : > { %v2085_v16 = vunpack.c.l.b16 %v7067_v41  ;;  %v1813_v17 = vrot.slane %v1811_v10, 1 }
 0x2e1   : > { %v1779_v40 = vunpack.c.l.b16 %v7069_v20  ;;  %v1652_v29 = vsel %vm1636_vm4, %v1623_v2, %v1644_v36  ;;  %v1780_v37 = vunpack.c.l.b16 %v1750_v28 }
 0x2e2   : > { %v7079_v31 = vadd.f32 %v1652_v29, %v6705_v51  ;;  %v1595_v42 = vpop.f32.mrf.mxu2  ;;  %v2108_v44 = vpack.c.b16 %v2085_v16, %v2082_v34  ;;  %v7083_v48 = vor.u32 %v1813_v17, %v1809_v4 }
 0x2e3   : > { %v1596_v60 = vadd.f32 %v1595_v42, %v1567_v46  ;;  %v1790_v51 = vpack.c.b16 %v1780_v37, %v1779_v40  ;;  %v1883_v54 = vpack.c.b16 %v1779_v40, %v1779_v40 }
 0x2e4   : > { %v1715_v56 = vrot.slane %v7079_v31, 7  ;;  %5526 = vmatmul.msk.bf16.vlgmr.msra.gmra.mxu2 %vm546_vm1, %v2108_v44 }
 0x2e5   : > { %v1625_v43 = vadd.f32 %v1624_v47, %v1596_v60  ;;  %1947 = vrot.lane.b32.xlu1 %v7083_v48, %s6199_s12  ;;  %v7104_v24 = vrot.slane %v1790_v51, 1  ;;  %v1816_v44 = vshrl.u32 %v1790_v51, 16  ;;  %v1629_v60 = vpop.f32.mrf.mxu0 }
 0x2e6   : > { %v1731_v1 = vsel %vm293_vm0, 0.0, %v1715_v56  ;;  %v1739_v63 = vsel %vm293_vm0, %v1715_v56, 0.0 }
 0x2e7   : > { %v7089_v15 = vpack.c.bf16 %v1731_v1, %v1731_v1  ;;  %v1752_v35 = vpack.c.bf16 %v1739_v63, %v1739_v63  ;;  %vm1637_vm5 = vcmp.ge.f32.partialorder %v1625_v43, 0.0  ;;  %v1645_v13 = vmul.f32 0.2, %v1625_v43  ;;  %1845 = vrot.lane.b32.xlu0 %v7063_v21, %s6198_s11  ;;  %1866 = vrot.lane.b32.xlu2 %v7044_v22, %s6197_s10 }
 0x2e8   : > { %v2088_v61 = vunpack.c.l.b16 %v7104_v24 }
 0x2e9   : > { %v7096_v49 = vunpack.c.l.b16 %v7089_v15  ;;  %v1782_v6 = vunpack.c.l.b16 %v1752_v35  ;;  %v1653_v53 = vsel %vm1637_vm5, %v1625_v43, %v1645_v13  ;;  %v1569_v38 = vpop.f32.mrf.mxu3  ;;  %v6002_v35 = vld [vmem:[%s8508_s1 + $0x198] sm:$0xff] }
 0x2ea   : > { %v7102_v58 = vadd.f32 %v1653_v53, %v6728_v25  ;;  %v1570_v50 = vadd.f32 %v7006_v26, %v1569_v38  ;;  %v5994_v13 = vld [vmem:[%s8508_s1 + $0x158] sm:$0xff]  ;;  %2275 = vmatpush.bf16.msrb.mxu3 %v6002_v35 }
 0x2eb   : > { %v7099_v11 = vpack.c.b16 %v1782_v6, %v7096_v49  ;;  %2246 = vmatpush.bf16.msrb.mxu1 %v5994_v13 }
 0x2ec   : > { %v1716_v22 = vrot.slane %v7102_v58, 7 }
 0x2ed   : > { %v7107_v18 = vrot.slane %v7099_v11, 1  ;;  %1847 = vrot.lane.b32.xlu1 %v7083_v48, %s6198_s11 }
 0x2ee   : > { %v1732_v12 = vsel %vm293_vm0, 0.0, %v1716_v22  ;;  %v1740_v2 = vsel %vm293_vm0, %v1716_v22, 0.0 }
 0x2ef   : > { %1933 = vrot.lane.b32.xlu2 %v1882_v52, %s6197_s10  ;;  %1919 = vrot.lane.b32.xlu0 %v7067_v41, %s6198_s11  ;;  %v2091_v25 = vunpack.c.l.b16 %v7107_v18  ;;  %v1818_v52 = vshll.u32 %v1790_v51, 16  ;;  %v7121_v28 = vpack.c.bf16 %v1732_v12, %v1732_v12  ;;  %v1754_v36 = vpack.c.bf16 %v1740_v2, %v1740_v2 }
 0x2f1   : > { %v2111_v62 = vpack.c.b16 %v2091_v25, %v2088_v61  ;;  %v1571_v34 = vpop.f32.mrf.mxu3  ;;  %v1820_v10 = vrot.slane %v1818_v52, 1  ;;  %v7130_v40 = vunpack.c.l.b16 %v7121_v28  ;;  %v1784_v4 = vunpack.c.l.b16 %v1754_v36 }
 0x2f2   : > { %v1598_v8 = vpop.f32.mrf.mxu2  ;;  %v1572_v29 = vadd.f32 %v7006_v26, %v1571_v34 }
 0x2f3   : > { %v1599_v32 = vadd.f32 %v1598_v8, %v1570_v50  ;;  %v7136_v56 = vor.u32 %v1820_v10, %v1816_v44  ;;  %v7143_v1 = vpack.c.b16 %v1784_v4, %v7130_v40  ;;  %v1823_v10 = vshrl.u32 %v7099_v11, 16  ;;  %v5992_v4 = vld [vmem:[%s8508_s1 + $0x148] sm:$0xff]  ;;  %v5991_v44 = vld [vmem:[%s8508_s1 + $0x140] sm:$0xff] }
 0x2f4   : > { %5527 = vmatmul.msk.bf16.gmra.mxu2 %vm546_vm1, %v2111_v62  ;;  %v1884_v62 = vpack.c.b16 %v7096_v49, %v7096_v49 }
 0x2f5   : > { %v1628_v23 = vadd.f32 %v1627_v7, %v1599_v32  ;;  %1921 = vrot.lane.b32.xlu1 %v7104_v24, %s6198_s11  ;;  %v1862_v25 = vrot.slane %v7143_v1, 1  ;;  %v1825_v7 = vshll.u32 %v7099_v11, 16  ;;  %v6000_v11 = vld [vmem:[%s8508_s1 + $0x188] sm:$0xff] }
 0x2f7   : > { %vm1638_vm6 = vcmp.ge.f32.partialorder %v1628_v23, 0.0  ;;  %v1646_v16 = vmul.f32 0.2, %v1628_v23  ;;  %1935 = vrot.lane.b32.xlu2 %v1883_v54, %s6197_s10  ;;  %1868 = vrot.lane.b32.xlu0 %v7067_v41, %s6197_s10  ;;  %v2094_v52 = vunpack.c.l.b16 %v1862_v25 }
 0x2f9   : > { %v1654_v46 = vsel %vm1638_vm6, %v1628_v23, %v1646_v16  ;;  %v6001_v23 = vld [vmem:[%s8508_s1 + $0x190] sm:$0xff] }
 0x2fa   : > { %v7133_v37 = vadd.f32 %v1654_v46, %v6751_v45  ;;  %v1600_v42 = vpop.f32.mrf.mxu2  ;;  %2276 = vmatpush.bf16.msrb.mxu3 %v6001_v23 }
 0x2fb   : > { %v1601_v17 = vadd.f32 %v1600_v42, %v1572_v29 }
 0x2fc   : > { %v1717_v47 = vrot.slane %v7133_v37, 7 }
 0x2fd   : > { %v1630_v41 = vadd.f32 %v1629_v60, %v1601_v17  ;;  %1949 = vrot.lane.b32.xlu1 %v7136_v56, %s6199_s12  ;;  %v1832_v17 = vshll.u32 %v7143_v1, 16  ;;  %v1885_v60 = vpack.c.b16 %v7130_v40, %v7130_v40 }
 0x2fe   : > { %v1733_v43 = vsel %vm293_vm0, 0.0, %v1717_v47  ;;  %v1741_v26 = vsel %vm293_vm0, %v1717_v47, 0.0  ;;  %2277 = vmatpush.bf16.msrb.mxu3 %v6000_v11 }
 0x2ff   : > { %v7145_v45 = vpack.c.bf16 %v1733_v43, %v1733_v43  ;;  %v1756_v63 = vpack.c.bf16 %v1741_v26, %v1741_v26  ;;  %vm1639_vm7 = vcmp.ge.f32.partialorder %v1630_v41, 0.0  ;;  %v1647_v51 = vmul.f32 0.2, %v1630_v41  ;;  %1894 = vrot.lane.b32.xlu2 %v1883_v54, %s6199_s12  ;;  %1849 = vrot.lane.b32.xlu0 %v7136_v56, %s6198_s11  ;;  %v5990_v43 = vld [vmem:[%s8508_s1 + $0x138] sm:$0xff] }
 0x300   : > { %v1827_v54 = vrot.slane %v1825_v7, 1  ;;  %v1834_v26 = vrot.slane %v1832_v17, 1 }
 0x301   : > { %v7157_v6 = vunpack.c.l.b16 %v7145_v45  ;;  %v1786_v53 = vunpack.c.l.b16 %v1756_v63  ;;  %v1655_v38 = vsel %vm1639_vm7, %v1630_v41, %v1647_v51  ;;  %v5999_v41 = vld [vmem:[%s8508_s1 + $0x180] sm:$0xff]  ;;  %v5989_v63 = vld [vmem:[%s8508_s1 + $0x130] sm:$0xff] }
 0x302   : > { %v7160_v22 = vadd.f32 %v1655_v38, %v6774_v27  ;;  %v7190_v29 = vor.u32 %v1827_v54, %v1823_v10  ;;  %2278 = vmatpush.bf16.msrb.mxu3 %v5999_v41  ;;  %v5995_v54 = vld [vmem:[%s8508_s1 + $0x160] sm:$0xff] }
 0x303   : > { %v7163_v61 = vpack.c.b16 %v1786_v53, %v7157_v6  ;;  %v5998_v53 = vld [vmem:[%s8508_s1 + $0x178] sm:$0xff] }
 0x304   : > { %v1718_v50 = vrot.slane %v7160_v22, 7 }
 0x305   : > { %v7171_v8 = vrot.slane %v7163_v61, 1  ;;  %1896 = vrot.lane.b32.xlu1 %v1884_v62, %s6199_s12  ;;  %v1839_v35 = vshll.u32 %v7163_v61, 16  ;;  %v1837_v38 = vshrl.u32 %v7163_v61, 16  ;;  %v5997_v61 = vld [vmem:[%s8508_s1 + $0x170] sm:$0xff] }
 0x306   : > { %v1734_v12 = vsel %vm293_vm0, 0.0, %v1718_v50  ;;  %v1742_v27 = vsel %vm293_vm0, %v1718_v50, 0.0  ;;  %2279 = vmatpush.bf16.msrb.mxu3 %v5998_v53  ;;  %v5987_v50 = vld [vmem:[%s8508_s1 + $0x120] sm:$0xff] }
 0x307   : > { %v1757_v2 = vpack.c.bf16 %v1734_v12, %v1734_v12  ;;  %v1758_v32 = vpack.c.bf16 %v1742_v27, %v1742_v27  ;;  %1870 = vrot.lane.b32.xlu2 %v7104_v24, %s6197_s10  ;;  %1937 = vrot.lane.b32.xlu0 %v1884_v62, %s6197_s10  ;;  %v2097_v49 = vunpack.c.l.b16 %v7171_v8  ;;  %v5993_v24 = vld [vmem:[%s8508_s1 + $0x150] sm:$0xff]  ;;  %v1841_v13 = vrot.slane %v1839_v35, 1 }
 0x308   : > { %2247 = vmatpush.bf16.msrb.mxu1 %v5993_v24 }
 0x309   : > { %v7183_v36 = vunpack.c.l.b16 %v1757_v2  ;;  %v1905_v34 = vunpack.c.l.b16 %v1758_v32  ;;  %v2114_v16 = vpack.c.b16 %v2097_v49, %v2094_v52  ;;  %v7246_v62 = vor.u32 %v1841_v13, %v1837_v38 }
 0x30a   : > { %2280 = vmatpush.bf16.msrb.mxu3 %v5997_v61 }
 0x30b   : > { %5528 = vmatmul.msk.bf16.gmra.mxu2 %vm546_vm1, %v2114_v16  ;;  %v1906_v46 = vpack.c.b16 %v1905_v34, %v7183_v36  ;;  %v1887_v49 = vpack.c.b16 %v7183_v36, %v7183_v36 }
 0x30c   : > { %2248 = vmatpush.bf16.msrb.mxu1 %v5992_v4 }
 0x30d   : > { %1851 = vrot.lane.b32.xlu1 %v7190_v29, %s6198_s11  ;;  %v1914_v42 = vrot.slane %v1906_v46, 1  ;;  %v1910_v12 = vshll.u32 %v1906_v46, 16  ;;  %v1908_v32 = vshrl.u32 %v1906_v46, 16 }
 0x30f   : > { %1923 = vrot.lane.b32.xlu0 %v7107_v18, %s6198_s11  ;;  %1951 = vrot.lane.b32.xlu2 %v7190_v29, %s6199_s12  ;;  %v2100_v47 = vunpack.c.l.b16 %v1914_v42  ;;  %v1912_v2 = vrot.slane %v1910_v12, 1 }
 0x310   : > { %2249 = vmatpush.bf16.msrb.mxu1 %v5991_v44 }
 0x311   : > { %v2117_v40 = vpack.c.b16 %v6607_v14, %v2100_v47  ;;  %v7264_v52 = vor.u32 %v1912_v2, %v1908_v32 }
 0x314   : > { %2250 = vmatpush.bf16.msrb.mxu1 %v5990_v43 }
 0x315   : > { %1925 = vrot.lane.b32.xlu1 %v1862_v25, %s6198_s11 }
 0x317   : > { %1872 = vrot.lane.b32.xlu0 %v7107_v18, %s6197_s10  ;;  %1939 = vrot.lane.b32.xlu2 %v1885_v60, %s6197_s10  ;;  %v1830_v18 = vshrl.u32 %v7143_v1, 16  ;;  %v5988_v1 = vld [vmem:[%s8508_s1 + $0x128] sm:$0xff] }
 0x318   : > { %2251 = vmatpush.bf16.msrb.mxu1 %v5989_v63 }
 0x319   : > { %v7227_v51 = vor.u32 %v1834_v26, %v1830_v18 }
 0x31b   : > { %5529 = vmatmul.msk.bf16.gmra.mxu2 %vm546_vm1, %v2117_v40 }
 0x31c   : > { %2252 = vmatpush.bf16.msrb.mxu1 %v5988_v1 }
 0x31d   : > { %1953 = vrot.lane.b32.xlu1 %v7227_v51, %s6199_s12 }
 0x31f   : > { %1874 = vrot.lane.b32.xlu0 %v1862_v25, %s6197_s10  ;;  %1898 = vrot.lane.b32.xlu2 %v1885_v60, %s6199_s12  ;;  %v1886_v25 = vpack.c.b16 %v7157_v6, %v7157_v6  ;;  %v5996_v6 = vld [vmem:[%s8508_s1 + $0x168] sm:$0xff] }
 0x320   : > { %2253 = vmatpush.bf16.msrb.mxu1 %v5987_v50  ;;  %2281 = vmatpush.bf16.msrb.mxu3 %v5996_v6 }
 0x324   : > { %2282 = vmatpush.bf16.msrb.mxu3 %v5995_v54 }
 0x325   : > { %1853 = vrot.lane.b32.xlu1 %v7227_v51, %s6198_s11 }
 0x327   : > { %1941 = vrot.lane.b32.xlu0 %v1886_v25, %s6197_s10  ;;  %1955 = vrot.lane.b32.xlu2 %v7246_v62, %s6199_s12 }
 0x329   : > { %v1916_v7 = vpop.permute.xlu2 %1915 }
 0x32d   : > { %1929 = vrot.lane.b32.xlu1 %v1914_v42, %s6198_s11 }
 0x32f   : > { %1927 = vrot.lane.b32.xlu0 %v7171_v8, %s6198_s11  ;;  %1855 = vrot.lane.b32.xlu2 %v7246_v62, %s6198_s11 }
 0x331   : > { %v1844_v27 = vpop.permute.xlu2 %1843 }
 0x332   : > { %v1961_v36 = vsel %vm546_vm1, %v7022_v30, %v1844_v27  ;;  %v2012_v30 = vsel %vm546_vm1, %v7046_v39, %v1916_v7 }
 0x335   : > { %1876 = vrot.lane.b32.xlu1 %v7171_v8, %s6197_s10 }
 0x337   : > { %1957 = vrot.lane.b32.xlu0 %v7264_v52, %s6199_s12  ;;  %1943 = vrot.lane.b32.xlu2 %v1887_v49, %s6197_s10 }
 0x339   : > { %v1891_v23 = vpop.permute.xlu2 %1890 }
 0x33f   : > { %v1889_v34 = vpop.permute.xlu1 %1888  ;;  %1902 = vrot.lane.b32.xlu0 %v1887_v49, %s6199_s12  ;;  %1900 = vrot.lane.b32.xlu2 %v1886_v25, %s6199_s12 }
 0x340   : > { %v1995_v8 = vsel %vm588_vm3, %v6520_v57, %v1889_v34 }
 0x341   : > { %v1867_v16 = vpop.permute.xlu2 %1866  ;;  %v1865_v10 = vpop.permute.xlu0 %1864  ;;  %v2080_v11 = vunpack.c.l.b16 %v1995_v8 }
 0x342   : > { %v1981_v24 = vsel %vm571_vm2, %v1961_v36, %v1865_v10 }
 0x343   : > { %v1997_v46 = vsel %vm588_vm3, %v1981_v24, %v1891_v23 }
 0x344   : > { %v2083_v4 = vunpack.c.l.b16 %v1997_v46 }
 0x346   : > { %v2106_v42 = vpack.c.b16 %v2083_v4, %v2080_v11 }
 0x347   : > { %v1932_v44 = vpop.permute.xlu1 %1931 }
 0x348   : > { %2254 = vmatmul.bf16.vlgmr.msrb.gmra.mxu1 %v2106_v42  ;;  %v2035_v40 = vsel %vm571_vm2, %v2012_v30, %v1932_v44 }
 0x349   : > { %v1934_v17 = vpop.permute.xlu2 %1933  ;;  %v1918_v60 = vpop.permute.xlu0 %1917 }
 0x34a   : > { %v2015_v26 = vsel %vm546_vm1, %v7063_v21, %v1918_v60 }
 0x34b   : > { %v2037_v35 = vsel %vm571_vm2, %v2015_v26, %v1934_v17 }
 0x34f   : > { %v1893_v47 = vpop.permute.xlu1 %1892 }
 0x351   : > { %v1946_v41 = vpop.permute.xlu0 %1945  ;;  %v1936_v43 = vpop.permute.xlu2 %1935 }
 0x352   : > { %v2050_v63 = vsel %vm588_vm3, %v2035_v40, %v1946_v41 }
 0x353   : > { %v2081_v1 = vunpack.c.l.b16 %v2050_v63 }
 0x357   : > { %v1948_v18 = vpop.permute.xlu1 %1947 }
 0x358   : > { %v2052_v13 = vsel %vm588_vm3, %v2037_v35, %v1948_v18 }
 0x359   : > { %v1846_v53 = vpop.permute.xlu0 %1845  ;;  %v2084_v38 = vunpack.c.l.b16 %v2052_v13  ;;  %v1895_v25 = vpop.permute.xlu2 %1894 }
 0x35a   : > { %v1964_v21 = vsel %vm546_vm1, %v7035_v3, %v1846_v53 }
 0x35b   : > { %v2107_v50 = vpack.c.b16 %v2084_v38, %v2081_v1  ;;  %v1983_v7 = vsel %vm571_vm2, %v1964_v21, %v1867_v16 }
 0x35c   : > { %v1999_v32 = vsel %vm588_vm3, %v1983_v7, %v1893_v47 }
 0x35d   : > { %2283 = vmatmul.bf16.vlgmr.msrb.gmra.mxu3 %v2107_v50  ;;  %v2086_v54 = vunpack.c.l.b16 %v1999_v32 }
 0x35f   : > { %v1848_v61 = vpop.permute.xlu1 %1847 }
 0x360   : > { %v1967_v27 = vsel %vm546_vm1, %v7054_v9, %v1848_v61 }
 0x361   : > { %v1920_v39 = vpop.permute.xlu0 %1919  ;;  %v1871_v12 = vpop.permute.xlu2 %1870 }
 0x362   : > { %v2018_v16 = vsel %vm546_vm1, %v7083_v48, %v1920_v39 }
 0x363   : > { %v2039_v24 = vsel %vm571_vm2, %v2018_v16, %v1936_v43 }
 0x367   : > { %v1922_v6 = vpop.permute.xlu1 %1921 }
 0x368   : > { %v2021_v46 = vsel %vm546_vm1, %v7136_v56, %v1922_v6 }
 0x369   : > { %v1869_v2 = vpop.permute.xlu0 %1868  ;;  %v1952_v3 = vpop.permute.xlu2 %1951 }
 0x36a   : > { %v1985_v49 = vsel %vm571_vm2, %v1967_v27, %v1869_v2 }
 0x36b   : > { %v2001_v23 = vsel %vm588_vm3, %v1985_v49, %v1895_v25 }
 0x36c   : > { %v2089_v34 = vunpack.c.l.b16 %v2001_v23 }
 0x36e   : > { %v2109_v36 = vpack.c.b16 %v2089_v34, %v2086_v54 }
 0x36f   : > { %v1950_v8 = vpop.permute.xlu1 %1949 }
 0x370   : > { %2259 = vmatmul.bf16.gmra.mxu1 %v2109_v36  ;;  %v2054_v11 = vsel %vm588_vm3, %v2039_v24, %v1950_v8 }
 0x371   : > { %v1850_v10 = vpop.permute.xlu0 %1849  ;;  %v1940_v44 = vpop.permute.xlu2 %1939  ;;  %v2087_v60 = vunpack.c.l.b16 %v2054_v11 }
 0x372   : > { %v1970_v43 = vsel %vm546_vm1, %v7069_v20, %v1850_v10 }
 0x373   : > { %v1987_v56 = vsel %vm571_vm2, %v1970_v43, %v1871_v12 }
 0x377   : > { %v1897_v9 = vpop.permute.xlu1 %1896 }
 0x378   : > { %v2003_v63 = vsel %vm588_vm3, %v1987_v56, %v1897_v9  ;;  %v7345_v56 = vld [vmem:[%s8509_s2 + $0x2] ss:$0 sm:$0xff] }
 0x379   : > { %v1938_v4 = vpop.permute.xlu0 %1937  ;;  %v1899_v26 = vpop.permute.xlu2 %1898  ;;  %v2092_v1 = vunpack.c.l.b16 %v2003_v63 }
 0x37a   : > { %v2041_v42 = vsel %vm571_vm2, %v2021_v46, %v1938_v4 }
 0x37b   : > { %v2056_v17 = vsel %vm588_vm3, %v2041_v42, %v1952_v3 }
 0x37c   : > { %v2090_v47 = vunpack.c.l.b16 %v2056_v17 }
 0x37e   : > { %v2110_v41 = vpack.c.b16 %v2090_v47, %v2087_v60 }
 0x37f   : > { %v1852_v30 = vpop.permute.xlu1 %1851 }
 0x380   : > { %2288 = vmatmul.bf16.gmra.mxu3 %v2110_v41  ;;  %v1973_v18 = vsel %vm546_vm1, %v7089_v15, %v1852_v30 }
 0x381   : > { %v1924_v48 = vpop.permute.xlu0 %1923  ;;  %v1956_v25 = vpop.permute.xlu2 %1955 }
 0x382   : > { %v2024_v39 = vsel %vm546_vm1, %v7190_v29, %v1924_v48 }
 0x383   : > { %v2043_v21 = vsel %vm571_vm2, %v2024_v39, %v1940_v44 }
 0x387   : > { %v1926_v40 = vpop.permute.xlu1 %1925 }
 0x388   : > { %v2027_v15 = vsel %vm546_vm1, %v7227_v51, %v1926_v40  ;;  %v2313_v40 = vpop.f32.mrf.mxu2 }
 0x389   : > { %v1873_v35 = vpop.permute.xlu0 %1872  ;;  %v1856_v12 = vpop.permute.xlu2 %1855 }
 0x38a   : > { %v1989_v13 = vsel %vm571_vm2, %v1973_v18, %v1873_v35 }
 0x38b   : > { %v2005_v53 = vsel %vm588_vm3, %v1989_v13, %v1899_v26 }
 0x38c   : > { %v2095_v38 = vunpack.c.l.b16 %v2005_v53 }
 0x38e   : > { %v2112_v50 = vpack.c.b16 %v2095_v38, %v2092_v1 }
 0x38f   : > { %v1954_v61 = vpop.permute.xlu1 %1953 }
 0x390   : > { %2264 = vmatmul.bf16.gmra.mxu1 %v2112_v50  ;;  %v2058_v6 = vsel %vm588_vm3, %v2043_v21, %v1954_v61 }
 0x391   : > { %v1875_v20 = vpop.permute.xlu0 %1874  ;;  %v2093_v49 = vunpack.c.l.b16 %v2058_v6  ;;  %v1944_v8 = vpop.permute.xlu2 %1943 }
 0x397   : > { %v1854_v7 = vpop.permute.xlu1 %1853 }
 0x398   : > { %v1976_v9 = vsel %vm546_vm1, %v7121_v28, %v1854_v7 }
 0x399   : > { %v1942_v27 = vpop.permute.xlu0 %1941  ;;  %v1901_v4 = vpop.permute.xlu2 %1900  ;;  %v1991_v42 = vsel %vm571_vm2, %v1976_v9, %v1875_v20 }
 0x39a   : > { %v2045_v2 = vsel %vm571_vm2, %v2027_v15, %v1942_v27  ;;  %v2007_v60 = vsel %vm588_vm3, %v1991_v42, %v1901_v4  ;;  %v2315_v20 = vpop.f32.mrf.mxu2 }
 0x39b   : > { %v2060_v32 = vsel %vm588_vm3, %v2045_v2, %v1956_v25  ;;  %v2098_v30 = vunpack.c.l.b16 %v2007_v60 }
 0x39c   : > { %v2096_v23 = vunpack.c.l.b16 %v2060_v32 }
 0x39e   : > { %v2113_v54 = vpack.c.b16 %v2096_v23, %v2093_v49 }
 0x39f   : > { %v1930_v34 = vpop.permute.xlu1 %1929 }
 0x3a0   : > { %2293 = vmatmul.bf16.gmra.mxu3 %v2113_v54  ;;  %v2033_v36 = vsel %vm546_vm1, %v7264_v52, %v1930_v34 }
 0x3a1   : > { %v1928_v29 = vpop.permute.xlu0 %1927  ;;  %v2048_v51 = vsel %vm571_vm2, %v2033_v36, %v6635_v0 }
 0x3a2   : > { %v2030_v3 = vsel %vm546_vm1, %v7246_v62, %v1928_v29  ;;  %v2063_v10 = vsel %vm588_vm3, %v2048_v51, %v6633_v5  ;;  %v1979_v62 = vsel %vm546_vm1, %v7145_v45, %v1856_v12 }
 0x3a3   : > { %v2047_v16 = vsel %vm571_vm2, %v2030_v3, %v1944_v8  ;;  %v2102_v52 = vunpack.c.l.b16 %v2063_v10 }
 0x3a7   : > { %v1877_v17 = vpop.permute.xlu1 %1876 }
 0x3a8   : > { %v1993_v47 = vsel %vm571_vm2, %v1979_v62, %v1877_v17 }
 0x3a9   : > { %v1958_v24 = vpop.permute.xlu0 %1957 }
 0x3aa   : > { %v2062_v46 = vsel %vm588_vm3, %v2047_v16, %v1958_v24 }
 0x3ab   : > { %v2099_v11 = vunpack.c.l.b16 %v2062_v46  ;;  %v6021_v46 = vld [vmem:[%s8508_s1 + $0x230] sm:$0xff] }
 0x3ad   : > { %v2116_v44 = vpack.c.b16 %v2102_v52, %v2099_v11 }
 0x3b0   : > { %2298 = vmatmul.bf16.gmra.mxu3 %v2116_v44 }
 0x3b1   : > { %v1903_v41 = vpop.permute.xlu0 %1902 }
 0x3b2   : > { %v2009_v28 = vsel %vm588_vm3, %v1993_v47, %v1903_v41  ;;  %v2318_v41 = vpop.f32.mrf.mxu2 }
 0x3b3   : > { %v2101_v48 = vunpack.c.l.b16 %v2009_v28 }
 0x3b5   : > { %v2115_v43 = vpack.c.b16 %v2101_v48, %v2098_v30 }
 0x3b7   : > { %2269 = vmatmul.bf16.gmra.mxu1 %v2115_v43 }
 0x3c5   : > { %v2255_v26 = vpop.f32.mrf.mxu1 }
 0x3c6   : > { %v2256_v45 = vadd.f32 %v7345_v56, %v2255_v26 }
 0x3cd   : > { %v2257_v13 = vpop.f32.mrf.mxu1 }
 0x3ce   : > { %v2258_v1 = vadd.f32 %v7345_v56, %v2257_v13 }
 0x3e0   : > { %v2284_v63 = vpop.f32.mrf.mxu3 }
 0x3e1   : > { %v2285_v18 = vadd.f32 %v2284_v63, %v2256_v45 }
 0x3e3   : > { %v2314_v35 = vadd.f32 %v2313_v40, %v2285_v18 }
 0x3e5   : > { %vm2333_vm8 = vcmp.ge.f32.partialorder %v2314_v35, 0.0  ;;  %v2341_v53 = vmul.f32 0.2, %v2314_v35 }
 0x3e7   : > { %v2349_v38 = vsel %vm2333_vm8, %v2314_v35, %v2341_v53 }
 0x3e8   : > { %v7350_v50 = vadd.f32 %v2349_v38, %v7017_v33  ;;  %v2286_v25 = vpop.f32.mrf.mxu3 }
 0x3e9   : > { %v2287_v61 = vadd.f32 %v2286_v25, %v2258_v1  ;;  %v2320_v1 = vpop.f32.mrf.mxu2 }
 0x3ea   : > { %v2412_v39 = vrot.slane %v7350_v50, 7 }
 0x3eb   : > { %v2316_v21 = vadd.f32 %v2315_v20, %v2287_v61 }
 0x3ec   : > { %v2428_v7 = vsel %vm293_vm0, 0.0, %v2412_v39  ;;  %v2436_v15 = vsel %vm293_vm0, %v2412_v39, 0.0 }
 0x3ed   : > { %vm2334_vm9 = vcmp.ge.f32.partialorder %v2316_v21, 0.0  ;;  %v2342_v12 = vmul.f32 0.2, %v2316_v21  ;;  %v7355_v6 = vpack.c.bf16 %v2428_v7, %v2428_v7  ;;  %v2445_v27 = vpack.c.bf16 %v2436_v15, %v2436_v15  ;;  %v2260_v42 = vpop.f32.mrf.mxu1 }
 0x3ee   : > { %v2261_v47 = vadd.f32 %v7345_v56, %v2260_v42 }
 0x3ef   : > { %v2350_v2 = vsel %vm2334_vm9, %v2316_v21, %v2342_v12  ;;  %v2474_v32 = vunpack.c.l.b16 %v7355_v6  ;;  %v2475_v49 = vunpack.c.l.b16 %v2445_v27 }
 0x3f0   : > { %v7359_v33 = vadd.f32 %v2350_v2, %v7027_v19  ;;  %v6022_v19 = vld [vmem:[%s8508_s1 + $0x238] sm:$0xff] }
 0x3f1   : > { %v2581_v23 = vpack.c.b16 %v2474_v32, %v2474_v32  ;;  %v2488_v34 = vpack.c.b16 %v2475_v49, %v2474_v32  ;;  %3011 = vmatpush.bf16.msra.mxu3 %v6022_v19  ;;  %v2323_v42 = vpop.f32.mrf.mxu2 }
 0x3f2   : > { %v2413_v54 = vrot.slane %v7359_v33, 7 }
 0x3f3   : > { %2589 = vrot.lane.b32.xlu0 %v2581_v23, %s6199_s12  ;;  %v2558_v29 = vrot.slane %v2488_v34, 1  ;;  %v2498_v36 = vshll.u32 %v2488_v34, 16  ;;  %v2496_v10 = vshrl.u32 %v2488_v34, 16 }
 0x3f4   : > { %v2429_v8 = vsel %vm293_vm0, 0.0, %v2413_v54  ;;  %v2437_v51 = vsel %vm293_vm0, %v2413_v54, 0.0 }
 0x3f5   : > { %v7365_v3 = vpack.c.bf16 %v2429_v8, %v2429_v8  ;;  %2565 = vrot.lane.b32.xlu2 %v2558_v29, %s6197_s10  ;;  %v2500_v16 = vrot.slane %v2498_v36, 1  ;;  %v2447_v24 = vpack.c.bf16 %v2437_v51, %v2437_v51  ;;  %3012 = vmatpush.bf16.msra.mxu3 %v6021_v46  ;;  %v2262_v45 = vpop.f32.mrf.mxu1 }
 0x3f6   : > { %v2263_v63 = vadd.f32 %v7345_v56, %v2262_v45 }
 0x3f7   : > { %v2476_v9 = vunpack.c.l.b16 %v7365_v3  ;;  %v7375_v11 = vor.u32 %v2500_v16, %v2496_v10  ;;  %v2477_v52 = vunpack.c.l.b16 %v2447_v24 }
 0x3f9   : > { %2544 = vrot.lane.b32.xlu1 %v7375_v11, %s6198_s11  ;;  %v2489_v4 = vpack.c.b16 %v2477_v52, %v2476_v9  ;;  %v2582_v62 = vpack.c.b16 %v2476_v9, %v2476_v9 }
 0x3fb   : > { %v2559_v44 = vrot.slane %v2489_v4, 1  ;;  %v2505_v17 = vshll.u32 %v2489_v4, 16  ;;  %v2503_v30 = vshrl.u32 %v2489_v4, 16 }
 0x3fd   : > { %2618 = vrot.lane.b32.xlu0 %v2559_v44, %s6198_s11  ;;  %2616 = vrot.lane.b32.xlu2 %v2558_v29, %s6198_s11  ;;  %v2507_v60 = vrot.slane %v2505_v17, 1  ;;  %v2783_v34 = vunpack.c.l.b16 %v2559_v44 }
 0x3ff   : > { %v7383_v43 = vor.u32 %v2507_v60, %v2503_v30 }
 0x401   : > { %2591 = vrot.lane.b32.xlu1 %v2582_v62, %s6199_s12 }
 0x403   : > { %v2289_v28 = vpop.f32.mrf.mxu3 }
 0x404   : > { %v2290_v48 = vadd.f32 %v2289_v28, %v2261_v47 }
 0x405   : > { %2646 = vrot.lane.b32.xlu0 %v7383_v43, %s6199_s12  ;;  %2546 = vrot.lane.b32.xlu2 %v7383_v43, %s6198_s11 }
 0x406   : > { %v2319_v26 = vadd.f32 %v2318_v41, %v2290_v48 }
 0x408   : > { %vm2335_vm10 = vcmp.ge.f32.partialorder %v2319_v26, 0.0  ;;  %v2343_v40 = vmul.f32 0.2, %v2319_v26 }
 0x409   : > { %2632 = vrot.lane.b32.xlu1 %v2582_v62, %s6197_s10 }
 0x40a   : > { %v2351_v18 = vsel %vm2335_vm10, %v2319_v26, %v2343_v40 }
 0x40b   : > { %v7391_v35 = vadd.f32 %v2351_v18, %v7040_v59  ;;  %v2291_v13 = vpop.f32.mrf.mxu3 }
 0x40c   : > { %v2292_v53 = vadd.f32 %v2291_v13, %v2263_v63 }
 0x40d   : > { %v2414_v38 = vrot.slane %v7391_v35, 7  ;;  %v2265_v52 = vpop.f32.mrf.mxu1 }
 0x40e   : > { %v2321_v25 = vadd.f32 %v2320_v1, %v2292_v53  ;;  %v2325_v53 = vpop.f32.mrf.mxu2 }
 0x40f   : > { %v2438_v61 = vsel %vm293_vm0, %v2414_v38, 0.0  ;;  %v2430_v20 = vsel %vm293_vm0, 0.0, %v2414_v38 }
 0x410   : > { %v2449_v39 = vpack.c.bf16 %v2438_v61, %v2438_v61  ;;  %vm2336_vm11 = vcmp.ge.f32.partialorder %v2321_v25, 0.0  ;;  %v2344_v21 = vmul.f32 0.2, %v2321_v25  ;;  %v7397_v7 = vpack.c.bf16 %v2430_v20, %v2430_v20 }
 0x411   : > { %2567 = vrot.lane.b32.xlu1 %v2559_v44, %s6197_s10  ;;  %v2266_v44 = vadd.f32 %v7345_v56, %v2265_v52 }
 0x412   : > { %v2479_v15 = vunpack.c.l.b16 %v2449_v39  ;;  %v2352_v59 = vsel %vm2336_vm11, %v2321_v25, %v2344_v21  ;;  %v2478_v12 = vunpack.c.l.b16 %v7397_v7 }
 0x413   : > { %v7401_v27 = vadd.f32 %v2352_v59, %v7059_v55  ;;  %v6012_v59 = vld [vmem:[%s8508_s1 + $0x1e8] sm:$0xff] }
 0x414   : > { %v2583_v2 = vpack.c.b16 %v2478_v12, %v2478_v12  ;;  %v2490_v32 = vpack.c.b16 %v2479_v15, %v2478_v12  ;;  %v6020_v12 = vld [vmem:[%s8508_s1 + $0x228] sm:$0xff]  ;;  %2947 = vmatpush.bf16.msrb.mxu0 %v6012_v59 }
 0x415   : > { %v2415_v49 = vrot.slane %v7401_v27, 7  ;;  %v2267_v30 = vpop.f32.mrf.mxu1  ;;  %2976 = vmatpush.bf16.msra.mxu1 %v6020_v12  ;;  %v6018_v12 = vld [vmem:[%s8508_s1 + $0x218] sm:$0xff] }
 0x416   : > { %2593 = vrot.lane.b32.xlu0 %v2583_v2, %s6199_s12  ;;  %v2560_v23 = vrot.slane %v2490_v32, 1  ;;  %2634 = vrot.lane.b32.xlu2 %v2583_v2, %s6197_s10  ;;  %v2512_v54 = vshll.u32 %v2490_v32, 16  ;;  %v2510_v36 = vshrl.u32 %v2490_v32, 16  ;;  %v2268_v45 = vadd.f32 %v7345_v56, %v2267_v30  ;;  %v6011_v30 = vld [vmem:[%s8508_s1 + $0x1e0] sm:$0xff] }
 0x417   : > { %v2439_v29 = vsel %vm293_vm0, %v2415_v49, 0.0  ;;  %v2431_v8 = vsel %vm293_vm0, 0.0, %v2415_v49 }
 0x418   : > { %v2451_v55 = vpack.c.bf16 %v2439_v29, %v2439_v29  ;;  %v2514_v51 = vrot.slane %v2512_v54, 1  ;;  %v2786_v19 = vunpack.c.l.b16 %v2560_v23  ;;  %v7409_v10 = vpack.c.bf16 %v2431_v8, %v2431_v8  ;;  %2948 = vmatpush.bf16.msrb.mxu0 %v6011_v30 }
 0x41a   : > { %v7411_v16 = vor.u32 %v2514_v51, %v2510_v36  ;;  %v2809_v24 = vpack.c.b16 %v2786_v19, %v2783_v34  ;;  %v2480_v9 = vunpack.c.l.b16 %v7409_v10  ;;  %v2481_v46 = vunpack.c.l.b16 %v2451_v55  ;;  %v2328_v51 = vpop.f32.mrf.mxu2 }
 0x41c   : > { %2648 = vrot.lane.b32.xlu1 %v7411_v16, %s6199_s12  ;;  %5639 = vmatmul.msk.bf16.vlgmr.msra.gmra.mxu3 %vm546_vm1, %v2809_v24  ;;  %v2491_v4 = vpack.c.b16 %v2481_v46, %v2480_v9  ;;  %v2584_v17 = vpack.c.b16 %v2480_v9, %v2480_v9 }
 0x41e   : > { %2569 = vrot.lane.b32.xlu2 %v2560_v23, %s6197_s10  ;;  %2548 = vrot.lane.b32.xlu0 %v7411_v16, %s6198_s11  ;;  %v2561_v47 = vrot.slane %v2491_v4, 1  ;;  %v2519_v41 = vshll.u32 %v2491_v4, 16  ;;  %v2517_v63 = vshrl.u32 %v2491_v4, 16 }
 0x420   : > { %v2521_v26 = vrot.slane %v2519_v41, 1  ;;  %v2789_v24 = vunpack.c.l.b16 %v2561_v47 }
 0x422   : > { %v7429_v38 = vor.u32 %v2521_v26, %v2517_v63 }
 0x423   : > { %v2294_v62 = vpop.f32.mrf.mxu3 }
 0x424   : > { %v2295_v60 = vadd.f32 %v2294_v62, %v2266_v44  ;;  %2595 = vrot.lane.b32.xlu1 %v2584_v17, %s6199_s12 }
 0x426   : > { %v2324_v28 = vadd.f32 %v2323_v42, %v2295_v60  ;;  %2620 = vrot.lane.b32.xlu2 %v2560_v23, %s6198_s11  ;;  %2622 = vrot.lane.b32.xlu0 %v2561_v47, %s6198_s11 }
 0x428   : > { %vm2337_vm12 = vcmp.ge.f32.partialorder %v2324_v28, 0.0  ;;  %v2345_v48 = vmul.f32 0.2, %v2324_v28 }
 0x42a   : > { %v2353_v40 = vsel %vm2337_vm12, %v2324_v28, %v2345_v48 }
 0x42b   : > { %v7426_v18 = vadd.f32 %v2353_v40, %v7079_v31  ;;  %v2296_v13 = vpop.f32.mrf.mxu3 }
 0x42c   : > { %v2297_v1 = vadd.f32 %v2296_v13, %v2268_v45  ;;  %2636 = vrot.lane.b32.xlu1 %v2584_v17, %s6197_s10 }
 0x42d   : > { %v2416_v25 = vrot.slane %v7426_v18, 7 }
 0x42e   : > { %v2326_v61 = vadd.f32 %v2325_v53, %v2297_v1  ;;  %2550 = vrot.lane.b32.xlu2 %v7429_v38, %s6198_s11  ;;  %2650 = vrot.lane.b32.xlu0 %v7429_v38, %s6199_s12 }
 0x42f   : > { %v2440_v20 = vsel %vm293_vm0, %v2416_v25, 0.0  ;;  %v2432_v31 = vsel %vm293_vm0, 0.0, %v2416_v25 }
 0x430   : > { %v2453_v39 = vpack.c.bf16 %v2440_v20, %v2440_v20  ;;  %vm2338_vm13 = vcmp.ge.f32.partialorder %v2326_v61, 0.0  ;;  %v2346_v21 = vmul.f32 0.2, %v2326_v61  ;;  %v7438_v15 = vpack.c.bf16 %v2432_v31, %v2432_v31 }
 0x432   : > { %v2483_v2 = vunpack.c.l.b16 %v2453_v39  ;;  %v2354_v32 = vsel %vm2338_vm13, %v2326_v61, %v2346_v21  ;;  %v2482_v49 = vunpack.c.l.b16 %v7438_v15  ;;  %v2330_v61 = vpop.f32.mrf.mxu2 }
 0x433   : > { %v7448_v23 = vadd.f32 %v2354_v32, %v7102_v58  ;;  %v2299_v54 = vpop.f32.mrf.mxu3 }
 0x434   : > { %2571 = vrot.lane.b32.xlu1 %v2561_v47, %s6197_s10  ;;  %v2270_v34 = vpop.f32.mrf.mxu1  ;;  %v2585_v29 = vpack.c.b16 %v2482_v49, %v2482_v49  ;;  %v2492_v36 = vpack.c.b16 %v2483_v2, %v2482_v49  ;;  %v6019_v47 = vld [vmem:[%s8508_s1 + $0x220] sm:$0xff] }
 0x435   : > { %v2417_v8 = vrot.slane %v7448_v23, 7  ;;  %v2271_v55 = vadd.f32 %v7345_v56, %v2270_v34  ;;  %2977 = vmatpush.bf16.msra.mxu1 %v6019_v47 }
 0x436   : > { %2597 = vrot.lane.b32.xlu0 %v2585_v29, %s6199_s12  ;;  %2638 = vrot.lane.b32.xlu2 %v2585_v29, %s6197_s10  ;;  %v2526_v19 = vshll.u32 %v2492_v36, 16  ;;  %v2562_v58 = vrot.slane %v2492_v36, 1  ;;  %v2524_v52 = vshrl.u32 %v2492_v36, 16 }
 0x437   : > { %v2441_v9 = vsel %vm293_vm0, %v2417_v8, 0.0  ;;  %v2300_v46 = vadd.f32 %v2299_v54, %v2271_v55  ;;  %v2433_v4 = vsel %vm293_vm0, 0.0, %v2417_v8 }
 0x438   : > { %v2455_v42 = vpack.c.bf16 %v2441_v9, %v2441_v9  ;;  %v2528_v44 = vrot.slane %v2526_v19, 1  ;;  %v2792_v17 = vunpack.c.l.b16 %v2562_v58  ;;  %v7457_v62 = vpack.c.bf16 %v2433_v4, %v2433_v4  ;;  %v6009_v19 = vld [vmem:[%s8508_s1 + $0x1d0] sm:$0xff] }
 0x439   : > { %v2329_v60 = vadd.f32 %v2328_v51, %v2300_v46  ;;  %2978 = vmatpush.bf16.msra.mxu1 %v6018_v12 }
 0x43a   : > { %v7459_v41 = vor.u32 %v2528_v44, %v2524_v52  ;;  %v2812_v28 = vpack.c.b16 %v2792_v17, %v2789_v24  ;;  %v2484_v45 = vunpack.c.l.b16 %v7457_v62  ;;  %v2485_v40 = vunpack.c.l.b16 %v2455_v42  ;;  %v6008_v52 = vld [vmem:[%s8508_s1 + $0x1c8] sm:$0xff] }
 0x43b   : > { %vm2339_vm14 = vcmp.ge.f32.partialorder %v2329_v60, 0.0  ;;  %v2347_v48 = vmul.f32 0.2, %v2329_v60  ;;  %v2301_v1 = vpop.f32.mrf.mxu3 }
 0x43c   : > { %2652 = vrot.lane.b32.xlu1 %v7459_v41, %s6199_s12  ;;  %v2272_v26 = vpop.f32.mrf.mxu1  ;;  %5640 = vmatmul.msk.bf16.gmra.mxu3 %vm546_vm1, %v2812_v28  ;;  %v2493_v31 = vpack.c.b16 %v2485_v40, %v2484_v45  ;;  %v2586_v59 = vpack.c.b16 %v2484_v45, %v2484_v45  ;;  %v6007_v45 = vld [vmem:[%s8508_s1 + $0x1c0] sm:$0xff] }
 0x43d   : > { %v2355_v63 = vsel %vm2339_vm14, %v2329_v60, %v2347_v48  ;;  %v2273_v13 = vadd.f32 %v7345_v56, %v2272_v26  ;;  %v6017_v26 = vld [vmem:[%s8508_s1 + $0x210] sm:$0xff] }
 0x43e   : > { %v7473_v53 = vadd.f32 %v2355_v63, %v7133_v37  ;;  %2573 = vrot.lane.b32.xlu2 %v2562_v58, %s6197_s10  ;;  %2552 = vrot.lane.b32.xlu0 %v7459_v41, %s6198_s11  ;;  %v6010_v37 = vld [vmem:[%s8508_s1 + $0x1d8] sm:$0xff]  ;;  %v2563_v54 = vrot.slane %v2493_v31, 1  ;;  %v2533_v34 = vshll.u32 %v2493_v31, 16 }
 0x43f   : > { %v2302_v25 = vadd.f32 %v2301_v1, %v2273_v13  ;;  %2949 = vmatpush.bf16.msrb.mxu0 %v6010_v37  ;;  %2979 = vmatpush.bf16.msra.mxu1 %v6017_v26  ;;  %v6006_v13 = vld [vmem:[%s8508_s1 + $0x1b8] sm:$0xff] }
 0x440   : > { %v2418_v20 = vrot.slane %v7473_v53, 7  ;;  %v2535_v9 = vrot.slane %v2533_v34, 1  ;;  %v2795_v42 = vunpack.c.l.b16 %v2563_v54  ;;  %v6014_v34 = vld [vmem:[%s8508_s1 + $0x1f8] sm:$0xff] }
 0x441   : > { %v2331_v39 = vadd.f32 %v2330_v61, %v2302_v25 }
 0x442   : > { %v2434_v21 = vsel %vm293_vm0, 0.0, %v2418_v20  ;;  %v2442_v56 = vsel %vm293_vm0, %v2418_v20, 0.0 }
 0x443   : > { %v7487_v2 = vpack.c.bf16 %v2434_v21, %v2434_v21  ;;  %v2457_v32 = vpack.c.bf16 %v2442_v56, %v2442_v56  ;;  %vm2340_vm15 = vcmp.ge.f32.partialorder %v2331_v39, 0.0  ;;  %v2348_v49 = vmul.f32 0.2, %v2331_v39  ;;  %2950 = vmatpush.bf16.msrb.mxu0 %v6009_v19  ;;  %v6016_v56 = vld [vmem:[%s8508_s1 + $0x208] sm:$0xff] }
 0x444   : > { %2599 = vrot.lane.b32.xlu1 %v2586_v59, %s6199_s12  ;;  %2980 = vmatpush.bf16.msra.mxu1 %v6016_v56 }
 0x445   : > { %v2486_v29 = vunpack.c.l.b16 %v7487_v2  ;;  %v2487_v36 = vunpack.c.l.b16 %v2457_v32  ;;  %v2356_v8 = vsel %vm2340_vm15, %v2331_v39, %v2348_v49  ;;  %v6015_v32 = vld [vmem:[%s8508_s1 + $0x200] sm:$0xff] }
 0x446   : > { %v7492_v55 = vadd.f32 %v2356_v8, %v7160_v22  ;;  %2624 = vrot.lane.b32.xlu2 %v2562_v58, %s6198_s11  ;;  %2626 = vrot.lane.b32.xlu0 %v2563_v54, %s6198_s11  ;;  %v2531_v22 = vshrl.u32 %v2493_v31, 16  ;;  %v6005_v31 = vld [vmem:[%s8508_s1 + $0x1b0] sm:$0xff] }
 0x447   : > { %v2494_v51 = vpack.c.b16 %v2487_v36, %v2486_v29  ;;  %2951 = vmatpush.bf16.msrb.mxu0 %v6008_v52  ;;  %v2587_v1 = vpack.c.b16 %v2486_v29, %v2486_v29 }
 0x448   : > { %v2419_v24 = vrot.slane %v7492_v55, 7  ;;  %v7506_v28 = vor.u32 %v2535_v9, %v2531_v22  ;;  %2981 = vmatpush.bf16.msra.mxu1 %v6015_v32 }
 0x449   : > { %v2564_v46 = vrot.slane %v2494_v51, 1  ;;  %v2540_v63 = vshll.u32 %v2494_v51, 16  ;;  %v2538_v39 = vshrl.u32 %v2494_v51, 16  ;;  %v6013_v51 = vld [vmem:[%s8508_s1 + $0x1f0] sm:$0xff] }
 0x44a   : > { %v2435_v4 = vsel %vm293_vm0, 0.0, %v2419_v24  ;;  %v2443_v58 = vsel %vm293_vm0, %v2419_v24, 0.0 }
 0x44b   : > { %v2798_v44 = vunpack.c.l.b16 %v2564_v46  ;;  %v2458_v17 = vpack.c.bf16 %v2435_v4, %v2435_v4  ;;  %v2459_v60 = vpack.c.bf16 %v2443_v58, %v2443_v58  ;;  %2952 = vmatpush.bf16.msrb.mxu0 %v6007_v45  ;;  %v2542_v20 = vrot.slane %v2540_v63, 1 }
 0x44c   : > { %2640 = vrot.lane.b32.xlu1 %v2586_v59, %s6197_s10  ;;  %2982 = vmatpush.bf16.msra.mxu1 %v6014_v34 }
 0x44d   : > { %v2815_v30 = vpack.c.b16 %v2798_v44, %v2795_v42  ;;  %v2580_v47 = vunpack.c.l.b16 %v2458_v17  ;;  %v2606_v48 = vunpack.c.l.b16 %v2459_v60  ;;  %v7531_v59 = vor.u32 %v2542_v20, %v2538_v39 }
 0x44e   : > { %2554 = vrot.lane.b32.xlu2 %v7506_v28, %s6198_s11  ;;  %2654 = vrot.lane.b32.xlu0 %v7506_v28, %s6199_s12 }
 0x44f   : > { %5641 = vmatmul.msk.bf16.gmra.mxu3 %vm546_vm1, %v2815_v30  ;;  %v2607_v40 = vpack.c.b16 %v2606_v48, %v2580_v47  ;;  %v2566_v25 = vpop.permute.xlu2 %2565  ;;  %2953 = vmatpush.bf16.msrb.mxu0 %v6006_v13  ;;  %v2588_v49 = vpack.c.b16 %v2580_v47, %v2580_v47 }
 0x450   : > { %2983 = vmatpush.bf16.msra.mxu1 %v6013_v51 }
 0x451   : > { %v2615_v61 = vrot.slane %v2607_v40, 1  ;;  %v2609_v8 = vshrl.u32 %v2607_v40, 16 }
 0x453   : > { %v2801_v21 = vunpack.c.l.b16 %v2615_v61  ;;  %2954 = vmatpush.bf16.msrb.mxu0 %v6005_v31 }
 0x454   : > { %2575 = vrot.lane.b32.xlu1 %v2563_v54, %s6197_s10  ;;  %v2611_v54 = vshll.u32 %v2607_v40, 16 }
 0x455   : > { %v2818_v37 = vpack.c.b16 %v6607_v14, %v2801_v21 }
 0x456   : > { %2601 = vrot.lane.b32.xlu0 %v2587_v1, %s6199_s12  ;;  %2642 = vrot.lane.b32.xlu2 %v2587_v1, %s6197_s10  ;;  %v2613_v29 = vrot.slane %v2611_v54, 1 }
 0x457   : > { %v2617_v12 = vpop.permute.xlu2 %2616 }
 0x458   : > { %v7553_v19 = vor.u32 %v2613_v29, %v2609_v8 }
 0x45c   : > { %2656 = vrot.lane.b32.xlu1 %v7531_v59, %s6199_s12 }
 0x45e   : > { %2577 = vrot.lane.b32.xlu2 %v2564_v46, %s6197_s10  ;;  %2556 = vrot.lane.b32.xlu0 %v7531_v59, %s6198_s11 }
 0x45f   : > { %5642 = vmatmul.msk.bf16.gmra.mxu3 %vm546_vm1, %v2818_v37  ;;  %v2547_v36 = vpop.permute.xlu2 %2546 }
 0x464   : > { %2603 = vrot.lane.b32.xlu1 %v2588_v49, %s6199_s12 }
 0x465   : > { %v2590_v9 = vpop.permute.xlu0 %2589 }
 0x466   : > { %2628 = vrot.lane.b32.xlu2 %v2564_v46, %s6198_s11  ;;  %2630 = vrot.lane.b32.xlu0 %v2615_v61, %s6198_s11  ;;  %v2696_v22 = vsel %vm588_vm3, %v6520_v57, %v2590_v9 }
 0x467   : > { %v2781_v17 = vunpack.c.l.b16 %v2696_v22 }
 0x46b   : > { %v2545_v24 = vpop.permute.xlu1 %2544 }
 0x46c   : > { %2644 = vrot.lane.b32.xlu1 %v2588_v49, %s6197_s10  ;;  %v2662_v52 = vsel %vm546_vm1, %v7355_v6, %v2545_v24  ;;  %v2713_v6 = vsel %vm546_vm1, %v7375_v11, %v2617_v12  ;;  %v2665_v11 = vsel %vm546_vm1, %v7365_v3, %v2547_v36 }
 0x46d   : > { %v2682_v4 = vsel %vm571_vm2, %v2662_v52, %v2566_v25 }
 0x46e   : > { %2658 = vrot.lane.b32.xlu2 %v7553_v19, %s6199_s12 }
 0x46f   : > { %v2619_v42 = vpop.permute.xlu0 %2618 }
 0x470   : > { %v2635_v46 = vpop.permute.xlu2 %2634  ;;  %v2716_v1 = vsel %vm546_vm1, %v7383_v43, %v2619_v42 }
 0x471   : > { %v2738_v61 = vsel %vm571_vm2, %v2716_v1, %v2635_v46 }
 0x473   : > { %v2592_v58 = vpop.permute.xlu1 %2591 }
 0x474   : > { %v2698_v44 = vsel %vm588_vm3, %v2682_v4, %v2592_v58 }
 0x475   : > { %v2784_v60 = vunpack.c.l.b16 %v2698_v44 }
 0x477   : > { %v2807_v30 = vpack.c.b16 %v2784_v60, %v2781_v17  ;;  %v2647_v26 = vpop.permute.xlu0 %2646 }
 0x478   : > { %v2570_v47 = vpop.permute.xlu2 %2569 }
 0x479   : > { %2955 = vmatmul.bf16.vlgmr.msrb.gmra.mxu0 %v2807_v30 }
 0x47b   : > { %v2633_v48 = vpop.permute.xlu1 %2632 }
 0x47c   : > { %v2736_v13 = vsel %vm571_vm2, %v2713_v6, %v2633_v48 }
 0x47d   : > { %v2751_v25 = vsel %vm588_vm3, %v2736_v13, %v2647_v26 }
 0x47e   : > { %v2782_v21 = vunpack.c.l.b16 %v2751_v25 }
 0x480   : > { %v2621_v45 = vpop.permute.xlu2 %2620 }
 0x481   : > { %v2719_v4 = vsel %vm546_vm1, %v7411_v16, %v2621_v45 }
 0x483   : > { %v2568_v40 = vpop.permute.xlu1 %2567 }
 0x484   : > { %v2684_v43 = vsel %vm571_vm2, %v2665_v11, %v2568_v40 }
 0x488   : > { %v2594_v63 = vpop.permute.xlu0 %2593  ;;  %v2551_v31 = vpop.permute.xlu2 %2550 }
 0x489   : > { %v2700_v49 = vsel %vm588_vm3, %v2684_v43, %v2594_v63  ;;  %v2671_v63 = vsel %vm546_vm1, %v7409_v10, %v2551_v31 }
 0x48a   : > { %v2787_v8 = vunpack.c.l.b16 %v2700_v49 }
 0x48e   : > { %v2649_v20 = vpop.permute.xlu1 %2648 }
 0x48f   : > { %v2753_v39 = vsel %vm588_vm3, %v2738_v61, %v2649_v20 }
 0x490   : > { %v2785_v56 = vunpack.c.l.b16 %v2753_v39  ;;  %v2549_v37 = vpop.permute.xlu0 %2548  ;;  %v2639_v9 = vpop.permute.xlu2 %2638 }
 0x491   : > { %v2668_v12 = vsel %vm546_vm1, %v7397_v7, %v2549_v37 }
 0x492   : > { %v2808_v32 = vpack.c.b16 %v2785_v56, %v2782_v21  ;;  %v2686_v34 = vsel %vm571_vm2, %v2668_v12, %v2570_v47 }
 0x494   : > { %2984 = vmatmul.bf16.vlgmr.msra.gmra.mxu1 %v2808_v32 }
 0x496   : > { %v2596_v54 = vpop.permute.xlu1 %2595 }
 0x497   : > { %v2702_v29 = vsel %vm588_vm3, %v2686_v34, %v2596_v54 }
 0x498   : > { %v2790_v51 = vunpack.c.l.b16 %v2702_v29  ;;  %v2623_v24 = vpop.permute.xlu0 %2622  ;;  %v2574_v52 = vpop.permute.xlu2 %2573 }
 0x499   : > { %v2722_v42 = vsel %vm546_vm1, %v7429_v38, %v2623_v24 }
 0x49a   : > { %v2810_v46 = vpack.c.b16 %v2790_v51, %v2787_v8  ;;  %v2742_v30 = vsel %vm571_vm2, %v2722_v42, %v2639_v9 }
 0x49c   : > { %2960 = vmatmul.bf16.gmra.mxu0 %v2810_v46 }
 0x49e   : > { %v2637_v3 = vpop.permute.xlu1 %2636 }
 0x49f   : > { %v2740_v58 = vsel %vm571_vm2, %v2719_v4, %v2637_v3 }
 0x4a0   : > { %v2651_v36 = vpop.permute.xlu0 %2650  ;;  %v2625_v44 = vpop.permute.xlu2 %2624 }
 0x4a1   : > { %v2755_v17 = vsel %vm588_vm3, %v2740_v58, %v2651_v36 }
 0x4a2   : > { %v2788_v48 = vunpack.c.l.b16 %v2755_v17 }
 0x4a6   : > { %v2572_v7 = vpop.permute.xlu1 %2571 }
 0x4a7   : > { %v2688_v16 = vsel %vm571_vm2, %v2671_v63, %v2572_v7 }
 0x4a8   : > { %v2598_v22 = vpop.permute.xlu0 %2597  ;;  %v2555_v25 = vpop.permute.xlu2 %2554 }
 0x4a9   : > { %v2704_v6 = vsel %vm588_vm3, %v2688_v16, %v2598_v22  ;;  %v2677_v46 = vsel %vm546_vm1, %v7457_v62, %v2555_v25 }
 0x4aa   : > { %v2793_v20 = vunpack.c.l.b16 %v2704_v6  ;;  %v3014_v6 = vpop.f32.mrf.mxu3 }
 0x4ae   : > { %v2653_v60 = vpop.permute.xlu1 %2652 }
 0x4af   : > { %v2757_v47 = vsel %vm588_vm3, %v2742_v30, %v2653_v60 }
 0x4b0   : > { %v2791_v26 = vunpack.c.l.b16 %v2757_v47  ;;  %v2553_v40 = vpop.permute.xlu0 %2552  ;;  %v2643_v37 = vpop.permute.xlu2 %2642 }
 0x4b1   : > { %v2674_v38 = vsel %vm546_vm1, %v7438_v15, %v2553_v40  ;;  %v2725_v15 = vsel %vm546_vm1, %v7459_v41, %v2625_v44 }
 0x4b2   : > { %v2811_v45 = vpack.c.b16 %v2791_v26, %v2788_v48  ;;  %v2690_v1 = vsel %vm571_vm2, %v2674_v38, %v2574_v52  ;;  %v7624_v38 = vld [vmem:[%s8509_s2 + $0x3] ss:$0 sm:$0xff] }
 0x4b4   : > { %2989 = vmatmul.bf16.gmra.mxu1 %v2811_v45 }
 0x4b6   : > { %v2600_v13 = vpop.permute.xlu1 %2599 }
 0x4b7   : > { %v2706_v61 = vsel %vm588_vm3, %v2690_v1, %v2600_v13 }
 0x4b8   : > { %v2796_v39 = vunpack.c.l.b16 %v2706_v61  ;;  %v2627_v21 = vpop.permute.xlu0 %2626  ;;  %v2578_v43 = vpop.permute.xlu2 %2577 }
 0x4b9   : > { %v2728_v49 = vsel %vm546_vm1, %v7506_v28, %v2627_v21 }
 0x4ba   : > { %v2813_v56 = vpack.c.b16 %v2796_v39, %v2793_v20  ;;  %v2746_v29 = vsel %vm571_vm2, %v2728_v49, %v2643_v37  ;;  %v3016_v37 = vpop.f32.mrf.mxu3 }
 0x4bc   : > { %2965 = vmatmul.bf16.gmra.mxu0 %v2813_v56 }
 0x4be   : > { %v2641_v10 = vpop.permute.xlu1 %2640 }
 0x4bf   : > { %v2744_v12 = vsel %vm571_vm2, %v2725_v15, %v2641_v10 }
 0x4c0   : > { %v2655_v31 = vpop.permute.xlu0 %2654  ;;  %v2629_v28 = vpop.permute.xlu2 %2628 }
 0x4c1   : > { %v2759_v54 = vsel %vm588_vm3, %v2744_v12, %v2655_v31 }
 0x4c2   : > { %v2794_v51 = vunpack.c.l.b16 %v2759_v54 }
 0x4c6   : > { %v2576_v32 = vpop.permute.xlu1 %2575 }
 0x4c7   : > { %v2692_v41 = vsel %vm571_vm2, %v2677_v46, %v2576_v32 }
 0x4c8   : > { %v2602_v11 = vpop.permute.xlu0 %2601  ;;  %v2659_v48 = vpop.permute.xlu2 %2658 }
 0x4c9   : > { %v2708_v52 = vsel %vm588_vm3, %v2692_v41, %v2602_v11 }
 0x4ca   : > { %v2799_v58 = vunpack.c.l.b16 %v2708_v52 }
 0x4ce   : > { %v2657_v34 = vpop.permute.xlu1 %2656 }
 0x4cf   : > { %v2761_v8 = vsel %vm588_vm3, %v2746_v29, %v2657_v34 }
 0x4d0   : > { %v2797_v24 = vunpack.c.l.b16 %v2761_v8  ;;  %v2557_v9 = vpop.permute.xlu0 %2556 }
 0x4d1   : > { %v2680_v36 = vsel %vm546_vm1, %v7487_v2, %v2557_v9  ;;  %v2731_v2 = vsel %vm546_vm1, %v7531_v59, %v2629_v28 }
 0x4d2   : > { %v2814_v3 = vpack.c.b16 %v2797_v24, %v2794_v51  ;;  %v2694_v22 = vsel %vm571_vm2, %v2680_v36, %v2578_v43 }
 0x4d4   : > { %2994 = vmatmul.bf16.gmra.mxu1 %v2814_v3  ;;  %v6040_v3 = vld [vmem:[%s8508_s1 + $0x2c8] sm:$0xff] }
 0x4d5   : > { %3712 = vmatpush.bf16.msrb.mxu1 %v6040_v3 }
 0x4d6   : > { %v2604_v7 = vpop.permute.xlu1 %2603 }
 0x4d7   : > { %v2710_v4 = vsel %vm588_vm3, %v2694_v22, %v2604_v7 }
 0x4d8   : > { %v2802_v42 = vunpack.c.l.b16 %v2710_v4  ;;  %v2631_v44 = vpop.permute.xlu0 %2630 }
 0x4d9   : > { %v2734_v62 = vsel %vm546_vm1, %v7553_v19, %v2631_v44  ;;  %v6039_v44 = vld [vmem:[%s8508_s1 + $0x2c0] sm:$0xff] }
 0x4da   : > { %v2816_v17 = vpack.c.b16 %v2802_v42, %v2799_v58  ;;  %v2749_v60 = vsel %vm571_vm2, %v2734_v62, %v6635_v0  ;;  %3713 = vmatpush.bf16.msrb.mxu1 %v6039_v44 }
 0x4db   : > { %v2764_v47 = vsel %vm588_vm3, %v2749_v60, %v6633_v5 }
 0x4dc   : > { %2970 = vmatmul.bf16.gmra.mxu0 %v2816_v17  ;;  %v2803_v16 = vunpack.c.l.b16 %v2764_v47 }
 0x4de   : > { %v2645_v30 = vpop.permute.xlu1 %2644 }
 0x4df   : > { %v2748_v26 = vsel %vm571_vm2, %v2731_v2, %v2645_v30 }
 0x4e0   : > { %v2763_v40 = vsel %vm588_vm3, %v2748_v26, %v2659_v48  ;;  %v3019_v26 = vpop.f32.mrf.mxu3 }
 0x4e1   : > { %v2800_v63 = vunpack.c.l.b16 %v2763_v40 }
 0x4e3   : > { %v2817_v19 = vpack.c.b16 %v2803_v16, %v2800_v63 }
 0x4e5   : > { %2999 = vmatmul.bf16.gmra.mxu1 %v2817_v19 }
 0x4f6   : > { %v2956_v45 = vpop.f32.mrf.mxu0 }
 0x4f7   : > { %v2957_v59 = vadd.f32 %v7624_v38, %v2956_v45 }
 0x4fe   : > { %v2958_v61 = vpop.f32.mrf.mxu0 }
 0x4ff   : > { %v2959_v39 = vadd.f32 %v7624_v38, %v2958_v61 }
 0x511   : > { %v2985_v13 = vpop.f32.mrf.mxu1 }
 0x512   : > { %v2986_v1 = vadd.f32 %v2985_v13, %v2957_v59 }
 0x514   : > { %v3015_v25 = vadd.f32 %v3014_v6, %v2986_v1 }
 0x516   : > { %vm3034_vm4 = vcmp.ge.f32.partialorder %v3015_v25, 0.0  ;;  %v3042_v20 = vmul.f32 0.2, %v3015_v25 }
 0x518   : > { %v3050_v21 = vsel %vm3034_vm4, %v3015_v25, %v3042_v20 }
 0x519   : > { %v7629_v56 = vadd.f32 %v3050_v21, %v7350_v50  ;;  %v2987_v10 = vpop.f32.mrf.mxu1  ;;  %v2961_v17 = vpop.f32.mrf.mxu0 }
 0x51a   : > { %v2988_v31 = vadd.f32 %v2987_v10, %v2959_v39  ;;  %v2962_v30 = vadd.f32 %v7624_v38, %v2961_v17  ;;  %v3021_v39 = vpop.f32.mrf.mxu3 }
 0x51b   : > { %v3113_v32 = vrot.slane %v7629_v56, 7 }
 0x51c   : > { %v3017_v11 = vadd.f32 %v3016_v37, %v2988_v31 }
 0x51d   : > { %v3137_v15 = vsel %vm293_vm0, %v3113_v32, 0.0  ;;  %v3129_v12 = vsel %vm293_vm0, 0.0, %v3113_v32 }
 0x51e   : > { %v3146_v43 = vpack.c.bf16 %v3137_v15, %v3137_v15  ;;  %vm3035_vm5 = vcmp.ge.f32.partialorder %v3017_v11, 0.0  ;;  %v3043_v49 = vmul.f32 0.2, %v3017_v11  ;;  %v7634_v54 = vpack.c.bf16 %v3129_v12, %v3129_v12 }
 0x520   : > { %v3176_v34 = vunpack.c.l.b16 %v3146_v43  ;;  %v3051_v29 = vsel %vm3035_vm5, %v3017_v11, %v3043_v49  ;;  %v3175_v50 = vunpack.c.l.b16 %v7634_v54 }
 0x521   : > { %v7638_v8 = vadd.f32 %v3051_v29, %v7359_v33  ;;  %v2963_v59 = vpop.f32.mrf.mxu0 }
 0x522   : > { %v3282_v51 = vpack.c.b16 %v3175_v50, %v3175_v50  ;;  %v3189_v24 = vpack.c.b16 %v3176_v34, %v3175_v50  ;;  %v2964_v13 = vadd.f32 %v7624_v38, %v2963_v59 }
 0x523   : > { %v3114_v9 = vrot.slane %v7638_v8, 7 }
 0x524   : > { %3290 = vrot.lane.b32.xlu2 %v3282_v51, %s6199_s12  ;;  %v3259_v46 = vrot.slane %v3189_v24, 1  ;;  %v3199_v41 = vshll.u32 %v3189_v24, 16  ;;  %v3197_v7 = vshrl.u32 %v3189_v24, 16 }
 0x525   : > { %v3130_v36 = vsel %vm293_vm0, 0.0, %v3114_v9  ;;  %v3138_v28 = vsel %vm293_vm0, %v3114_v9, 0.0 }
 0x526   : > { %v7647_v52 = vpack.c.bf16 %v3130_v36, %v3130_v36  ;;  %v3148_v33 = vpack.c.bf16 %v3138_v28, %v3138_v28  ;;  %3266 = vrot.lane.b32.xlu1 %v3259_v46, %s6197_s10  ;;  %v3201_v22 = vrot.slane %v3199_v41, 1 }
 0x528   : > { %v3178_v4 = vunpack.c.l.b16 %v3148_v33  ;;  %v7650_v58 = vor.u32 %v3201_v22, %v3197_v7  ;;  %v3177_v42 = vunpack.c.l.b16 %v7647_v52 }
 0x52a   : > { %3245 = vrot.lane.b32.xlu0 %v7650_v58, %s6198_s11  ;;  %v3190_v62 = vpack.c.b16 %v3178_v4, %v3177_v42  ;;  %v3283_v47 = vpack.c.b16 %v3177_v42, %v3177_v42 }
 0x52c   : > { %v3260_v60 = vrot.slane %v3190_v62, 1  ;;  %v3206_v2 = vshll.u32 %v3190_v62, 16  ;;  %v3204_v16 = vshrl.u32 %v3190_v62, 16  ;;  %v3024_v62 = vpop.f32.mrf.mxu3 }
 0x52e   : > { %3319 = vrot.lane.b32.xlu2 %v3260_v60, %s6198_s11  ;;  %3317 = vrot.lane.b32.xlu1 %v3259_v46, %s6198_s11  ;;  %v3208_v48 = vrot.slane %v3206_v2, 1  ;;  %v3484_v9 = vunpack.c.l.b16 %v3260_v60 }
 0x530   : > { %v7662_v45 = vor.u32 %v3208_v48, %v3204_v16 }
 0x531   : > { %v2990_v40 = vpop.f32.mrf.mxu1 }
 0x532   : > { %v2991_v63 = vadd.f32 %v2990_v40, %v2962_v30  ;;  %3292 = vrot.lane.b32.xlu0 %v3283_v47, %s6199_s12 }
 0x534   : > { %v3020_v19 = vadd.f32 %v3019_v26, %v2991_v63  ;;  %v3026_v59 = vpop.f32.mrf.mxu3 }
 0x536   : > { %vm3036_vm6 = vcmp.ge.f32.partialorder %v3020_v19, 0.0  ;;  %v3044_v6 = vmul.f32 0.2, %v3020_v19  ;;  %3347 = vrot.lane.b32.xlu2 %v7662_v45, %s6199_s12  ;;  %3247 = vrot.lane.b32.xlu1 %v7662_v45, %s6198_s11 }
 0x538   : > { %v3052_v1 = vsel %vm3036_vm6, %v3020_v19, %v3044_v6 }
 0x539   : > { %v7670_v25 = vadd.f32 %v3052_v1, %v7391_v35  ;;  %v2992_v61 = vpop.f32.mrf.mxu1  ;;  %v2966_v4 = vpop.f32.mrf.mxu0 }
 0x53a   : > { %v2993_v20 = vadd.f32 %v2992_v61, %v2964_v13  ;;  %3333 = vrot.lane.b32.xlu0 %v3283_v47, %s6197_s10 }
 0x53b   : > { %v3115_v21 = vrot.slane %v7670_v25, 7 }
 0x53c   : > { %v3022_v10 = vadd.f32 %v3021_v39, %v2993_v20 }
 0x53d   : > { %v3139_v31 = vsel %vm293_vm0, %v3115_v21, 0.0  ;;  %v3131_v37 = vsel %vm293_vm0, 0.0, %v3115_v21 }
 0x53e   : > { %v3150_v32 = vpack.c.bf16 %v3139_v31, %v3139_v31  ;;  %vm3037_vm7 = vcmp.ge.f32.partialorder %v3022_v10, 0.0  ;;  %v3045_v11 = vmul.f32 0.2, %v3022_v10  ;;  %v7676_v15 = vpack.c.bf16 %v3131_v37, %v3131_v37 }
 0x540   : > { %v3180_v12 = vunpack.c.l.b16 %v3150_v32  ;;  %v3053_v35 = vsel %vm3037_vm7, %v3022_v10, %v3045_v11  ;;  %v3179_v43 = vunpack.c.l.b16 %v7676_v15 }
 0x541   : > { %v7680_v49 = vadd.f32 %v3053_v35, %v7401_v27  ;;  %v2968_v40 = vpop.f32.mrf.mxu0 }
 0x542   : > { %3268 = vrot.lane.b32.xlu0 %v3260_v60, %s6197_s10  ;;  %v3284_v34 = vpack.c.b16 %v3179_v43, %v3179_v43  ;;  %v3191_v29 = vpack.c.b16 %v3180_v12, %v3179_v43  ;;  %v2967_v60 = vadd.f32 %v7624_v38, %v2966_v4  ;;  %v2969_v6 = vadd.f32 %v7624_v38, %v2968_v40  ;;  %v6029_v4 = vld [vmem:[%s8508_s1 + $0x270] sm:$0xff] }
 0x543   : > { %v3116_v50 = vrot.slane %v7680_v49, 7 }
 0x544   : > { %3294 = vrot.lane.b32.xlu2 %v3284_v34, %s6199_s12  ;;  %v3261_v51 = vrot.slane %v3191_v29, 1  ;;  %3335 = vrot.lane.b32.xlu1 %v3284_v34, %s6197_s10  ;;  %v3213_v24 = vshll.u32 %v3191_v29, 16  ;;  %v3211_v41 = vshrl.u32 %v3191_v29, 16 }
 0x545   : > { %v3140_v46 = vsel %vm293_vm0, %v3116_v50, 0.0  ;;  %v3132_v3 = vsel %vm293_vm0, 0.0, %v3116_v50  ;;  %v6030_v50 = vld [vmem:[%s8508_s1 + $0x278] sm:$0xff] }
 0x546   : > { %v3152_v27 = vpack.c.bf16 %v3140_v46, %v3140_v46  ;;  %v3215_v36 = vrot.slane %v3213_v24, 1  ;;  %v3487_v28 = vunpack.c.l.b16 %v3261_v51  ;;  %v7688_v33 = vpack.c.bf16 %v3132_v3, %v3132_v3  ;;  %3648 = vmatpush.bf16.msrb.mxu2 %v6030_v50 }
 0x548   : > { %v7690_v7 = vor.u32 %v3215_v36, %v3211_v41  ;;  %v3510_v22 = vpack.c.b16 %v3487_v28, %v3484_v9  ;;  %v3182_v42 = vunpack.c.l.b16 %v3152_v27  ;;  %v3181_v44 = vunpack.c.l.b16 %v7688_v33  ;;  %v3029_v9 = vpop.f32.mrf.mxu3 }
 0x54a   : > { %3349 = vrot.lane.b32.xlu0 %v7690_v7, %s6199_s12  ;;  %5752 = vmatmul.msk.bf16.vlgmr.msrb.gmra.mxu1 %vm546_vm1, %v3510_v22  ;;  %v3192_v17 = vpack.c.b16 %v3182_v42, %v3181_v44  ;;  %v3285_v2 = vpack.c.b16 %v3181_v44, %v3181_v44  ;;  %v6038_v42 = vld [vmem:[%s8508_s1 + $0x2b8] sm:$0xff] }
 0x54b   : > { %3649 = vmatpush.bf16.msrb.mxu2 %v6029_v4  ;;  %3677 = vmatpush.bf16.msra.mxu0 %v6038_v42 }
 0x54c   : > { %3270 = vrot.lane.b32.xlu1 %v3261_v51, %s6197_s10  ;;  %3249 = vrot.lane.b32.xlu2 %v7690_v7, %s6198_s11  ;;  %v7701_v48 = vrot.slane %v3192_v17, 1  ;;  %v3220_v26 = vshll.u32 %v3192_v17, 16  ;;  %v3218_v1 = vshrl.u32 %v3192_v17, 16 }
 0x54e   : > { %v3222_v19 = vrot.slane %v3220_v26, 1 }
 0x550   : > { %v7711_v21 = vor.u32 %v3222_v19, %v3218_v1 }
 0x551   : > { %v2995_v30 = vpop.f32.mrf.mxu1 }
 0x552   : > { %v2996_v47 = vadd.f32 %v2995_v30, %v2967_v60  ;;  %3296 = vrot.lane.b32.xlu0 %v3285_v2, %s6199_s12 }
 0x554   : > { %v3025_v63 = vadd.f32 %v3024_v62, %v2996_v47  ;;  %3321 = vrot.lane.b32.xlu1 %v3261_v51, %s6198_s11  ;;  %3323 = vrot.lane.b32.xlu2 %v7701_v48, %s6198_s11 }
 0x556   : > { %vm3038_vm8 = vcmp.ge.f32.partialorder %v3025_v63, 0.0  ;;  %v3046_v16 = vmul.f32 0.2, %v3025_v63 }
 0x558   : > { %v3054_v13 = vsel %vm3038_vm8, %v3025_v63, %v3046_v16 }
 0x559   : > { %v7708_v61 = vadd.f32 %v3054_v13, %v7426_v18  ;;  %v2997_v20 = vpop.f32.mrf.mxu1  ;;  %v2971_v31 = vpop.f32.mrf.mxu0 }
 0x55a   : > { %v2998_v39 = vadd.f32 %v2997_v20, %v2969_v6  ;;  %3337 = vrot.lane.b32.xlu0 %v3285_v2, %s6197_s10  ;;  %v2972_v51 = vadd.f32 %v7624_v38, %v2971_v31 }
 0x55b   : > { %v3117_v10 = vrot.slane %v7708_v61, 7 }
 0x55c   : > { %v3027_v37 = vadd.f32 %v3026_v59, %v2998_v39  ;;  %3251 = vrot.lane.b32.xlu1 %v7711_v21, %s6198_s11  ;;  %3351 = vrot.lane.b32.xlu2 %v7711_v21, %s6199_s12 }
 0x55d   : > { %v3141_v32 = vsel %vm293_vm0, %v3117_v10, 0.0  ;;  %v3133_v18 = vsel %vm293_vm0, 0.0, %v3117_v10  ;;  %v3031_v10 = vpop.f32.mrf.mxu3 }
 0x55e   : > { %v3154_v11 = vpack.c.bf16 %v3141_v32, %v3141_v32  ;;  %vm3039_vm9 = vcmp.ge.f32.partialorder %v3027_v37, 0.0  ;;  %v3047_v12 = vmul.f32 0.2, %v3027_v37  ;;  %v7720_v35 = vpack.c.bf16 %v3133_v18, %v3133_v18 }
 0x560   : > { %v3184_v43 = vunpack.c.l.b16 %v3154_v11  ;;  %v3055_v34 = vsel %vm3039_vm9, %v3027_v37, %v3047_v12  ;;  %v3183_v29 = vunpack.c.l.b16 %v7720_v35 }
 0x561   : > { %v7728_v24 = vadd.f32 %v3055_v34, %v7448_v23  ;;  %v3490_v23 = vunpack.c.l.b16 %v7701_v48  ;;  %v2973_v30 = vpop.f32.mrf.mxu0 }
 0x562   : > { %3272 = vrot.lane.b32.xlu0 %v7701_v48, %s6197_s10  ;;  %v3000_v46 = vpop.f32.mrf.mxu1  ;;  %v3286_v41 = vpack.c.b16 %v3183_v29, %v3183_v29  ;;  %v3193_v3 = vpack.c.b16 %v3184_v43, %v3183_v29  ;;  %v2974_v19 = vadd.f32 %v7624_v38, %v2973_v30  ;;  %v6037_v38 = vld [vmem:[%s8508_s1 + $0x2b0] sm:$0xff] }
 0x563   : > { %v3118_v27 = vrot.slane %v7728_v24, 7  ;;  %v3001_v36 = vadd.f32 %v3000_v46, %v2972_v51  ;;  %3678 = vmatpush.bf16.msra.mxu0 %v6037_v38 }
 0x564   : > { %3298 = vrot.lane.b32.xlu2 %v3286_v41, %s6199_s12  ;;  %3339 = vrot.lane.b32.xlu1 %v3286_v41, %s6197_s10  ;;  %v3227_v28 = vshll.u32 %v3193_v3, 16  ;;  %v3263_v22 = vrot.slane %v3193_v3, 1  ;;  %v3225_v17 = vshrl.u32 %v3193_v3, 16 }
 0x565   : > { %v3142_v44 = vsel %vm293_vm0, %v3118_v27, 0.0  ;;  %v3030_v62 = vadd.f32 %v3029_v9, %v3001_v36  ;;  %v3134_v60 = vsel %vm293_vm0, 0.0, %v3118_v27 }
 0x566   : > { %v3156_v2 = vpack.c.bf16 %v3142_v44, %v3142_v44  ;;  %v3229_v47 = vrot.slane %v3227_v28, 1  ;;  %v3493_v26 = vunpack.c.l.b16 %v3263_v22  ;;  %v7744_v40 = vpack.c.bf16 %v3134_v60, %v3134_v60  ;;  %v6027_v28 = vld [vmem:[%s8508_s1 + $0x260] sm:$0xff] }
 0x567   : > { %vm3040_vm10 = vcmp.ge.f32.partialorder %v3030_v62, 0.0  ;;  %v3048_v48 = vmul.f32 0.2, %v3030_v62 }
 0x568   : > { %v7746_v63 = vor.u32 %v3229_v47, %v3225_v17  ;;  %v3513_v16 = vpack.c.b16 %v3493_v26, %v3490_v23  ;;  %v3186_v6 = vunpack.c.l.b16 %v3156_v2  ;;  %v3185_v20 = vunpack.c.l.b16 %v7744_v40 }
 0x569   : > { %v3056_v59 = vsel %vm3040_vm10, %v3030_v62, %v3048_v48 }
 0x56a   : > { %v7750_v13 = vadd.f32 %v3056_v59, %v7473_v53  ;;  %3353 = vrot.lane.b32.xlu0 %v7746_v63, %s6199_s12  ;;  %v3002_v1 = vpop.f32.mrf.mxu1  ;;  %5753 = vmatmul.msk.bf16.gmra.mxu1 %vm546_vm1, %v3513_v16  ;;  %v6028_v53 = vld [vmem:[%s8508_s1 + $0x268] sm:$0xff]  ;;  %v3194_v11 = vpack.c.b16 %v3186_v6, %v3185_v20  ;;  %v3287_v29 = vpack.c.b16 %v3185_v20, %v3185_v20  ;;  %v6026_v16 = vld [vmem:[%s8508_s1 + $0x258] sm:$0xff]  ;;  %v6025_v59 = vld [vmem:[%s8508_s1 + $0x250] sm:$0xff] }
 0x56b   : > { %v3003_v39 = vadd.f32 %v3002_v1, %v2974_v19  ;;  %3650 = vmatpush.bf16.msrb.mxu2 %v6028_v53  ;;  %v6035_v6 = vld [vmem:[%s8508_s1 + $0x2a0] sm:$0xff] }
 0x56c   : > { %v3119_v31 = vrot.slane %v7750_v13, 7  ;;  %3274 = vrot.lane.b32.xlu1 %v3263_v22, %s6197_s10  ;;  %3253 = vrot.lane.b32.xlu2 %v7746_v63, %s6198_s11  ;;  %v3264_v41 = vrot.slane %v3194_v11, 1  ;;  %v3234_v3 = vshll.u32 %v3194_v11, 16  ;;  %v3232_v2 = vshrl.u32 %v3194_v11, 16  ;;  %v6034_v11 = vld [vmem:[%s8508_s1 + $0x298] sm:$0xff] }
 0x56d   : > { %v3032_v37 = vadd.f32 %v3031_v10, %v3003_v39  ;;  %v6024_v39 = vld [vmem:[%s8508_s1 + $0x248] sm:$0xff] }
 0x56e   : > { %v3135_v32 = vsel %vm293_vm0, 0.0, %v3119_v31  ;;  %v3143_v18 = vsel %vm293_vm0, %v3119_v31, 0.0  ;;  %v3236_v44 = vrot.slane %v3234_v3, 1  ;;  %v3496_v17 = vunpack.c.l.b16 %v3264_v41 }
 0x56f   : > { %v7768_v12 = vpack.c.bf16 %v3135_v32, %v3135_v32  ;;  %v3158_v43 = vpack.c.bf16 %v3143_v18, %v3143_v18  ;;  %vm3041_vm11 = vcmp.ge.f32.partialorder %v3032_v37, 0.0  ;;  %v3049_v34 = vmul.f32 0.2, %v3032_v37  ;;  %3651 = vmatpush.bf16.msrb.mxu2 %v6027_v28  ;;  %v6023_v18 = vld [vmem:[%s8508_s1 + $0x240] sm:$0xff] }
 0x570   : > { %v7787_v48 = vor.u32 %v3236_v44, %v3232_v2 }
 0x571   : > { %v3187_v50 = vunpack.c.l.b16 %v7768_v12  ;;  %v3188_v51 = vunpack.c.l.b16 %v3158_v43  ;;  %v3057_v9 = vsel %vm3041_vm11, %v3032_v37, %v3049_v34 }
 0x572   : > { %v7772_v46 = vadd.f32 %v3057_v9, %v7492_v55  ;;  %3300 = vrot.lane.b32.xlu0 %v3287_v29, %s6199_s12  ;;  %v6036_v55 = vld [vmem:[%s8508_s1 + $0x2a8] sm:$0xff] }
 0x573   : > { %v3195_v27 = vpack.c.b16 %v3188_v51, %v3187_v50  ;;  %3679 = vmatpush.bf16.msra.mxu0 %v6036_v55  ;;  %3652 = vmatpush.bf16.msrb.mxu2 %v6026_v16  ;;  %v3288_v10 = vpack.c.b16 %v3187_v50, %v3187_v50 }
 0x574   : > { %v3120_v36 = vrot.slane %v7772_v46, 7  ;;  %3325 = vrot.lane.b32.xlu1 %v3263_v22, %s6198_s11  ;;  %3327 = vrot.lane.b32.xlu2 %v3264_v41, %s6198_s11 }
 0x575   : > { %v3265_v23 = vrot.slane %v3195_v27, 1  ;;  %v3241_v1 = vshll.u32 %v3195_v27, 16  ;;  %v3239_v37 = vshrl.u32 %v3195_v27, 16 }
 0x576   : > { %v3136_v4 = vsel %vm293_vm0, 0.0, %v3120_v36  ;;  %v3144_v42 = vsel %vm293_vm0, %v3120_v36, 0.0 }
 0x577   : > { %v3159_v62 = vpack.c.bf16 %v3136_v4, %v3136_v4  ;;  %v3160_v22 = vpack.c.bf16 %v3144_v42, %v3144_v42  ;;  %v3499_v60 = vunpack.c.l.b16 %v3265_v23  ;;  %3680 = vmatpush.bf16.msra.mxu0 %v6035_v6  ;;  %3653 = vmatpush.bf16.msrb.mxu2 %v6025_v59  ;;  %v3243_v31 = vrot.slane %v3241_v1, 1  ;;  %v6031_v4 = vld [vmem:[%s8508_s1 + $0x280] sm:$0xff] }
 0x579   : > { %v3281_v30 = vunpack.c.l.b16 %v3159_v62  ;;  %v3307_v47 = vunpack.c.l.b16 %v3160_v22  ;;  %v3516_v26 = vpack.c.b16 %v3499_v60, %v3496_v17  ;;  %v7809_v32 = vor.u32 %v3243_v31, %v3239_v37 }
 0x57a   : > { %3341 = vrot.lane.b32.xlu0 %v3287_v29, %s6197_s10  ;;  %v6033_v29 = vld [vmem:[%s8508_s1 + $0x290] sm:$0xff] }
 0x57b   : > { %5754 = vmatmul.msk.bf16.gmra.mxu1 %vm546_vm1, %v3516_v26  ;;  %v3308_v19 = vpack.c.b16 %v3307_v47, %v3281_v30  ;;  %3654 = vmatpush.bf16.msrb.mxu2 %v6024_v39  ;;  %v3289_v50 = vpack.c.b16 %v3281_v30, %v3281_v30 }
 0x57c   : > { %3255 = vrot.lane.b32.xlu1 %v7787_v48, %s6198_s11  ;;  %3355 = vrot.lane.b32.xlu2 %v7787_v48, %s6199_s12 }
 0x57d   : > { %v3316_v20 = vrot.slane %v3308_v19, 1  ;;  %3681 = vmatpush.bf16.msra.mxu0 %v6034_v11  ;;  %v3312_v51 = vshll.u32 %v3308_v19, 16  ;;  %v3310_v27 = vshrl.u32 %v3308_v19, 16 }
 0x57e   : > { %v3291_v38 = vpop.permute.xlu2 %3290 }
 0x57f   : > { %v3502_v53 = vunpack.c.l.b16 %v3316_v20  ;;  %3655 = vmatpush.bf16.msrb.mxu2 %v6023_v18  ;;  %v3314_v9 = vrot.slane %v3312_v51, 1  ;;  %v3397_v44 = vsel %vm588_vm3, %v6520_v57, %v3291_v38 }
 0x580   : > { %v3482_v2 = vunpack.c.l.b16 %v3397_v44 }
 0x581   : > { %v3519_v43 = vpack.c.b16 %v6607_v14, %v3502_v53  ;;  %3682 = vmatpush.bf16.msra.mxu0 %v6033_v29  ;;  %v7834_v28 = vor.u32 %v3314_v9, %v3310_v27 }
 0x582   : > { %3276 = vrot.lane.b32.xlu0 %v3264_v41, %s6197_s10  ;;  %v6032_v41 = vld [vmem:[%s8508_s1 + $0x288] sm:$0xff] }
 0x584   : > { %3302 = vrot.lane.b32.xlu2 %v3288_v10, %s6199_s12  ;;  %3343 = vrot.lane.b32.xlu1 %v3288_v10, %s6197_s10 }
 0x585   : > { %3683 = vmatpush.bf16.msra.mxu0 %v6032_v41 }
 0x588   : > { %v3320_v34 = vpop.permute.xlu2 %3319 }
 0x589   : > { %3684 = vmatpush.bf16.msra.mxu0 %v6031_v4  ;;  %v3417_v39 = vsel %vm546_vm1, %v7662_v45, %v3320_v34 }
 0x58a   : > { %3357 = vrot.lane.b32.xlu0 %v7809_v32, %s6199_s12 }
 0x58b   : > { %5755 = vmatmul.msk.bf16.gmra.mxu1 %vm546_vm1, %v3519_v43 }
 0x58c   : > { %3278 = vrot.lane.b32.xlu1 %v3265_v23, %s6197_s10  ;;  %3257 = vrot.lane.b32.xlu2 %v7809_v32, %s6198_s11 }
 0x590   : > { %v3348_v3 = vpop.permute.xlu2 %3347 }
 0x592   : > { %3304 = vrot.lane.b32.xlu0 %v3289_v50, %s6199_s12 }
 0x594   : > { %3329 = vrot.lane.b32.xlu1 %v3265_v23, %s6198_s11  ;;  %3331 = vrot.lane.b32.xlu2 %v3316_v20, %s6198_s11 }
 0x598   : > { %v3267_v36 = vpop.permute.xlu1 %3266 }
 0x59a   : > { %3345 = vrot.lane.b32.xlu0 %v3289_v50, %s6197_s10 }
 0x59c   : > { %3359 = vrot.lane.b32.xlu1 %v7834_v28, %s6199_s12  ;;  %v3246_v55 = vpop.permute.xlu0 %3245 }
 0x59d   : > { %v3363_v42 = vsel %vm546_vm1, %v7634_v54, %v3246_v55 }
 0x59e   : > { %v3295_v23 = vpop.permute.xlu2 %3294  ;;  %v3383_v22 = vsel %vm571_vm2, %v3363_v42, %v3267_v36 }
 0x5a0   : > { %v3318_v62 = vpop.permute.xlu1 %3317 }
 0x5a1   : > { %v3414_v1 = vsel %vm546_vm1, %v7650_v58, %v3318_v62 }
 0x5a4   : > { %v3293_v17 = vpop.permute.xlu0 %3292 }
 0x5a5   : > { %v3399_v60 = vsel %vm588_vm3, %v3383_v22, %v3293_v17 }
 0x5a6   : > { %v3485_v30 = vunpack.c.l.b16 %v3399_v60  ;;  %v3250_v26 = vpop.permute.xlu2 %3249 }
 0x5a7   : > { %v3369_v45 = vsel %vm546_vm1, %v7676_v15, %v3250_v26 }
 0x5a8   : > { %v3508_v47 = vpack.c.b16 %v3485_v30, %v3482_v2  ;;  %v3248_v19 = vpop.permute.xlu1 %3247 }
 0x5a9   : > { %v3366_v29 = vsel %vm546_vm1, %v7647_v52, %v3248_v19 }
 0x5aa   : > { %3656 = vmatmul.bf16.vlgmr.msrb.gmra.mxu2 %v3508_v47 }
 0x5ac   : > { %v3334_v16 = vpop.permute.xlu0 %3333 }
 0x5ad   : > { %v3437_v20 = vsel %vm571_vm2, %v3414_v1, %v3334_v16 }
 0x5ae   : > { %v3324_v59 = vpop.permute.xlu2 %3323  ;;  %v3452_v10 = vsel %vm588_vm3, %v3437_v20, %v3348_v3 }
 0x5af   : > { %v3483_v37 = vunpack.c.l.b16 %v3452_v10  ;;  %v3423_v17 = vsel %vm546_vm1, %v7711_v21, %v3324_v59 }
 0x5b4   : > { %v3269_v6 = vpop.permute.xlu0 %3268 }
 0x5b5   : > { %v3385_v58 = vsel %vm571_vm2, %v3366_v29, %v3269_v6 }
 0x5b6   : > { %v3336_v54 = vpop.permute.xlu1 %3335  ;;  %v3352_v18 = vpop.permute.xlu2 %3351  ;;  %v3401_v34 = vsel %vm588_vm3, %v3385_v58, %v3295_v23 }
 0x5b7   : > { %v3439_v31 = vsel %vm571_vm2, %v3417_v39, %v3336_v54  ;;  %v3488_v3 = vunpack.c.l.b16 %v3401_v34 }
 0x5bc   : > { %v3350_v53 = vpop.permute.xlu0 %3349 }
 0x5bd   : > { %v3454_v38 = vsel %vm588_vm3, %v3439_v31, %v3350_v53 }
 0x5be   : > { %v3486_v11 = vunpack.c.l.b16 %v3454_v38  ;;  %v3271_v43 = vpop.permute.xlu1 %3270  ;;  %v3299_v55 = vpop.permute.xlu2 %3298 }
 0x5bf   : > { %v3387_v51 = vsel %vm571_vm2, %v3369_v45, %v3271_v43 }
 0x5c0   : > { %v3509_v50 = vpack.c.b16 %v3486_v11, %v3483_v37 }
 0x5c2   : > { %3685 = vmatmul.bf16.vlgmr.msra.gmra.mxu0 %v3509_v50 }
 0x5c4   : > { %v3297_v9 = vpop.permute.xlu0 %3296 }
 0x5c5   : > { %v3403_v41 = vsel %vm588_vm3, %v3387_v51, %v3297_v9 }
 0x5c6   : > { %v3491_v27 = vunpack.c.l.b16 %v3403_v41  ;;  %v3322_v36 = vpop.permute.xlu1 %3321  ;;  %v3254_v44 = vpop.permute.xlu2 %3253 }
 0x5c7   : > { %v3420_v15 = vsel %vm546_vm1, %v7690_v7, %v3322_v36  ;;  %v3375_v21 = vsel %vm546_vm1, %v7720_v35, %v3254_v44 }
 0x5c8   : > { %v3511_v4 = vpack.c.b16 %v3491_v27, %v3488_v3 }
 0x5ca   : > { %3661 = vmatmul.bf16.gmra.mxu2 %v3511_v4 }
 0x5cc   : > { %v3338_v52 = vpop.permute.xlu0 %3337 }
 0x5cd   : > { %v3441_v23 = vsel %vm571_vm2, %v3420_v15, %v3338_v52 }
 0x5ce   : > { %v3252_v42 = vpop.permute.xlu1 %3251  ;;  %v3456_v60 = vsel %vm588_vm3, %v3441_v23, %v3352_v18  ;;  %v3328_v2 = vpop.permute.xlu2 %3327 }
 0x5cf   : > { %v3489_v16 = vunpack.c.l.b16 %v3456_v60  ;;  %v3372_v54 = vsel %vm546_vm1, %v7688_v33, %v3252_v42  ;;  %v3429_v34 = vsel %vm546_vm1, %v7787_v48, %v3328_v2 }
 0x5d4   : > { %v3273_v62 = vpop.permute.xlu0 %3272 }
 0x5d5   : > { %v3389_v7 = vsel %vm571_vm2, %v3372_v54, %v3273_v62 }
 0x5d6   : > { %v3340_v22 = vpop.permute.xlu1 %3339  ;;  %v3405_v59 = vsel %vm588_vm3, %v3389_v7, %v3299_v55  ;;  %v3356_v53 = vpop.permute.xlu2 %3355 }
 0x5d7   : > { %v3443_v30 = vsel %vm571_vm2, %v3423_v17, %v3340_v22  ;;  %v3494_v31 = vunpack.c.l.b16 %v3405_v59  ;;  %v3715_v59 = vpop.f32.mrf.mxu1 }
 0x5dc   : > { %v3354_v47 = vpop.permute.xlu0 %3353 }
 0x5dd   : > { %v3458_v26 = vsel %vm588_vm3, %v3443_v30, %v3354_v47 }
 0x5de   : > { %v3492_v19 = vunpack.c.l.b16 %v3458_v26  ;;  %v3275_v6 = vpop.permute.xlu1 %3274  ;;  %v3303_v43 = vpop.permute.xlu2 %3302 }
 0x5df   : > { %v3391_v20 = vsel %vm571_vm2, %v3375_v21, %v3275_v6  ;;  %v7908_v21 = vld [vmem:[%s8509_s2 + $0x4] ss:$0 sm:$0xff] }
 0x5e0   : > { %v3512_v1 = vpack.c.b16 %v3492_v19, %v3489_v16 }
 0x5e2   : > { %3690 = vmatmul.bf16.gmra.mxu0 %v3512_v1 }
 0x5e4   : > { %v3301_v39 = vpop.permute.xlu0 %3300 }
 0x5e5   : > { %v3407_v10 = vsel %vm588_vm3, %v3391_v20, %v3301_v39 }
 0x5e6   : > { %v3497_v38 = vunpack.c.l.b16 %v3407_v10  ;;  %v3326_v37 = vpop.permute.xlu1 %3325  ;;  %v3258_v45 = vpop.permute.xlu2 %3257 }
 0x5e7   : > { %v3426_v35 = vsel %vm546_vm1, %v7746_v63, %v3326_v37  ;;  %v3381_v48 = vsel %vm546_vm1, %v7768_v12, %v3258_v45 }
 0x5e8   : > { %v3514_v18 = vpack.c.b16 %v3497_v38, %v3494_v31 }
 0x5ea   : > { %3666 = vmatmul.bf16.gmra.mxu2 %v3514_v18 }
 0x5ec   : > { %v3342_v33 = vpop.permute.xlu0 %3341 }
 0x5ed   : > { %v3445_v50 = vsel %vm571_vm2, %v3426_v35, %v3342_v33 }
 0x5ee   : > { %v3256_v11 = vpop.permute.xlu1 %3255  ;;  %v3460_v51 = vsel %vm588_vm3, %v3445_v50, %v3356_v53  ;;  %v3332_v44 = vpop.permute.xlu2 %3331 }
 0x5ef   : > { %v3495_v27 = vunpack.c.l.b16 %v3460_v51  ;;  %v3378_v4 = vsel %vm546_vm1, %v7744_v40, %v3256_v11  ;;  %v3435_v40 = vsel %vm546_vm1, %v7834_v28, %v3332_v44 }
 0x5f0   : > { %v3450_v30 = vsel %vm571_vm2, %v3435_v40, %v6635_v0 }
 0x5f1   : > { %v3465_v16 = vsel %vm588_vm3, %v3450_v30, %v6633_v5 }
 0x5f2   : > { %v3504_v7 = vunpack.c.l.b16 %v3465_v16 }
 0x5f4   : > { %v3277_v29 = vpop.permute.xlu0 %3276 }
 0x5f5   : > { %v3393_v63 = vsel %vm571_vm2, %v3378_v4, %v3277_v29 }
 0x5f6   : > { %v3344_v58 = vpop.permute.xlu1 %3343  ;;  %v3409_v42 = vsel %vm588_vm3, %v3393_v63, %v3303_v43  ;;  %v3717_v43 = vpop.f32.mrf.mxu1 }
 0x5f7   : > { %v3447_v9 = vsel %vm571_vm2, %v3429_v34, %v3344_v58  ;;  %v3500_v23 = vunpack.c.l.b16 %v3409_v42 }
 0x5fc   : > { %v3358_v41 = vpop.permute.xlu0 %3357 }
 0x5fd   : > { %v3462_v3 = vsel %vm588_vm3, %v3447_v9, %v3358_v41 }
 0x5fe   : > { %v3498_v36 = vunpack.c.l.b16 %v3462_v3  ;;  %v3279_v55 = vpop.permute.xlu1 %3278 }
 0x5ff   : > { %v3395_v62 = vsel %vm571_vm2, %v3381_v48, %v3279_v55 }
 0x600   : > { %v3515_v52 = vpack.c.b16 %v3498_v36, %v3495_v27 }
 0x602   : > { %3695 = vmatmul.bf16.gmra.mxu0 %v3515_v52  ;;  %v6058_v52 = vld [vmem:[%s8508_s1 + $0x358] sm:$0xff] }
 0x603   : > { %4413 = vmatpush.bf16.msrb.mxu0 %v6058_v52 }
 0x604   : > { %v3305_v22 = vpop.permute.xlu0 %3304 }
 0x605   : > { %v3411_v15 = vsel %vm588_vm3, %v3395_v62, %v3305_v22 }
 0x606   : > { %v3503_v17 = vunpack.c.l.b16 %v3411_v15  ;;  %v3330_v60 = vpop.permute.xlu1 %3329 }
 0x607   : > { %v3432_v12 = vsel %vm546_vm1, %v7809_v32, %v3330_v60  ;;  %v6057_v60 = vld [vmem:[%s8508_s1 + $0x350] sm:$0xff] }
 0x608   : > { %v3517_v2 = vpack.c.b16 %v3503_v17, %v3500_v23  ;;  %4414 = vmatpush.bf16.msrb.mxu0 %v6057_v60 }
 0x60a   : > { %3671 = vmatmul.bf16.gmra.mxu2 %v3517_v2 }
 0x60c   : > { %v3346_v47 = vpop.permute.xlu0 %3345 }
 0x60d   : > { %v3449_v26 = vsel %vm571_vm2, %v3432_v12, %v3346_v47 }
 0x60e   : > { %v3360_v19 = vpop.permute.xlu1 %3359 }
 0x60f   : > { %v3464_v6 = vsel %vm588_vm3, %v3449_v26, %v3360_v19  ;;  %v3720_v19 = vpop.f32.mrf.mxu1 }
 0x610   : > { %v3501_v54 = vunpack.c.l.b16 %v3464_v6 }
 0x612   : > { %v3518_v28 = vpack.c.b16 %v3504_v7, %v3501_v54 }
 0x614   : > { %3700 = vmatmul.bf16.gmra.mxu0 %v3518_v28 }
 0x62d   : > { %v3657_v1 = vpop.f32.mrf.mxu2 }
 0x62e   : > { %v3658_v32 = vadd.f32 %v7908_v21, %v3657_v1 }
 0x635   : > { %v3659_v31 = vpop.f32.mrf.mxu2 }
 0x636   : > { %v3660_v38 = vadd.f32 %v7908_v21, %v3659_v31 }
 0x63f   : > { %v3686_v20 = vpop.f32.mrf.mxu0 }
 0x640   : > { %v3687_v39 = vadd.f32 %v3686_v20, %v3658_v32 }
 0x642   : > { %v3716_v10 = vadd.f32 %v3715_v59, %v3687_v39 }
 0x644   : > { %vm3735_vm12 = vcmp.ge.f32.partialorder %v3716_v10, 0.0  ;;  %v3743_v53 = vmul.f32 0.2, %v3716_v10 }
 0x646   : > { %v3751_v37 = vsel %vm3735_vm12, %v3716_v10, %v3743_v53 }
 0x647   : > { %v7913_v18 = vadd.f32 %v3751_v37, %v7629_v56  ;;  %v3688_v33 = vpop.f32.mrf.mxu0 }
 0x648   : > { %v3689_v11 = vadd.f32 %v3688_v33, %v3660_v38  ;;  %v3722_v38 = vpop.f32.mrf.mxu1 }
 0x649   : > { %v3814_v29 = vrot.slane %v7913_v18, 7 }
 0x64a   : > { %v3718_v58 = vadd.f32 %v3717_v43, %v3689_v11 }
 0x64b   : > { %v3838_v35 = vsel %vm293_vm0, %v3814_v29, 0.0  ;;  %v3830_v50 = vsel %vm293_vm0, 0.0, %v3814_v29 }
 0x64c   : > { %v3847_v45 = vpack.c.bf16 %v3838_v35, %v3838_v35  ;;  %vm3736_vm13 = vcmp.ge.f32.partialorder %v3718_v58, 0.0  ;;  %v3744_v34 = vmul.f32 0.2, %v3718_v58  ;;  %v7918_v51 = vpack.c.bf16 %v3830_v50, %v3830_v50 }
 0x64d   : > { %v3662_v2 = vpop.f32.mrf.mxu2 }
 0x64e   : > { %v3877_v9 = vunpack.c.l.b16 %v3847_v45  ;;  %v3752_v41 = vsel %vm3736_vm13, %v3718_v58, %v3744_v34  ;;  %v3876_v56 = vunpack.c.l.b16 %v7918_v51  ;;  %v3663_v47 = vadd.f32 %v7908_v21, %v3662_v2 }
 0x64f   : > { %v7922_v3 = vadd.f32 %v3752_v41, %v7638_v8 }
 0x650   : > { %v3983_v27 = vpack.c.b16 %v3876_v56, %v3876_v56  ;;  %v3890_v36 = vpack.c.b16 %v3877_v9, %v3876_v56  ;;  %v3725_v2 = vpop.f32.mrf.mxu1 }
 0x651   : > { %v3815_v55 = vrot.slane %v7922_v3, 7 }
 0x652   : > { %3991 = vrot.lane.b32.xlu1 %v3983_v27, %s6199_s12  ;;  %v3960_v4 = vrot.slane %v3890_v36, 1  ;;  %v3900_v63 = vshll.u32 %v3890_v36, 16  ;;  %v3898_v62 = vshrl.u32 %v3890_v36, 16 }
 0x653   : > { %v3831_v48 = vsel %vm293_vm0, 0.0, %v3815_v55  ;;  %v3839_v42 = vsel %vm293_vm0, %v3815_v55, 0.0 }
 0x654   : > { %v7931_v44 = vpack.c.bf16 %v3831_v48, %v3831_v48  ;;  %v3849_v8 = vpack.c.bf16 %v3839_v42, %v3839_v42  ;;  %3967 = vrot.lane.b32.xlu0 %v3960_v4, %s6197_s10  ;;  %v3902_v22 = vrot.slane %v3900_v63, 1 }
 0x655   : > { %v3664_v32 = vpop.f32.mrf.mxu2 }
 0x656   : > { %v3879_v15 = vunpack.c.l.b16 %v3849_v8  ;;  %v7934_v23 = vor.u32 %v3902_v22, %v3898_v62  ;;  %v3878_v17 = vunpack.c.l.b16 %v7931_v44  ;;  %v3665_v20 = vadd.f32 %v7908_v21, %v3664_v32 }
 0x658   : > { %3946 = vrot.lane.b32.xlu2 %v7934_v23, %s6198_s11  ;;  %v3891_v40 = vpack.c.b16 %v3879_v15, %v3878_v17  ;;  %v3984_v26 = vpack.c.b16 %v3878_v17, %v3878_v17 }
 0x65a   : > { %v3961_v30 = vrot.slane %v3891_v40, 1  ;;  %v3907_v12 = vshll.u32 %v3891_v40, 16  ;;  %v3905_v7 = vshrl.u32 %v3891_v40, 16 }
 0x65c   : > { %4020 = vrot.lane.b32.xlu1 %v3961_v30, %s6198_s11  ;;  %4018 = vrot.lane.b32.xlu0 %v3960_v4, %s6198_s11  ;;  %v3909_v16 = vrot.slane %v3907_v12, 1  ;;  %v4185_v55 = vunpack.c.l.b16 %v3961_v30 }
 0x65e   : > { %v7946_v1 = vor.u32 %v3909_v16, %v3905_v7 }
 0x65f   : > { %v3691_v6 = vpop.f32.mrf.mxu0 }
 0x660   : > { %v3692_v54 = vadd.f32 %v3691_v6, %v3663_v47  ;;  %3993 = vrot.lane.b32.xlu2 %v3984_v26, %s6199_s12 }
 0x662   : > { %v3721_v28 = vadd.f32 %v3720_v19, %v3692_v54 }
 0x664   : > { %vm3737_vm14 = vcmp.ge.f32.partialorder %v3721_v28, 0.0  ;;  %v3745_v59 = vmul.f32 0.2, %v3721_v28  ;;  %4048 = vrot.lane.b32.xlu1 %v7946_v1, %s6199_s12  ;;  %3948 = vrot.lane.b32.xlu0 %v7946_v1, %s6198_s11 }
 0x666   : > { %v3753_v39 = vsel %vm3737_vm14, %v3721_v28, %v3745_v59 }
 0x667   : > { %v7954_v10 = vadd.f32 %v3753_v39, %v7670_v25  ;;  %v3693_v31 = vpop.f32.mrf.mxu0  ;;  %v3727_v39 = vpop.f32.mrf.mxu1 }
 0x668   : > { %v3694_v53 = vadd.f32 %v3693_v31, %v3665_v20  ;;  %4034 = vrot.lane.b32.xlu2 %v3984_v26, %s6197_s10 }
 0x669   : > { %v3816_v37 = vrot.slane %v7954_v10, 7 }
 0x66a   : > { %v3723_v33 = vadd.f32 %v3722_v38, %v3694_v53 }
 0x66b   : > { %v3840_v11 = vsel %vm293_vm0, %v3816_v37, 0.0  ;;  %v3832_v43 = vsel %vm293_vm0, 0.0, %v3816_v37 }
 0x66c   : > { %v3851_v29 = vpack.c.bf16 %v3840_v11, %v3840_v11  ;;  %vm3738_vm15 = vcmp.ge.f32.partialorder %v3723_v33, 0.0  ;;  %v3746_v58 = vmul.f32 0.2, %v3723_v33  ;;  %v7960_v35 = vpack.c.bf16 %v3832_v43, %v3832_v43 }
 0x66d   : > { %v3667_v60 = vpop.f32.mrf.mxu2 }
 0x66e   : > { %v3881_v50 = vunpack.c.l.b16 %v3851_v29  ;;  %v3754_v25 = vsel %vm3738_vm15, %v3723_v33, %v3746_v58  ;;  %v3880_v45 = vunpack.c.l.b16 %v7960_v35  ;;  %v6048_v29 = vld [vmem:[%s8508_s1 + $0x308] sm:$0xff] }
 0x66f   : > { %v7964_v34 = vadd.f32 %v3754_v25, %v7680_v49  ;;  %4349 = vmatpush.bf16.msrb.mxu3 %v6048_v29  ;;  %v6044_v29 = vld [vmem:[%s8508_s1 + $0x2e8] sm:$0xff] }
 0x670   : > { %3969 = vrot.lane.b32.xlu2 %v3961_v30, %s6197_s10  ;;  %v3985_v9 = vpack.c.b16 %v3880_v45, %v3880_v45  ;;  %v3892_v41 = vpack.c.b16 %v3881_v50, %v3880_v45  ;;  %v3668_v30 = vadd.f32 %v7908_v21, %v3667_v60 }
 0x671   : > { %v3817_v56 = vrot.slane %v7964_v34, 7 }
 0x672   : > { %3995 = vrot.lane.b32.xlu1 %v3985_v9, %s6199_s12  ;;  %v3962_v27 = vrot.slane %v3892_v41, 1  ;;  %4036 = vrot.lane.b32.xlu0 %v3985_v9, %s6197_s10  ;;  %v3914_v36 = vshll.u32 %v3892_v41, 16  ;;  %v3912_v63 = vshrl.u32 %v3892_v41, 16 }
 0x673   : > { %v3841_v4 = vsel %vm293_vm0, %v3817_v56, 0.0  ;;  %v3833_v52 = vsel %vm293_vm0, 0.0, %v3817_v56 }
 0x674   : > { %v3853_v49 = vpack.c.bf16 %v3841_v4, %v3841_v4  ;;  %v3916_v48 = vrot.slane %v3914_v36, 1  ;;  %v4188_v42 = vunpack.c.l.b16 %v3962_v27  ;;  %v7972_v8 = vpack.c.bf16 %v3833_v52, %v3833_v52 }
 0x675   : > { %v3669_v54 = vpop.f32.mrf.mxu2 }
 0x676   : > { %v7974_v62 = vor.u32 %v3916_v48, %v3912_v63  ;;  %v4211_v22 = vpack.c.b16 %v4188_v42, %v4185_v55  ;;  %v3883_v15 = vunpack.c.l.b16 %v3853_v49  ;;  %v3882_v17 = vunpack.c.l.b16 %v7972_v8  ;;  %v3730_v63 = vpop.f32.mrf.mxu1  ;;  %v6047_v48 = vld [vmem:[%s8508_s1 + $0x300] sm:$0xff] }
 0x677   : > { %v3670_v32 = vadd.f32 %v7908_v21, %v3669_v54  ;;  %4350 = vmatpush.bf16.msrb.mxu3 %v6047_v48 }
 0x678   : > { %4050 = vrot.lane.b32.xlu2 %v7974_v62, %s6199_s12  ;;  %5865 = vmatmul.msk.bf16.vlgmr.msrb.gmra.mxu0 %vm546_vm1, %v4211_v22  ;;  %v3893_v40 = vpack.c.b16 %v3883_v15, %v3882_v17  ;;  %v3986_v12 = vpack.c.b16 %v3882_v17, %v3882_v17 }
 0x67a   : > { %3971 = vrot.lane.b32.xlu0 %v3962_v27, %s6197_s10  ;;  %3950 = vrot.lane.b32.xlu1 %v7974_v62, %s6198_s11  ;;  %v7985_v16 = vrot.slane %v3893_v40, 1  ;;  %v3921_v19 = vshll.u32 %v3893_v40, 16  ;;  %v3919_v20 = vshrl.u32 %v3893_v40, 16  ;;  %v6046_v40 = vld [vmem:[%s8508_s1 + $0x2f8] sm:$0xff] }
 0x67b   : > { %4351 = vmatpush.bf16.msrb.mxu3 %v6046_v40 }
 0x67c   : > { %v3923_v28 = vrot.slane %v3921_v19, 1 }
 0x67e   : > { %v7995_v37 = vor.u32 %v3923_v28, %v3919_v20 }
 0x67f   : > { %v3696_v47 = vpop.f32.mrf.mxu0 }
 0x680   : > { %v3697_v26 = vadd.f32 %v3696_v47, %v3668_v30  ;;  %3997 = vrot.lane.b32.xlu2 %v3986_v12, %s6199_s12 }
 0x682   : > { %v3726_v6 = vadd.f32 %v3725_v2, %v3697_v26  ;;  %4022 = vrot.lane.b32.xlu0 %v3962_v27, %s6198_s11  ;;  %4024 = vrot.lane.b32.xlu1 %v7985_v16, %s6198_s11 }
 0x684   : > { %vm3739_vm4 = vcmp.ge.f32.partialorder %v3726_v6, 0.0  ;;  %v3747_v7 = vmul.f32 0.2, %v3726_v6 }
 0x686   : > { %v3755_v59 = vsel %vm3739_vm4, %v3726_v6, %v3747_v7  ;;  %v4191_v6 = vunpack.c.l.b16 %v7985_v16 }
 0x687   : > { %v7992_v31 = vadd.f32 %v3755_v59, %v7708_v61  ;;  %v3698_v53 = vpop.f32.mrf.mxu0 }
 0x688   : > { %v3699_v38 = vadd.f32 %v3698_v53, %v3670_v32  ;;  %4038 = vrot.lane.b32.xlu2 %v3986_v12, %s6197_s10 }
 0x689   : > { %v3818_v33 = vrot.slane %v7992_v31, 7 }
 0x68a   : > { %v3728_v11 = vadd.f32 %v3727_v39, %v3699_v38  ;;  %3952 = vrot.lane.b32.xlu0 %v7995_v37, %s6198_s11  ;;  %4052 = vrot.lane.b32.xlu1 %v7995_v37, %s6199_s12 }
 0x68b   : > { %v3842_v43 = vsel %vm293_vm0, %v3818_v33, 0.0  ;;  %v3834_v61 = vsel %vm293_vm0, 0.0, %v3818_v33  ;;  %v6045_v33 = vld [vmem:[%s8508_s1 + $0x2f0] sm:$0xff] }
 0x68c   : > { %v3855_v58 = vpack.c.bf16 %v3842_v43, %v3842_v43  ;;  %vm3740_vm5 = vcmp.ge.f32.partialorder %v3728_v11, 0.0  ;;  %v3748_v50 = vmul.f32 0.2, %v3728_v11  ;;  %v8007_v25 = vpack.c.bf16 %v3834_v61, %v3834_v61  ;;  %4352 = vmatpush.bf16.msrb.mxu3 %v6045_v33  ;;  %v6052_v33 = vld [vmem:[%s8508_s1 + $0x328] sm:$0xff] }
 0x68d   : > { %v3672_v45 = vpop.f32.mrf.mxu2 }
 0x68e   : > { %v3885_v9 = vunpack.c.l.b16 %v3855_v58  ;;  %v3756_v41 = vsel %vm3740_vm5, %v3728_v11, %v3748_v50  ;;  %v3884_v56 = vunpack.c.l.b16 %v8007_v25  ;;  %v3673_v36 = vadd.f32 %v7908_v21, %v3672_v45  ;;  %v6055_v11 = vld [vmem:[%s8508_s1 + $0x340] sm:$0xff] }
 0x68f   : > { %v8011_v27 = vadd.f32 %v3756_v41, %v7728_v24  ;;  %v6056_v24 = vld [vmem:[%s8508_s1 + $0x348] sm:$0xff] }
 0x690   : > { %3973 = vrot.lane.b32.xlu2 %v7985_v16, %s6197_s10  ;;  %v3987_v55 = vpack.c.b16 %v3884_v56, %v3884_v56  ;;  %v3894_v4 = vpack.c.b16 %v3885_v9, %v3884_v56  ;;  %4378 = vmatpush.bf16.msra.mxu2 %v6056_v24  ;;  %v6043_v24 = vld [vmem:[%s8508_s1 + $0x2e0] sm:$0xff] }
 0x691   : > { %v3819_v52 = vrot.slane %v8011_v27, 7  ;;  %v3701_v49 = vpop.f32.mrf.mxu0  ;;  %4353 = vmatpush.bf16.msrb.mxu3 %v6044_v29 }
 0x692   : > { %v3702_v42 = vadd.f32 %v3701_v49, %v3673_v36  ;;  %3999 = vrot.lane.b32.xlu1 %v3987_v55, %s6199_s12  ;;  %4040 = vrot.lane.b32.xlu0 %v3987_v55, %s6197_s10  ;;  %v3928_v22 = vshll.u32 %v3894_v4, 16  ;;  %v3964_v15 = vrot.slane %v3894_v4, 1  ;;  %v3926_v19 = vshrl.u32 %v3894_v4, 16 }
 0x693   : > { %v3843_v17 = vsel %vm293_vm0, %v3819_v52, 0.0  ;;  %v3835_v60 = vsel %vm293_vm0, 0.0, %v3819_v52 }
 0x694   : > { %v3857_v2 = vpack.c.bf16 %v3843_v17, %v3843_v17  ;;  %v3731_v30 = vadd.f32 %v3730_v63, %v3702_v42  ;;  %v3930_v12 = vrot.slane %v3928_v22, 1  ;;  %v4194_v47 = vunpack.c.l.b16 %v3964_v15  ;;  %4379 = vmatpush.bf16.msra.mxu2 %v6055_v11  ;;  %v6054_v42 = vld [vmem:[%s8508_s1 + $0x338] sm:$0xff] }
 0x695   : > { %v3674_v26 = vpop.f32.mrf.mxu2  ;;  %v8031_v54 = vpack.c.bf16 %v3835_v60, %v3835_v60  ;;  %4354 = vmatpush.bf16.msrb.mxu3 %v6043_v24 }
 0x696   : > { %vm3741_vm6 = vcmp.ge.f32.partialorder %v3731_v30, 0.0  ;;  %v3749_v7 = vmul.f32 0.2, %v3731_v30  ;;  %v3887_v28 = vunpack.c.l.b16 %v3857_v2  ;;  %v8033_v32 = vor.u32 %v3930_v12, %v3926_v19 }
 0x697   : > { %v4214_v59 = vpack.c.b16 %v4194_v47, %v4191_v6  ;;  %v3886_v20 = vunpack.c.l.b16 %v8031_v54  ;;  %v3675_v53 = vadd.f32 %v7908_v21, %v3674_v26 }
 0x698   : > { %v3757_v39 = vsel %vm3741_vm6, %v3731_v30, %v3749_v7  ;;  %4054 = vrot.lane.b32.xlu2 %v8033_v32, %s6199_s12  ;;  %4380 = vmatpush.bf16.msra.mxu2 %v6054_v42 }
 0x699   : > { %v8038_v38 = vadd.f32 %v3757_v39, %v7750_v13  ;;  %5866 = vmatmul.msk.bf16.gmra.mxu0 %vm546_vm1, %v4214_v59  ;;  %v3703_v16 = vpop.f32.mrf.mxu0  ;;  %v3732_v13 = vpop.f32.mrf.mxu1  ;;  %v3895_v61 = vpack.c.b16 %v3887_v28, %v3886_v20  ;;  %v3988_v36 = vpack.c.b16 %v3886_v20, %v3886_v20  ;;  %v6041_v20 = vld [vmem:[%s8508_s1 + $0x2d0] sm:$0xff] }
 0x69a   : > { %v3704_v43 = vadd.f32 %v3703_v16, %v3675_v53  ;;  %3975 = vrot.lane.b32.xlu0 %v3964_v15, %s6197_s10  ;;  %3954 = vrot.lane.b32.xlu1 %v8033_v32, %s6198_s11  ;;  %v6053_v39 = vld [vmem:[%s8508_s1 + $0x330] sm:$0xff] }
 0x69b   : > { %v3820_v21 = vrot.slane %v8038_v38, 7  ;;  %v3965_v55 = vrot.slane %v3895_v61, 1  ;;  %v3935_v49 = vshll.u32 %v3895_v61, 16  ;;  %v3933_v30 = vshrl.u32 %v3895_v61, 16 }
 0x69c   : > { %v3733_v58 = vadd.f32 %v3732_v13, %v3704_v43  ;;  %4381 = vmatpush.bf16.msra.mxu2 %v6053_v39 }
 0x69d   : > { %v3836_v50 = vsel %vm293_vm0, 0.0, %v3820_v21  ;;  %v3844_v45 = vsel %vm293_vm0, %v3820_v21, 0.0  ;;  %v4197_v26 = vunpack.c.l.b16 %v3965_v55 }
 0x69e   : > { %v8058_v9 = vpack.c.bf16 %v3836_v50, %v3836_v50  ;;  %v3859_v41 = vpack.c.bf16 %v3844_v45, %v3844_v45  ;;  %vm3742_vm7 = vcmp.ge.f32.partialorder %v3733_v58, 0.0  ;;  %v3750_v56 = vmul.f32 0.2, %v3733_v58  ;;  %v6051_v50 = vld [vmem:[%s8508_s1 + $0x320] sm:$0xff] }
 0x6a0   : > { %v3888_v4 = vunpack.c.l.b16 %v8058_v9  ;;  %v3889_v63 = vunpack.c.l.b16 %v3859_v41  ;;  %v3758_v52 = vsel %vm3742_vm7, %v3733_v58, %v3750_v56  ;;  %4001 = vrot.lane.b32.xlu2 %v3988_v36, %s6199_s12  ;;  %4382 = vmatpush.bf16.msra.mxu2 %v6052_v33  ;;  %v6050_v56 = vld [vmem:[%s8508_s1 + $0x318] sm:$0xff] }
 0x6a1   : > { %v8062_v48 = vadd.f32 %v3758_v52, %v7772_v46  ;;  %v3937_v46 = vrot.slane %v3935_v49, 1 }
 0x6a2   : > { %v3896_v22 = vpack.c.b16 %v3889_v63, %v3888_v4  ;;  %4026 = vrot.lane.b32.xlu0 %v3964_v15, %s6198_s11  ;;  %4028 = vrot.lane.b32.xlu1 %v3965_v55, %s6198_s11  ;;  %v6042_v15 = vld [vmem:[%s8508_s1 + $0x2d8] sm:$0xff]  ;;  %v3989_v11 = vpack.c.b16 %v3888_v4, %v3888_v4 }
 0x6a3   : > { %v3821_v17 = vrot.slane %v8062_v48, 7  ;;  %v8079_v6 = vor.u32 %v3937_v46, %v3933_v30  ;;  %4355 = vmatpush.bf16.msrb.mxu3 %v6042_v15  ;;  %v6049_v30 = vld [vmem:[%s8508_s1 + $0x310] sm:$0xff] }
 0x6a4   : > { %v3966_v60 = vrot.slane %v3896_v22, 1  ;;  %v3942_v16 = vshll.u32 %v3896_v22, 16  ;;  %v3940_v61 = vshrl.u32 %v3896_v22, 16  ;;  %4383 = vmatpush.bf16.msra.mxu2 %v6051_v50 }
 0x6a5   : > { %v3837_v40 = vsel %vm293_vm0, 0.0, %v3821_v17  ;;  %v3845_v2 = vsel %vm293_vm0, %v3821_v17, 0.0 }
 0x6a6   : > { %v3860_v12 = vpack.c.bf16 %v3837_v40, %v3837_v40  ;;  %v3861_v47 = vpack.c.bf16 %v3845_v2, %v3845_v2  ;;  %v4200_v19 = vunpack.c.l.b16 %v3966_v60  ;;  %v3944_v21 = vrot.slane %v3942_v16, 1 }
 0x6a7   : > { %4356 = vmatpush.bf16.msrb.mxu3 %v6041_v20 }
 0x6a8   : > { %v4217_v7 = vpack.c.b16 %v4200_v19, %v4197_v26  ;;  %v3982_v28 = vunpack.c.l.b16 %v3860_v12  ;;  %v4008_v59 = vunpack.c.l.b16 %v3861_v47  ;;  %4042 = vrot.lane.b32.xlu2 %v3988_v36, %s6197_s10  ;;  %v8099_v58 = vor.u32 %v3944_v21, %v3940_v61  ;;  %4384 = vmatpush.bf16.msra.mxu2 %v6050_v56 }
 0x6aa   : > { %3956 = vrot.lane.b32.xlu0 %v8079_v6, %s6198_s11  ;;  %4056 = vrot.lane.b32.xlu1 %v8079_v6, %s6199_s12  ;;  %v4009_v53 = vpack.c.b16 %v4008_v59, %v3982_v28  ;;  %v3990_v36 = vpack.c.b16 %v3982_v28, %v3982_v28 }
 0x6ab   : > { %5867 = vmatmul.msk.bf16.gmra.mxu0 %vm546_vm1, %v4217_v7 }
 0x6ac   : > { %v4017_v43 = vrot.slane %v4009_v53, 1  ;;  %v4011_v22 = vshrl.u32 %v4009_v53, 16  ;;  %4385 = vmatpush.bf16.msra.mxu2 %v6049_v30 }
 0x6ae   : > { %v4203_v29 = vunpack.c.l.b16 %v4017_v43 }
 0x6b0   : > { %3977 = vrot.lane.b32.xlu2 %v3965_v55, %s6197_s10  ;;  %v4220_v45 = vpack.c.b16 %v6607_v14, %v4203_v29  ;;  %v4013_v55 = vshll.u32 %v4009_v53, 16 }
 0x6b2   : > { %v3947_v13 = vpop.permute.xlu2 %3946  ;;  %4003 = vrot.lane.b32.xlu1 %v3989_v11, %s6199_s12  ;;  %4044 = vrot.lane.b32.xlu0 %v3989_v11, %s6197_s10  ;;  %v4015_v52 = vrot.slane %v4013_v55, 1 }
 0x6b3   : > { %v4064_v49 = vsel %vm546_vm1, %v7918_v51, %v3947_v13 }
 0x6b4   : > { %v8123_v40 = vor.u32 %v4015_v52, %v4011_v22 }
 0x6b8   : > { %4058 = vrot.lane.b32.xlu2 %v8099_v58, %s6199_s12 }
 0x6ba   : > { %v3994_v41 = vpop.permute.xlu2 %3993  ;;  %3979 = vrot.lane.b32.xlu0 %v3966_v60, %s6197_s10  ;;  %3958 = vrot.lane.b32.xlu1 %v8099_v58, %s6198_s11 }
 0x6bb   : > { %5868 = vmatmul.msk.bf16.gmra.mxu0 %vm546_vm1, %v4220_v45 }
 0x6c0   : > { %4005 = vrot.lane.b32.xlu2 %v3990_v36, %s6199_s12 }
 0x6c2   : > { %v4035_v4 = vpop.permute.xlu2 %4034  ;;  %4030 = vrot.lane.b32.xlu0 %v3966_v60, %s6198_s11  ;;  %4032 = vrot.lane.b32.xlu1 %v4017_v43, %s6198_s11 }
 0x6c4   : > { %v3992_v63 = vpop.permute.xlu1 %3991 }
 0x6c5   : > { %v4098_v24 = vsel %vm588_vm3, %v6520_v57, %v3992_v63 }
 0x6c6   : > { %v3968_v42 = vpop.permute.xlu0 %3967  ;;  %v4183_v2 = vunpack.c.l.b16 %v4098_v24 }
 0x6c7   : > { %v4084_v17 = vsel %vm571_vm2, %v4064_v49, %v3968_v42 }
 0x6c8   : > { %v4100_v46 = vsel %vm588_vm3, %v4084_v17, %v3994_v41  ;;  %4046 = vrot.lane.b32.xlu2 %v3990_v36, %s6197_s10 }
 0x6c9   : > { %v4186_v60 = vunpack.c.l.b16 %v4100_v46 }
 0x6ca   : > { %v3970_v51 = vpop.permute.xlu2 %3969  ;;  %4060 = vrot.lane.b32.xlu0 %v8123_v40, %s6199_s12 }
 0x6cb   : > { %v4209_v12 = vpack.c.b16 %v4186_v60, %v4183_v2 }
 0x6cd   : > { %4357 = vmatmul.bf16.vlgmr.msrb.gmra.mxu3 %v4209_v12 }
 0x6ce   : > { %v4021_v47 = vpop.permute.xlu1 %4020  ;;  %v4019_v26 = vpop.permute.xlu0 %4018 }
 0x6cf   : > { %v4115_v59 = vsel %vm546_vm1, %v7934_v23, %v4019_v26  ;;  %v4118_v39 = vsel %vm546_vm1, %v7946_v1, %v4021_v47 }
 0x6d0   : > { %v4138_v20 = vsel %vm571_vm2, %v4115_v59, %v4035_v4 }
 0x6d2   : > { %v4051_v19 = vpop.permute.xlu2 %4050 }
 0x6d6   : > { %v4049_v15 = vpop.permute.xlu1 %4048  ;;  %v3949_v7 = vpop.permute.xlu0 %3948 }
 0x6d7   : > { %v4153_v53 = vsel %vm588_vm3, %v4138_v20, %v4049_v15  ;;  %v4067_v29 = vsel %vm546_vm1, %v7931_v44, %v3949_v7 }
 0x6d8   : > { %v4184_v13 = vunpack.c.l.b16 %v4153_v53  ;;  %v4086_v50 = vsel %vm571_vm2, %v4067_v29, %v3970_v51 }
 0x6da   : > { %v3998_v28 = vpop.permute.xlu2 %3997 }
 0x6e2   : > { %v4039_v21 = vpop.permute.xlu2 %4038 }
 0x6e4   : > { %v3996_v16 = vpop.permute.xlu1 %3995  ;;  %v4037_v33 = vpop.permute.xlu0 %4036 }
 0x6e5   : > { %v4140_v11 = vsel %vm571_vm2, %v4118_v39, %v4037_v33  ;;  %v4102_v41 = vsel %vm588_vm3, %v4086_v50, %v3996_v16 }
 0x6e6   : > { %v4155_v43 = vsel %vm588_vm3, %v4140_v11, %v4051_v19  ;;  %v4189_v4 = vunpack.c.l.b16 %v4102_v41 }
 0x6e7   : > { %v4187_v61 = vunpack.c.l.b16 %v4155_v43 }
 0x6e9   : > { %v4210_v23 = vpack.c.b16 %v4187_v61, %v4184_v13 }
 0x6ea   : > { %v3974_v52 = vpop.permute.xlu2 %3973 }
 0x6eb   : > { %4386 = vmatmul.bf16.vlgmr.msra.gmra.mxu2 %v4210_v23 }
 0x6ec   : > { %v3951_v45 = vpop.permute.xlu1 %3950  ;;  %v3972_v1 = vpop.permute.xlu0 %3971 }
 0x6ed   : > { %v4070_v56 = vsel %vm546_vm1, %v7960_v35, %v3951_v45 }
 0x6ee   : > { %v4088_v36 = vsel %vm571_vm2, %v4070_v56, %v3972_v1 }
 0x6ef   : > { %v4104_v55 = vsel %vm588_vm3, %v4088_v36, %v3998_v28 }
 0x6f0   : > { %v4192_v63 = vunpack.c.l.b16 %v4104_v55 }
 0x6f2   : > { %v4212_v49 = vpack.c.b16 %v4192_v63, %v4189_v4  ;;  %v4055_v42 = vpop.permute.xlu2 %4054 }
 0x6f4   : > { %v4025_v44 = vpop.permute.xlu1 %4024  ;;  %4362 = vmatmul.bf16.gmra.mxu3 %v4212_v49  ;;  %v4023_v24 = vpop.permute.xlu0 %4022 }
 0x6f5   : > { %v4121_v46 = vsel %vm546_vm1, %v7974_v62, %v4023_v24  ;;  %v4124_v35 = vsel %vm546_vm1, %v7995_v37, %v4025_v44 }
 0x6f6   : > { %v4142_v2 = vsel %vm571_vm2, %v4121_v46, %v4039_v21 }
 0x6fa   : > { %v4002_v12 = vpop.permute.xlu2 %4001 }
 0x6fc   : > { %v4053_v22 = vpop.permute.xlu1 %4052  ;;  %v3953_v17 = vpop.permute.xlu0 %3952 }
 0x6fd   : > { %v4157_v60 = vsel %vm588_vm3, %v4142_v2, %v4053_v22  ;;  %v4073_v7 = vsel %vm546_vm1, %v7972_v8, %v3953_v17 }
 0x6fe   : > { %v4190_v19 = vunpack.c.l.b16 %v4157_v60  ;;  %v4090_v28 = vsel %vm571_vm2, %v4073_v7, %v3974_v52 }
 0x702   : > { %v4043_v16 = vpop.permute.xlu2 %4042 }
 0x704   : > { %v4000_v30 = vpop.permute.xlu1 %3999  ;;  %v4041_v51 = vpop.permute.xlu0 %4040 }
 0x705   : > { %v4144_v47 = vsel %vm571_vm2, %v4124_v35, %v4041_v51  ;;  %v4106_v20 = vsel %vm588_vm3, %v4090_v28, %v4000_v30 }
 0x706   : > { %v4159_v26 = vsel %vm588_vm3, %v4144_v47, %v4055_v42  ;;  %v4195_v11 = vunpack.c.l.b16 %v4106_v20  ;;  %v8192_v20 = vld [vmem:[%s8509_s2 + $0x5] ss:$0 sm:$0xff] }
 0x707   : > { %v4193_v15 = vunpack.c.l.b16 %v4159_v26 }
 0x709   : > { %v4213_v62 = vpack.c.b16 %v4193_v15, %v4190_v19 }
 0x70a   : > { %v3978_v61 = vpop.permute.xlu2 %3977 }
 0x70b   : > { %4391 = vmatmul.bf16.gmra.mxu2 %v4213_v62 }
 0x70c   : > { %v3955_v59 = vpop.permute.xlu1 %3954  ;;  %v3976_v37 = vpop.permute.xlu0 %3975 }
 0x70d   : > { %v4076_v39 = vsel %vm546_vm1, %v8007_v25, %v3955_v59 }
 0x70e   : > { %v4092_v53 = vsel %vm571_vm2, %v4076_v39, %v3976_v37  ;;  %v4416_v39 = vpop.f32.mrf.mxu0 }
 0x70f   : > { %v4108_v33 = vsel %vm588_vm3, %v4092_v53, %v4002_v12 }
 0x710   : > { %v4198_v43 = vunpack.c.l.b16 %v4108_v33 }
 0x712   : > { %v4215_v13 = vpack.c.b16 %v4198_v43, %v4195_v11  ;;  %v4059_v45 = vpop.permute.xlu2 %4058 }
 0x714   : > { %v4029_v8 = vpop.permute.xlu1 %4028  ;;  %4367 = vmatmul.bf16.gmra.mxu3 %v4215_v13  ;;  %v4027_v21 = vpop.permute.xlu0 %4026 }
 0x715   : > { %v4127_v50 = vsel %vm546_vm1, %v8033_v32, %v4027_v21  ;;  %v4130_v1 = vsel %vm546_vm1, %v8079_v6, %v4029_v8 }
 0x716   : > { %v4146_v25 = vsel %vm571_vm2, %v4127_v50, %v4043_v16 }
 0x71a   : > { %v4006_v17 = vpop.permute.xlu2 %4005 }
 0x71c   : > { %v4057_v29 = vpop.permute.xlu1 %4056  ;;  %v3957_v23 = vpop.permute.xlu0 %3956 }
 0x71d   : > { %v4161_v41 = vsel %vm588_vm3, %v4146_v25, %v4057_v29  ;;  %v4079_v49 = vsel %vm546_vm1, %v8031_v54, %v3957_v23  ;;  %v4418_v23 = vpop.f32.mrf.mxu0 }
 0x71e   : > { %v4196_v63 = vunpack.c.l.b16 %v4161_v41  ;;  %v4094_v44 = vsel %vm571_vm2, %v4079_v49, %v3978_v61 }
 0x722   : > { %v4047_v26 = vpop.permute.xlu2 %4046 }
 0x724   : > { %v4004_v56 = vpop.permute.xlu1 %4003  ;;  %v4045_v36 = vpop.permute.xlu0 %4044 }
 0x725   : > { %v4148_v55 = vsel %vm571_vm2, %v4130_v1, %v4045_v36  ;;  %v4110_v6 = vsel %vm588_vm3, %v4094_v44, %v4004_v56 }
 0x726   : > { %v4163_v4 = vsel %vm588_vm3, %v4148_v55, %v4059_v45  ;;  %v4201_v35 = vunpack.c.l.b16 %v4110_v6 }
 0x727   : > { %v4199_v52 = vunpack.c.l.b16 %v4163_v4 }
 0x729   : > { %v4216_v32 = vpack.c.b16 %v4199_v52, %v4196_v63 }
 0x72b   : > { %4396 = vmatmul.bf16.gmra.mxu2 %v4216_v32 }
 0x72c   : > { %v3959_v24 = vpop.permute.xlu1 %3958  ;;  %v3980_v42 = vpop.permute.xlu0 %3979 }
 0x72d   : > { %v4082_v22 = vsel %vm546_vm1, %v8058_v9, %v3959_v24 }
 0x72e   : > { %v4096_v46 = vsel %vm571_vm2, %v4082_v22, %v3980_v42  ;;  %v6076_v42 = vld [vmem:[%s8510_s3 + $0x88] sm:$0xff] }
 0x72f   : > { %v4112_v2 = vsel %vm588_vm3, %v4096_v46, %v4006_v17  ;;  %5112 = vmatpush.bf16.msrb.mxu2 %v6076_v42 }
 0x730   : > { %v4204_v60 = vunpack.c.l.b16 %v4112_v2 }
 0x732   : > { %v4218_v30 = vpack.c.b16 %v4204_v60, %v4201_v35  ;;  %v6075_v60 = vld [vmem:[%s8510_s3 + $0x80] sm:$0xff] }
 0x733   : > { %5113 = vmatpush.bf16.msrb.mxu2 %v6075_v60 }
 0x734   : > { %v4033_v54 = vpop.permute.xlu1 %4032  ;;  %4372 = vmatmul.bf16.gmra.mxu3 %v4218_v30  ;;  %v4031_v51 = vpop.permute.xlu0 %4030 }
 0x735   : > { %v4136_v12 = vsel %vm546_vm1, %v8123_v40, %v4033_v54  ;;  %v4133_v9 = vsel %vm546_vm1, %v8099_v58, %v4031_v51 }
 0x736   : > { %v4151_v47 = vsel %vm571_vm2, %v4136_v12, %v6635_v0  ;;  %v4150_v15 = vsel %vm571_vm2, %v4133_v9, %v4047_v26 }
 0x737   : > { %v4166_v19 = vsel %vm588_vm3, %v4151_v47, %v6633_v5 }
 0x738   : > { %v4205_v59 = vunpack.c.l.b16 %v4166_v19 }
 0x73c   : > { %v4061_v7 = vpop.permute.xlu0 %4060 }
 0x73d   : > { %v4165_v62 = vsel %vm588_vm3, %v4150_v15, %v4061_v7  ;;  %v4421_v7 = vpop.f32.mrf.mxu0 }
 0x73e   : > { %v4202_v28 = vunpack.c.l.b16 %v4165_v62 }
 0x740   : > { %v4219_v37 = vpack.c.b16 %v4205_v59, %v4202_v28 }
 0x742   : > { %4401 = vmatmul.bf16.gmra.mxu2 %v4219_v37 }
 0x750   : > { %v4358_v40 = vpop.f32.mrf.mxu3 }
 0x751   : > { %v4359_v58 = vadd.f32 %v8192_v20, %v4358_v40 }
 0x758   : > { %v4360_v11 = vpop.f32.mrf.mxu3 }
 0x759   : > { %v4361_v13 = vadd.f32 %v8192_v20, %v4360_v11 }
 0x76e   : > { %v4387_v53 = vpop.f32.mrf.mxu2 }
 0x76f   : > { %v4388_v16 = vadd.f32 %v4387_v53, %v4359_v58 }
 0x771   : > { %v4417_v33 = vadd.f32 %v4416_v39, %v4388_v16 }
 0x773   : > { %vm4436_vm8 = vcmp.ge.f32.partialorder %v4417_v33, 0.0  ;;  %v4444_v43 = vmul.f32 0.2, %v4417_v33 }
 0x775   : > { %v4452_v8 = vsel %vm4436_vm8, %v4417_v33, %v4444_v43 }
 0x776   : > { %v4460_v21 = vadd.f32 %v4452_v8, %v7913_v18  ;;  %v4389_v61 = vpop.f32.mrf.mxu2 }
 0x777   : > { %v4390_v29 = vadd.f32 %v4389_v61, %v4361_v13  ;;  %v4363_v12 = vpop.f32.mrf.mxu3  ;;  %v4423_v13 = vpop.f32.mrf.mxu0 }
 0x778   : > { %v4513_v50 = vrot.slane %v4460_v21, 7  ;;  %v4364_v19 = vadd.f32 %v8192_v20, %v4363_v12 }
 0x779   : > { %v4419_v45 = vadd.f32 %v4418_v23, %v4390_v29 }
 0x77a   : > { %v4529_v25 = vsel %vm293_vm0, 0.0, %v4513_v50  ;;  %v4537_v1 = vsel %vm293_vm0, %v4513_v50, 0.0 }
 0x77b   : > { %v8199_v41 = vpack.c.bf16 %v4529_v25, %v4529_v25  ;;  %v4546_v56 = vpack.c.bf16 %v4537_v1, %v4537_v1  ;;  %vm4437_vm9 = vcmp.ge.f32.partialorder %v4419_v45, 0.0  ;;  %v4445_v36 = vmul.f32 0.2, %v4419_v45 }
 0x77d   : > { %v4576_v55 = vunpack.c.l.b16 %v4546_v56  ;;  %v4453_v4 = vsel %vm4437_vm9, %v4419_v45, %v4445_v36  ;;  %v4575_v63 = vunpack.c.l.b16 %v8199_v41 }
 0x77e   : > { %v4461_v18 = vadd.f32 %v4453_v4, %v7922_v3 }
 0x77f   : > { %v4682_v52 = vpack.c.b16 %v4575_v63, %v4575_v63  ;;  %v4589_v49 = vpack.c.b16 %v4576_v55, %v4575_v63  ;;  %v4365_v58 = vpop.f32.mrf.mxu3 }
 0x780   : > { %v4514_v32 = vrot.slane %v4461_v18, 7  ;;  %v4366_v53 = vadd.f32 %v8192_v20, %v4365_v58 }
 0x781   : > { %4690 = vrot.lane.b32.xlu0 %v4682_v52, %s6199_s12  ;;  %v4659_v44 = vrot.slane %v4589_v49, 1  ;;  %v4599_v24 = vshll.u32 %v4589_v49, 16  ;;  %v4597_v51 = vshrl.u32 %v4589_v49, 16 }
 0x782   : > { %v4530_v6 = vsel %vm293_vm0, 0.0, %v4514_v32  ;;  %v4538_v22 = vsel %vm293_vm0, %v4514_v32, 0.0 }
 0x783   : > { %v8209_v17 = vpack.c.bf16 %v4530_v6, %v4530_v6  ;;  %v4548_v46 = vpack.c.bf16 %v4538_v22, %v4538_v22  ;;  %4666 = vrot.lane.b32.xlu2 %v4659_v44, %s6197_s10  ;;  %4717 = vrot.lane.b32.xlu1 %v4659_v44, %s6198_s11  ;;  %v4601_v35 = vrot.slane %v4599_v24, 1 }
 0x785   : > { %v4578_v3 = vunpack.c.l.b16 %v4548_v46  ;;  %v4577_v2 = vunpack.c.l.b16 %v8209_v17  ;;  %v8218_v9 = vor.u32 %v4601_v35, %v4597_v51 }
 0x787   : > { %v4590_v30 = vpack.c.b16 %v4578_v3, %v4577_v2  ;;  %v4683_v54 = vpack.c.b16 %v4577_v2, %v4577_v2 }
 0x789   : > { %4733 = vrot.lane.b32.xlu0 %v4683_v54, %s6197_s10  ;;  %v4660_v47 = vrot.slane %v4590_v30, 1  ;;  %v4606_v26 = vshll.u32 %v4590_v30, 16  ;;  %v4604_v59 = vshrl.u32 %v4590_v30, 16 }
 0x78b   : > { %4719 = vrot.lane.b32.xlu2 %v4660_v47, %s6198_s11  ;;  %4645 = vrot.lane.b32.xlu1 %v8218_v9, %s6198_s11  ;;  %v4608_v15 = vrot.slane %v4606_v26, 1  ;;  %v4884_v52 = vunpack.c.l.b16 %v4660_v47 }
 0x78d   : > { %v8224_v40 = vor.u32 %v4608_v15, %v4604_v59 }
 0x78e   : > { %v4392_v62 = vpop.f32.mrf.mxu2 }
 0x78f   : > { %v4393_v28 = vadd.f32 %v4392_v62, %v4364_v19 }
 0x791   : > { %v4422_v37 = vadd.f32 %v4421_v7, %v4393_v28 }
 0x793   : > { %vm4438_vm10 = vcmp.ge.f32.partialorder %v4422_v37, 0.0  ;;  %v4446_v39 = vmul.f32 0.2, %v4422_v37  ;;  %4747 = vrot.lane.b32.xlu2 %v8224_v40, %s6199_s12  ;;  %4692 = vrot.lane.b32.xlu1 %v4683_v54, %s6199_s12 }
 0x795   : > { %v4454_v16 = vsel %vm4438_vm10, %v4422_v37, %v4446_v39 }
 0x796   : > { %v4462_v33 = vadd.f32 %v4454_v16, %v7954_v10  ;;  %v4394_v11 = vpop.f32.mrf.mxu2 }
 0x797   : > { %v4395_v43 = vadd.f32 %v4394_v11, %v4366_v53  ;;  %v4368_v60 = vpop.f32.mrf.mxu3 }
 0x798   : > { %v4515_v8 = vrot.slane %v4462_v33, 7  ;;  %v4369_v51 = vadd.f32 %v8192_v20, %v4368_v60 }
 0x799   : > { %v4424_v21 = vadd.f32 %v4423_v13, %v4395_v43 }
 0x79a   : > { %v4531_v61 = vsel %vm293_vm0, 0.0, %v4515_v8  ;;  %v4539_v29 = vsel %vm293_vm0, %v4515_v8, 0.0 }
 0x79b   : > { %v8233_v23 = vpack.c.bf16 %v4531_v61, %v4531_v61  ;;  %v4550_v50 = vpack.c.bf16 %v4539_v29, %v4539_v29  ;;  %vm4439_vm11 = vcmp.ge.f32.partialorder %v4424_v21, 0.0  ;;  %v4447_v45 = vmul.f32 0.2, %v4424_v21  ;;  %4647 = vrot.lane.b32.xlu2 %v8224_v40, %s6198_s11  ;;  %4668 = vrot.lane.b32.xlu1 %v4660_v47, %s6197_s10  ;;  %v4426_v47 = vpop.f32.mrf.mxu0 }
 0x79d   : > { %v4580_v10 = vunpack.c.l.b16 %v4550_v50  ;;  %v4455_v25 = vsel %vm4439_vm11, %v4424_v21, %v4447_v45  ;;  %v4579_v1 = vunpack.c.l.b16 %v8233_v23 }
 0x79e   : > { %v4463_v56 = vadd.f32 %v4455_v25, %v7964_v34 }
 0x79f   : > { %v4684_v36 = vpack.c.b16 %v4579_v1, %v4579_v1  ;;  %v4591_v55 = vpack.c.b16 %v4580_v10, %v4579_v1  ;;  %v4370_v28 = vpop.f32.mrf.mxu3 }
 0x7a0   : > { %v4516_v4 = vrot.slane %v4463_v56, 7  ;;  %v4371_v37 = vadd.f32 %v8192_v20, %v4370_v28 }
 0x7a1   : > { %4694 = vrot.lane.b32.xlu0 %v4684_v36, %s6199_s12  ;;  %v4661_v63 = vrot.slane %v4591_v55, 1  ;;  %v4613_v18 = vshll.u32 %v4591_v55, 16  ;;  %v4611_v46 = vshrl.u32 %v4591_v55, 16 }
 0x7a2   : > { %v4532_v49 = vsel %vm293_vm0, 0.0, %v4516_v4  ;;  %v4540_v32 = vsel %vm293_vm0, %v4516_v4, 0.0 }
 0x7a3   : > { %v8243_v44 = vpack.c.bf16 %v4532_v49, %v4532_v49  ;;  %v4552_v24 = vpack.c.bf16 %v4540_v32, %v4540_v32  ;;  %4735 = vrot.lane.b32.xlu1 %v4684_v36, %s6197_s10  ;;  %4721 = vrot.lane.b32.xlu2 %v4661_v63, %s6198_s11  ;;  %v4887_v34 = vunpack.c.l.b16 %v4661_v63  ;;  %v4615_v42 = vrot.slane %v4613_v18, 1  ;;  %v4428_v11 = vpop.f32.mrf.mxu0 }
 0x7a5   : > { %v4582_v6 = vunpack.c.l.b16 %v4552_v24  ;;  %v4910_v22 = vpack.c.b16 %v4887_v34, %v4884_v52  ;;  %v4581_v3 = vunpack.c.l.b16 %v8243_v44  ;;  %v8249_v2 = vor.u32 %v4615_v42, %v4611_v46 }
 0x7a7   : > { %5941 = vmatmul.msk.bf16.vlgmr.msrb.gmra.mxu2 %vm546_vm1, %v4910_v22  ;;  %v4592_v35 = vpack.c.b16 %v4582_v6, %v4581_v3  ;;  %v4685_v30 = vpack.c.b16 %v4581_v3, %v4581_v3 }
 0x7a9   : > { %4749 = vrot.lane.b32.xlu0 %v8249_v2, %s6199_s12  ;;  %v4620_v54 = vshll.u32 %v4592_v35, 16  ;;  %v4618_v15 = vshrl.u32 %v4592_v35, 16  ;;  %v4662_v33 = vrot.slane %v4592_v35, 1 }
 0x7ab   : > { %4737 = vrot.lane.b32.xlu1 %v4685_v30, %s6197_s10  ;;  %4670 = vrot.lane.b32.xlu2 %v4661_v63, %s6197_s10  ;;  %v4622_v12 = vrot.slane %v4620_v54, 1  ;;  %v4890_v32 = vunpack.c.l.b16 %v4662_v33 }
 0x7ad   : > { %v8258_v62 = vor.u32 %v4622_v12, %v4618_v15  ;;  %v6066_v12 = vld [vmem:[%s8510_s3 + $0x38] sm:$0xff] }
 0x7ae   : > { %v4397_v26 = vpop.f32.mrf.mxu2  ;;  %5048 = vmatpush.bf16.msra.mxu1 %v6066_v12  ;;  %v6061_v12 = vld [vmem:[%s8510_s3 + $0x10] sm:$0xff] }
 0x7af   : > { %v4398_v19 = vadd.f32 %v4397_v26, %v4369_v51 }
 0x7b1   : > { %v4427_v7 = vadd.f32 %v4426_v47, %v4398_v19  ;;  %4649 = vrot.lane.b32.xlu0 %v8249_v2, %s6198_s11 }
 0x7b3   : > { %vm4440_vm12 = vcmp.ge.f32.partialorder %v4427_v7, 0.0  ;;  %v4448_v59 = vmul.f32 0.2, %v4427_v7  ;;  %4696 = vrot.lane.b32.xlu1 %v4685_v30, %s6199_s12  ;;  %4651 = vrot.lane.b32.xlu2 %v8258_v62, %s6198_s11 }
 0x7b5   : > { %v4456_v58 = vsel %vm4440_vm12, %v4427_v7, %v4448_v59 }
 0x7b6   : > { %v4464_v39 = vadd.f32 %v4456_v58, %v7992_v31  ;;  %v4399_v53 = vpop.f32.mrf.mxu2 }
 0x7b7   : > { %v4400_v16 = vadd.f32 %v4399_v53, %v4371_v37  ;;  %v4373_v1 = vpop.f32.mrf.mxu3  ;;  %v6065_v53 = vld [vmem:[%s8510_s3 + $0x30] sm:$0xff] }
 0x7b8   : > { %v4517_v43 = vrot.slane %v4464_v39, 7  ;;  %v4374_v34 = vadd.f32 %v8192_v20, %v4373_v1  ;;  %5049 = vmatpush.bf16.msra.mxu1 %v6065_v53 }
 0x7b9   : > { %v4429_v13 = vadd.f32 %v4428_v11, %v4400_v16  ;;  %4723 = vrot.lane.b32.xlu0 %v4662_v33, %s6198_s11 }
 0x7ba   : > { %v4533_v8 = vsel %vm293_vm0, 0.0, %v4517_v43  ;;  %v4541_v21 = vsel %vm293_vm0, %v4517_v43, 0.0 }
 0x7bb   : > { %v8268_v61 = vpack.c.bf16 %v4533_v8, %v4533_v8  ;;  %v4554_v29 = vpack.c.bf16 %v4541_v21, %v4541_v21  ;;  %vm4441_vm13 = vcmp.ge.f32.partialorder %v4429_v13, 0.0  ;;  %v4449_v50 = vmul.f32 0.2, %v4429_v13  ;;  %4672 = vrot.lane.b32.xlu1 %v4662_v33, %s6197_s10 }
 0x7bd   : > { %v4584_v31 = vunpack.c.l.b16 %v4554_v29  ;;  %v4457_v45 = vsel %vm4441_vm13, %v4429_v13, %v4449_v50  ;;  %v4583_v10 = vunpack.c.l.b16 %v8268_v61 }
 0x7be   : > { %v4465_v25 = vadd.f32 %v4457_v45, %v8011_v27  ;;  %v4431_v27 = vpop.f32.mrf.mxu0  ;;  %v6064_v45 = vld [vmem:[%s8510_s3 + $0x28] sm:$0xff] }
 0x7bf   : > { %v4686_v56 = vpack.c.b16 %v4583_v10, %v4583_v10  ;;  %v4593_v36 = vpack.c.b16 %v4584_v31, %v4583_v10  ;;  %v4375_v54 = vpop.f32.mrf.mxu3  ;;  %5050 = vmatpush.bf16.msra.mxu1 %v6064_v45 }
 0x7c0   : > { %v4518_v55 = vrot.slane %v4465_v25, 7  ;;  %v4376_v26 = vadd.f32 %v8192_v20, %v4375_v54 }
 0x7c1   : > { %4751 = vrot.lane.b32.xlu0 %v8258_v62, %s6199_s12  ;;  %4739 = vrot.lane.b32.xlu2 %v4686_v56, %s6197_s10  ;;  %v4627_v4 = vshll.u32 %v4593_v36, 16  ;;  %v4663_v63 = vrot.slane %v4593_v36, 1  ;;  %v4625_v52 = vshrl.u32 %v4593_v36, 16 }
 0x7c2   : > { %v4534_v18 = vsel %vm293_vm0, 0.0, %v4518_v55  ;;  %v4542_v3 = vsel %vm293_vm0, %v4518_v55, 0.0 }
 0x7c3   : > { %v4629_v49 = vrot.slane %v4627_v4, 1  ;;  %v4893_v24 = vunpack.c.l.b16 %v4663_v63  ;;  %v8278_v42 = vpack.c.bf16 %v4534_v18, %v4534_v18  ;;  %v4556_v30 = vpack.c.bf16 %v4542_v3, %v4542_v3 }
 0x7c5   : > { %v4402_v6 = vpop.f32.mrf.mxu2  ;;  %v8280_v22 = vor.u32 %v4629_v49, %v4625_v52  ;;  %v4913_v46 = vpack.c.b16 %v4893_v24, %v4890_v32  ;;  %v4585_v51 = vunpack.c.l.b16 %v8278_v42  ;;  %v4586_v15 = vunpack.c.l.b16 %v4556_v30  ;;  %v6074_v30 = vld [vmem:[%s8510_s3 + $0x78] sm:$0xff] }
 0x7c6   : > { %v4403_v35 = vadd.f32 %v4402_v6, %v4374_v34  ;;  %v4433_v58 = vpop.f32.mrf.mxu0  ;;  %5077 = vmatpush.bf16.msra.mxu3 %v6074_v30 }
 0x7c7   : > { %4753 = vrot.lane.b32.xlu1 %v8280_v22, %s6199_s12  ;;  %5942 = vmatmul.msk.bf16.gmra.mxu2 %vm546_vm1, %v4913_v46  ;;  %v4687_v59 = vpack.c.b16 %v4585_v51, %v4585_v51  ;;  %v4594_v11 = vpack.c.b16 %v4586_v15, %v4585_v51 }
 0x7c8   : > { %v4432_v60 = vadd.f32 %v4431_v27, %v4403_v35 }
 0x7c9   : > { %4698 = vrot.lane.b32.xlu0 %v4686_v56, %s6199_s12  ;;  %4725 = vrot.lane.b32.xlu2 %v4663_v63, %s6198_s11  ;;  %v4664_v31 = vrot.slane %v4594_v11, 1  ;;  %v4634_v1 = vshll.u32 %v4594_v11, 16  ;;  %v6063_v56 = vld [vmem:[%s8510_s3 + $0x20] sm:$0xff]  ;;  %v4632_v35 = vshrl.u32 %v4594_v11, 16 }
 0x7ca   : > { %vm4442_vm14 = vcmp.ge.f32.partialorder %v4432_v60, 0.0  ;;  %v4450_v47 = vmul.f32 0.2, %v4432_v60  ;;  %5051 = vmatpush.bf16.msra.mxu1 %v6063_v56  ;;  %v6071_v11 = vld [vmem:[%s8510_s3 + $0x60] sm:$0xff] }
 0x7cb   : > { %v4636_v34 = vrot.slane %v4634_v1, 1 }
 0x7cc   : > { %v4458_v19 = vsel %vm4442_vm14, %v4432_v60, %v4450_v47  ;;  %v6062_v60 = vld [vmem:[%s8510_s3 + $0x18] sm:$0xff] }
 0x7cd   : > { %v4466_v7 = vadd.f32 %v4458_v19, %v8038_v38  ;;  %v4404_v28 = vpop.f32.mrf.mxu2  ;;  %v8332_v54 = vor.u32 %v4636_v34, %v4632_v35  ;;  %v6060_v19 = vld [vmem:[%s8510_s3 + $0x8] sm:$0xff] }
 0x7ce   : > { %v4405_v37 = vadd.f32 %v4404_v28, %v4376_v26  ;;  %5052 = vmatpush.bf16.msra.mxu1 %v6062_v60  ;;  %v6073_v28 = vld [vmem:[%s8510_s3 + $0x70] sm:$0xff] }
 0x7cf   : > { %v4519_v39 = vrot.slane %v4466_v7, 7  ;;  %4741 = vrot.lane.b32.xlu1 %v4687_v59, %s6197_s10  ;;  %5078 = vmatpush.bf16.msra.mxu3 %v6073_v28 }
 0x7d0   : > { %v4434_v16 = vadd.f32 %v4433_v58, %v4405_v37  ;;  %v6059_v37 = vld [vmem:[%s8510_s3] sm:$0xff]  ;;  %v6072_v58 = vld [vmem:[%s8510_s3 + $0x68] sm:$0xff] }
 0x7d1   : > { %v4535_v33 = vsel %vm293_vm0, 0.0, %v4519_v39  ;;  %v4543_v20 = vsel %vm293_vm0, %v4519_v39, 0.0  ;;  %4674 = vrot.lane.b32.xlu2 %v4663_v63, %s6197_s10  ;;  %4653 = vrot.lane.b32.xlu0 %v8280_v22, %s6198_s11  ;;  %v4896_v63 = vunpack.c.l.b16 %v4664_v31 }
 0x7d2   : > { %v8303_v38 = vpack.c.bf16 %v4535_v33, %v4535_v33  ;;  %v4558_v43 = vpack.c.bf16 %v4543_v20, %v4543_v20  ;;  %vm4443_vm15 = vcmp.ge.f32.partialorder %v4434_v16, 0.0  ;;  %v4451_v13 = vmul.f32 0.2, %v4434_v16  ;;  %5053 = vmatpush.bf16.msra.mxu1 %v6061_v12 }
 0x7d3   : > { %5079 = vmatpush.bf16.msra.mxu3 %v6072_v58 }
 0x7d4   : > { %v4587_v8 = vunpack.c.l.b16 %v8303_v38  ;;  %v4588_v21 = vunpack.c.l.b16 %v4558_v43  ;;  %v4459_v29 = vsel %vm4443_vm15, %v4434_v16, %v4451_v13 }
 0x7d5   : > { %v4467_v50 = vadd.f32 %v4459_v29, %v8062_v48  ;;  %v6068_v29 = vld [vmem:[%s8510_s3 + $0x48] sm:$0xff] }
 0x7d6   : > { %v4595_v10 = vpack.c.b16 %v4588_v21, %v4587_v8  ;;  %v4688_v51 = vpack.c.b16 %v4587_v8, %v4587_v8  ;;  %5054 = vmatpush.bf16.msra.mxu1 %v6060_v19  ;;  %v6069_v21 = vld [vmem:[%s8510_s3 + $0x50] sm:$0xff] }
 0x7d7   : > { %v4520_v25 = vrot.slane %v4467_v50, 7  ;;  %4700 = vrot.lane.b32.xlu1 %v4687_v59, %s6199_s12  ;;  %5080 = vmatpush.bf16.msra.mxu3 %v6071_v11 }
 0x7d8   : > { %v8314_v36 = vrot.slane %v4595_v10, 1  ;;  %v4641_v55 = vshll.u32 %v4595_v10, 16  ;;  %v4639_v18 = vshrl.u32 %v4595_v10, 16 }
 0x7d9   : > { %v4536_v48 = vsel %vm293_vm0, 0.0, %v4520_v25  ;;  %v4544_v4 = vsel %vm293_vm0, %v4520_v25, 0.0  ;;  %4676 = vrot.lane.b32.xlu2 %v4664_v31, %s6197_s10  ;;  %4727 = vrot.lane.b32.xlu0 %v4664_v31, %s6198_s11  ;;  %v6067_v31 = vld [vmem:[%s8510_s3 + $0x40] sm:$0xff] }
 0x7da   : > { %v4559_v52 = vpack.c.bf16 %v4536_v48, %v4536_v48  ;;  %v4560_v49 = vpack.c.bf16 %v4544_v4, %v4544_v4  ;;  %v4899_v32 = vunpack.c.l.b16 %v8314_v36  ;;  %v4643_v24 = vrot.slane %v4641_v55, 1  ;;  %5055 = vmatpush.bf16.msra.mxu1 %v6059_v37 }
 0x7dc   : > { %v4681_v27 = vunpack.c.l.b16 %v4559_v52  ;;  %v4707_v6 = vunpack.c.l.b16 %v4560_v49  ;;  %v4916_v46 = vpack.c.b16 %v4899_v32, %v4896_v63  ;;  %v8321_v3 = vor.u32 %v4643_v24, %v4639_v18 }
 0x7dd   : > { %v4667_v26 = vpop.permute.xlu2 %4666 }
 0x7de   : > { %5943 = vmatmul.msk.bf16.gmra.mxu2 %vm546_vm1, %v4916_v46  ;;  %v4708_v47 = vpack.c.b16 %v4707_v6, %v4681_v27  ;;  %v4689_v33 = vpack.c.b16 %v4681_v27, %v4681_v27 }
 0x7df   : > { %4757 = vrot.lane.b32.xlu1 %v8321_v3, %s6199_s12 }
 0x7e0   : > { %v4716_v15 = vrot.slane %v4708_v47, 1  ;;  %v4712_v7 = vshll.u32 %v4708_v47, 16  ;;  %v4710_v20 = vshrl.u32 %v4708_v47, 16 }
 0x7e1   : > { %4755 = vrot.lane.b32.xlu0 %v8332_v54, %s6199_s12  ;;  %4743 = vrot.lane.b32.xlu2 %v4688_v51, %s6197_s10 }
 0x7e2   : > { %v4902_v59 = vunpack.c.l.b16 %v4716_v15  ;;  %v4714_v39 = vrot.slane %v4712_v7, 1 }
 0x7e4   : > { %v4919_v16 = vpack.c.b16 %v6607_v14, %v4902_v59  ;;  %v8364_v43 = vor.u32 %v4714_v39, %v4710_v20  ;;  %v6070_v14 = vld [vmem:[%s8510_s3 + $0x58] sm:$0xff] }
 0x7e5   : > { %v4720_v53 = vpop.permute.xlu2 %4719  ;;  %5081 = vmatpush.bf16.msra.mxu3 %v6070_v14 }
 0x7e6   : > { %v4817_v27 = vsel %vm546_vm1, %v8224_v40, %v4720_v53 }
 0x7e7   : > { %4657 = vrot.lane.b32.xlu1 %v8321_v3, %s6198_s11 }
 0x7e9   : > { %4655 = vrot.lane.b32.xlu0 %v8332_v54, %s6198_s11  ;;  %4729 = vrot.lane.b32.xlu2 %v8314_v36, %s6198_s11 }
 0x7ea   : > { %5082 = vmatpush.bf16.msra.mxu3 %v6069_v21 }
 0x7ed   : > { %v4748_v8 = vpop.permute.xlu2 %4747 }
 0x7ee   : > { %5944 = vmatmul.msk.bf16.gmra.mxu2 %vm546_vm1, %v4919_v16  ;;  %5083 = vmatpush.bf16.msra.mxu3 %v6068_v29 }
 0x7ef   : > { %4745 = vrot.lane.b32.xlu1 %v4689_v33, %s6197_s10 }
 0x7f1   : > { %4731 = vrot.lane.b32.xlu0 %v4716_v15, %s6198_s11  ;;  %4759 = vrot.lane.b32.xlu2 %v8364_v43, %s6199_s12  ;;  %s6148_s11 = scalar_lea.hbm %s6147_s9, 64 }
 0x7f2   : > { %5084 = vmatpush.bf16.msra.mxu3 %v6067_v31  ;;  %p6149_p11 = scmp.ne.s32.totalorder %s6147_s9, %s6148_s11  ;;  %p6154_p1 = scmp.lt.s32.totalorder %s6152_s15, %s6148_s11 }
 0x7f3   : > { %v4691_v10 = vpop.permute.xlu0 %4690 }
 0x7f4   : > { %v4797_v1 = vsel %vm588_vm3, %v6520_v57, %v4691_v10  ;;  %p6150_p12 = pnand %p6149_p11, %p6270_p5  ;;  %p6155_p2 = por %p6154_p1, %p6153_p0 }
 0x7f5   : > { %v4718_v13 = vpop.permute.xlu1 %4717  ;;  %v4648_v45 = vpop.permute.xlu2 %4647  ;;  %v4882_v48 = vunpack.c.l.b16 %v4797_v1 }
 0x7f6   : > { %p6151_p13 = pneg %p6150_p12 }
 0x7f7   : > { %4702 = vrot.lane.b32.xlu1 %v4688_v51, %s6199_s12 }
 0x7f8   : > { %p6156_p3 = pnand %p6155_p2, %p6151_p13 }
 0x7f9   : > { %4678 = vrot.lane.b32.xlu0 %v8314_v36, %s6197_s10  ;;  %4704 = vrot.lane.b32.xlu2 %v4689_v33, %s6199_s12 }
 0x7fb   : > { %v4734_v52 = vpop.permute.xlu0 %4733 }
 0x7fd   : > { %v4646_v50 = vpop.permute.xlu1 %4645  ;;  %v4722_v18 = vpop.permute.xlu2 %4721 }
 0x7fe   : > { %v4763_v25 = vsel %vm546_vm1, %v8199_v41, %v4646_v50  ;;  %v4814_v41 = vsel %vm546_vm1, %v8218_v9, %v4718_v13  ;;  %v4766_v9 = vsel %vm546_vm1, %v8209_v17, %v4648_v45  ;;  %v4820_v14 = vsel %vm546_vm1, %v8249_v2, %v4722_v18 }
 0x7ff   : > { %v4783_v56 = vsel %vm571_vm2, %v4763_v25, %v4667_v26  ;;  %v4837_v57 = vsel %vm571_vm2, %v4814_v41, %v4734_v52 }
 0x800   : > { %v4852_v6 = vsel %vm588_vm3, %v4837_v57, %v4748_v8 }
 0x801   : > { %v4883_v30 = vunpack.c.l.b16 %v4852_v6 }
 0x805   : > { %v4693_v36 = vpop.permute.xlu1 %4692  ;;  %v4671_v24 = vpop.permute.xlu2 %4670 }
 0x806   : > { %v4799_v55 = vsel %vm588_vm3, %v4783_v56, %v4693_v36 }
 0x807   : > { %v4885_v4 = vunpack.c.l.b16 %v4799_v55 }
 0x809   : > { %v4908_v63 = vpack.c.b16 %v4885_v4, %v4882_v48 }
 0x80b   : > { %5056 = vmatmul.bf16.vlgmr.msra.gmra.mxu1 %v4908_v63 }
 0x80d   : > { %v4669_v49 = vpop.permute.xlu1 %4668  ;;  %v4652_v47 = vpop.permute.xlu2 %4651 }
 0x80e   : > { %v4785_v19 = vsel %vm571_vm2, %v4766_v9, %v4669_v49 }
 0x813   : > { %v4695_v32 = vpop.permute.xlu0 %4694 }
 0x814   : > { %v4801_v40 = vsel %vm588_vm3, %v4785_v19, %v4695_v32 }
 0x815   : > { %v4736_v34 = vpop.permute.xlu1 %4735  ;;  %v4888_v39 = vunpack.c.l.b16 %v4801_v40 }
 0x816   : > { %v4839_v46 = vsel %vm571_vm2, %v4817_v27, %v4736_v34 }
 0x81b   : > { %v4750_v35 = vpop.permute.xlu0 %4749  ;;  %v4740_v37 = vpop.permute.xlu2 %4739 }
 0x81c   : > { %v4854_v60 = vsel %vm588_vm3, %v4839_v46, %v4750_v35 }
 0x81d   : > { %v4886_v51 = vunpack.c.l.b16 %v4854_v60  ;;  %v4738_v12 = vpop.permute.xlu1 %4737 }
 0x81e   : > { %v4841_v13 = vsel %vm571_vm2, %v4820_v14, %v4738_v12 }
 0x81f   : > { %v4909_v26 = vpack.c.b16 %v4886_v51, %v4883_v30 }
 0x821   : > { %5085 = vmatmul.bf16.vlgmr.msra.gmra.mxu3 %v4909_v26 }
 0x823   : > { %v4650_v15 = vpop.permute.xlu0 %4649  ;;  %v4726_v17 = vpop.permute.xlu2 %4725 }
 0x824   : > { %v4769_v7 = vsel %vm546_vm1, %v8233_v23, %v4650_v15  ;;  %v4826_v27 = vsel %vm546_vm1, %v8280_v22, %v4726_v17 }
 0x825   : > { %v4697_v28 = vpop.permute.xlu1 %4696  ;;  %v4787_v59 = vsel %vm571_vm2, %v4769_v7, %v4671_v24 }
 0x826   : > { %v4803_v58 = vsel %vm588_vm3, %v4787_v59, %v4697_v28 }
 0x827   : > { %v4891_v53 = vunpack.c.l.b16 %v4803_v58 }
 0x829   : > { %v4911_v16 = vpack.c.b16 %v4891_v53, %v4888_v39 }
 0x82b   : > { %5061 = vmatmul.bf16.gmra.mxu1 %v4911_v16  ;;  %v4724_v33 = vpop.permute.xlu0 %4723  ;;  %v4675_v50 = vpop.permute.xlu2 %4674 }
 0x82c   : > { %v4823_v23 = vsel %vm546_vm1, %v8258_v62, %v4724_v33  ;;  %v4772_v62 = vsel %vm546_vm1, %v8243_v44, %v4652_v47 }
 0x82d   : > { %v4673_v20 = vpop.permute.xlu1 %4672  ;;  %v4843_v29 = vsel %vm571_vm2, %v4823_v23, %v4740_v37 }
 0x82e   : > { %v4789_v48 = vsel %vm571_vm2, %v4772_v62, %v4673_v20 }
 0x833   : > { %v4752_v11 = vpop.permute.xlu0 %4751  ;;  %v4677_v36 = vpop.permute.xlu2 %4676 }
 0x834   : > { %v4856_v8 = vsel %vm588_vm3, %v4841_v13, %v4752_v11 }
 0x835   : > { %v4889_v45 = vunpack.c.l.b16 %v4856_v8  ;;  %v6131_v8 = vld [vmem:[%s8511_s4] ss:$0 sm:$0xff] }
 0x839   : > { %v4754_v21 = vpop.permute.xlu1 %4753 }
 0x83a   : > { %v4858_v31 = vsel %vm588_vm3, %v4843_v29, %v4754_v21  ;;  %v5115_v21 = vpop.f32.mrf.mxu2 }
 0x83b   : > { %v4892_v10 = vunpack.c.l.b16 %v4858_v31  ;;  %v4699_v25 = vpop.permute.xlu0 %4698  ;;  %v4744_v41 = vpop.permute.xlu2 %4743 }
 0x83c   : > { %v4805_v4 = vsel %vm588_vm3, %v4789_v48, %v4699_v25 }
 0x83d   : > { %v4912_v1 = vpack.c.b16 %v4892_v10, %v4889_v45  ;;  %v4894_v49 = vunpack.c.l.b16 %v4805_v4 }
 0x83f   : > { %5090 = vmatmul.bf16.gmra.mxu3 %v4912_v1 }
 0x841   : > { %v4742_v56 = vpop.permute.xlu1 %4741 }
 0x842   : > { %v4845_v46 = vsel %vm571_vm2, %v4826_v27, %v4742_v56  ;;  %v5117_v56 = vpop.f32.mrf.mxu2 }
 0x843   : > { %v4654_v2 = vpop.permute.xlu0 %4653  ;;  %v4730_v47 = vpop.permute.xlu2 %4729 }
 0x844   : > { %v4775_v55 = vsel %vm546_vm1, %v8268_v61, %v4654_v2  ;;  %v4832_v9 = vsel %vm546_vm1, %v8321_v3, %v4730_v47 }
 0x845   : > { %v4791_v18 = vsel %vm571_vm2, %v4775_v55, %v4675_v50 }
 0x849   : > { %v4701_v63 = vpop.permute.xlu1 %4700 }
 0x84a   : > { %v4807_v52 = vsel %vm588_vm3, %v4791_v18, %v4701_v63  ;;  %v5120_v55 = vpop.f32.mrf.mxu2 }
 0x84b   : > { %v4897_v32 = vunpack.c.l.b16 %v4807_v52  ;;  %v4728_v24 = vpop.permute.xlu0 %4727  ;;  %v4760_v15 = vpop.permute.xlu2 %4759 }
 0x84c   : > { %v4829_v44 = vsel %vm546_vm1, %v8332_v54, %v4728_v24 }
 0x84d   : > { %v4914_v34 = vpack.c.b16 %v4897_v32, %v4894_v49  ;;  %v4847_v61 = vsel %vm571_vm2, %v4829_v44, %v4744_v41 }
 0x84f   : > { %5066 = vmatmul.bf16.gmra.mxu1 %v4914_v34 }
 0x851   : > { %v4758_v57 = vpop.permute.xlu1 %4757 }
 0x852   : > { %v4862_v6 = vsel %vm588_vm3, %v4847_v61, %v4758_v57  ;;  %v5122_v24 = vpop.f32.mrf.mxu2 }
 0x853   : > { %v4756_v35 = vpop.permute.xlu0 %4755  ;;  %v4898_v30 = vunpack.c.l.b16 %v4862_v6  ;;  %v4705_v20 = vpop.permute.xlu2 %4704 }
 0x854   : > { %v4860_v60 = vsel %vm588_vm3, %v4845_v46, %v4756_v35 }
 0x855   : > { %v4895_v51 = vunpack.c.l.b16 %v4860_v60 }
 0x857   : > { %v4915_v12 = vpack.c.b16 %v4898_v30, %v4895_v51 }
 0x859   : > { %v4658_v26 = vpop.permute.xlu1 %4657  ;;  %5095 = vmatmul.bf16.gmra.mxu3 %v4915_v12 }
 0x85b   : > { %v4656_v54 = vpop.permute.xlu0 %4655 }
 0x85c   : > { %v4778_v58 = vsel %vm546_vm1, %v8278_v42, %v4656_v54 }
 0x85d   : > { %v4793_v33 = vsel %vm571_vm2, %v4778_v58, %v4677_v36 }
 0x861   : > { %v4746_v19 = vpop.permute.xlu1 %4745  ;;  %v5125_v57 = vpop.f32.mrf.mxu2 }
 0x862   : > { %v4849_v22 = vsel %vm571_vm2, %v4832_v9, %v4746_v19 }
 0x863   : > { %v4732_v40 = vpop.permute.xlu0 %4731  ;;  %v4864_v7 = vsel %vm588_vm3, %v4849_v22, %v4760_v15 }
 0x864   : > { %v4835_v28 = vsel %vm546_vm1, %v8364_v43, %v4732_v40  ;;  %v4901_v3 = vunpack.c.l.b16 %v4864_v7  ;;  %v4781_v43 = vsel %vm546_vm1, %v8303_v38, %v4658_v26 }
 0x865   : > { %v4850_v59 = vsel %vm571_vm2, %v4835_v28, %v6635_v0 }
 0x866   : > { %v4865_v37 = vsel %vm588_vm3, %v4850_v59, %v6633_v5 }
 0x867   : > { %v4904_v39 = vunpack.c.l.b16 %v4865_v37 }
 0x869   : > { %v4703_v53 = vpop.permute.xlu1 %4702  ;;  %v4918_v16 = vpack.c.b16 %v4904_v39, %v4901_v3  ;;  %v5127_v51 = vpop.f32.mrf.mxu2 }
 0x86a   : > { %v4809_v17 = vsel %vm588_vm3, %v4793_v33, %v4703_v53 }
 0x86b   : > { %5100 = vmatmul.bf16.gmra.mxu3 %v4918_v16  ;;  %v4679_v0 = vpop.permute.xlu0 %4678  ;;  %v4900_v11 = vunpack.c.l.b16 %v4809_v17 }
 0x86c   : > { %v4795_v5 = vsel %vm571_vm2, %v4781_v43, %v4679_v0 }
 0x86d   : > { %v4811_v42 = vsel %vm588_vm3, %v4795_v5, %v4705_v20 }
 0x86e   : > { %v4903_v14 = vunpack.c.l.b16 %v4811_v42 }
 0x870   : > { %v4917_v23 = vpack.c.b16 %v4903_v14, %v4900_v11 }
 0x871   : > { %v5130_v9 = vpop.f32.mrf.mxu2 }
 0x872   : > { %5071 = vmatmul.bf16.gmra.mxu1 %v4917_v23 }
 0x879   : > { %v5132_v59 = vpop.f32.mrf.mxu2 }
 0x888   : > { %v5057_v13 = vpop.f32.mrf.mxu1 }
 0x889   : > { %v5058_v38 = vadd.f32 %v6131_v8, %v5057_v13 }
 0x890   : > { %v5059_v45 = vpop.f32.mrf.mxu1 }
 0x891   : > { %v5060_v10 = vadd.f32 %v6131_v8, %v5059_v45 }
 0x8a4   : > { %v5086_v29 = vpop.f32.mrf.mxu3 }
 0x8a5   : > { %v5087_v50 = vadd.f32 %v5086_v29, %v5058_v38 }
 0x8a7   : > { %v5116_v31 = vadd.f32 %v5115_v21, %v5087_v50 }
 0x8a8   : > { %v5062_v36 = vpop.f32.mrf.mxu1 }
 0x8a9   : > { %5135 = vst.msk [vmem:[%s8455_s23] sm:$0xff] %vm546_vm1, %v5116_v31  ;;  %v5063_v62 = vadd.f32 %v6131_v8, %v5062_v36 }
 0x8ac   : > { %v5088_v25 = vpop.f32.mrf.mxu3 }
 0x8ad   : > { %v5089_v1 = vadd.f32 %v5088_v25, %v5060_v10 }
 0x8af   : > { %v5118_v2 = vadd.f32 %v5117_v56, %v5089_v1 }
 0x8b0   : > { %v5064_v18 = vpop.f32.mrf.mxu1 }
 0x8b1   : > { %5136 = vst.msk [vmem:[%s8455_s23 + $0x8] sm:$0xff] %vm546_vm1, %v5118_v2  ;;  %v5065_v52 = vadd.f32 %v6131_v8, %v5064_v18 }
 0x8c2   : > { %v5091_v48 = vpop.f32.mrf.mxu3 }
 0x8c3   : > { %v5092_v4 = vadd.f32 %v5091_v48, %v5063_v62 }
 0x8c5   : > { %v5121_v63 = vadd.f32 %v5120_v55, %v5092_v4 }
 0x8c7   : > { %5137 = vst.msk [vmem:[%s8455_s23 + $0x10] sm:$0xff] %vm546_vm1, %v5121_v63 }
 0x8ca   : > { %v5093_v49 = vpop.f32.mrf.mxu3 }
 0x8cb   : > { %v5094_v32 = vadd.f32 %v5093_v49, %v5065_v52 }
 0x8cc   : > { %v5067_v41 = vpop.f32.mrf.mxu1 }
 0x8cd   : > { %v5123_v34 = vadd.f32 %v5122_v24, %v5094_v32  ;;  %v5068_v44 = vadd.f32 %v6131_v8, %v5067_v41 }
 0x8cf   : > { %5138 = vst.msk [vmem:[%s8455_s23 + $0x18] sm:$0xff] %vm546_vm1, %v5123_v34 }
 0x8d4   : > { %v5069_v46 = vpop.f32.mrf.mxu1 }
 0x8d5   : > { %v5070_v35 = vadd.f32 %v6131_v8, %v5069_v46 }
 0x8dc   : > { %v5096_v61 = vpop.f32.mrf.mxu3 }
 0x8dd   : > { %v5097_v27 = vadd.f32 %v5096_v61, %v5068_v44 }
 0x8df   : > { %v5126_v6 = vadd.f32 %v5125_v57, %v5097_v27 }
 0x8e1   : > { %5139 = vst.msk [vmem:[%s8455_s23 + $0x20] sm:$0xff] %vm546_vm1, %v5126_v6 }
 0x8e4   : > { %v5098_v60 = vpop.f32.mrf.mxu3 }
 0x8e5   : > { %v5099_v30 = vadd.f32 %v5098_v60, %v5070_v35 }
 0x8e7   : > { %v5128_v12 = vadd.f32 %v5127_v51, %v5099_v30 }
 0x8e9   : > { %5140 = vst.msk [vmem:[%s8455_s23 + $0x28] sm:$0xff] %vm546_vm1, %v5128_v12 }
 0x8ee   : > { %v5101_v47 = vpop.f32.mrf.mxu3 }
 0x8ef   : > { %v5072_v26 = vpop.f32.mrf.mxu1 }
 0x8f0   : > { %v5073_v54 = vadd.f32 %v6131_v8, %v5072_v26 }
 0x8f2   : > { %v5102_v19 = vadd.f32 %v5101_v47, %v5073_v54 }
 0x8f4   : > { %v5131_v15 = vadd.f32 %v5130_v9, %v5102_v19 }
 0x8f6   : > { %5141 = vst.msk [vmem:[%s8455_s23 + $0x30] sm:$0xff] %vm546_vm1, %v5131_v15  ;;  %v5103_v7 = vpop.f32.mrf.mxu3 }
 0x8f7   : > { %v5074_v22 = vpop.f32.mrf.mxu1 }
 0x8f8   : > { %v5075_v40 = vadd.f32 %v6131_v8, %v5074_v22 }
 0x8fa   : > { %v5104_v28 = vadd.f32 %v5103_v7, %v5075_v40 }
 0x8fc   : > { %v5133_v37 = vadd.f32 %v5132_v59, %v5104_v28 }
 0x8fe   : > { %5142 = vst.msk [vmem:[%s8455_s23 + $0x38] sm:$0xff] %vm546_vm1, %v5133_v37 }
 0x8ff   : > { %6159 = shalt.err (!%p6156_p3)
}
 0x900   : > { %s6200_s16 = smov 128   ;;  %s6201_s17 = smov 8  }
 0x901   : > { %6080 = dma.vmem_to_hbm [thread:$0]  (%p6270_p5), %s5157_s7, 1024, %s5159_s8, %s5144_s22, %s6200_s16, %s6200_s16, %s6201_s17  }
 0x902 PF: > { %p6086_p4 = scmp.ge.s32.totalorder %s6194_s21, 2  ;;  %s5173_s23 = sand.u32 1, %s6182_s18  }
 0x903   : > { %s5174_s25 = scalar_lea.sflag [#allocation3], %s5173_s23 }
 0x904   : > { %p6083_p7 = pnand %p6086_p4, %p6274_p6 }
 0x906   : > { %p6084_p8 = pneg %p6083_p7 }
 0x908   : > { %6177 = dma.done.wait (%p6084_p8), %s5174_s25, 1024  }
 0x909   : > { %6179 = vsyncadd (%p6084_p8), %s5174_s25, 4294966272  ;;  %p15_p9 = scmp.ge.s32.totalorder %s6257_s24, 4   ;;  %s8515_s18 = smov %s6186_s19 }
 0x90a   : > { %s8516_s19 = smov %s6190_s20  ;;  %s8517_s20 = smov %s6268_s27 }
 0x90b   : > { %s8518_s21 = smov %s6257_s24  ;;  %17 = sbr.rel (!%p15_p9) target bundleno = 3 (0x3), region = 85 }
 0x910   :  { %5180 = vsyncpa [#allocation3], 1 }
 0x911   :  { %5182 = vsyncpa [#allocation3 + $0x1], 1 }

</bundles_post_ra>
